<compile_context>
chip_gen: v7x
topology: tpu7x:2x2x1
jax: 0.10.0
libtpu: 0.0.40
codegen_flags: <defaults>
</compile_context>

<pallas_src>
import numpy as np
import jax
import jax.numpy as jnp
from jax.experimental import pallas as pl
from jax.experimental.pallas import tpu as pltpu

BN_EPS = 1e-5
LRELU_SLOPE = 0.03   # matches nn.LeakyReLU(0.03) used in the reference model


# ------------------------------ Pallas kernel -------------------------------

def _encoder_kernel(x0_ref,
                    e1_ref, e2_ref, e3_ref, e4_ref,
                    r1_ref, r2_ref, r3_ref, r4_ref,
                    rt1_ref, rt2_ref, rt3_ref, rt4_ref,
                    gb1_ref, gb2_ref, gb3_ref, gb4_ref,
                    wfc_ref, gbfc_ref, wml_ref, bml_ref, eps_ref,
                    out_ref):
    n = x0_ref.shape[0]

    def conv_bn_lrelu(x, e_ref, r_ref, rt_ref, gb_ref):
        # Folded conv: one batched matmul.  Output (N, Mo*Cout), columns in
        # (spatial, channel) order -- directly the next layer's input layout.
        y = jnp.dot(x.astype(jnp.bfloat16), e_ref[...],
                    preferred_element_type=jnp.float32)
        mo_cout, cout = r_ref.shape
        cnt = float(n * (mo_cout // cout))
        # Train-mode BatchNorm2d: stats pooled over (N, H, W) per channel.
        s = jnp.sum(y, axis=0, keepdims=True)                     # (1, Mo*Cout)
        ss = jnp.sum(y * y, axis=0, keepdims=True)
        stats = jnp.dot(jnp.concatenate([s, ss], axis=0), r_ref[...],
                        preferred_element_type=jnp.float32)       # (2, Cout)
        mean = stats[0:1, :] / cnt
        var = jnp.maximum(stats[1:2, :] / cnt - mean * mean, 0.0)
        scale = gb_ref[0:1, :] * jax.lax.rsqrt(var + BN_EPS)      # gamma row
        shift = gb_ref[1:2, :] - mean * scale                     # beta row
        # Broadcast per-channel scale/shift back over spatial positions.
        aff = jnp.dot(jnp.concatenate([scale, shift], axis=0), rt_ref[...],
                      preferred_element_type=jnp.float32)         # (2, Mo*Cout)
        y = y * aff[0:1, :] + aff[1:2, :]
        return jnp.where(y >= 0, y, LRELU_SLOPE * y)              # LeakyReLU

    h = x0_ref[...]
    h = conv_bn_lrelu(h, e1_ref, r1_ref, rt1_ref, gb1_ref)
    h = conv_bn_lrelu(h, e2_ref, r2_ref, rt2_ref, gb2_ref)
    h = conv_bn_lrelu(h, e3_ref, r3_ref, rt3_ref, gb3_ref)
    h = conv_bn_lrelu(h, e4_ref, r4_ref, rt4_ref, gb4_ref)

    # fc head: one batched matmul.  wfc rows were pre-permuted to (spatial,
    # channel) order, so PyTorch's NCHW flatten is reproduced exactly.
    t = jnp.dot(h.astype(jnp.bfloat16), wfc_ref[...],
                preferred_element_type=jnp.float32)               # (N, 32)

    # Train-mode BatchNorm1d + LeakyReLU (fc bias cancelled by BN).
    cnt = float(n)
    mean = jnp.sum(t, axis=0, keepdims=True) / cnt
    var = jnp.maximum(jnp.sum(t * t, axis=0, keepdims=True) / cnt
                      - mean * mean, 0.0)
    scale = gbfc_ref[0:1, :] * jax.lax.rsqrt(var + BN_EPS)
    shift = gbfc_ref[1:2, :] - mean * scale
    t = t * scale + shift
    t = jnp.where(t >= 0, t, LRELU_SLOPE * t)

    # Merged mu / logvar heads + reparameterize; single (N, 3z) output.
    ml = jnp.dot(t.astype(jnp.bfloat16), wml_ref[...],
                 preferred_element_type=jnp.float32) + bml_ref[...]
    z_len = eps_ref.shape[1]
    mu = ml[:, :z_len]
    lv = ml[:, z_len:]
    z = mu + eps_ref[...] * jnp.exp(0.5 * lv)
    out_ref[...] = jnp.concatenate([mu, lv, z], axis=1)


# ------------------------------ glue (JAX) ----------------------------------

def modality_encoder_forward(a_nchw, x_nchw, params, eps):
    n, _, h, w = a_nchw.shape
    out = jnp.concatenate([a_nchw, x_nchw], axis=1)                # (N, C0, H, W)
    c0 = out.shape[1]
    # (spatial, channel)-ordered flatten so each conv layer is one matmul.
    x0 = jnp.transpose(out, (0, 2, 3, 1)).reshape(n, h * w * c0)

    z_len = eps.shape[1]
    vmem = pl.BlockSpec(memory_space=pltpu.MemorySpace.VMEM)
    res = pl.pallas_call(
        _encoder_kernel,
        out_shape=jax.ShapeDtypeStruct((n, 3 * z_len), jnp.float32),
        in_specs=[vmem] * 22,
        out_specs=vmem,
        compiler_params=pltpu.CompilerParams(vmem_limit_bytes=16 * 1024 * 1024),
    )(x0,
      params["e1"], params["e2"], params["e3"], params["e4"],
      params["r1"], params["r2"], params["r3"], params["r4"],
      params["rt1"], params["rt2"], params["rt3"], params["rt4"],
      params["gb1"], params["gb2"], params["gb3"], params["gb4"],
      params["w_fc"], params["gb_fc"], params["w_ml"], params["b_ml"], eps)
    mu = res[:, :z_len]
    logvar = res[:, z_len:2 * z_len]
    z = res[:, 2 * z_len:]
    return z, mu, logvar


# --------------------------- deterministic params ---------------------------

def _fold_conv3x3_s2_p1(w, hi, wi):
    """Matrix (Hi*Wi*Cin, Ho*Wo*Cout) equivalent to conv3x3 / stride2 / pad1.

    Input/output flattened in (spatial, channel) order, so the whole layer is
    a single (N, Hi*Wi*Cin) @ E matmul (the 0/1 patch-gather is folded in).
    """
    cin, cout = w.shape[2], w.shape[3]
    ho, wo = hi // 2, wi // 2
    e = np.zeros((hi * wi * cin, ho * wo * cout), np.float32)
    for yo in range(ho):
        for xo in range(wo):
            m = yo * wo + xo
            for di in range(3):
                yi = 2 * yo + di - 1
                if yi < 0 or yi >= hi:
                    continue
                for dj in range(3):
                    xi = 2 * xo + dj - 1
                    if xi < 0 or xi >= wi:
                        continue
                    s = yi * wi + xi
                    e[s * cin:(s + 1) * cin, m * cout:(m + 1) * cout] = w[di, dj]
    return e


def _make_channel_reduce(mo, cout):
    """0/1 matrix (Mo*Cout, Cout): (spatial, channel) columns -> channels."""
    return np.tile(np.eye(cout, dtype=np.float32), (mo, 1))


def init_params(key, in_channels, target_size, z_length):
    start_channels = 8 + in_channels
    chans = [start_channels, 16, 32, 64, 128]
    keys = jax.random.split(key, 20)
    params = {}
    ki = 0
    spatial = target_size
    for i in range(1, 5):
        cin, cout = chans[i - 1], chans[i]
        wt = 0.1 * jax.random.normal(keys[ki], (3, 3, cin, cout), jnp.float32)
        gamma = (jnp.ones((cout,), jnp.float32)
                 + 0.05 * jax.random.normal(keys[ki + 1], (cout,), jnp.float32))
        beta = 0.05 * jax.random.normal(keys[ki + 2], (cout,), jnp.float32)
        # conv bias omitted: train-mode BatchNorm cancels it exactly.
        e = _fold_conv3x3_s2_p1(np.asarray(wt), spatial, spatial)
        params[f"e{i}"] = jnp.asarray(e, dtype=jnp.bfloat16)       # pre-cast
        mo = (spatial // 2) ** 2
        r = _make_channel_reduce(mo, cout)
        params[f"r{i}"] = jnp.asarray(r, dtype=jnp.float32)
        params[f"rt{i}"] = jnp.asarray(r.T, dtype=jnp.float32)
        params[f"gb{i}"] = jnp.stack([gamma, beta], axis=0)        # (2, Cout)
        spatial //= 2
        ki += 3

    c4 = chans[4]
    s4 = (target_size // 16) ** 2
    fc_in = target_size ** 2 // 2                      # == c4 * s4
    w_fc = 0.1 * jax.random.normal(keys[ki], (fc_in, 32), jnp.float32)
    # PyTorch flattens NCHW as (c, h, w); re-order fc rows to (spatial, channel)
    # so the kernel's flatten matches with static layout only.
    w_fc = jnp.transpose(w_fc.reshape(c4, s4, 32), (1, 0, 2)).reshape(s4 * c4, 32)
    params["w_fc"] = w_fc.astype(jnp.bfloat16)
    # fc bias omitted (cancelled by BatchNorm1d).
    gamma_fc = (jnp.ones((32,), jnp.float32)
                + 0.05 * jax.random.normal(keys[ki + 1], (32,), jnp.float32))
    beta_fc = 0.05 * jax.random.normal(keys[ki + 2], (32,), jnp.float32)
    params["gb_fc"] = jnp.stack([gamma_fc, beta_fc], axis=0)
    w_mu = 0.1 * jax.random.normal(keys[ki + 3], (32, z_length), jnp.float32)
    b_mu = 0.01 * jax.random.normal(keys[ki + 4], (z_length,), jnp.float32)
    w_lv = 0.1 * jax.random.normal(keys[ki + 5], (32, z_length), jnp.float32)
    b_lv = 0.01 * jax.random.normal(keys[ki + 6], (z_length,), jnp.float32)
    params["w_ml"] = jnp.concatenate([w_mu, w_lv], axis=1).astype(jnp.bfloat16)
    params["b_ml"] = jnp.concatenate([b_mu, b_lv], axis=0).reshape(1, 2 * z_length)
    return params


# ----------------------------------- main -----------------------------------

if __name__ == "__main__":
    batch = 2
    in_channels = 1          # image channels
    target_size = 16         # spatial size (divisible by 16)
    z_length = 8

    key = jax.random.PRNGKey(0)
    k_a, k_x, k_eps, k_p = jax.random.split(key, 4)

    a = jax.random.normal(k_a, (batch, 8, target_size, target_size), jnp.float32)
    x = jax.random.normal(k_x, (batch, in_channels, target_size, target_size),
                          jnp.float32)
    # torch.randn_like inside reparameterize -> explicit eps input (determinism)
    eps = jax.random.normal(k_eps, (batch, z_length), jnp.float32)

    params = init_params(k_p, in_channels, target_size, z_length)

    fwd = jax.jit(modality_encoder_forward)
    z, mu, logvar = fwd(a, x, params, eps)
    jax.block_until_ready((z, mu, logvar))

    assert z.shape == (batch, z_length)
    assert mu.shape == (batch, z_length)
    assert logvar.shape == (batch, z_length)
    assert bool(jnp.all(jnp.isfinite(z)))
    print("KERNEL_OK")
</pallas_src>

<mosaic_0001>
module attributes {stable_mosaic.version = 11 : i64} {
  func.func @_encoder_kernel(%arg0: memref<2x2304xf32, #tpu.memory_space<vmem>>, %arg1: memref<2304x1024xbf16, #tpu.memory_space<vmem>>, %arg2: memref<1024x512xbf16, #tpu.memory_space<vmem>>, %arg3: memref<512x256xbf16, #tpu.memory_space<vmem>>, %arg4: memref<256x128xbf16, #tpu.memory_space<vmem>>, %arg5: memref<1024x16xf32, #tpu.memory_space<vmem>>, %arg6: memref<512x32xf32, #tpu.memory_space<vmem>>, %arg7: memref<256x64xf32, #tpu.memory_space<vmem>>, %arg8: memref<128x128xf32, #tpu.memory_space<vmem>>, %arg9: memref<16x1024xf32, #tpu.memory_space<vmem>>, %arg10: memref<32x512xf32, #tpu.memory_space<vmem>>, %arg11: memref<64x256xf32, #tpu.memory_space<vmem>>, %arg12: memref<128x128xf32, #tpu.memory_space<vmem>>, %arg13: memref<2x16xf32, #tpu.memory_space<vmem>>, %arg14: memref<2x32xf32, #tpu.memory_space<vmem>>, %arg15: memref<2x64xf32, #tpu.memory_space<vmem>>, %arg16: memref<2x128xf32, #tpu.memory_space<vmem>>, %arg17: memref<128x32xbf16, #tpu.memory_space<vmem>>, %arg18: memref<2x32xf32, #tpu.memory_space<vmem>>, %arg19: memref<32x16xbf16, #tpu.memory_space<vmem>>, %arg20: memref<1x16xf32, #tpu.memory_space<vmem>>, %arg21: memref<2x8xf32, #tpu.memory_space<vmem>>, %arg22: memref<2x24xf32, #tpu.memory_space<vmem>>) attributes {dimension_semantics = [], scalar_prefetch = 0 : i64, scratch_operands = 0 : i64, tpu.core_type = #tpu.core_type<tc>} {
    %c0 = arith.constant 0 : index
    %c0_0 = arith.constant 0 : index
    %0 = vector.load %arg0[%c0, %c0_0] : memref<2x2304xf32, #tpu.memory_space<vmem>>, vector<2x2304xf32>
    %1 = arith.truncf %0 : vector<2x2304xf32> to vector<2x2304xbf16>
    %c0_1 = arith.constant 0 : index
    %c0_2 = arith.constant 0 : index
    %2 = vector.load %arg1[%c0_1, %c0_2] : memref<2304x1024xbf16, #tpu.memory_space<vmem>>, vector<2304x1024xbf16>
    %cst = arith.constant dense<0.000000e+00> : vector<2x1024xf32>
    %3 = tpu.matmul %1, %2, %cst {dimension_numbers = #tpu.dot_dimension_numbers<[1], [0], [0], [1], [0, 0, 1, 1], [], []>} : vector<2x2304xbf16>, vector<2304x1024xbf16>, vector<2x1024xf32> -> vector<2x1024xf32>
    %cst_3 = arith.constant dense<0.000000e+00> : vector<1024xf32>
    %4 = vector.multi_reduction <add>, %3, %cst_3 [0] : vector<2x1024xf32> to vector<1024xf32>
    %5 = vector.shape_cast %4 : vector<1024xf32> to vector<1x1024xf32>
    %6 = arith.mulf %3, %3 : vector<2x1024xf32>
    %cst_4 = arith.constant dense<0.000000e+00> : vector<1024xf32>
    %7 = vector.multi_reduction <add>, %6, %cst_4 [0] : vector<2x1024xf32> to vector<1024xf32>
    %8 = vector.shape_cast %7 : vector<1024xf32> to vector<1x1024xf32>
    %9 = tpu.concatenate %5, %8 in 0 : vector<1x1024xf32>, vector<1x1024xf32> -> vector<2x1024xf32>
    %c0_5 = arith.constant 0 : index
    %c0_6 = arith.constant 0 : index
    %10 = vector.load %arg5[%c0_5, %c0_6] : memref<1024x16xf32, #tpu.memory_space<vmem>>, vector<1024x16xf32>
    %cst_7 = arith.constant dense<0.000000e+00> : vector<2x16xf32>
    %11 = tpu.matmul %9, %10, %cst_7 {dimension_numbers = #tpu.dot_dimension_numbers<[1], [0], [0], [1], [0, 0, 1, 1], [], []>} : vector<2x1024xf32>, vector<1024x16xf32>, vector<2x16xf32> -> vector<2x16xf32>
    %12 = vector.extract_strided_slice %11 {offsets = [0, 0], sizes = [1, 16], strides = [1, 1]} : vector<2x16xf32> to vector<1x16xf32>
    %cst_8 = arith.constant 1.280000e+02 : f32
    %13 = vector.broadcast %cst_8 : f32 to vector<1x16xf32>
    %14 = arith.divf %12, %13 : vector<1x16xf32>
    %15 = vector.extract_strided_slice %11 {offsets = [1, 0], sizes = [1, 16], strides = [1, 1]} : vector<2x16xf32> to vector<1x16xf32>
    %cst_9 = arith.constant 1.280000e+02 : f32
    %16 = vector.broadcast %cst_9 : f32 to vector<1x16xf32>
    %17 = arith.divf %15, %16 : vector<1x16xf32>
    %18 = arith.mulf %14, %14 : vector<1x16xf32>
    %19 = arith.subf %17, %18 : vector<1x16xf32>
    %cst_10 = arith.constant 0.000000e+00 : f32
    %20 = vector.broadcast %cst_10 : f32 to vector<1x16xf32>
    %21 = arith.maximumf %19, %20 : vector<1x16xf32>
    %c0_11 = arith.constant 0 : index
    %c0_12 = arith.constant 0 : index
    %22 = vector.load %arg13[%c0_11, %c0_12] : memref<2x16xf32, #tpu.memory_space<vmem>>, vector<1x16xf32>
    %cst_13 = arith.constant 9.99999974E-6 : f32
    %23 = vector.broadcast %cst_13 : f32 to vector<1x16xf32>
    %24 = arith.addf %21, %23 : vector<1x16xf32>
    %25 = math.rsqrt %24 : vector<1x16xf32>
    %26 = arith.mulf %22, %25 : vector<1x16xf32>
    %c1 = arith.constant 1 : index
    %c0_14 = arith.constant 0 : index
    %27 = vector.load %arg13[%c1, %c0_14] : memref<2x16xf32, #tpu.memory_space<vmem>>, vector<1x16xf32>
    %28 = arith.mulf %14, %26 : vector<1x16xf32>
    %29 = arith.subf %27, %28 : vector<1x16xf32>
    %30 = tpu.concatenate %26, %29 in 0 : vector<1x16xf32>, vector<1x16xf32> -> vector<2x16xf32>
    %c0_15 = arith.constant 0 : index
    %c0_16 = arith.constant 0 : index
    %31 = vector.load %arg9[%c0_15, %c0_16] : memref<16x1024xf32, #tpu.memory_space<vmem>>, vector<16x1024xf32>
    %cst_17 = arith.constant dense<0.000000e+00> : vector<2x1024xf32>
    %32 = tpu.matmul %30, %31, %cst_17 {dimension_numbers = #tpu.dot_dimension_numbers<[1], [0], [0], [1], [0, 0, 1, 1], [], []>} : vector<2x16xf32>, vector<16x1024xf32>, vector<2x1024xf32> -> vector<2x1024xf32>
    %33 = vector.extract_strided_slice %32 {offsets = [0, 0], sizes = [1, 1024], strides = [1, 1]} : vector<2x1024xf32> to vector<1x1024xf32>
    %34 = vector.broadcast %33 : vector<1x1024xf32> to vector<2x1024xf32>
    %35 = arith.mulf %3, %34 : vector<2x1024xf32>
    %36 = vector.extract_strided_slice %32 {offsets = [1, 0], sizes = [1, 1024], strides = [1, 1]} : vector<2x1024xf32> to vector<1x1024xf32>
    %37 = vector.broadcast %36 : vector<1x1024xf32> to vector<2x1024xf32>
    %38 = arith.addf %35, %37 : vector<2x1024xf32>
    %cst_18 = arith.constant 0.000000e+00 : f32
    %39 = vector.broadcast %cst_18 : f32 to vector<2x1024xf32>
    %40 = arith.cmpf oge, %38, %39 : vector<2x1024xf32>
    %cst_19 = arith.constant 3.000000e-02 : f32
    %41 = vector.broadcast %cst_19 : f32 to vector<2x1024xf32>
    %42 = arith.mulf %41, %38 : vector<2x1024xf32>
    %43 = arith.select %40, %38, %42 : vector<2x1024xi1>, vector<2x1024xf32>
    %44 = arith.truncf %43 : vector<2x1024xf32> to vector<2x1024xbf16>
    %c0_20 = arith.constant 0 : index
    %c0_21 = arith.constant 0 : index
    %45 = vector.load %arg2[%c0_20, %c0_21] : memref<1024x512xbf16, #tpu.memory_space<vmem>>, vector<1024x512xbf16>
    %cst_22 = arith.constant dense<0.000000e+00> : vector<2x512xf32>
    %46 = tpu.matmul %44, %45, %cst_22 {dimension_numbers = #tpu.dot_dimension_numbers<[1], [0], [0], [1], [0, 0, 1, 1], [], []>} : vector<2x1024xbf16>, vector<1024x512xbf16>, vector<2x512xf32> -> vector<2x512xf32>
    %cst_23 = arith.constant dense<0.000000e+00> : vector<512xf32>
    %47 = vector.multi_reduction <add>, %46, %cst_23 [0] : vector<2x512xf32> to vector<512xf32>
    %48 = vector.shape_cast %47 : vector<512xf32> to vector<1x512xf32>
    %49 = arith.mulf %46, %46 : vector<2x512xf32>
    %cst_24 = arith.constant dense<0.000000e+00> : vector<512xf32>
    %50 = vector.multi_reduction <add>, %49, %cst_24 [0] : vector<2x512xf32> to vector<512xf32>
    %51 = vector.shape_cast %50 : vector<512xf32> to vector<1x512xf32>
    %52 = tpu.concatenate %48, %51 in 0 : vector<1x512xf32>, vector<1x512xf32> -> vector<2x512xf32>
    %c0_25 = arith.constant 0 : index
    %c0_26 = arith.constant 0 : index
    %53 = vector.load %arg6[%c0_25, %c0_26] : memref<512x32xf32, #tpu.memory_space<vmem>>, vector<512x32xf32>
    %cst_27 = arith.constant dense<0.000000e+00> : vector<2x32xf32>
    %54 = tpu.matmul %52, %53, %cst_27 {dimension_numbers = #tpu.dot_dimension_numbers<[1], [0], [0], [1], [0, 0, 1, 1], [], []>} : vector<2x512xf32>, vector<512x32xf32>, vector<2x32xf32> -> vector<2x32xf32>
    %55 = vector.extract_strided_slice %54 {offsets = [0, 0], sizes = [1, 32], strides = [1, 1]} : vector<2x32xf32> to vector<1x32xf32>
    %cst_28 = arith.constant 3.200000e+01 : f32
    %56 = vector.broadcast %cst_28 : f32 to vector<1x32xf32>
    %57 = arith.divf %55, %56 : vector<1x32xf32>
    %58 = vector.extract_strided_slice %54 {offsets = [1, 0], sizes = [1, 32], strides = [1, 1]} : vector<2x32xf32> to vector<1x32xf32>
    %cst_29 = arith.constant 3.200000e+01 : f32
    %59 = vector.broadcast %cst_29 : f32 to vector<1x32xf32>
    %60 = arith.divf %58, %59 : vector<1x32xf32>
    %61 = arith.mulf %57, %57 : vector<1x32xf32>
    %62 = arith.subf %60, %61 : vector<1x32xf32>
    %cst_30 = arith.constant 0.000000e+00 : f32
    %63 = vector.broadcast %cst_30 : f32 to vector<1x32xf32>
    %64 = arith.maximumf %62, %63 : vector<1x32xf32>
    %c0_31 = arith.constant 0 : index
    %c0_32 = arith.constant 0 : index
    %65 = vector.load %arg14[%c0_31, %c0_32] : memref<2x32xf32, #tpu.memory_space<vmem>>, vector<1x32xf32>
    %cst_33 = arith.constant 9.99999974E-6 : f32
    %66 = vector.broadcast %cst_33 : f32 to vector<1x32xf32>
    %67 = arith.addf %64, %66 : vector<1x32xf32>
    %68 = math.rsqrt %67 : vector<1x32xf32>
    %69 = arith.mulf %65, %68 : vector<1x32xf32>
    %c1_34 = arith.constant 1 : index
    %c0_35 = arith.constant 0 : index
    %70 = vector.load %arg14[%c1_34, %c0_35] : memref<2x32xf32, #tpu.memory_space<vmem>>, vector<1x32xf32>
    %71 = arith.mulf %57, %69 : vector<1x32xf32>
    %72 = arith.subf %70, %71 : vector<1x32xf32>
    %73 = tpu.concatenate %69, %72 in 0 : vector<1x32xf32>, vector<1x32xf32> -> vector<2x32xf32>
    %c0_36 = arith.constant 0 : index
    %c0_37 = arith.constant 0 : index
    %74 = vector.load %arg10[%c0_36, %c0_37] : memref<32x512xf32, #tpu.memory_space<vmem>>, vector<32x512xf32>
    %cst_38 = arith.constant dense<0.000000e+00> : vector<2x512xf32>
    %75 = tpu.matmul %73, %74, %cst_38 {dimension_numbers = #tpu.dot_dimension_numbers<[1], [0], [0], [1], [0, 0, 1, 1], [], []>} : vector<2x32xf32>, vector<32x512xf32>, vector<2x512xf32> -> vector<2x512xf32>
    %76 = vector.extract_strided_slice %75 {offsets = [0, 0], sizes = [1, 512], strides = [1, 1]} : vector<2x512xf32> to vector<1x512xf32>
    %77 = vector.broadcast %76 : vector<1x512xf32> to vector<2x512xf32>
    %78 = arith.mulf %46, %77 : vector<2x512xf32>
    %79 = vector.extract_strided_slice %75 {offsets = [1, 0], sizes = [1, 512], strides = [1, 1]} : vector<2x512xf32> to vector<1x512xf32>
    %80 = vector.broadcast %79 : vector<1x512xf32> to vector<2x512xf32>
    %81 = arith.addf %78, %80 : vector<2x512xf32>
    %cst_39 = arith.constant 0.000000e+00 : f32
    %82 = vector.broadcast %cst_39 : f32 to vector<2x512xf32>
    %83 = arith.cmpf oge, %81, %82 : vector<2x512xf32>
    %cst_40 = arith.constant 3.000000e-02 : f32
    %84 = vector.broadcast %cst_40 : f32 to vector<2x512xf32>
    %85 = arith.mulf %84, %81 : vector<2x512xf32>
    %86 = arith.select %83, %81, %85 : vector<2x512xi1>, vector<2x512xf32>
    %87 = arith.truncf %86 : vector<2x512xf32> to vector<2x512xbf16>
    %c0_41 = arith.constant 0 : index
    %c0_42 = arith.constant 0 : index
    %88 = vector.load %arg3[%c0_41, %c0_42] : memref<512x256xbf16, #tpu.memory_space<vmem>>, vector<512x256xbf16>
    %cst_43 = arith.constant dense<0.000000e+00> : vector<2x256xf32>
    %89 = tpu.matmul %87, %88, %cst_43 {dimension_numbers = #tpu.dot_dimension_numbers<[1], [0], [0], [1], [0, 0, 1, 1], [], []>} : vector<2x512xbf16>, vector<512x256xbf16>, vector<2x256xf32> -> vector<2x256xf32>
    %cst_44 = arith.constant dense<0.000000e+00> : vector<256xf32>
    %90 = vector.multi_reduction <add>, %89, %cst_44 [0] : vector<2x256xf32> to vector<256xf32>
    %91 = vector.shape_cast %90 : vector<256xf32> to vector<1x256xf32>
    %92 = arith.mulf %89, %89 : vector<2x256xf32>
    %cst_45 = arith.constant dense<0.000000e+00> : vector<256xf32>
    %93 = vector.multi_reduction <add>, %92, %cst_45 [0] : vector<2x256xf32> to vector<256xf32>
    %94 = vector.shape_cast %93 : vector<256xf32> to vector<1x256xf32>
    %95 = tpu.concatenate %91, %94 in 0 : vector<1x256xf32>, vector<1x256xf32> -> vector<2x256xf32>
    %c0_46 = arith.constant 0 : index
    %c0_47 = arith.constant 0 : index
    %96 = vector.load %arg7[%c0_46, %c0_47] : memref<256x64xf32, #tpu.memory_space<vmem>>, vector<256x64xf32>
    %cst_48 = arith.constant dense<0.000000e+00> : vector<2x64xf32>
    %97 = tpu.matmul %95, %96, %cst_48 {dimension_numbers = #tpu.dot_dimension_numbers<[1], [0], [0], [1], [0, 0, 1, 1], [], []>} : vector<2x256xf32>, vector<256x64xf32>, vector<2x64xf32> -> vector<2x64xf32>
    %98 = vector.extract_strided_slice %97 {offsets = [0, 0], sizes = [1, 64], strides = [1, 1]} : vector<2x64xf32> to vector<1x64xf32>
    %cst_49 = arith.constant 8.000000e+00 : f32
    %99 = vector.broadcast %cst_49 : f32 to vector<1x64xf32>
    %100 = arith.divf %98, %99 : vector<1x64xf32>
    %101 = vector.extract_strided_slice %97 {offsets = [1, 0], sizes = [1, 64], strides = [1, 1]} : vector<2x64xf32> to vector<1x64xf32>
    %cst_50 = arith.constant 8.000000e+00 : f32
    %102 = vector.broadcast %cst_50 : f32 to vector<1x64xf32>
    %103 = arith.divf %101, %102 : vector<1x64xf32>
    %104 = arith.mulf %100, %100 : vector<1x64xf32>
    %105 = arith.subf %103, %104 : vector<1x64xf32>
    %cst_51 = arith.constant 0.000000e+00 : f32
    %106 = vector.broadcast %cst_51 : f32 to vector<1x64xf32>
    %107 = arith.maximumf %105, %106 : vector<1x64xf32>
    %c0_52 = arith.constant 0 : index
    %c0_53 = arith.constant 0 : index
    %108 = vector.load %arg15[%c0_52, %c0_53] : memref<2x64xf32, #tpu.memory_space<vmem>>, vector<1x64xf32>
    %cst_54 = arith.constant 9.99999974E-6 : f32
    %109 = vector.broadcast %cst_54 : f32 to vector<1x64xf32>
    %110 = arith.addf %107, %109 : vector<1x64xf32>
    %111 = math.rsqrt %110 : vector<1x64xf32>
    %112 = arith.mulf %108, %111 : vector<1x64xf32>
    %c1_55 = arith.constant 1 : index
    %c0_56 = arith.constant 0 : index
    %113 = vector.load %arg15[%c1_55, %c0_56] : memref<2x64xf32, #tpu.memory_space<vmem>>, vector<1x64xf32>
    %114 = arith.mulf %100, %112 : vector<1x64xf32>
    %115 = arith.subf %113, %114 : vector<1x64xf32>
    %116 = tpu.concatenate %112, %115 in 0 : vector<1x64xf32>, vector<1x64xf32> -> vector<2x64xf32>
    %c0_57 = arith.constant 0 : index
    %c0_58 = arith.constant 0 : index
    %117 = vector.load %arg11[%c0_57, %c0_58] : memref<64x256xf32, #tpu.memory_space<vmem>>, vector<64x256xf32>
    %cst_59 = arith.constant dense<0.000000e+00> : vector<2x256xf32>
    %118 = tpu.matmul %116, %117, %cst_59 {dimension_numbers = #tpu.dot_dimension_numbers<[1], [0], [0], [1], [0, 0, 1, 1], [], []>} : vector<2x64xf32>, vector<64x256xf32>, vector<2x256xf32> -> vector<2x256xf32>
    %119 = vector.extract_strided_slice %118 {offsets = [0, 0], sizes = [1, 256], strides = [1, 1]} : vector<2x256xf32> to vector<1x256xf32>
    %120 = vector.broadcast %119 : vector<1x256xf32> to vector<2x256xf32>
    %121 = arith.mulf %89, %120 : vector<2x256xf32>
    %122 = vector.extract_strided_slice %118 {offsets = [1, 0], sizes = [1, 256], strides = [1, 1]} : vector<2x256xf32> to vector<1x256xf32>
    %123 = vector.broadcast %122 : vector<1x256xf32> to vector<2x256xf32>
    %124 = arith.addf %121, %123 : vector<2x256xf32>
    %cst_60 = arith.constant 0.000000e+00 : f32
    %125 = vector.broadcast %cst_60 : f32 to vector<2x256xf32>
    %126 = arith.cmpf oge, %124, %125 : vector<2x256xf32>
    %cst_61 = arith.constant 3.000000e-02 : f32
    %127 = vector.broadcast %cst_61 : f32 to vector<2x256xf32>
    %128 = arith.mulf %127, %124 : vector<2x256xf32>
    %129 = arith.select %126, %124, %128 : vector<2x256xi1>, vector<2x256xf32>
    %130 = arith.truncf %129 : vector<2x256xf32> to vector<2x256xbf16>
    %c0_62 = arith.constant 0 : index
    %c0_63 = arith.constant 0 : index
    %131 = vector.load %arg4[%c0_62, %c0_63] : memref<256x128xbf16, #tpu.memory_space<vmem>>, vector<256x128xbf16>
    %cst_64 = arith.constant dense<0.000000e+00> : vector<2x128xf32>
    %132 = tpu.matmul %130, %131, %cst_64 {dimension_numbers = #tpu.dot_dimension_numbers<[1], [0], [0], [1], [0, 0, 1, 1], [], []>} : vector<2x256xbf16>, vector<256x128xbf16>, vector<2x128xf32> -> vector<2x128xf32>
    %cst_65 = arith.constant dense<0.000000e+00> : vector<128xf32>
    %133 = vector.multi_reduction <add>, %132, %cst_65 [0] : vector<2x128xf32> to vector<128xf32>
    %134 = vector.shape_cast %133 : vector<128xf32> to vector<1x128xf32>
    %135 = arith.mulf %132, %132 : vector<2x128xf32>
    %cst_66 = arith.constant dense<0.000000e+00> : vector<128xf32>
    %136 = vector.multi_reduction <add>, %135, %cst_66 [0] : vector<2x128xf32> to vector<128xf32>
    %137 = vector.shape_cast %136 : vector<128xf32> to vector<1x128xf32>
    %138 = tpu.concatenate %134, %137 in 0 : vector<1x128xf32>, vector<1x128xf32> -> vector<2x128xf32>
    %c0_67 = arith.constant 0 : index
    %c0_68 = arith.constant 0 : index
    %139 = vector.load %arg8[%c0_67, %c0_68] : memref<128x128xf32, #tpu.memory_space<vmem>>, vector<128x128xf32>
    %cst_69 = arith.constant dense<0.000000e+00> : vector<2x128xf32>
    %140 = tpu.matmul %138, %139, %cst_69 {dimension_numbers = #tpu.dot_dimension_numbers<[1], [0], [0], [1], [0, 0, 1, 1], [], []>} : vector<2x128xf32>, vector<128x128xf32>, vector<2x128xf32> -> vector<2x128xf32>
    %141 = vector.extract_strided_slice %140 {offsets = [0, 0], sizes = [1, 128], strides = [1, 1]} : vector<2x128xf32> to vector<1x128xf32>
    %cst_70 = arith.constant 2.000000e+00 : f32
    %142 = vector.broadcast %cst_70 : f32 to vector<1x128xf32>
    %143 = arith.divf %141, %142 : vector<1x128xf32>
    %144 = vector.extract_strided_slice %140 {offsets = [1, 0], sizes = [1, 128], strides = [1, 1]} : vector<2x128xf32> to vector<1x128xf32>
    %cst_71 = arith.constant 2.000000e+00 : f32
    %145 = vector.broadcast %cst_71 : f32 to vector<1x128xf32>
    %146 = arith.divf %144, %145 : vector<1x128xf32>
    %147 = arith.mulf %143, %143 : vector<1x128xf32>
    %148 = arith.subf %146, %147 : vector<1x128xf32>
    %cst_72 = arith.constant 0.000000e+00 : f32
    %149 = vector.broadcast %cst_72 : f32 to vector<1x128xf32>
    %150 = arith.maximumf %148, %149 : vector<1x128xf32>
    %c0_73 = arith.constant 0 : index
    %c0_74 = arith.constant 0 : index
    %151 = vector.load %arg16[%c0_73, %c0_74] : memref<2x128xf32, #tpu.memory_space<vmem>>, vector<1x128xf32>
    %cst_75 = arith.constant 9.99999974E-6 : f32
    %152 = vector.broadcast %cst_75 : f32 to vector<1x128xf32>
    %153 = arith.addf %150, %152 : vector<1x128xf32>
    %154 = math.rsqrt %153 : vector<1x128xf32>
    %155 = arith.mulf %151, %154 : vector<1x128xf32>
    %c1_76 = arith.constant 1 : index
    %c0_77 = arith.constant 0 : index
    %156 = vector.load %arg16[%c1_76, %c0_77] : memref<2x128xf32, #tpu.memory_space<vmem>>, vector<1x128xf32>
    %157 = arith.mulf %143, %155 : vector<1x128xf32>
    %158 = arith.subf %156, %157 : vector<1x128xf32>
    %159 = tpu.concatenate %155, %158 in 0 : vector<1x128xf32>, vector<1x128xf32> -> vector<2x128xf32>
    %c0_78 = arith.constant 0 : index
    %c0_79 = arith.constant 0 : index
    %160 = vector.load %arg12[%c0_78, %c0_79] : memref<128x128xf32, #tpu.memory_space<vmem>>, vector<128x128xf32>
    %cst_80 = arith.constant dense<0.000000e+00> : vector<2x128xf32>
    %161 = tpu.matmul %159, %160, %cst_80 {dimension_numbers = #tpu.dot_dimension_numbers<[1], [0], [0], [1], [0, 0, 1, 1], [], []>} : vector<2x128xf32>, vector<128x128xf32>, vector<2x128xf32> -> vector<2x128xf32>
    %162 = vector.extract_strided_slice %161 {offsets = [0, 0], sizes = [1, 128], strides = [1, 1]} : vector<2x128xf32> to vector<1x128xf32>
    %163 = vector.broadcast %162 : vector<1x128xf32> to vector<2x128xf32>
    %164 = arith.mulf %132, %163 : vector<2x128xf32>
    %165 = vector.extract_strided_slice %161 {offsets = [1, 0], sizes = [1, 128], strides = [1, 1]} : vector<2x128xf32> to vector<1x128xf32>
    %166 = vector.broadcast %165 : vector<1x128xf32> to vector<2x128xf32>
    %167 = arith.addf %164, %166 : vector<2x128xf32>
    %cst_81 = arith.constant 0.000000e+00 : f32
    %168 = vector.broadcast %cst_81 : f32 to vector<2x128xf32>
    %169 = arith.cmpf oge, %167, %168 : vector<2x128xf32>
    %cst_82 = arith.constant 3.000000e-02 : f32
    %170 = vector.broadcast %cst_82 : f32 to vector<2x128xf32>
    %171 = arith.mulf %170, %167 : vector<2x128xf32>
    %172 = arith.select %169, %167, %171 : vector<2x128xi1>, vector<2x128xf32>
    %173 = arith.truncf %172 : vector<2x128xf32> to vector<2x128xbf16>
    %c0_83 = arith.constant 0 : index
    %c0_84 = arith.constant 0 : index
    %174 = vector.load %arg17[%c0_83, %c0_84] : memref<128x32xbf16, #tpu.memory_space<vmem>>, vector<128x32xbf16>
    %cst_85 = arith.constant dense<0.000000e+00> : vector<2x32xf32>
    %175 = tpu.matmul %173, %174, %cst_85 {dimension_numbers = #tpu.dot_dimension_numbers<[1], [0], [0], [1], [0, 0, 1, 1], [], []>} : vector<2x128xbf16>, vector<128x32xbf16>, vector<2x32xf32> -> vector<2x32xf32>
    %cst_86 = arith.constant dense<0.000000e+00> : vector<32xf32>
    %176 = vector.multi_reduction <add>, %175, %cst_86 [0] : vector<2x32xf32> to vector<32xf32>
    %177 = vector.shape_cast %176 : vector<32xf32> to vector<1x32xf32>
    %cst_87 = arith.constant 2.000000e+00 : f32
    %178 = vector.broadcast %cst_87 : f32 to vector<1x32xf32>
    %179 = arith.divf %177, %178 : vector<1x32xf32>
    %180 = arith.mulf %175, %175 : vector<2x32xf32>
    %cst_88 = arith.constant dense<0.000000e+00> : vector<32xf32>
    %181 = vector.multi_reduction <add>, %180, %cst_88 [0] : vector<2x32xf32> to vector<32xf32>
    %182 = vector.shape_cast %181 : vector<32xf32> to vector<1x32xf32>
    %cst_89 = arith.constant 2.000000e+00 : f32
    %183 = vector.broadcast %cst_89 : f32 to vector<1x32xf32>
    %184 = arith.divf %182, %183 : vector<1x32xf32>
    %185 = arith.mulf %179, %179 : vector<1x32xf32>
    %186 = arith.subf %184, %185 : vector<1x32xf32>
    %cst_90 = arith.constant 0.000000e+00 : f32
    %187 = vector.broadcast %cst_90 : f32 to vector<1x32xf32>
    %188 = arith.maximumf %186, %187 : vector<1x32xf32>
    %c0_91 = arith.constant 0 : index
    %c0_92 = arith.constant 0 : index
    %189 = vector.load %arg18[%c0_91, %c0_92] : memref<2x32xf32, #tpu.memory_space<vmem>>, vector<1x32xf32>
    %cst_93 = arith.constant 9.99999974E-6 : f32
    %190 = vector.broadcast %cst_93 : f32 to vector<1x32xf32>
    %191 = arith.addf %188, %190 : vector<1x32xf32>
    %192 = math.rsqrt %191 : vector<1x32xf32>
    %193 = arith.mulf %189, %192 : vector<1x32xf32>
    %c1_94 = arith.constant 1 : index
    %c0_95 = arith.constant 0 : index
    %194 = vector.load %arg18[%c1_94, %c0_95] : memref<2x32xf32, #tpu.memory_space<vmem>>, vector<1x32xf32>
    %195 = arith.mulf %179, %193 : vector<1x32xf32>
    %196 = arith.subf %194, %195 : vector<1x32xf32>
    %197 = vector.broadcast %193 : vector<1x32xf32> to vector<2x32xf32>
    %198 = arith.mulf %175, %197 : vector<2x32xf32>
    %199 = vector.broadcast %196 : vector<1x32xf32> to vector<2x32xf32>
    %200 = arith.addf %198, %199 : vector<2x32xf32>
    %cst_96 = arith.constant 0.000000e+00 : f32
    %201 = vector.broadcast %cst_96 : f32 to vector<2x32xf32>
    %202 = arith.cmpf oge, %200, %201 : vector<2x32xf32>
    %cst_97 = arith.constant 3.000000e-02 : f32
    %203 = vector.broadcast %cst_97 : f32 to vector<2x32xf32>
    %204 = arith.mulf %203, %200 : vector<2x32xf32>
    %205 = arith.select %202, %200, %204 : vector<2x32xi1>, vector<2x32xf32>
    %206 = arith.truncf %205 : vector<2x32xf32> to vector<2x32xbf16>
    %c0_98 = arith.constant 0 : index
    %c0_99 = arith.constant 0 : index
    %207 = vector.load %arg19[%c0_98, %c0_99] : memref<32x16xbf16, #tpu.memory_space<vmem>>, vector<32x16xbf16>
    %cst_100 = arith.constant dense<0.000000e+00> : vector<2x16xf32>
    %208 = tpu.matmul %206, %207, %cst_100 {dimension_numbers = #tpu.dot_dimension_numbers<[1], [0], [0], [1], [0, 0, 1, 1], [], []>} : vector<2x32xbf16>, vector<32x16xbf16>, vector<2x16xf32> -> vector<2x16xf32>
    %c0_101 = arith.constant 0 : index
    %c0_102 = arith.constant 0 : index
    %209 = vector.load %arg20[%c0_101, %c0_102] : memref<1x16xf32, #tpu.memory_space<vmem>>, vector<1x16xf32>
    %210 = vector.broadcast %209 : vector<1x16xf32> to vector<2x16xf32>
    %211 = arith.addf %208, %210 : vector<2x16xf32>
    %212 = vector.extract_strided_slice %211 {offsets = [0, 0], sizes = [2, 8], strides = [1, 1]} : vector<2x16xf32> to vector<2x8xf32>
    %213 = vector.extract_strided_slice %211 {offsets = [0, 8], sizes = [2, 8], strides = [1, 1]} : vector<2x16xf32> to vector<2x8xf32>
    %c0_103 = arith.constant 0 : index
    %c0_104 = arith.constant 0 : index
    %214 = vector.load %arg21[%c0_103, %c0_104] : memref<2x8xf32, #tpu.memory_space<vmem>>, vector<2x8xf32>
    %cst_105 = arith.constant 5.000000e-01 : f32
    %215 = vector.broadcast %cst_105 : f32 to vector<2x8xf32>
    %216 = arith.mulf %215, %213 : vector<2x8xf32>
    %217 = math.exp %216 : vector<2x8xf32>
    %218 = arith.mulf %214, %217 : vector<2x8xf32>
    %219 = arith.addf %212, %218 : vector<2x8xf32>
    %220 = tpu.concatenate %212, %213, %219 in 1 : vector<2x8xf32>, vector<2x8xf32>, vector<2x8xf32> -> vector<2x24xf32>
    %c0_106 = arith.constant 0 : index
    %c0_107 = arith.constant 0 : index
    %221 = vector.load %arg22[%c0_106, %c0_107] : memref<2x24xf32, #tpu.memory_space<vmem>>, vector<2x24xf32>
    tpu.vector_store %arg22[%c0_106, %c0_107], %220 {strides = array<i32>} : memref<2x24xf32, #tpu.memory_space<vmem>>, vector<2x24xf32>,
    return
  }
}

</mosaic_0001>

<bundles_post_ra>
// kernel: modality_encoder_forward.1
= control target key start
LH: loop header
LB: loop body
LE: loop exit
PB: predicated region body
PF: predicated region fallthrough
CT: control target
= control target key end

     0   :  { %s18362_s0 = inlined_call_operand.vmem [shape: f32[2,2304], index: 0, kind: input, shape index: {}]   ;;  %s18363_s1 = inlined_call_operand.hbm [shape: bf16[2304,1024], index: 1, kind: input, shape index: {}]   ;;  %s18364_s2 = inlined_call_operand.hbm [shape: bf16[1024,512], index: 2, kind: input, shape index: {}]   ;;  %s18365_s3 = inlined_call_operand.hbm [shape: bf16[512,256], index: 3, kind: input, shape index: {}]   ;;  %s18366_s4 = inlined_call_operand.hbm [shape: bf16[256,128], index: 4, kind: input, shape index: {}]   ;;  %s18367_s5 = inlined_call_operand.vmem [shape: f32[1024,16], index: 5, kind: input, shape index: {}]   ;;  %s18368_s6 = inlined_call_operand.vmem [shape: f32[512,32], index: 6, kind: input, shape index: {}]   ;;  %s18369_s7 = inlined_call_operand.vmem [shape: f32[256,64], index: 7, kind: input, shape index: {}]   ;;  %s18370_s8 = inlined_call_operand.hbm [shape: f32[128,128], index: 8, kind: input, shape index: {}]   ;;  %s18371_s9 = inlined_call_operand.hbm [shape: f32[16,1024], index: 9, kind: input, shape index: {}]   ;;  %s18372_s10 = inlined_call_operand.hbm [shape: f32[32,512], index: 10, kind: input, shape index: {}]   ;;  %s18373_s11 = inlined_call_operand.hbm [shape: f32[64,256], index: 11, kind: input, shape index: {}]   ;;  %s18374_s12 = inlined_call_operand.hbm [shape: f32[128,128], index: 12, kind: input, shape index: {}]   ;;  %s18375_s13 = inlined_call_operand.hbm [shape: f32[2,16], index: 13, kind: input, shape index: {}]   ;;  %s18376_s14 = inlined_call_operand.hbm [shape: f32[2,32], index: 14, kind: input, shape index: {}]   ;;  %s18377_s15 = inlined_call_operand.hbm [shape: f32[2,64], index: 15, kind: input, shape index: {}]   ;;  %s18378_s16 = inlined_call_operand.hbm [shape: f32[2,128], index: 16, kind: input, shape index: {}]   ;;  %s18379_s17 = inlined_call_operand.vmem [shape: bf16[128,32], index: 17, kind: input, shape index: {}]   ;;  %s18380_s18 = inlined_call_operand.hbm [shape: f32[2,32], index: 18, kind: input, shape index: {}]   ;;  %s18381_s19 = inlined_call_operand.vmem [shape: bf16[32,16], index: 19, kind: input, shape index: {}]   ;;  %s18382_s20 = inlined_call_operand.hbm [shape: f32[1,16], index: 20, kind: input, shape index: {}]   ;;  %s18383_s21 = inlined_call_operand.hbm [shape: f32[2,8], index: 21, kind: input, shape index: {}]   ;;  %s18384_s22 = inlined_call_operand.vmem [shape: f32[2,24], index: 22, kind: output, shape index: {}]  }
   0x1   :  { %18396 = sst [smem:[#allocation36_spill]] %s18362_s0 }
   0x2   :  { %18397 = sst [smem:[#allocation37_spill]] %s18363_s1 }
   0x3   :  { %18398 = sst [smem:[#allocation38_spill]] %s18364_s2 }
   0x4   :  { %18399 = sst [smem:[#allocation39_spill]] %s18365_s3 }
   0x5   :  { %18400 = sst [smem:[#allocation40_spill]] %s18366_s4 }
   0x6   :  { %18401 = sst [smem:[#allocation41_spill]] %s18367_s5 }
   0x7   :  { %18402 = sst [smem:[#allocation42_spill]] %s18368_s6 }
   0x8   :  { %18403 = sst [smem:[#allocation43_spill]] %s18381_s19 }
   0x9   :  { %18404 = sst [smem:[#allocation44_spill]] %s18384_s22 }
   0xa   :  { %27 = vsyncpa [#allocation3], 0 }
   0xb   :  { %28 = vsyncpa [#allocation5], 0 }
   0xc   :  { %29 = vsyncpa [#allocation8], 0 }
   0xd   :  { %30 = vsyncpa [#allocation11], 0 }
   0xe   :  { %31 = vsyncpa [#allocation14], 0 }
   0xf   :  { %32 = vsyncpa [#allocation17], 0 }
  0x10   :  { %33 = vsyncpa [#allocation20], 0 }
  0x11   :  { %34 = vsyncpa [#allocation23], 0 }
  0x12   :  { %35 = vsyncpa [#allocation26], 0  ;;  %s16825_s3 = smov [#allocation4]   ;;  %s18405_s4 = sld [smem:[#allocation38_spill]] }
  0x13   :  { %s55_s28 = sshll.u32 %s16825_s3, 4  ;;  %s56_s28 = int_to_ptr.vmem [resolvable:$true] %s55_s28 }
  0x18   :  { %s16455_s0 = scalar_lea.hbm %s18405_s4, 32768 }
  0x19   :  { %p16456_p0 = scmp.ne.s32.totalorder %s18405_s4, %s16455_s0  ;;  %p16459_p1 = scmp.lt.u32.totalorder %s16455_s0, %s18405_s4 }
  0x1b   :  { %p16461_p2 = pnand %p16459_p1, %p16456_p0 }
  0x1d   :  { %16464 = shalt.err (!%p16461_p2)
}
  0x1e   :  { %s16465_s6 = scalar_lea.vmem %s56_s28, 32768  ;;  %p16470_p4 = scmp.lt.s32.totalorder %s56_s28, %s56_s28 }
  0x1f   :  { %p16466_p3 = scmp.ne.s32.totalorder %s56_s28, %s16465_s6  ;;  %p16471_p5 = scmp.lt.s32.totalorder %s16465_s6, %s16465_s6 }
  0x21   :  { %p16472_p6 = por %p16471_p5, %p16470_p4 }
  0x23   :  { %p16473_p7 = pnand %p16472_p6, %p16466_p3 }
  0x25   :  { %16476 = shalt.err (!%p16473_p7)
}
  0x26   :  { %s18393_s25 = smov 256   ;;  %s18394_s26 = smov 16  }
  0x27   :  { %61 = dma.hbm_to_vmem [thread:$0]  %s18405_s4, 32768, %s56_s28, [#allocation5], %s18393_s25, %s18393_s25, %s18394_s26  }
  0x28   :  { %s16828_s3 = smov [#allocation7]   ;;  %s18406_s23 = sld [smem:[#allocation40_spill]] }
  0x29   :  { %s79_s29 = sshll.u32 %s16828_s3, 4  ;;  %s80_s29 = int_to_ptr.vmem [resolvable:$true] %s79_s29 }
  0x2e   :  { %s16477_s1 = scalar_lea.hbm %s18406_s23, 2048 }
  0x2f   :  { %p16478_p8 = scmp.ne.s32.totalorder %s18406_s23, %s16477_s1  ;;  %p16481_p9 = scmp.lt.u32.totalorder %s16477_s1, %s18406_s23 }
  0x31   :  { %p16483_p10 = pnand %p16481_p9, %p16478_p8 }
  0x33   :  { %16486 = shalt.err (!%p16483_p10)
}
  0x34   :  { %s16487_s19 = scalar_lea.vmem %s80_s29, 2048  ;;  %p16492_p12 = scmp.lt.s32.totalorder %s80_s29, %s80_s29 }
  0x35   :  { %p16488_p11 = scmp.ne.s32.totalorder %s80_s29, %s16487_s19  ;;  %p16493_p13 = scmp.lt.s32.totalorder %s16487_s19, %s16487_s19 }
  0x37   :  { %p16494_p0 = por %p16493_p13, %p16492_p12 }
  0x39   :  { %p16495_p1 = pnand %p16494_p0, %p16488_p11 }
  0x3b   :  { %16498 = shalt.err (!%p16495_p1)
}
  0x3c   :  { %s16829_s28 = smov 64   ;;  %s16830_s4 = smov 4  }
  0x3d   :  { %85 = dma.hbm_to_vmem [thread:$0]  %s18406_s23, 2048, %s80_s29, [#allocation8], %s16829_s28, %s16829_s28, %s16830_s4  }
  0x3e   :  { %s16831_s3 = smov [#allocation10]   ;;  %s16832_s22 = smov [#allocation13]  }
  0x3f   :  { %s109_s30 = sshll.u32 %s16831_s3, 4  ;;  %s133_s0 = sshll.u32 %s16832_s22, 4  ;;  %s110_s30 = int_to_ptr.vmem [resolvable:$true] %s109_s30  ;;  %s134_s0 = int_to_ptr.vmem [resolvable:$true] %s133_s0 }
  0x40   :  { %s16499_s24 = scalar_lea.hbm %s18371_s9, 2048 }
  0x41   :  { %p16500_p2 = scmp.ne.s32.totalorder %s18371_s9, %s16499_s24  ;;  %p16503_p3 = scmp.lt.u32.totalorder %s16499_s24, %s18371_s9 }
  0x43   :  { %p16505_p4 = pnand %p16503_p3, %p16500_p2 }
  0x45   :  { %16508 = shalt.err (!%p16505_p4)
}
  0x46   :  { %s16509_s29 = scalar_lea.vmem %s110_s30, 2048  ;;  %p16514_p6 = scmp.lt.s32.totalorder %s110_s30, %s110_s30 }
  0x47   :  { %p16510_p5 = scmp.ne.s32.totalorder %s110_s30, %s16509_s29  ;;  %p16515_p7 = scmp.lt.s32.totalorder %s16509_s29, %s16509_s29 }
  0x49   :  { %p16516_p8 = por %p16515_p7, %p16514_p6 }
  0x4b   :  { %p16517_p9 = pnand %p16516_p8, %p16510_p5 }
  0x4d   :  { %16520 = shalt.err (!%p16517_p9)
}
  0x4e   :  { %s16833_s23 = smov 1024   ;;  %s16521_s25 = scalar_lea.hbm %s18373_s11, 2048 }
  0x4f   :  { %115 = dma.hbm_to_vmem [thread:$0]  %s18371_s9, 2048, %s110_s30, [#allocation11], %s16833_s23, %s16833_s23, %s16829_s28  }
  0x50   :  { %p16522_p10 = scmp.ne.s32.totalorder %s18373_s11, %s16521_s25  ;;  %p16525_p11 = scmp.lt.u32.totalorder %s16521_s25, %s18373_s11 }
  0x52   :  { %p16527_p12 = pnand %p16525_p11, %p16522_p10 }
  0x54   :  { %16530 = shalt.err (!%p16527_p12)
}
  0x55   :  { %s16531_s24 = scalar_lea.vmem %s134_s0, 2048  ;;  %p16536_p0 = scmp.lt.s32.totalorder %s134_s0, %s134_s0 }
  0x56   :  { %p16532_p13 = scmp.ne.s32.totalorder %s134_s0, %s16531_s24  ;;  %p16537_p1 = scmp.lt.s32.totalorder %s16531_s24, %s16531_s24 }
  0x58   :  { %p16538_p2 = por %p16537_p1, %p16536_p0 }
  0x5a   :  { %p16539_p3 = pnand %p16538_p2, %p16532_p13 }
  0x5c   :  { %16542 = shalt.err (!%p16539_p3)
}
  0x5d   :  { %s18407_s9 = smov 16   ;;  %s18408_s28 = smov 256  }
  0x5e   :  { %139 = dma.hbm_to_vmem [thread:$0]  %s18373_s11, 2048, %s134_s0, [#allocation14], %s18408_s28, %s18408_s28, %s18407_s9  }
  0x5f   :  { %s16834_s19 = smov [#allocation16]   ;;  %s16835_s23 = smov [#allocation19]  }
  0x60   :  { %s158_s29 = sshll.u32 %s16834_s19, 4  ;;  %s178_s4 = sshll.u32 %s16835_s23, 4  ;;  %s159_s29 = int_to_ptr.vmem [resolvable:$true] %s158_s29  ;;  %s179_s4 = int_to_ptr.vmem [resolvable:$true] %s178_s4 }
  0x61   :  { %s16543_s3 = scalar_lea.hbm %s18375_s13, 32 }
  0x62   :  { %p16544_p4 = scmp.ne.s32.totalorder %s18375_s13, %s16543_s3  ;;  %p16547_p5 = scmp.lt.u32.totalorder %s16543_s3, %s18375_s13 }
  0x64   :  { %p16549_p6 = pnand %p16547_p5, %p16544_p4 }
  0x66   :  { %16552 = shalt.err (!%p16549_p6)
}
  0x67   :  { %s16553_s11 = scalar_lea.vmem %s159_s29, 32  ;;  %p16558_p8 = scmp.lt.s32.totalorder %s159_s29, %s159_s29 }
  0x68   :  { %p16554_p7 = scmp.ne.s32.totalorder %s159_s29, %s16553_s11  ;;  %p16559_p9 = scmp.lt.s32.totalorder %s16553_s11, %s16553_s11 }
  0x6a   :  { %p16560_p10 = por %p16559_p9, %p16558_p8 }
  0x6c   :  { %p16561_p11 = pnand %p16560_p10, %p16554_p7 }
  0x6e   :  { %16564 = shalt.err (!%p16561_p11)
}
  0x6f   :  { %161 = dma.hbm_to_vmem [thread:$0]  %s18375_s13, 32, %s159_s29, [#allocation17]  }
  0x70   :  { %s16565_s30 = scalar_lea.hbm %s18377_s15, 32 }
  0x71   :  { %p16566_p12 = scmp.ne.s32.totalorder %s18377_s15, %s16565_s30  ;;  %p16569_p13 = scmp.lt.u32.totalorder %s16565_s30, %s18377_s15 }
  0x73   :  { %p16571_p0 = pnand %p16569_p13, %p16566_p12 }
  0x75   :  { %16574 = shalt.err (!%p16571_p0)
}
  0x76   :  { %s16575_s27 = scalar_lea.vmem %s179_s4, 32  ;;  %p16580_p2 = scmp.lt.s32.totalorder %s179_s4, %s179_s4 }
  0x77   :  { %p16576_p1 = scmp.ne.s32.totalorder %s179_s4, %s16575_s27  ;;  %p16581_p3 = scmp.lt.s32.totalorder %s16575_s27, %s16575_s27 }
  0x79   :  { %p16582_p4 = por %p16581_p3, %p16580_p2 }
  0x7b   :  { %p16583_p5 = pnand %p16582_p4, %p16576_p1 }
  0x7d   :  { %16586 = shalt.err (!%p16583_p5)
}
  0x7e   :  { %181 = dma.hbm_to_vmem [thread:$0]  %s18377_s15, 32, %s179_s4, [#allocation20]  }
  0x7f   :  { %s16836_s3 = smov [#allocation22]   ;;  %s16837_s26 = smov [#allocation2]  }
  0x80   :  { %s200_s25 = sshll.u32 %s16836_s3, 4  ;;  %s43_s22 = sshll.u32 %s16837_s26, 4  ;;  %s201_s25 = int_to_ptr.vmem [resolvable:$true] %s200_s25  ;;  %s44_s22 = int_to_ptr.vmem [resolvable:$true] %s43_s22 }
  0x81   :  { %s16587_s0 = scalar_lea.hbm %s18380_s18, 32 }
  0x82   :  { %p16588_p6 = scmp.ne.s32.totalorder %s18380_s18, %s16587_s0  ;;  %p16591_p7 = scmp.lt.u32.totalorder %s16587_s0, %s18380_s18 }
  0x84   :  { %p16593_p8 = pnand %p16591_p7, %p16588_p6 }
  0x86   :  { %16596 = shalt.err (!%p16593_p8)
}
  0x87   :  { %s16597_s15 = scalar_lea.vmem %s201_s25, 32  ;;  %p16602_p10 = scmp.lt.s32.totalorder %s201_s25, %s201_s25 }
  0x88   :  { %p16598_p9 = scmp.ne.s32.totalorder %s201_s25, %s16597_s15  ;;  %p16603_p11 = scmp.lt.s32.totalorder %s16597_s15, %s16597_s15 }
  0x8a   :  { %p16604_p12 = por %p16603_p11, %p16602_p10 }
  0x8c   :  { %p16605_p13 = pnand %p16604_p12, %p16598_p9 }
  0x8e   :  { %16608 = shalt.err (!%p16605_p13)
}
  0x8f   :  { %203 = dma.hbm_to_vmem [thread:$0]  %s18380_s18, 32, %s201_s25, [#allocation23]  }
  0x90   :  { %s18409_s2 = sld [smem:[#allocation37_spill]] }
  0x96   :  { %s16609_s27 = scalar_lea.hbm %s18409_s2, 147456 }
  0x97   :  { %p16610_p0 = scmp.ne.s32.totalorder %s18409_s2, %s16609_s27  ;;  %p16613_p1 = scmp.lt.u32.totalorder %s16609_s27, %s18409_s2 }
  0x99   :  { %p16615_p2 = pnand %p16613_p1, %p16610_p0 }
  0x9b   :  { %16618 = shalt.err (!%p16615_p2)
}
  0x9c   :  { %s16619_s1 = scalar_lea.vmem %s44_s22, 147456  ;;  %p16624_p4 = scmp.lt.s32.totalorder %s44_s22, %s44_s22 }
  0x9d   :  { %p16620_p3 = scmp.ne.s32.totalorder %s44_s22, %s16619_s1  ;;  %p16625_p5 = scmp.lt.s32.totalorder %s16619_s1, %s16619_s1 }
  0x9f   :  { %p16626_p6 = por %p16625_p5, %p16624_p4 }
  0xa1   :  { %p16627_p7 = pnand %p16626_p6, %p16620_p3 }
  0xa3   :  { %16630 = shalt.err (!%p16627_p7)
}
  0xa4   :  { %s16838_s18 = smov 512   ;;  %s16839_s25 = smov 32  }
  0xa5   :  { %49 = dma.hbm_to_vmem [thread:$0]  %s18409_s2, 147456, %s44_s22, [#allocation3], %s16838_s18, %s16838_s18, %s16839_s25  }
  0xa6   :  { %s16840_s5 = smov [#allocation6]   ;;  %s18410_s15 = sld [smem:[#allocation39_spill]] }
  0xa7   :  { %s67_s24 = sshll.u32 %s16840_s5, 4  ;;  %s68_s24 = int_to_ptr.vmem [resolvable:$true] %s67_s24 }
  0xac   :  { %s16631_s4 = scalar_lea.hbm %s18410_s15, 8192 }
  0xad   :  { %p16632_p8 = scmp.ne.s32.totalorder %s18410_s15, %s16631_s4  ;;  %p16635_p9 = scmp.lt.u32.totalorder %s16631_s4, %s18410_s15 }
  0xaf   :  { %p16637_p10 = pnand %p16635_p9, %p16632_p8 }
  0xb1   :  { %16640 = shalt.err (!%p16637_p10)
}
  0xb2   :  { %s16641_s13 = scalar_lea.vmem %s68_s24, 8192  ;;  %p16646_p12 = scmp.lt.s32.totalorder %s68_s24, %s68_s24 }
  0xb3   :  { %p16642_p11 = scmp.ne.s32.totalorder %s68_s24, %s16641_s13  ;;  %p16647_p13 = scmp.lt.s32.totalorder %s16641_s13, %s16641_s13 }
  0xb5   :  { %p16648_p0 = por %p16647_p13, %p16646_p12 }
  0xb7   :  { %p16649_p1 = pnand %p16648_p0, %p16642_p11 }
  0xb9   :  { %16652 = shalt.err (!%p16649_p1)
}
  0xba   :  { %s16841_s22 = smov 128   ;;  %s16842_s2 = smov 8  }
  0xbb   :  { %73 = dma.hbm_to_vmem [thread:$0]  %s18410_s15, 8192, %s68_s24, [#allocation5], %s16841_s22, %s16841_s22, %s16842_s2  }
  0xbc   :  { %s16843_s26 = smov [#allocation9]   ;;  %s16844_s11 = smov [#allocation12]  }
  0xbd   :  { %s97_s1 = sshll.u32 %s16843_s26, 4  ;;  %s121_s0 = sshll.u32 %s16844_s11, 4  ;;  %s98_s1 = int_to_ptr.vmem [resolvable:$true] %s97_s1  ;;  %s17090_s0 = int_to_ptr.vmem [resolvable:$true] %s121_s0 }
  0xbe   :  { %s16653_s30 = scalar_lea.hbm %s18370_s8, 2048 }
  0xbf   :  { %p16654_p2 = scmp.ne.s32.totalorder %s18370_s8, %s16653_s30  ;;  %p16657_p3 = scmp.lt.u32.totalorder %s16653_s30, %s18370_s8 }
  0xc1   :  { %p16659_p4 = pnand %p16657_p3, %p16654_p2 }
  0xc3   :  { %16662 = shalt.err (!%p16659_p4)
}
  0xc4   :  { %s16663_s24 = scalar_lea.vmem %s98_s1, 2048  ;;  %p16668_p6 = scmp.lt.s32.totalorder %s98_s1, %s98_s1 }
  0xc5   :  { %p16664_p5 = scmp.ne.s32.totalorder %s98_s1, %s16663_s24  ;;  %p16669_p7 = scmp.lt.s32.totalorder %s16663_s24, %s16663_s24 }
  0xc7   :  { %p16670_p8 = por %p16669_p7, %p16668_p6 }
  0xc9   :  { %p16671_p9 = pnand %p16670_p8, %p16664_p5 }
  0xcb   :  { %16674 = shalt.err (!%p16671_p9)
}
  0xcc   :  { %103 = dma.hbm_to_vmem [thread:$0]  %s18370_s8, 2048, %s98_s1, [#allocation8], %s16841_s22, %s16841_s22, %s16842_s2  }
  0xcd   :  { %s16675_s3 = scalar_lea.hbm %s18372_s10, 2048 }
  0xce   :  { %p16676_p10 = scmp.ne.s32.totalorder %s18372_s10, %s16675_s3  ;;  %p16679_p11 = scmp.lt.u32.totalorder %s16675_s3, %s18372_s10 }
  0xd0   :  { %p16681_p12 = pnand %p16679_p11, %p16676_p10 }
  0xd2   :  { %16684 = shalt.err (!%p16681_p12)
}
  0xd3   :  { %s16685_s30 = scalar_lea.vmem %s17090_s0, 2048  ;;  %p16690_p0 = scmp.lt.s32.totalorder %s17090_s0, %s17090_s0 }
  0xd4   :  { %p16686_p13 = scmp.ne.s32.totalorder %s17090_s0, %s16685_s30  ;;  %p16691_p1 = scmp.lt.s32.totalorder %s16685_s30, %s16685_s30 }
  0xd6   :  { %p16692_p2 = por %p16691_p1, %p16690_p0 }
  0xd8   :  { %p16693_p3 = pnand %p16692_p2, %p16686_p13 }
  0xda   :  { %16696 = shalt.err (!%p16693_p3)
}
  0xdb   :  { %127 = dma.hbm_to_vmem [thread:$0]  %s18372_s10, 2048, %s17090_s0, [#allocation11], %s16838_s18, %s16838_s18, %s16839_s25  }
  0xdc   :  { %s16845_s4 = smov [#allocation15]   ;;  %s16846_s19 = smov [#allocation18]  }
  0xdd   :  { %s145_s6 = sshll.u32 %s16845_s4, 4  ;;  %s168_s23 = sshll.u32 %s16846_s19, 4  ;;  %s146_s6 = int_to_ptr.vmem [resolvable:$true] %s145_s6  ;;  %s169_s23 = int_to_ptr.vmem [resolvable:$true] %s168_s23 }
  0xde   :  { %s16697_s27 = scalar_lea.hbm %s18374_s12, 2048 }
  0xdf   :  { %p16698_p4 = scmp.ne.s32.totalorder %s18374_s12, %s16697_s27  ;;  %p16701_p5 = scmp.lt.u32.totalorder %s16697_s27, %s18374_s12 }
  0xe1   :  { %p16703_p6 = pnand %p16701_p5, %p16698_p4 }
  0xe3   :  { %16706 = shalt.err (!%p16703_p6)
}
  0xe4   :  { %s16707_s10 = scalar_lea.vmem %s146_s6, 2048  ;;  %p16712_p8 = scmp.lt.s32.totalorder %s146_s6, %s146_s6 }
  0xe5   :  { %p16708_p7 = scmp.ne.s32.totalorder %s146_s6, %s16707_s10  ;;  %p16713_p9 = scmp.lt.s32.totalorder %s16707_s10, %s16707_s10 }
  0xe7   :  { %p16714_p10 = por %p16713_p9, %p16712_p8 }
  0xe9   :  { %p16715_p11 = pnand %p16714_p10, %p16708_p7 }
  0xeb   :  { %16718 = shalt.err (!%p16715_p11)
}
  0xec   :  { %151 = dma.hbm_to_vmem [thread:$0]  %s18374_s12, 2048, %s146_s6, [#allocation14], %s16841_s22, %s16841_s22, %s16842_s2  }
  0xed   :  { %s16719_s5 = scalar_lea.hbm %s18376_s14, 32 }
  0xee   :  { %p16720_p12 = scmp.ne.s32.totalorder %s18376_s14, %s16719_s5  ;;  %p16723_p13 = scmp.lt.u32.totalorder %s16719_s5, %s18376_s14 }
  0xf0   :  { %p16725_p0 = pnand %p16723_p13, %p16720_p12 }
  0xf2   :  { %16728 = shalt.err (!%p16725_p0)
}
  0xf3   :  { %s16729_s4 = scalar_lea.vmem %s169_s23, 32  ;;  %p16734_p2 = scmp.lt.s32.totalorder %s169_s23, %s169_s23 }
  0xf4   :  { %p16730_p1 = scmp.ne.s32.totalorder %s169_s23, %s16729_s4  ;;  %p16735_p3 = scmp.lt.s32.totalorder %s16729_s4, %s16729_s4 }
  0xf6   :  { %p16736_p4 = por %p16735_p3, %p16734_p2 }
  0xf8   :  { %p16737_p5 = pnand %p16736_p4, %p16730_p1 }
  0xfa   :  { %16740 = shalt.err (!%p16737_p5)
}
  0xfb   :  { %171 = dma.hbm_to_vmem [thread:$0]  %s18376_s14, 32, %s169_s23, [#allocation17]  }
  0xfc   :  { %s16847_s2 = smov [#allocation21]   ;;  %s16848_s19 = smov [#allocation24]  }
  0xfd   :  { %s188_s6 = sshll.u32 %s16847_s2, 4  ;;  %s212_s24 = sshll.u32 %s16848_s19, 4  ;;  %s189_s6 = int_to_ptr.vmem [resolvable:$true] %s188_s6  ;;  %s213_s24 = int_to_ptr.vmem [resolvable:$true] %s212_s24 }
  0xfe   :  { %s16741_s13 = scalar_lea.hbm %s18378_s16, 32 }
  0xff   :  { %p16742_p6 = scmp.ne.s32.totalorder %s18378_s16, %s16741_s13  ;;  %p16745_p7 = scmp.lt.u32.totalorder %s16741_s13, %s18378_s16 }
 0x101   :  { %p16747_p8 = pnand %p16745_p7, %p16742_p6 }
 0x103   :  { %16750 = shalt.err (!%p16747_p8)
}
 0x104   :  { %s16751_s14 = scalar_lea.vmem %s189_s6, 32  ;;  %p16756_p10 = scmp.lt.s32.totalorder %s189_s6, %s189_s6 }
 0x105   :  { %p16752_p9 = scmp.ne.s32.totalorder %s189_s6, %s16751_s14  ;;  %p16757_p11 = scmp.lt.s32.totalorder %s16751_s14, %s16751_s14 }
 0x107   :  { %p16758_p12 = por %p16757_p11, %p16756_p10 }
 0x109   :  { %p16759_p13 = pnand %p16758_p12, %p16752_p9 }
 0x10b   :  { %16762 = shalt.err (!%p16759_p13)
}
 0x10c   :  { %191 = dma.hbm_to_vmem [thread:$0]  %s18378_s16, 32, %s189_s6, [#allocation20]  }
 0x10d   :  { %s16763_s11 = scalar_lea.hbm %s18382_s20, 16 }
 0x10e   :  { %p16764_p0 = scmp.ne.s32.totalorder %s18382_s20, %s16763_s11  ;;  %p16767_p1 = scmp.lt.u32.totalorder %s16763_s11, %s18382_s20 }
 0x110   :  { %p16769_p2 = pnand %p16767_p1, %p16764_p0 }
 0x112   :  { %16772 = shalt.err (!%p16769_p2)
}
 0x113   :  { %s16773_s1 = scalar_lea.vmem %s213_s24, 16  ;;  %s16777_s4 = scalar_lea.vmem %s213_s24, 32 }
 0x114   :  { %p16774_p3 = scmp.ne.s32.totalorder %s213_s24, %s16773_s1  ;;  %p16778_p4 = scmp.lt.s32.totalorder %s213_s24, %s213_s24 }
 0x115   :  { %p16779_p5 = scmp.lt.s32.totalorder %s16777_s4, %s16773_s1 }
 0x117   :  { %p16780_p6 = por %p16779_p5, %p16778_p4 }
 0x119   :  { %p16781_p7 = pnand %p16780_p6, %p16774_p3 }
 0x11b   :  { %16784 = shalt.err (!%p16781_p7)
}
 0x11c   :  { %215 = dma.hbm_to_vmem [thread:$0]  %s18382_s20, 16, %s213_s24, [#allocation23]  }
 0x11d   :  { %s16849_s22 = smov [#allocation25]   ;;  %s16785_s15 = scalar_lea.hbm %s18383_s21, 32 }
 0x11e   :  { %s222_s2 = sshll.u32 %s16849_s22, 4  ;;  %p16786_p8 = scmp.ne.s32.totalorder %s18383_s21, %s16785_s15  ;;  %s223_s2 = int_to_ptr.vmem [resolvable:$true] %s222_s2 }
 0x11f   :  { %p16789_p9 = scmp.lt.u32.totalorder %s16785_s15, %s18383_s21 }
 0x121   :  { %p16791_p10 = pnand %p16789_p9, %p16786_p8 }
 0x123   :  { %16794 = shalt.err (!%p16791_p10)
}
 0x124   :  { %s16795_s26 = scalar_lea.vmem %s223_s2, 32  ;;  %p16800_p12 = scmp.lt.s32.totalorder %s223_s2, %s223_s2 }
 0x125   :  { %p16796_p11 = scmp.ne.s32.totalorder %s223_s2, %s16795_s26  ;;  %p16801_p13 = scmp.lt.s32.totalorder %s16795_s26, %s16795_s26 }
 0x127   :  { %p16802_p0 = por %p16801_p13, %p16800_p12 }
 0x129   :  { %p16803_p1 = pnand %p16802_p0, %p16796_p11 }
 0x12b   :  { %16806 = shalt.err (!%p16803_p1)
}
 0x12c   :  { %225 = dma.hbm_to_vmem [thread:$0]  %s18383_s21, 32, %s223_s2, [#allocation26]  }
 0x12d   :  { %16807 = dma.done.wait [#allocation3], 147456  }
 0x12e   :  { %16808 = vsyncadd [#allocation3], 4294819840 }
 0x12f   :  { %16809 = dma.done.wait [#allocation5], 40960  }
 0x130   :  { %16810 = vsyncadd [#allocation5], 4294926336 }
 0x131   :  { %16811 = dma.done.wait [#allocation8], 4096  }
 0x132   :  { %16812 = vsyncadd [#allocation8], 4294963200 }
 0x133   :  { %16813 = dma.done.wait [#allocation11], 4096  }
 0x134   :  { %16814 = vsyncadd [#allocation11], 4294963200 }
 0x135   :  { %16815 = dma.done.wait [#allocation14], 4096  }
 0x136   :  { %16816 = vsyncadd [#allocation14], 4294963200 }
 0x137   :  { %16817 = dma.done.wait [#allocation17], 64  }
 0x138   :  { %16818 = vsyncadd [#allocation17], 4294967232 }
 0x139   :  { %16819 = dma.done.wait [#allocation20], 64  }
 0x13a   :  { %16820 = vsyncadd [#allocation20], 4294967232 }
 0x13b   :  { %16821 = dma.done.wait [#allocation23], 48  }
 0x13c   :  { %16822 = vsyncadd [#allocation23], 4294967248 }
 0x13d   :  { %16823 = dma.done.wait [#allocation26], 32  }
 0x13e   :  { %16824 = vsyncadd [#allocation26], 4294967264  ;;  %v397_v0 = vld [vmem:[#allocation2] sm:$0xff]  ;;  %v398_v2 = vld [vmem:[#allocation2 + $0x8] sm:$0xff]  ;;  %v16850_v32 = vmov 1983009808   ;;  %v289_v34 = vlaneseq }
 0x13f   :  { %v401_v1 = vld [vmem:[#allocation2 + $0x20] sm:$0xff]  ;;  %v402_v4 = vld [vmem:[#allocation2 + $0x28] sm:$0xff]  ;;  %v287_v33 = vunpack.c.l.s4 %v16850_v32  ;;  %s18411_s14 = sld [smem:[#allocation36_spill]]  ;;  %vm8785_vm0 = vcmask 1041408   ;;  %s18412_s4 = sld [smem:[#allocation41_spill]]  ;;  %vm8906_vm1 = vcmask 1040384  }
 0x140   :  { %v13510_v3 = vcombine.high %v397_v0, %v401_v1  ;;  %v13509_v5 = vcombine.low %v397_v0, %v401_v1  ;;  %v405_v6 = vld [vmem:[#allocation2 + $0x40] sm:$0xff]  ;;  %v13512_v8 = vcombine.high %v398_v2, %v402_v4  ;;  %v13511_v9 = vcombine.low %v398_v2, %v402_v4  ;;  %v406_v11 = vld [vmem:[#allocation2 + $0x48] sm:$0xff]  ;;  %s18413_s20 = sld [smem:[#allocation42_spill]]  ;;  %s18414_s12 = sld [smem:[#allocation43_spill]] }
 0x141   :  { %v409_v7 = vld [vmem:[#allocation2 + $0x60] sm:$0xff]  ;;  %v410_v12 = vld [vmem:[#allocation2 + $0x68] sm:$0xff]  ;;  %v288_v43 = vunpack.c.0.s8 %v287_v33  ;;  %v17190_v44 = vshrl.u32 %v289_v34, 7  ;;  %vm9361_vm2 = vcmask 130048   ;;  %vm11931_vm11 = vcmask 261120   ;;  %s16854_s2 = smov 120  }
 0x142   :  { %v13518_v10 = vcombine.high %v405_v6, %v409_v7  ;;  %v413_v13 = vld [vmem:[#allocation2 + $0x80] sm:$0xff]  ;;  %7309 = vmatprep.subr.bf16.mxu0 %v13510_v3  ;;  %v13520_v14 = vcombine.high %v406_v11, %v410_v12  ;;  %v414_v16 = vld [vmem:[#allocation2 + $0x88] sm:$0xff]  ;;  %7678 = vmatprep.subr.bf16.mxu1 %v13512_v8  ;;  %v13517_v18 = vcombine.low %v405_v6, %v409_v7  ;;  %s18415_s19 = sld [smem:[#allocation44_spill]] }
 0x143   :  { %v417_v15 = vld [vmem:[#allocation2 + $0xa0] sm:$0xff]  ;;  %v418_v17 = vld [vmem:[#allocation2 + $0xa8] sm:$0xff]  ;;  %7310 = vmatpush1.bf16.msra.mxu0 %v13509_v5  ;;  %7679 = vmatpush1.bf16.msra.mxu1 %v13511_v9  ;;  %v13519_v19 = vcombine.low %v406_v11, %v410_v12  ;;  %v17193_v53 = vsub.s32 %v288_v43, %v17190_v44 }
 0x144   :  { %7311 = vmatprep.subr.bf16.mxu0 %v13518_v10  ;;  %v13526_v20 = vcombine.high %v413_v13, %v417_v15  ;;  %7680 = vmatprep.subr.bf16.mxu1 %v13520_v14  ;;  %v13528_v21 = vcombine.high %v414_v16, %v418_v17  ;;  %v421_v22 = vld [vmem:[#allocation2 + $0xc0] sm:$0xff]  ;;  %v422_v24 = vld [vmem:[#allocation2 + $0xc8] sm:$0xff]  ;;  %v13525_v26 = vcombine.low %v413_v13, %v417_v15 }
 0x145   :  { %v425_v23 = vld [vmem:[#allocation2 + $0xe0] sm:$0xff]  ;;  %v426_v25 = vld [vmem:[#allocation2 + $0xe8] sm:$0xff]  ;;  %v13527_v27 = vcombine.low %v414_v16, %v418_v17 }
 0x146   :  { %v13534_v28 = vcombine.high %v421_v22, %v425_v23  ;;  %v13536_v29 = vcombine.high %v422_v24, %v426_v25  ;;  %v429_v30 = vld [vmem:[#allocation2 + $0x100] sm:$0xff]  ;;  %v430_v35 = vld [vmem:[#allocation2 + $0x108] sm:$0xff]  ;;  %v13533_v37 = vcombine.low %v421_v22, %v425_v23  ;;  %v13535_v38 = vcombine.low %v422_v24, %v426_v25 }
 0x147   :  { %7312 = vmatpush1.bf16.msra.mxu0 %v13517_v18  ;;  %7681 = vmatpush1.bf16.msra.mxu1 %v13519_v19  ;;  %v433_v31 = vld [vmem:[#allocation2 + $0x120] sm:$0xff]  ;;  %v434_v36 = vld [vmem:[#allocation2 + $0x128] sm:$0xff] }
 0x148   :  { %7313 = vmatprep.subr.bf16.mxu0 %v13526_v20  ;;  %7682 = vmatprep.subr.bf16.mxu1 %v13528_v21  ;;  %v13542_v39 = vcombine.high %v429_v30, %v433_v31  ;;  %v13544_v40 = vcombine.high %v430_v35, %v434_v36  ;;  %v437_v41 = vld [vmem:[#allocation2 + $0x140] sm:$0xff]  ;;  %v438_v45 = vld [vmem:[#allocation2 + $0x148] sm:$0xff]  ;;  %v13541_v47 = vcombine.low %v429_v30, %v433_v31 }
 0x149   :  { %v441_v42 = vld [vmem:[#allocation2 + $0x160] sm:$0xff]  ;;  %v442_v46 = vld [vmem:[#allocation2 + $0x168] sm:$0xff]  ;;  %v13543_v48 = vcombine.low %v430_v35, %v434_v36 }
 0x14a   :  { %v13550_v49 = vcombine.high %v437_v41, %v441_v42  ;;  %v13552_v50 = vcombine.high %v438_v45, %v442_v46  ;;  %v445_v51 = vld [vmem:[#allocation2 + $0x180] sm:$0xff]  ;;  %v446_v54 = vld [vmem:[#allocation2 + $0x188] sm:$0xff]  ;;  %v13549_v56 = vcombine.low %v437_v41, %v441_v42  ;;  %v13551_v57 = vcombine.low %v438_v45, %v442_v46 }
 0x14b   :  { %7314 = vmatpush1.bf16.msra.mxu0 %v13525_v26  ;;  %7683 = vmatpush1.bf16.msra.mxu1 %v13527_v27  ;;  %v449_v52 = vld [vmem:[#allocation2 + $0x1a0] sm:$0xff]  ;;  %v450_v55 = vld [vmem:[#allocation2 + $0x1a8] sm:$0xff] }
 0x14c   :  { %7315 = vmatprep.subr.bf16.mxu0 %v13534_v28  ;;  %7684 = vmatprep.subr.bf16.mxu1 %v13536_v29  ;;  %v13558_v58 = vcombine.high %v445_v51, %v449_v52  ;;  %v17198_v59 = vld [vmem:[%s18411_s14] sm:$0xff]  ;;  %v13560_v60 = vcombine.high %v446_v54, %v450_v55  ;;  %v454_v0 = vld [vmem:[#allocation2 + $0x1c8] sm:$0xff]  ;;  %v13557_v2 = vcombine.low %v445_v51, %v449_v52 }
 0x14d   :  { %v453_v61 = vld [vmem:[#allocation2 + $0x1c0] sm:$0xff]  ;;  %v17202_v63 = vrot.slane %v17198_v59, %v17193_v53  ;;  %v458_v1 = vld [vmem:[#allocation2 + $0x1e8] sm:$0xff]  ;;  %v13559_v4 = vcombine.low %v446_v54, %v450_v55 }
 0x14e   :  { %v457_v62 = vld [vmem:[#allocation2 + $0x1e0] sm:$0xff]  ;;  %v13568_v6 = vcombine.high %v454_v0, %v458_v1  ;;  %v462_v10 = vld [vmem:[#allocation2 + $0x208] sm:$0xff]  ;;  %v13567_v13 = vcombine.low %v454_v0, %v458_v1 }
 0x14f   :  { %7316 = vmatpush1.bf16.msra.mxu0 %v13533_v37  ;;  %7685 = vmatpush1.bf16.msra.mxu1 %v13535_v38  ;;  %v300_v3 = vcombine.high %v17202_v63, %v17202_v63  ;;  %v13566_v5 = vcombine.high %v453_v61, %v457_v62  ;;  %v461_v7 = vld [vmem:[#allocation2 + $0x200] sm:$0xff]  ;;  %v466_v11 = vld [vmem:[#allocation2 + $0x228] sm:$0xff]  ;;  %v13565_v12 = vcombine.low %v453_v61, %v457_v62 }
 0x150   :  { %7317 = vmatprep.subr.bf16.mxu0 %v13542_v39  ;;  %7686 = vmatprep.subr.bf16.mxu1 %v13544_v40  ;;  %v465_v8 = vld [vmem:[#allocation2 + $0x220] sm:$0xff]  ;;  %v13576_v15 = vcombine.high %v462_v10, %v466_v11  ;;  %v470_v18 = vld [vmem:[#allocation2 + $0x248] sm:$0xff]  ;;  %v13575_v21 = vcombine.low %v462_v10, %v466_v11 }
 0x151   :  { %v17206_v9 = vpack.c.bf16 %v300_v3, %v300_v3  ;;  %v13574_v14 = vcombine.high %v461_v7, %v465_v8  ;;  %v469_v16 = vld [vmem:[#allocation2 + $0x240] sm:$0xff]  ;;  %v474_v19 = vld [vmem:[#allocation2 + $0x268] sm:$0xff]  ;;  %v13573_v20 = vcombine.low %v461_v7, %v465_v8 }
 0x152   :  { %v473_v17 = vld [vmem:[#allocation2 + $0x260] sm:$0xff]  ;;  %v13584_v23 = vcombine.high %v470_v18, %v474_v19  ;;  %v478_v26 = vld [vmem:[#allocation2 + $0x288] sm:$0xff]  ;;  %v13583_v29 = vcombine.low %v470_v18, %v474_v19 }
 0x153   :  { %7318 = vmatpush1.bf16.msra.mxu0 %v13541_v47  ;;  %7687 = vmatpush1.bf16.msra.mxu1 %v13543_v48  ;;  %v13582_v22 = vcombine.high %v469_v16, %v473_v17  ;;  %v477_v24 = vld [vmem:[#allocation2 + $0x280] sm:$0xff]  ;;  %v482_v27 = vld [vmem:[#allocation2 + $0x2a8] sm:$0xff]  ;;  %v13581_v28 = vcombine.low %v469_v16, %v473_v17 }
 0x154   :  { %7319 = vmatprep.subr.bf16.mxu0 %v13550_v49  ;;  %7688 = vmatprep.subr.bf16.mxu1 %v13552_v50  ;;  %v481_v25 = vld [vmem:[#allocation2 + $0x2a0] sm:$0xff]  ;;  %v13592_v31 = vcombine.high %v478_v26, %v482_v27  ;;  %v486_v34 = vld [vmem:[#allocation2 + $0x2c8] sm:$0xff]  ;;  %v13591_v37 = vcombine.low %v478_v26, %v482_v27 }
 0x155   :  { %7341 = vmatprep.mubr.bf16.mxu0 %v17206_v9  ;;  %7710 = vmatprep.mubr.bf16.mxu1 %v17206_v9  ;;  %v13590_v30 = vcombine.high %v477_v24, %v481_v25  ;;  %v485_v32 = vld [vmem:[#allocation2 + $0x2c0] sm:$0xff]  ;;  %v490_v35 = vld [vmem:[#allocation2 + $0x2e8] sm:$0xff]  ;;  %v13589_v36 = vcombine.low %v477_v24, %v481_v25  ;;  %v17219_v25 = vpack.c.bf16 %v17202_v63, %v17202_v63 }
 0x156   :  { %v489_v33 = vld [vmem:[#allocation2 + $0x2e0] sm:$0xff]  ;;  %v13600_v39 = vcombine.high %v486_v34, %v490_v35  ;;  %v494_v42 = vld [vmem:[#allocation2 + $0x308] sm:$0xff]  ;;  %v13599_v46 = vcombine.low %v486_v34, %v490_v35 }
 0x157   :  { %7320 = vmatpush1.bf16.msra.mxu0 %v13549_v56  ;;  %7689 = vmatpush1.bf16.msra.mxu1 %v13551_v57  ;;  %v13598_v38 = vcombine.high %v485_v32, %v489_v33  ;;  %v493_v40 = vld [vmem:[#allocation2 + $0x300] sm:$0xff]  ;;  %v498_v43 = vld [vmem:[#allocation2 + $0x328] sm:$0xff]  ;;  %v13597_v45 = vcombine.low %v485_v32, %v489_v33 }
 0x158   :  { %7321 = vmatprep.subr.bf16.mxu0 %v13558_v58  ;;  %7690 = vmatprep.subr.bf16.mxu1 %v13560_v60  ;;  %v497_v41 = vld [vmem:[#allocation2 + $0x320] sm:$0xff]  ;;  %v13608_v48 = vcombine.high %v494_v42, %v498_v43  ;;  %v502_v51 = vld [vmem:[#allocation2 + $0x348] sm:$0xff]  ;;  %v13607_v55 = vcombine.low %v494_v42, %v498_v43 }
 0x159   :  { %v13606_v47 = vcombine.high %v493_v40, %v497_v41  ;;  %v501_v49 = vld [vmem:[#allocation2 + $0x340] sm:$0xff]  ;;  %v506_v52 = vld [vmem:[#allocation2 + $0x368] sm:$0xff]  ;;  %v13605_v54 = vcombine.low %v493_v40, %v497_v41 }
 0x15a   :  { %v505_v50 = vld [vmem:[#allocation2 + $0x360] sm:$0xff]  ;;  %v13616_v57 = vcombine.high %v502_v51, %v506_v52  ;;  %v510_v61 = vld [vmem:[#allocation2 + $0x388] sm:$0xff]  ;;  %v13615_v1 = vcombine.low %v502_v51, %v506_v52 }
 0x15b   :  { %7322 = vmatpush1.bf16.msra.mxu0 %v13557_v2  ;;  %7691 = vmatpush1.bf16.msra.mxu1 %v13559_v4  ;;  %v13614_v56 = vcombine.high %v501_v49, %v505_v50  ;;  %v509_v58 = vld [vmem:[#allocation2 + $0x380] sm:$0xff]  ;;  %v514_v62 = vld [vmem:[#allocation2 + $0x3a8] sm:$0xff]  ;;  %v13613_v0 = vcombine.low %v501_v49, %v505_v50 }
 0x15c   :  { %7323 = vmatprep.subr.bf16.mxu0 %v13566_v5  ;;  %7692 = vmatprep.subr.bf16.mxu1 %v13568_v6  ;;  %v513_v60 = vld [vmem:[#allocation2 + $0x3a0] sm:$0xff]  ;;  %v13624_v3 = vcombine.high %v510_v61, %v514_v62  ;;  %v285_v6 = vcombine.high %v17198_v59, %v17198_v59  ;;  %v518_v7 = vld [vmem:[#allocation2 + $0x3c8] sm:$0xff]  ;;  %v13623_v11 = vcombine.low %v510_v61, %v514_v62 }
 0x15d   :  { %v13622_v2 = vcombine.high %v509_v58, %v513_v60  ;;  %v517_v4 = vld [vmem:[#allocation2 + $0x3c0] sm:$0xff]  ;;  %v522_v8 = vld [vmem:[#allocation2 + $0x3e8] sm:$0xff]  ;;  %v13621_v10 = vcombine.low %v509_v58, %v513_v60 }
 0x15e   :  { %v521_v5 = vld [vmem:[#allocation2 + $0x3e0] sm:$0xff]  ;;  %v17213_v16 = vrot.slane %v285_v6, %v17193_v53  ;;  %v526_v17 = vld [vmem:[#allocation2 + $0x408] sm:$0xff]  ;;  %v13631_v59 = vcombine.low %v518_v7, %v522_v8 }
 0x15f   :  { %7324 = vmatpush1.bf16.msra.mxu0 %v13565_v12  ;;  %7693 = vmatpush1.bf16.msra.mxu1 %v13567_v13  ;;  %v13630_v12 = vcombine.high %v517_v4, %v521_v5  ;;  %v13632_v13 = vcombine.high %v518_v7, %v522_v8  ;;  %v530_v18 = vld [vmem:[#allocation2 + $0x428] sm:$0xff]  ;;  %v13629_v19 = vcombine.low %v517_v4, %v521_v5  ;;  %v545_v32 = vld [vmem:[#allocation2 + $0x4a0] sm:$0xff] }
 0x160   :  { %7325 = vmatprep.subr.bf16.mxu0 %v13574_v14  ;;  %7694 = vmatprep.subr.bf16.mxu1 %v13576_v15  ;;  %v525_v14 = vld [vmem:[#allocation2 + $0x400] sm:$0xff]  ;;  %v301_v24 = vcombine.high %v17213_v16, %v17213_v16  ;;  %v534_v26 = vld [vmem:[#allocation2 + $0x448] sm:$0xff] }
 0x161   :  { %v529_v15 = vld [vmem:[#allocation2 + $0x420] sm:$0xff]  ;;  %v538_v27 = vld [vmem:[#allocation2 + $0x468] sm:$0xff] }
 0x162   :  { %v542_v33 = vld [vmem:[#allocation2 + $0x488] sm:$0xff]  ;;  %v13648_v34 = vcombine.high %v534_v26, %v538_v27  ;;  %v553_v40 = vld [vmem:[#allocation2 + $0x4e0] sm:$0xff] }
 0x163   :  { %7326 = vmatpush1.bf16.msra.mxu0 %v13573_v20  ;;  %7695 = vmatpush1.bf16.msra.mxu1 %v13575_v21  ;;  %v13638_v20 = vcombine.high %v525_v14, %v529_v15  ;;  %v13640_v21 = vcombine.high %v526_v17, %v530_v18  ;;  %v546_v35 = vld [vmem:[#allocation2 + $0x4a8] sm:$0xff]  ;;  %v561_v49 = vld [vmem:[#allocation2 + $0x520] sm:$0xff] }
 0x164   :  { %7327 = vmatprep.subr.bf16.mxu0 %v13582_v22  ;;  %7696 = vmatprep.subr.bf16.mxu1 %v13584_v23  ;;  %v533_v22 = vld [vmem:[#allocation2 + $0x440] sm:$0xff]  ;;  %v550_v41 = vld [vmem:[#allocation2 + $0x4c8] sm:$0xff]  ;;  %v13656_v42 = vcombine.high %v542_v33, %v546_v35 }
 0x165   :  { %v537_v23 = vld [vmem:[#allocation2 + $0x460] sm:$0xff]  ;;  %v554_v43 = vld [vmem:[#allocation2 + $0x4e8] sm:$0xff] }
 0x166   :  { %v13645_v63 = vcombine.low %v533_v22, %v537_v23  ;;  %v558_v50 = vld [vmem:[#allocation2 + $0x508] sm:$0xff]  ;;  %v13664_v51 = vcombine.high %v550_v41, %v554_v43  ;;  %v569_v58 = vld [vmem:[#allocation2 + $0x560] sm:$0xff] }
 0x167   :  { %7328 = vmatpush1.bf16.msra.mxu0 %v13581_v28  ;;  %7697 = vmatpush1.bf16.msra.mxu1 %v13583_v29  ;;  %v13637_v28 = vcombine.low %v525_v14, %v529_v15  ;;  %v13639_v29 = vcombine.low %v526_v17, %v530_v18  ;;  %v562_v52 = vld [vmem:[#allocation2 + $0x528] sm:$0xff]  ;;  %v577_v4 = vld [vmem:[#allocation2 + $0x5a0] sm:$0xff] }
 0x168   :  { %7329 = vmatprep.subr.bf16.mxu0 %v13590_v30  ;;  %7698 = vmatprep.subr.bf16.mxu1 %v13592_v31  ;;  %v13646_v30 = vcombine.high %v533_v22, %v537_v23  ;;  %v541_v31 = vld [vmem:[#allocation2 + $0x480] sm:$0xff]  ;;  %v566_v60 = vld [vmem:[#allocation2 + $0x548] sm:$0xff]  ;;  %v13672_v61 = vcombine.high %v558_v50, %v562_v52 }
 0x169   :  { %v570_v62 = vld [vmem:[#allocation2 + $0x568] sm:$0xff] }
 0x16a   :  { %v574_v5 = vld [vmem:[#allocation2 + $0x588] sm:$0xff]  ;;  %v13680_v6 = vcombine.high %v566_v60, %v570_v62 }
 0x16b   :  { %7330 = vmatpush1.bf16.msra.mxu0 %v13589_v36  ;;  %7699 = vmatpush1.bf16.msra.mxu1 %v13591_v37  ;;  %v17221_v36 = vpack.c.bf16 %v301_v24, %v301_v24  ;;  %v13647_v37 = vcombine.low %v534_v26, %v538_v27  ;;  %v578_v7 = vld [vmem:[#allocation2 + $0x5a8] sm:$0xff] }
 0x16c   :  { %7331 = vmatprep.subr.bf16.mxu0 %v13598_v38  ;;  %7700 = vmatprep.subr.bf16.mxu1 %v13600_v39  ;;  %v13654_v38 = vcombine.high %v541_v31, %v545_v32  ;;  %v549_v39 = vld [vmem:[#allocation2 + $0x4c0] sm:$0xff]  ;;  %v582_v14 = vld [vmem:[#allocation2 + $0x5c8] sm:$0xff]  ;;  %v13688_v15 = vcombine.high %v574_v5, %v578_v7 }
 0x16d   :  { %v586_v17 = vld [vmem:[#allocation2 + $0x5e8] sm:$0xff] }
 0x16e   :  { %v590_v22 = vld [vmem:[#allocation2 + $0x608] sm:$0xff]  ;;  %v13696_v23 = vcombine.high %v582_v14, %v586_v17  ;;  %v13695_v27 = vcombine.low %v582_v14, %v586_v17  ;;  %v645_v17 = vld [vmem:[#allocation2 + $0x7c0] sm:$0xff] }
 0x16f   :  { %7332 = vmatpush1.bf16.msra.mxu0 %v13597_v45  ;;  %7701 = vmatpush1.bf16.msra.mxu1 %v13599_v46  ;;  %v13653_v45 = vcombine.low %v541_v31, %v545_v32  ;;  %v13655_v46 = vcombine.low %v542_v33, %v546_v35  ;;  %v594_v24 = vld [vmem:[#allocation2 + $0x628] sm:$0xff] }
 0x170   :  { %7333 = vmatprep.subr.bf16.mxu0 %v13606_v47  ;;  %7702 = vmatprep.subr.bf16.mxu1 %v13608_v48  ;;  %v13662_v47 = vcombine.high %v549_v39, %v553_v40  ;;  %v557_v48 = vld [vmem:[#allocation2 + $0x500] sm:$0xff]  ;;  %v598_v31 = vld [vmem:[#allocation2 + $0x648] sm:$0xff]  ;;  %v13704_v32 = vcombine.high %v590_v22, %v594_v24  ;;  %v13703_v35 = vcombine.low %v590_v22, %v594_v24 }
 0x171   :  { %v602_v33 = vld [vmem:[#allocation2 + $0x668] sm:$0xff] }
 0x172   :  { %v642_v14 = vld [vmem:[#allocation2 + $0x7a8] sm:$0xff] }
 0x173   :  { %7334 = vmatpush1.bf16.msra.mxu0 %v13605_v54  ;;  %7703 = vmatpush1.bf16.msra.mxu1 %v13607_v55  ;;  %v13661_v54 = vcombine.low %v549_v39, %v553_v40  ;;  %v13663_v55 = vcombine.low %v550_v41, %v554_v43  ;;  %v606_v39 = vld [vmem:[#allocation2 + $0x688] sm:$0xff]  ;;  %v13712_v40 = vcombine.high %v598_v31, %v602_v33 }
 0x174   :  { %7335 = vmatprep.subr.bf16.mxu0 %v13614_v56  ;;  %7704 = vmatprep.subr.bf16.mxu1 %v13616_v57  ;;  %v13670_v56 = vcombine.high %v557_v48, %v561_v49  ;;  %v565_v57 = vld [vmem:[#allocation2 + $0x540] sm:$0xff]  ;;  %v610_v41 = vld [vmem:[#allocation2 + $0x6a8] sm:$0xff]  ;;  %v13711_v43 = vcombine.low %v598_v31, %v602_v33 }
 0x175   :  { %v13677_v8 = vcombine.low %v565_v57, %v569_v58 }
 0x177   :  { %7336 = vmatpush1.bf16.msra.mxu0 %v13613_v0  ;;  %7705 = vmatpush1.bf16.msra.mxu1 %v13615_v1  ;;  %v13669_v0 = vcombine.low %v557_v48, %v561_v49  ;;  %v13671_v1 = vcombine.low %v558_v50, %v562_v52  ;;  %v614_v48 = vld [vmem:[#allocation2 + $0x6c8] sm:$0xff]  ;;  %v13720_v49 = vcombine.high %v606_v39, %v610_v41 }
 0x178   :  { %7337 = vmatprep.subr.bf16.mxu0 %v13622_v2  ;;  %7706 = vmatprep.subr.bf16.mxu1 %v13624_v3  ;;  %v13678_v2 = vcombine.high %v565_v57, %v569_v58  ;;  %v573_v3 = vld [vmem:[#allocation2 + $0x580] sm:$0xff]  ;;  %v618_v50 = vld [vmem:[#allocation2 + $0x6e8] sm:$0xff]  ;;  %v13719_v52 = vcombine.low %v606_v39, %v610_v41 }
 0x179   :  { %v13685_v18 = vcombine.low %v573_v3, %v577_v4  ;;  %v622_v57 = vld [vmem:[#allocation2 + $0x708] sm:$0xff]  ;;  %v13728_v58 = vcombine.high %v614_v48, %v618_v50 }
 0x17a   :  { %v662_v39 = vld [vmem:[#allocation2 + $0x848] sm:$0xff] }
 0x17b   :  { %7338 = vmatpush1.bf16.msra.mxu0 %v13621_v10  ;;  %7707 = vmatpush1.bf16.msra.mxu1 %v13623_v11  ;;  %v13679_v10 = vcombine.low %v566_v60, %v570_v62  ;;  %v13686_v11 = vcombine.high %v573_v3, %v577_v4  ;;  %v626_v60 = vld [vmem:[#allocation2 + $0x728] sm:$0xff]  ;;  %v13727_v62 = vcombine.low %v614_v48, %v618_v50  ;;  %v669_v48 = vld [vmem:[#allocation2 + $0x880] sm:$0xff] }
 0x17c   :  { %7339 = vmatprep.subr.bf16.mxu0 %v13630_v12  ;;  %7708 = vmatprep.subr.bf16.mxu1 %v13632_v13  ;;  %v581_v12 = vld [vmem:[#allocation2 + $0x5c0] sm:$0xff]  ;;  %v630_v3 = vld [vmem:[#allocation2 + $0x748] sm:$0xff]  ;;  %v13736_v4 = vcombine.high %v622_v57, %v626_v60 }
 0x17d   :  { %v585_v13 = vld [vmem:[#allocation2 + $0x5e0] sm:$0xff]  ;;  %v666_v41 = vld [vmem:[#allocation2 + $0x868] sm:$0xff] }
 0x17e   :  { %v13693_v26 = vcombine.low %v581_v12, %v585_v13  ;;  %v670_v50 = vld [vmem:[#allocation2 + $0x888] sm:$0xff] }
 0x17f   :  { %7340 = vmatpush1.bf16.msra.mxu0 %v13629_v19  ;;  %7709 = vmatpush1.bf16.msra.mxu1 %v13631_v59  ;;  %v13687_v19 = vcombine.low %v574_v5, %v578_v7  ;;  %v13694_v59 = vcombine.high %v581_v12, %v585_v13  ;;  %v634_v5 = vld [vmem:[#allocation2 + $0x768] sm:$0xff]  ;;  %v13735_v7 = vcombine.low %v622_v57, %v626_v60  ;;  %v677_v57 = vld [vmem:[#allocation2 + $0x8c0] sm:$0xff] }
 0x180   :  { %7350 = vmatprep.subr.bf16.mxu0 %v13638_v20  ;;  %7719 = vmatprep.subr.bf16.mxu1 %v13640_v21  ;;  %v589_v20 = vld [vmem:[#allocation2 + $0x600] sm:$0xff]  ;;  %v638_v12 = vld [vmem:[#allocation2 + $0x788] sm:$0xff]  ;;  %v13744_v13 = vcombine.high %v630_v3, %v634_v5 }
 0x181   :  { %v593_v21 = vld [vmem:[#allocation2 + $0x620] sm:$0xff]  ;;  %v13752_v22 = vcombine.high %v638_v12, %v642_v14  ;;  %v678_v60 = vld [vmem:[#allocation2 + $0x8c8] sm:$0xff] }
 0x182   :  { %7342 = vmatmul.mubr.bf16.vlgmr.msra.gmra.mrb[0].mxu0 %v17219_v25  ;;  %7711 = vmatmul.mubr.bf16.vlgmr.msra.gmra.mrb[0].mxu1 %v17219_v25 }
 0x183   :  { %7351 = vmatpush1.bf16.msra.mxu0 %v13637_v28  ;;  %7720 = vmatpush1.bf16.msra.mxu1 %v13639_v29  ;;  %v13702_v28 = vcombine.high %v589_v20, %v593_v21  ;;  %v597_v29 = vld [vmem:[#allocation2 + $0x640] sm:$0xff] }
 0x184   :  { %7352 = vmatprep.subr.bf16.mxu0 %v13646_v30  ;;  %7721 = vmatprep.subr.bf16.mxu1 %v13648_v34  ;;  %v601_v30 = vld [vmem:[#allocation2 + $0x660] sm:$0xff]  ;;  %v13701_v34 = vcombine.low %v589_v20, %v593_v21  ;;  %v646_v20 = vld [vmem:[#allocation2 + $0x7c8] sm:$0xff] }
 0x185   :  { %7382 = vmatprep.mubr.bf16.mxu0 %v17221_v36  ;;  %7751 = vmatprep.mubr.bf16.mxu1 %v17221_v36  ;;  %v650_v21 = vld [vmem:[#allocation2 + $0x7e8] sm:$0xff] }
 0x186   :  { %v13760_v31 = vcombine.high %v646_v20, %v650_v21 }
 0x187   :  { %7353 = vmatpush1.bf16.msra.mxu0 %v13645_v63  ;;  %7722 = vmatpush1.bf16.msra.mxu1 %v13647_v37  ;;  %v13710_v63 = vcombine.high %v597_v29, %v601_v30  ;;  %v605_v37 = vld [vmem:[#allocation2 + $0x680] sm:$0xff] }
 0x188   :  { %7354 = vmatprep.subr.bf16.mxu0 %v13654_v38  ;;  %7723 = vmatprep.subr.bf16.mxu1 %v13656_v42  ;;  %v609_v38 = vld [vmem:[#allocation2 + $0x6a0] sm:$0xff]  ;;  %v13709_v42 = vcombine.low %v597_v29, %v601_v30  ;;  %v654_v30 = vld [vmem:[#allocation2 + $0x808] sm:$0xff] }
 0x189   :  { %v657_v29 = vld [vmem:[#allocation2 + $0x820] sm:$0xff] }
 0x18b   :  { %7355 = vmatpush1.bf16.msra.mxu0 %v13653_v45  ;;  %7724 = vmatpush1.bf16.msra.mxu1 %v13655_v46  ;;  %v13718_v45 = vcombine.high %v605_v37, %v609_v38  ;;  %v613_v46 = vld [vmem:[#allocation2 + $0x6c0] sm:$0xff] }
 0x18c   :  { %7356 = vmatprep.subr.bf16.mxu0 %v13662_v47  ;;  %7725 = vmatprep.subr.bf16.mxu1 %v13664_v51  ;;  %v617_v47 = vld [vmem:[#allocation2 + $0x6e0] sm:$0xff]  ;;  %v13717_v51 = vcombine.low %v605_v37, %v609_v38 }
 0x18d   :  { %v661_v37 = vld [vmem:[#allocation2 + $0x840] sm:$0xff] }
 0x18e   :  { %v665_v38 = vld [vmem:[#allocation2 + $0x860] sm:$0xff] }
 0x18f   :  { %7357 = vmatpush1.bf16.msra.mxu0 %v13661_v54  ;;  %7726 = vmatpush1.bf16.msra.mxu1 %v13663_v55  ;;  %v13726_v54 = vcombine.high %v613_v46, %v617_v47  ;;  %v621_v55 = vld [vmem:[#allocation2 + $0x700] sm:$0xff] }
 0x190   :  { %7358 = vmatprep.subr.bf16.mxu0 %v13670_v56  ;;  %7727 = vmatprep.subr.bf16.mxu1 %v13672_v61  ;;  %v625_v56 = vld [vmem:[#allocation2 + $0x720] sm:$0xff]  ;;  %v13725_v61 = vcombine.low %v613_v46, %v617_v47  ;;  %v13774_v47 = vcombine.high %v661_v37, %v665_v38 }
 0x193   :  { %7359 = vmatpush1.bf16.msra.mxu0 %v13669_v0  ;;  %7728 = vmatpush1.bf16.msra.mxu1 %v13671_v1  ;;  %v13734_v0 = vcombine.high %v621_v55, %v625_v56  ;;  %v629_v1 = vld [vmem:[#allocation2 + $0x740] sm:$0xff] }
 0x194   :  { %7360 = vmatprep.subr.bf16.mxu0 %v13678_v2  ;;  %7729 = vmatprep.subr.bf16.mxu1 %v13680_v6  ;;  %v633_v2 = vld [vmem:[#allocation2 + $0x760] sm:$0xff]  ;;  %v13733_v6 = vcombine.low %v621_v55, %v625_v56  ;;  %v13775_v55 = vcombine.low %v662_v39, %v666_v41 }
 0x197   :  { %7361 = vmatpush1.bf16.msra.mxu0 %v13677_v8  ;;  %7730 = vmatpush1.bf16.msra.mxu1 %v13679_v10  ;;  %v13742_v8 = vcombine.high %v629_v1, %v633_v2  ;;  %v637_v10 = vld [vmem:[#allocation2 + $0x780] sm:$0xff] }
 0x198   :  { %7362 = vmatprep.subr.bf16.mxu0 %v13686_v11  ;;  %7731 = vmatprep.subr.bf16.mxu1 %v13688_v15  ;;  %v641_v11 = vld [vmem:[#allocation2 + $0x7a0] sm:$0xff]  ;;  %v13741_v15 = vcombine.low %v629_v1, %v633_v2 }
 0x199   :  { %v13749_v24 = vcombine.low %v637_v10, %v641_v11 }
 0x19b   :  { %7363 = vmatpush1.bf16.msra.mxu0 %v13685_v18  ;;  %7732 = vmatpush1.bf16.msra.mxu1 %v13687_v19  ;;  %v13743_v18 = vcombine.low %v630_v3, %v634_v5  ;;  %v13750_v19 = vcombine.high %v637_v10, %v641_v11  ;;  %v685_v3 = vld [vmem:[#allocation2 + $0x900] sm:$0xff]  ;;  %v686_v5 = vld [vmem:[#allocation2 + $0x908] sm:$0xff] }
 0x19c   :  { %7364 = vmatprep.subr.bf16.mxu0 %v13694_v59  ;;  %7733 = vmatprep.subr.bf16.mxu1 %v13696_v23  ;;  %v649_v59 = vld [vmem:[#allocation2 + $0x7e0] sm:$0xff]  ;;  %v17230_v23 = vld [vmem:[%s18411_s14 + $0x8] sm:$0xff] }
 0x19d   :  { %v17234_v33 = vrot.slane %v17230_v23, %v17193_v53 }
 0x19f   :  { %7365 = vmatpush1.bf16.msra.mxu0 %v13693_v26  ;;  %7734 = vmatpush1.bf16.msra.mxu1 %v13695_v27  ;;  %v13751_v26 = vcombine.low %v638_v12, %v642_v14  ;;  %v13758_v27 = vcombine.high %v645_v17, %v649_v59  ;;  %v693_v12 = vld [vmem:[#allocation2 + $0x940] sm:$0xff]  ;;  %v694_v14 = vld [vmem:[#allocation2 + $0x948] sm:$0xff] }
 0x1a0   :  { %7366 = vmatprep.subr.bf16.mxu0 %v13702_v28  ;;  %7735 = vmatprep.subr.bf16.mxu1 %v13704_v32  ;;  %v653_v28 = vld [vmem:[#allocation2 + $0x800] sm:$0xff]  ;;  %v658_v32 = vld [vmem:[#allocation2 + $0x828] sm:$0xff] }
 0x1a1   :  { %v13767_v46 = vcombine.low %v654_v30, %v658_v32 }
 0x1a3   :  { %7367 = vmatpush1.bf16.msra.mxu0 %v13701_v34  ;;  %7736 = vmatpush1.bf16.msra.mxu1 %v13703_v35  ;;  %v13757_v34 = vcombine.low %v645_v17, %v649_v59  ;;  %v13759_v35 = vcombine.low %v646_v20, %v650_v21  ;;  %v698_v17 = vld [vmem:[#allocation2 + $0x968] sm:$0xff]  ;;  %v701_v20 = vld [vmem:[#allocation2 + $0x980] sm:$0xff] }
 0x1a4   :  { %7368 = vmatprep.subr.bf16.mxu0 %v13710_v63  ;;  %7737 = vmatprep.subr.bf16.mxu1 %v13712_v40  ;;  %v13766_v63 = vcombine.high %v653_v28, %v657_v29  ;;  %v13768_v40 = vcombine.high %v654_v30, %v658_v32  ;;  %v705_v21 = vld [vmem:[#allocation2 + $0x9a0] sm:$0xff]  ;;  %v710_v32 = vld [vmem:[#allocation2 + $0x9c8] sm:$0xff] }
 0x1a5   :  { %v709_v30 = vld [vmem:[#allocation2 + $0x9c0] sm:$0xff] }
 0x1a7   :  { %7369 = vmatpush1.bf16.msra.mxu0 %v13709_v42  ;;  %7738 = vmatpush1.bf16.msra.mxu1 %v13711_v43  ;;  %v317_v42 = vcombine.high %v17234_v33, %v17234_v33  ;;  %v17240_v43 = vpack.c.bf16 %v17213_v16, %v17213_v16  ;;  %v13773_v16 = vcombine.low %v661_v37, %v665_v38 }
 0x1a8   :  { %7370 = vmatprep.subr.bf16.mxu0 %v13718_v45  ;;  %7739 = vmatprep.subr.bf16.mxu1 %v13720_v49  ;;  %v13765_v45 = vcombine.low %v653_v28, %v657_v29  ;;  %v673_v49 = vld [vmem:[#allocation2 + $0x8a0] sm:$0xff]  ;;  %v13807_v28 = vcombine.low %v694_v14, %v698_v17  ;;  %v13814_v29 = vcombine.high %v701_v20, %v705_v21 }
 0x1a9   :  { %v13782_v56 = vcombine.high %v669_v48, %v673_v49 }
 0x1ab   :  { %7371 = vmatpush1.bf16.msra.mxu0 %v13717_v51  ;;  %7740 = vmatpush1.bf16.msra.mxu1 %v13719_v52  ;;  %v13776_v51 = vcombine.high %v662_v39, %v666_v41  ;;  %v674_v52 = vld [vmem:[#allocation2 + $0x8a8] sm:$0xff]  ;;  %v717_v39 = vld [vmem:[#allocation2 + $0xa00] sm:$0xff] }
 0x1ac   :  { %7372 = vmatprep.subr.bf16.mxu0 %v13726_v54  ;;  %7741 = vmatprep.subr.bf16.mxu1 %v13728_v58  ;;  %v17242_v54 = vpack.c.bf16 %v317_v42, %v317_v42  ;;  %v681_v58 = vld [vmem:[#allocation2 + $0x8e0] sm:$0xff]  ;;  %v13783_v1 = vcombine.low %v670_v50, %v674_v52  ;;  %v718_v41 = vld [vmem:[#allocation2 + $0xa08] sm:$0xff] }
 0x1ad   :  { %v13790_v2 = vcombine.high %v677_v57, %v681_v58 }
 0x1af   :  { %7373 = vmatpush1.bf16.msra.mxu0 %v13725_v61  ;;  %7742 = vmatpush1.bf16.msra.mxu1 %v13727_v62  ;;  %v13784_v61 = vcombine.high %v670_v50, %v674_v52  ;;  %v682_v62 = vld [vmem:[#allocation2 + $0x8e8] sm:$0xff]  ;;  %v729_v50 = vld [vmem:[#allocation2 + $0xa60] sm:$0xff] }
 0x1b0   :  { %7374 = vmatprep.subr.bf16.mxu0 %v13734_v0  ;;  %7743 = vmatprep.subr.bf16.mxu1 %v13736_v4  ;;  %v13781_v0 = vcombine.low %v669_v48, %v673_v49  ;;  %v689_v4 = vld [vmem:[#allocation2 + $0x920] sm:$0xff]  ;;  %v13791_v10 = vcombine.low %v678_v60, %v682_v62 }
 0x1b1   :  { %v13798_v11 = vcombine.high %v685_v3, %v689_v4  ;;  %v725_v49 = vld [vmem:[#allocation2 + $0xa40] sm:$0xff] }
 0x1b3   :  { %7375 = vmatpush1.bf16.msra.mxu0 %v13733_v6  ;;  %7744 = vmatpush1.bf16.msra.mxu1 %v13735_v7  ;;  %v13792_v6 = vcombine.high %v678_v60, %v682_v62  ;;  %v690_v7 = vld [vmem:[#allocation2 + $0x928] sm:$0xff]  ;;  %v737_v60 = vld [vmem:[#allocation2 + $0xaa0] sm:$0xff] }
 0x1b4   :  { %7376 = vmatprep.subr.bf16.mxu0 %v13742_v8  ;;  %7745 = vmatprep.subr.bf16.mxu1 %v13744_v13  ;;  %v13789_v8 = vcombine.low %v677_v57, %v681_v58  ;;  %v697_v13 = vld [vmem:[#allocation2 + $0x960] sm:$0xff]  ;;  %v13838_v57 = vcombine.high %v725_v49, %v729_v50 }
 0x1b5   :  { %v13806_v59 = vcombine.high %v693_v12, %v697_v13  ;;  %v733_v58 = vld [vmem:[#allocation2 + $0xa80] sm:$0xff] }
 0x1b7   :  { %7377 = vmatpush1.bf16.msra.mxu0 %v13741_v15  ;;  %7746 = vmatpush1.bf16.msra.mxu1 %v13743_v18  ;;  %v13800_v15 = vcombine.high %v686_v5, %v690_v7  ;;  %v13797_v18 = vcombine.low %v685_v3, %v689_v4  ;;  %v13846_v3 = vcombine.high %v733_v58, %v737_v60  ;;  %v741_v4 = vld [vmem:[#allocation2 + $0xac0] sm:$0xff] }
 0x1b8   :  { %7378 = vmatprep.subr.bf16.mxu0 %v13750_v19  ;;  %7747 = vmatprep.subr.bf16.mxu1 %v13752_v22  ;;  %v13799_v19 = vcombine.low %v686_v5, %v690_v7  ;;  %v702_v22 = vld [vmem:[#allocation2 + $0x988] sm:$0xff]  ;;  %v745_v5 = vld [vmem:[#allocation2 + $0xae0] sm:$0xff] }
 0x1bb   :  { %7379 = vmatpush1.bf16.msra.mxu0 %v13749_v24  ;;  %7748 = vmatpush1.bf16.msra.mxu1 %v13751_v26  ;;  %v13808_v24 = vcombine.high %v694_v14, %v698_v17  ;;  %v706_v26 = vld [vmem:[#allocation2 + $0x9a8] sm:$0xff]  ;;  %v753_v14 = vld [vmem:[#allocation2 + $0xb20] sm:$0xff] }
 0x1bc   :  { %7380 = vmatprep.subr.bf16.mxu0 %v13758_v27  ;;  %7749 = vmatprep.subr.bf16.mxu1 %v13760_v31  ;;  %v13805_v27 = vcombine.low %v693_v12, %v697_v13  ;;  %v713_v31 = vld [vmem:[#allocation2 + $0x9e0] sm:$0xff]  ;;  %v13815_v37 = vcombine.low %v702_v22, %v706_v26  ;;  %v13854_v12 = vcombine.high %v741_v4, %v745_v5 }
 0x1bd   :  { %v13822_v38 = vcombine.high %v709_v30, %v713_v31  ;;  %v749_v13 = vld [vmem:[#allocation2 + $0xb00] sm:$0xff] }
 0x1bf   :  { %7381 = vmatpush1.bf16.msra.mxu0 %v13757_v34  ;;  %7750 = vmatpush1.bf16.msra.mxu1 %v13759_v35  ;;  %v13816_v34 = vcombine.high %v702_v22, %v706_v26  ;;  %v714_v35 = vld [vmem:[#allocation2 + $0x9e8] sm:$0xff]  ;;  %v761_v22 = vld [vmem:[#allocation2 + $0xb60] sm:$0xff] }
 0x1c0   :  { %7391 = vmatprep.subr.bf16.mxu0 %v13766_v63  ;;  %7760 = vmatprep.subr.bf16.mxu1 %v13768_v40  ;;  %v13813_v63 = vcombine.low %v701_v20, %v705_v21  ;;  %v721_v40 = vld [vmem:[#allocation2 + $0xa20] sm:$0xff]  ;;  %v13824_v42 = vcombine.high %v710_v32, %v714_v35  ;;  %v13862_v20 = vcombine.high %v749_v13, %v753_v14 }
 0x1c1   :  { %v13830_v48 = vcombine.high %v717_v39, %v721_v40  ;;  %v757_v21 = vld [vmem:[#allocation2 + $0xb40] sm:$0xff] }
 0x1c2   :  { %7383 = vmatmul.mubr.bf16.vlgmr.msra.gmra.mrb[0].mxu0 %v17240_v43  ;;  %7752 = vmatmul.mubr.bf16.vlgmr.msra.gmra.mrb[0].mxu1 %v17240_v43 }
 0x1c3   :  { %7392 = vmatpush1.bf16.msra.mxu0 %v13765_v45  ;;  %7761 = vmatpush1.bf16.msra.mxu1 %v13767_v46  ;;  %v722_v45 = vld [vmem:[#allocation2 + $0xa28] sm:$0xff]  ;;  %v13821_v46 = vcombine.low %v709_v30, %v713_v31  ;;  %v13870_v30 = vcombine.high %v757_v21, %v761_v22  ;;  %v765_v31 = vld [vmem:[#allocation2 + $0xb80] sm:$0xff] }
 0x1c4   :  { %7393 = vmatprep.subr.bf16.mxu0 %v13774_v47  ;;  %7762 = vmatprep.subr.bf16.mxu1 %v13776_v51  ;;  %v13823_v47 = vcombine.low %v710_v32, %v714_v35  ;;  %v726_v51 = vld [vmem:[#allocation2 + $0xa48] sm:$0xff]  ;;  %v13832_v52 = vcombine.high %v718_v41, %v722_v45  ;;  %v769_v32 = vld [vmem:[#allocation2 + $0xba0] sm:$0xff] }
 0x1c5   :  { %7423 = vmatprep.mubr.bf16.mxu0 %v17242_v54  ;;  %7792 = vmatprep.mubr.bf16.mxu1 %v17242_v54 }
 0x1c7   :  { %7394 = vmatpush1.bf16.msra.mxu0 %v13773_v16  ;;  %7763 = vmatpush1.bf16.msra.mxu1 %v13775_v55  ;;  %v730_v16 = vld [vmem:[#allocation2 + $0xa68] sm:$0xff]  ;;  %v13829_v55 = vcombine.low %v717_v39, %v721_v40  ;;  %v13878_v39 = vcombine.high %v765_v31, %v769_v32  ;;  %v773_v40 = vld [vmem:[#allocation2 + $0xbc0] sm:$0xff] }
 0x1c8   :  { %7395 = vmatprep.subr.bf16.mxu0 %v13782_v56  ;;  %7764 = vmatprep.subr.bf16.mxu1 %v13784_v61  ;;  %v13831_v56 = vcombine.low %v718_v41, %v722_v45  ;;  %v734_v61 = vld [vmem:[#allocation2 + $0xa88] sm:$0xff]  ;;  %v13840_v62 = vcombine.high %v726_v51, %v730_v16  ;;  %v777_v41 = vld [vmem:[#allocation2 + $0xbe0] sm:$0xff] }
 0x1cb   :  { %7396 = vmatpush1.bf16.msra.mxu0 %v13781_v0  ;;  %7765 = vmatpush1.bf16.msra.mxu1 %v13783_v1  ;;  %v738_v0 = vld [vmem:[#allocation2 + $0xaa8] sm:$0xff]  ;;  %v13837_v1 = vcombine.low %v725_v49, %v729_v50  ;;  %v13886_v50 = vcombine.high %v773_v40, %v777_v41 }
 0x1cc   :  { %7397 = vmatprep.subr.bf16.mxu0 %v13790_v2  ;;  %7766 = vmatprep.subr.bf16.mxu1 %v13792_v6  ;;  %v13839_v2 = vcombine.low %v726_v51, %v730_v16  ;;  %v742_v6 = vld [vmem:[#allocation2 + $0xac8] sm:$0xff]  ;;  %v13848_v7 = vcombine.high %v734_v61, %v738_v0  ;;  %v781_v51 = vld [vmem:[#allocation2 + $0xc00] sm:$0xff] }
 0x1cd   :  { %v782_v16 = vld [vmem:[#allocation2 + $0xc08] sm:$0xff] }
 0x1cf   :  { %7398 = vmatpush1.bf16.msra.mxu0 %v13789_v8  ;;  %7767 = vmatpush1.bf16.msra.mxu1 %v13791_v10  ;;  %v746_v8 = vld [vmem:[#allocation2 + $0xae8] sm:$0xff]  ;;  %v13845_v10 = vcombine.low %v733_v58, %v737_v60  ;;  %v13885_v58 = vcombine.low %v773_v40, %v777_v41 }
 0x1d0   :  { %7399 = vmatprep.subr.bf16.mxu0 %v13798_v11  ;;  %7768 = vmatprep.subr.bf16.mxu1 %v13800_v15  ;;  %v13847_v11 = vcombine.low %v734_v61, %v738_v0  ;;  %v750_v15 = vld [vmem:[#allocation2 + $0xb08] sm:$0xff]  ;;  %v13856_v17 = vcombine.high %v742_v6, %v746_v8  ;;  %v789_v61 = vld [vmem:[#allocation2 + $0xc40] sm:$0xff] }
 0x1d1   :  { %v826_v40 = vld [vmem:[#allocation2 + $0xd68] sm:$0xff] }
 0x1d3   :  { %7400 = vmatpush1.bf16.msra.mxu0 %v13797_v18  ;;  %7769 = vmatpush1.bf16.msra.mxu1 %v13799_v19  ;;  %v754_v18 = vld [vmem:[#allocation2 + $0xb28] sm:$0xff]  ;;  %v13853_v19 = vcombine.low %v741_v4, %v745_v5  ;;  %v17257_v4 = vpack.c.bf16 %v17234_v33, %v17234_v33 }
 0x1d4   :  { %7401 = vmatprep.subr.bf16.mxu0 %v13806_v59  ;;  %7770 = vmatprep.subr.bf16.mxu1 %v13808_v24  ;;  %v13855_v59 = vcombine.low %v742_v6, %v746_v8  ;;  %v758_v24 = vld [vmem:[#allocation2 + $0xb48] sm:$0xff]  ;;  %v13864_v26 = vcombine.high %v750_v15, %v754_v18  ;;  %v797_v8 = vld [vmem:[#allocation2 + $0xc80] sm:$0xff] }
 0x1d7   :  { %7402 = vmatpush1.bf16.msra.mxu0 %v13805_v27  ;;  %7771 = vmatpush1.bf16.msra.mxu1 %v13807_v28  ;;  %v762_v27 = vld [vmem:[#allocation2 + $0xb68] sm:$0xff]  ;;  %v13861_v28 = vcombine.low %v749_v13, %v753_v14 }
 0x1d8   :  { %7403 = vmatprep.subr.bf16.mxu0 %v13814_v29  ;;  %7772 = vmatprep.subr.bf16.mxu1 %v13816_v34  ;;  %v13863_v29 = vcombine.low %v750_v15, %v754_v18  ;;  %v766_v34 = vld [vmem:[#allocation2 + $0xb88] sm:$0xff]  ;;  %v13872_v35 = vcombine.high %v758_v24, %v762_v27  ;;  %v805_v18 = vld [vmem:[#allocation2 + $0xcc0] sm:$0xff] }
 0x1d9   :  { %v802_v13 = vld [vmem:[#allocation2 + $0xca8] sm:$0xff] }
 0x1db   :  { %7404 = vmatpush1.bf16.msra.mxu0 %v13813_v63  ;;  %7773 = vmatpush1.bf16.msra.mxu1 %v13815_v37  ;;  %v770_v63 = vld [vmem:[#allocation2 + $0xba8] sm:$0xff]  ;;  %v13869_v37 = vcombine.low %v757_v21, %v761_v22 }
 0x1dc   :  { %7405 = vmatprep.subr.bf16.mxu0 %v13822_v38  ;;  %7774 = vmatprep.subr.bf16.mxu1 %v13824_v42  ;;  %v13871_v38 = vcombine.low %v758_v24, %v762_v27  ;;  %v774_v42 = vld [vmem:[#allocation2 + $0xbc8] sm:$0xff]  ;;  %v13880_v45 = vcombine.high %v766_v34, %v770_v63  ;;  %v13879_v49 = vcombine.low %v766_v34, %v770_v63  ;;  %v813_v27 = vld [vmem:[#allocation2 + $0xd00] sm:$0xff] }
 0x1dd   :  { %v810_v21 = vld [vmem:[#allocation2 + $0xce8] sm:$0xff]  ;;  %v821_v63 = vld [vmem:[#allocation2 + $0xd40] sm:$0xff] }
 0x1df   :  { %7406 = vmatpush1.bf16.msra.mxu0 %v13821_v46  ;;  %7775 = vmatpush1.bf16.msra.mxu1 %v13823_v47  ;;  %v778_v46 = vld [vmem:[#allocation2 + $0xbe8] sm:$0xff]  ;;  %v302_v47 = vcombine.high %v17230_v23, %v17230_v23 }
 0x1e0   :  { %7407 = vmatprep.subr.bf16.mxu0 %v13830_v48  ;;  %7776 = vmatprep.subr.bf16.mxu1 %v13832_v52  ;;  %v13877_v48 = vcombine.low %v765_v31, %v769_v32  ;;  %v785_v52 = vld [vmem:[#allocation2 + $0xc20] sm:$0xff]  ;;  %v13887_v23 = vcombine.low %v774_v42, %v778_v46  ;;  %v818_v31 = vld [vmem:[#allocation2 + $0xd28] sm:$0xff] }
 0x1e1   :  { %v13894_v60 = vcombine.high %v781_v51, %v785_v52  ;;  %v13893_v5 = vcombine.low %v781_v51, %v785_v52 }
 0x1e3   :  { %7408 = vmatpush1.bf16.msra.mxu0 %v13829_v55  ;;  %7777 = vmatpush1.bf16.msra.mxu1 %v13831_v56  ;;  %v13888_v55 = vcombine.high %v774_v42, %v778_v46  ;;  %v786_v56 = vld [vmem:[#allocation2 + $0xc28] sm:$0xff]  ;;  %v829_v46 = vld [vmem:[#allocation2 + $0xd80] sm:$0xff] }
 0x1e4   :  { %7409 = vmatprep.subr.bf16.mxu0 %v13838_v57  ;;  %7778 = vmatprep.subr.bf16.mxu1 %v13840_v62  ;;  %v17251_v57 = vrot.slane %v302_v47, %v17193_v53  ;;  %v793_v62 = vld [vmem:[#allocation2 + $0xc60] sm:$0xff]  ;;  %v13896_v0 = vcombine.high %v782_v16, %v786_v56  ;;  %v13895_v6 = vcombine.low %v782_v16, %v786_v56 }
 0x1e5   :  { %v13901_v33 = vcombine.low %v789_v61, %v793_v62  ;;  %v833_v47 = vld [vmem:[#allocation2 + $0xda0] sm:$0xff] }
 0x1e6   :  { %v13942_v16 = vcombine.high %v829_v46, %v833_v47  ;;  %v841_v56 = vld [vmem:[#allocation2 + $0xde0] sm:$0xff] }
 0x1e7   :  { %7410 = vmatpush1.bf16.msra.mxu0 %v13837_v1  ;;  %7779 = vmatpush1.bf16.msra.mxu1 %v13839_v2  ;;  %v790_v1 = vld [vmem:[#allocation2 + $0xc48] sm:$0xff] }
 0x1e8   :  { %7411 = vmatprep.subr.bf16.mxu0 %v13846_v3  ;;  %7780 = vmatprep.subr.bf16.mxu1 %v13848_v7  ;;  %v794_v2 = vld [vmem:[#allocation2 + $0xc68] sm:$0xff]  ;;  %v318_v3 = vcombine.high %v17251_v57, %v17251_v57  ;;  %v13902_v7 = vcombine.high %v789_v61, %v793_v62  ;;  %v13941_v61 = vcombine.low %v829_v46, %v833_v47 }
 0x1e9   :  { %v13903_v15 = vcombine.low %v790_v1, %v794_v2 }
 0x1ea   :  { %v17259_v14 = vpack.c.bf16 %v318_v3, %v318_v3  ;;  %v846_v3 = vld [vmem:[#allocation2 + $0xe08] sm:$0xff] }
 0x1eb   :  { %7412 = vmatpush1.bf16.msra.mxu0 %v13845_v10  ;;  %7781 = vmatpush1.bf16.msra.mxu1 %v13847_v11  ;;  %v801_v10 = vld [vmem:[#allocation2 + $0xca0] sm:$0xff]  ;;  %v798_v11 = vld [vmem:[#allocation2 + $0xc88] sm:$0xff] }
 0x1ec   :  { %7413 = vmatprep.subr.bf16.mxu0 %v13854_v12  ;;  %7782 = vmatprep.subr.bf16.mxu1 %v13856_v17  ;;  %v13904_v12 = vcombine.high %v790_v1, %v794_v2  ;;  %v13910_v17 = vcombine.high %v797_v8, %v801_v10  ;;  %v13909_v22 = vcombine.low %v797_v8, %v801_v10  ;;  %v845_v1 = vld [vmem:[#allocation2 + $0xe00] sm:$0xff] }
 0x1ed   :  { %v13911_v24 = vcombine.low %v798_v11, %v802_v13  ;;  %v849_v2 = vld [vmem:[#allocation2 + $0xe20] sm:$0xff] }
 0x1ee   :  { %v13958_v10 = vcombine.high %v845_v1, %v849_v2 }
 0x1ef   :  { %7414 = vmatpush1.bf16.msra.mxu0 %v13853_v19  ;;  %7783 = vmatpush1.bf16.msra.mxu1 %v13855_v59  ;;  %v809_v19 = vld [vmem:[#allocation2 + $0xce0] sm:$0xff]  ;;  %v806_v59 = vld [vmem:[#allocation2 + $0xcc8] sm:$0xff] }
 0x1f0   :  { %7415 = vmatprep.subr.bf16.mxu0 %v13862_v20  ;;  %7784 = vmatprep.subr.bf16.mxu1 %v13864_v26  ;;  %v13912_v20 = vcombine.high %v798_v11, %v802_v13  ;;  %v13918_v26 = vcombine.high %v805_v18, %v809_v19  ;;  %v13917_v32 = vcombine.low %v805_v18, %v809_v19  ;;  %v853_v11 = vld [vmem:[#allocation2 + $0xe40] sm:$0xff]  ;;  %v854_v13 = vld [vmem:[#allocation2 + $0xe48] sm:$0xff] }
 0x1f1   :  { %v13919_v34 = vcombine.low %v806_v59, %v810_v21 }
 0x1f3   :  { %7416 = vmatpush1.bf16.msra.mxu0 %v13861_v28  ;;  %7785 = vmatpush1.bf16.msra.mxu1 %v13863_v29  ;;  %v817_v28 = vld [vmem:[#allocation2 + $0xd20] sm:$0xff]  ;;  %v814_v29 = vld [vmem:[#allocation2 + $0xd08] sm:$0xff] }
 0x1f4   :  { %7417 = vmatprep.subr.bf16.mxu0 %v13870_v30  ;;  %7786 = vmatprep.subr.bf16.mxu1 %v13872_v35  ;;  %v13920_v30 = vcombine.high %v806_v59, %v810_v21  ;;  %v13926_v35 = vcombine.high %v813_v27, %v817_v28  ;;  %v13925_v41 = vcombine.low %v813_v27, %v817_v28  ;;  %v861_v59 = vld [vmem:[#allocation2 + $0xe80] sm:$0xff]  ;;  %v862_v21 = vld [vmem:[#allocation2 + $0xe88] sm:$0xff] }
 0x1f5   :  { %v13927_v42 = vcombine.low %v814_v29, %v818_v31 }
 0x1f7   :  { %7418 = vmatpush1.bf16.msra.mxu0 %v13869_v37  ;;  %7787 = vmatpush1.bf16.msra.mxu1 %v13871_v38  ;;  %v825_v37 = vld [vmem:[#allocation2 + $0xd60] sm:$0xff]  ;;  %v822_v38 = vld [vmem:[#allocation2 + $0xd48] sm:$0xff] }
 0x1f8   :  { %7419 = vmatprep.subr.bf16.mxu0 %v13878_v39  ;;  %7788 = vmatprep.subr.bf16.mxu1 %v13880_v45  ;;  %v13928_v39 = vcombine.high %v814_v29, %v818_v31  ;;  %v13934_v45 = vcombine.high %v821_v63, %v825_v37  ;;  %v13933_v51 = vcombine.low %v821_v63, %v825_v37  ;;  %v869_v29 = vld [vmem:[#allocation2 + $0xec0] sm:$0xff]  ;;  %v870_v31 = vld [vmem:[#allocation2 + $0xec8] sm:$0xff] }
 0x1f9   :  { %v13935_v52 = vcombine.low %v822_v38, %v826_v40 }
 0x1fb   :  { %7420 = vmatpush1.bf16.msra.mxu0 %v13877_v48  ;;  %7789 = vmatpush1.bf16.msra.mxu1 %v13879_v49  ;;  %v830_v48 = vld [vmem:[#allocation2 + $0xd88] sm:$0xff]  ;;  %v13936_v49 = vcombine.high %v822_v38, %v826_v40  ;;  %v877_v38 = vld [vmem:[#allocation2 + $0xf00] sm:$0xff] }
 0x1fc   :  { %7421 = vmatprep.subr.bf16.mxu0 %v13886_v50  ;;  %7790 = vmatprep.subr.bf16.mxu1 %v13888_v55  ;;  %v834_v50 = vld [vmem:[#allocation2 + $0xda8] sm:$0xff]  ;;  %v837_v55 = vld [vmem:[#allocation2 + $0xdc0] sm:$0xff] }
 0x1fd   :  { %v13943_v62 = vcombine.low %v830_v48, %v834_v50  ;;  %v878_v40 = vld [vmem:[#allocation2 + $0xf08] sm:$0xff] }
 0x1ff   :  { %7422 = vmatpush1.bf16.msra.mxu0 %v13885_v58  ;;  %7791 = vmatpush1.bf16.msra.mxu1 %v13887_v23  ;;  %v838_v58 = vld [vmem:[#allocation2 + $0xdc8] sm:$0xff]  ;;  %v13944_v23 = vcombine.high %v830_v48, %v834_v50  ;;  %v885_v48 = vld [vmem:[#allocation2 + $0xf40] sm:$0xff] }
 0x200   :  { %7432 = vmatprep.subr.bf16.mxu0 %v13894_v60  ;;  %7801 = vmatprep.subr.bf16.mxu1 %v13896_v0  ;;  %v842_v60 = vld [vmem:[#allocation2 + $0xde8] sm:$0xff]  ;;  %v13950_v0 = vcombine.high %v837_v55, %v841_v56 }
 0x201   :  { %v13951_v8 = vcombine.low %v838_v58, %v842_v60  ;;  %v886_v50 = vld [vmem:[#allocation2 + $0xf48] sm:$0xff] }
 0x202   :  { %7424 = vmatmul.mubr.bf16.vlgmr.msra.gmra.mrb[0].mxu0 %v17257_v4  ;;  %7793 = vmatmul.mubr.bf16.vlgmr.msra.gmra.mrb[0].mxu1 %v17257_v4 }
 0x203   :  { %7433 = vmatpush1.bf16.msra.mxu0 %v13893_v5  ;;  %7802 = vmatpush1.bf16.msra.mxu1 %v13895_v6  ;;  %v13952_v5 = vcombine.high %v838_v58, %v842_v60  ;;  %v850_v6 = vld [vmem:[#allocation2 + $0xe28] sm:$0xff]  ;;  %v893_v58 = vld [vmem:[#allocation2 + $0xf80] sm:$0xff] }
 0x204   :  { %7434 = vmatprep.subr.bf16.mxu0 %v13902_v7  ;;  %7803 = vmatprep.subr.bf16.mxu1 %v13904_v12  ;;  %v13949_v7 = vcombine.low %v837_v55, %v841_v56  ;;  %v857_v12 = vld [vmem:[#allocation2 + $0xe60] sm:$0xff]  ;;  %v13959_v18 = vcombine.low %v846_v3, %v850_v6  ;;  %v894_v60 = vld [vmem:[#allocation2 + $0xf88] sm:$0xff] }
 0x205   :  { %7464 = vmatprep.mubr.bf16.mxu0 %v17259_v14  ;;  %7833 = vmatprep.mubr.bf16.mxu1 %v17259_v14  ;;  %v13966_v19 = vcombine.high %v853_v11, %v857_v12 }
 0x207   :  { %7435 = vmatpush1.bf16.msra.mxu0 %v13901_v33  ;;  %7804 = vmatpush1.bf16.msra.mxu1 %v13903_v15  ;;  %v13960_v33 = vcombine.high %v846_v3, %v850_v6  ;;  %v858_v15 = vld [vmem:[#allocation2 + $0xe68] sm:$0xff] }
 0x208   :  { %7436 = vmatprep.subr.bf16.mxu0 %v13910_v17  ;;  %7805 = vmatprep.subr.bf16.mxu1 %v13912_v20  ;;  %v13957_v17 = vcombine.low %v845_v1, %v849_v2  ;;  %v865_v20 = vld [vmem:[#allocation2 + $0xea0] sm:$0xff]  ;;  %v13967_v27 = vcombine.low %v854_v13, %v858_v15  ;;  %v902_v6 = vld [vmem:[#allocation2 + $0xfc8] sm:$0xff] }
 0x209   :  { %v13974_v28 = vcombine.high %v861_v59, %v865_v20  ;;  %v901_v1 = vld [vmem:[#allocation2 + $0xfc0] sm:$0xff] }
 0x20b   :  { %7437 = vmatpush1.bf16.msra.mxu0 %v13909_v22  ;;  %7806 = vmatpush1.bf16.msra.mxu1 %v13911_v24  ;;  %v13968_v22 = vcombine.high %v854_v13, %v858_v15  ;;  %v866_v24 = vld [vmem:[#allocation2 + $0xea8] sm:$0xff]  ;;  %v913_v15 = vld [vmem:[#allocation2 + $0x1020] sm:$0xff] }
 0x20c   :  { %7438 = vmatprep.subr.bf16.mxu0 %v13918_v26  ;;  %7807 = vmatprep.subr.bf16.mxu1 %v13920_v30  ;;  %v13965_v26 = vcombine.low %v853_v11, %v857_v12  ;;  %v873_v30 = vld [vmem:[#allocation2 + $0xee0] sm:$0xff]  ;;  %v13975_v63 = vcombine.low %v862_v21, %v866_v24 }
 0x20d   :  { %v13982_v37 = vcombine.high %v869_v29, %v873_v30 }
 0x20f   :  { %7439 = vmatpush1.bf16.msra.mxu0 %v13917_v32  ;;  %7808 = vmatpush1.bf16.msra.mxu1 %v13919_v34  ;;  %v13976_v32 = vcombine.high %v862_v21, %v866_v24  ;;  %v874_v34 = vld [vmem:[#allocation2 + $0xee8] sm:$0xff] }
 0x210   :  { %7440 = vmatprep.subr.bf16.mxu0 %v13926_v35  ;;  %7809 = vmatprep.subr.bf16.mxu1 %v13928_v39  ;;  %v13973_v35 = vcombine.low %v861_v59, %v865_v20  ;;  %v881_v39 = vld [vmem:[#allocation2 + $0xf20] sm:$0xff]  ;;  %v13983_v46 = vcombine.low %v870_v31, %v874_v34  ;;  %v914_v59 = vld [vmem:[#allocation2 + $0x1028] sm:$0xff] }
 0x211   :  { %v13990_v47 = vcombine.high %v877_v38, %v881_v39 }
 0x213   :  { %7441 = vmatpush1.bf16.msra.mxu0 %v13925_v41  ;;  %7810 = vmatpush1.bf16.msra.mxu1 %v13927_v42  ;;  %v13984_v41 = vcombine.high %v870_v31, %v874_v34  ;;  %v882_v42 = vld [vmem:[#allocation2 + $0xf28] sm:$0xff] }
 0x214   :  { %7442 = vmatprep.subr.bf16.mxu0 %v13934_v45  ;;  %7811 = vmatprep.subr.bf16.mxu1 %v13936_v49  ;;  %v13981_v45 = vcombine.low %v869_v29, %v873_v30  ;;  %v889_v49 = vld [vmem:[#allocation2 + $0xf60] sm:$0xff]  ;;  %v13991_v55 = vcombine.low %v878_v40, %v882_v42  ;;  %v17278_v29 = vpack.c.bf16 %v17251_v57, %v17251_v57  ;;  %v918_v30 = vld [vmem:[#allocation2 + $0x1048] sm:$0xff] }
 0x215   :  { %v13998_v56 = vcombine.high %v885_v48, %v889_v49  ;;  %v922_v31 = vld [vmem:[#allocation2 + $0x1068] sm:$0xff] }
 0x217   :  { %7443 = vmatpush1.bf16.msra.mxu0 %v13933_v51  ;;  %7812 = vmatpush1.bf16.msra.mxu1 %v13935_v52  ;;  %v13992_v51 = vcombine.high %v878_v40, %v882_v42  ;;  %v890_v52 = vld [vmem:[#allocation2 + $0xf68] sm:$0xff]  ;;  %v14031_v42 = vcombine.low %v918_v30, %v922_v31 }
 0x218   :  { %7444 = vmatprep.subr.bf16.mxu0 %v13942_v16  ;;  %7813 = vmatprep.subr.bf16.mxu1 %v13944_v23  ;;  %v13989_v16 = vcombine.low %v877_v38, %v881_v39  ;;  %v897_v23 = vld [vmem:[#allocation2 + $0xfa0] sm:$0xff]  ;;  %v13999_v2 = vcombine.low %v886_v50, %v890_v52  ;;  %v926_v40 = vld [vmem:[#allocation2 + $0x1088] sm:$0xff] }
 0x219   :  { %v14006_v3 = vcombine.high %v893_v58, %v897_v23  ;;  %v14005_v11 = vcombine.low %v893_v58, %v897_v23  ;;  %v929_v38 = vld [vmem:[#allocation2 + $0x10a0] sm:$0xff]  ;;  %v942_v23 = vld [vmem:[#allocation2 + $0x1108] sm:$0xff] }
 0x21a   :  { %v945_v58 = vld [vmem:[#allocation2 + $0x1120] sm:$0xff] }
 0x21b   :  { %7445 = vmatpush1.bf16.msra.mxu0 %v13941_v61  ;;  %7814 = vmatpush1.bf16.msra.mxu1 %v13943_v62  ;;  %v14000_v61 = vcombine.high %v886_v50, %v890_v52  ;;  %v898_v62 = vld [vmem:[#allocation2 + $0xfa8] sm:$0xff] }
 0x21c   :  { %7446 = vmatprep.subr.bf16.mxu0 %v13950_v0  ;;  %7815 = vmatprep.subr.bf16.mxu1 %v13952_v5  ;;  %v13997_v0 = vcombine.low %v885_v48, %v889_v49  ;;  %v905_v5 = vld [vmem:[#allocation2 + $0xfe0] sm:$0xff]  ;;  %v14007_v12 = vcombine.low %v894_v60, %v898_v62  ;;  %v934_v49 = vld [vmem:[#allocation2 + $0x10c8] sm:$0xff] }
 0x21d   :  { %v14014_v13 = vcombine.high %v901_v1, %v905_v5  ;;  %v14013_v20 = vcombine.low %v901_v1, %v905_v5  ;;  %v937_v48 = vld [vmem:[#allocation2 + $0x10e0] sm:$0xff]  ;;  %v938_v50 = vld [vmem:[#allocation2 + $0x10e8] sm:$0xff] }
 0x21e   :  { %v950_v5 = vld [vmem:[#allocation2 + $0x1148] sm:$0xff] }
 0x21f   :  { %7447 = vmatpush1.bf16.msra.mxu0 %v13949_v7  ;;  %7816 = vmatpush1.bf16.msra.mxu1 %v13951_v8  ;;  %v906_v7 = vld [vmem:[#allocation2 + $0xfe8] sm:$0xff]  ;;  %v14008_v8 = vcombine.high %v894_v60, %v898_v62  ;;  %v14047_v62 = vcombine.low %v934_v49, %v938_v50 }
 0x220   :  { %7448 = vmatprep.subr.bf16.mxu0 %v13958_v10  ;;  %7817 = vmatprep.subr.bf16.mxu1 %v13960_v33  ;;  %v17268_v10 = vld [vmem:[%s18411_s14 + $0x10] sm:$0xff]  ;;  %v909_v33 = vld [vmem:[#allocation2 + $0x1000] sm:$0xff]  ;;  %v14015_v21 = vcombine.low %v902_v6, %v906_v7  ;;  %v946_v60 = vld [vmem:[#allocation2 + $0x1128] sm:$0xff] }
 0x221   :  { %v14056_v1 = vcombine.high %v942_v23, %v946_v60 }
 0x223   :  { %7449 = vmatpush1.bf16.msra.mxu0 %v13957_v17  ;;  %7818 = vmatpush1.bf16.msra.mxu1 %v13959_v18  ;;  %v14016_v17 = vcombine.high %v902_v6, %v906_v7  ;;  %v910_v18 = vld [vmem:[#allocation2 + $0x1008] sm:$0xff] }
 0x224   :  { %7450 = vmatprep.subr.bf16.mxu0 %v13966_v19  ;;  %7819 = vmatprep.subr.bf16.mxu1 %v13968_v22  ;;  %v17272_v19 = vrot.slane %v17268_v10, %v17193_v53  ;;  %v14022_v22 = vcombine.high %v909_v33, %v913_v15  ;;  %v14024_v24 = vcombine.high %v910_v18, %v914_v59  ;;  %v954_v6 = vld [vmem:[#allocation2 + $0x1168] sm:$0xff] }
 0x225   :  { %v14023_v34 = vcombine.low %v910_v18, %v914_v59  ;;  %v14063_v59 = vcombine.low %v950_v5, %v954_v6 }
 0x227   :  { %7451 = vmatpush1.bf16.msra.mxu0 %v13965_v26  ;;  %7820 = vmatpush1.bf16.msra.mxu1 %v13967_v27  ;;  %v917_v26 = vld [vmem:[#allocation2 + $0x1040] sm:$0xff] }
 0x228   :  { %7452 = vmatprep.subr.bf16.mxu0 %v13974_v28  ;;  %7821 = vmatprep.subr.bf16.mxu1 %v13976_v32  ;;  %v921_v27 = vld [vmem:[#allocation2 + $0x1060] sm:$0xff]  ;;  %v334_v28 = vcombine.high %v17272_v19, %v17272_v19  ;;  %v14021_v32 = vcombine.low %v909_v33, %v913_v15  ;;  %v958_v15 = vld [vmem:[#allocation2 + $0x1188] sm:$0xff] }
 0x229   :  { %v14029_v57 = vcombine.low %v917_v26, %v921_v27  ;;  %v961_v33 = vld [vmem:[#allocation2 + $0x11a0] sm:$0xff] }
 0x22a   :  { %v17280_v39 = vpack.c.bf16 %v334_v28, %v334_v28 }
 0x22b   :  { %7453 = vmatpush1.bf16.msra.mxu0 %v13973_v35  ;;  %7822 = vmatpush1.bf16.msra.mxu1 %v13975_v63  ;;  %v14030_v35 = vcombine.high %v917_v26, %v921_v27  ;;  %v14032_v63 = vcombine.high %v918_v30, %v922_v31  ;;  %v966_v26 = vld [vmem:[#allocation2 + $0x11c8] sm:$0xff] }
 0x22c   :  { %7454 = vmatprep.subr.bf16.mxu0 %v13982_v37  ;;  %7823 = vmatprep.subr.bf16.mxu1 %v13984_v41  ;;  %v925_v37 = vld [vmem:[#allocation2 + $0x1080] sm:$0xff]  ;;  %v930_v41 = vld [vmem:[#allocation2 + $0x10a8] sm:$0xff] }
 0x22d   :  { %v14039_v52 = vcombine.low %v926_v40, %v930_v41  ;;  %v970_v27 = vld [vmem:[#allocation2 + $0x11e8] sm:$0xff] }
 0x22f   :  { %7455 = vmatpush1.bf16.msra.mxu0 %v13981_v45  ;;  %7824 = vmatpush1.bf16.msra.mxu1 %v13983_v46  ;;  %v14038_v45 = vcombine.high %v925_v37, %v929_v38  ;;  %v14040_v46 = vcombine.high %v926_v40, %v930_v41  ;;  %v14079_v40 = vcombine.low %v966_v26, %v970_v27 }
 0x230   :  { %7456 = vmatprep.subr.bf16.mxu0 %v13990_v47  ;;  %7825 = vmatprep.subr.bf16.mxu1 %v13992_v51  ;;  %v933_v47 = vld [vmem:[#allocation2 + $0x10c0] sm:$0xff]  ;;  %v14037_v51 = vcombine.low %v925_v37, %v929_v38  ;;  %v978_v37 = vld [vmem:[#allocation2 + $0x1228] sm:$0xff] }
 0x233   :  { %7457 = vmatpush1.bf16.msra.mxu0 %v13989_v16  ;;  %7826 = vmatpush1.bf16.msra.mxu1 %v13991_v55  ;;  %v14046_v16 = vcombine.high %v933_v47, %v937_v48  ;;  %v14048_v55 = vcombine.high %v934_v49, %v938_v50 }
 0x234   :  { %7458 = vmatprep.subr.bf16.mxu0 %v13998_v56  ;;  %7827 = vmatprep.subr.bf16.mxu1 %v14000_v61  ;;  %v941_v56 = vld [vmem:[#allocation2 + $0x1100] sm:$0xff]  ;;  %v14045_v61 = vcombine.low %v933_v47, %v937_v48  ;;  %v986_v47 = vld [vmem:[#allocation2 + $0x1268] sm:$0xff] }
 0x235   :  { %v14053_v7 = vcombine.low %v941_v56, %v945_v58 }
 0x237   :  { %7459 = vmatpush1.bf16.msra.mxu0 %v13997_v0  ;;  %7828 = vmatpush1.bf16.msra.mxu1 %v13999_v2  ;;  %v14054_v0 = vcombine.high %v941_v56, %v945_v58  ;;  %v949_v2 = vld [vmem:[#allocation2 + $0x1140] sm:$0xff]  ;;  %v994_v56 = vld [vmem:[#allocation2 + $0x12a8] sm:$0xff] }
 0x238   :  { %7460 = vmatprep.subr.bf16.mxu0 %v14006_v3  ;;  %7829 = vmatprep.subr.bf16.mxu1 %v14008_v8  ;;  %v953_v3 = vld [vmem:[#allocation2 + $0x1160] sm:$0xff]  ;;  %v14055_v8 = vcombine.low %v942_v23, %v946_v60 }
 0x239   :  { %v14061_v18 = vcombine.low %v949_v2, %v953_v3 }
 0x23b   :  { %7461 = vmatpush1.bf16.msra.mxu0 %v14005_v11  ;;  %7830 = vmatpush1.bf16.msra.mxu1 %v14007_v12  ;;  %v14062_v11 = vcombine.high %v949_v2, %v953_v3  ;;  %v14064_v12 = vcombine.high %v950_v5, %v954_v6  ;;  %v1002_v2 = vld [vmem:[#allocation2 + $0x12e8] sm:$0xff] }
 0x23c   :  { %7462 = vmatprep.subr.bf16.mxu0 %v14014_v13  ;;  %7831 = vmatprep.subr.bf16.mxu1 %v14016_v17  ;;  %v957_v13 = vld [vmem:[#allocation2 + $0x1180] sm:$0xff]  ;;  %v962_v17 = vld [vmem:[#allocation2 + $0x11a8] sm:$0xff] }
 0x23d   :  { %v14069_v28 = vcombine.low %v957_v13, %v961_v33  ;;  %v14071_v30 = vcombine.low %v958_v15, %v962_v17 }
 0x23f   :  { %7463 = vmatpush1.bf16.msra.mxu0 %v14013_v20  ;;  %7832 = vmatpush1.bf16.msra.mxu1 %v14015_v21  ;;  %v14070_v20 = vcombine.high %v957_v13, %v961_v33  ;;  %v14072_v21 = vcombine.high %v958_v15, %v962_v17  ;;  %v1010_v13 = vld [vmem:[#allocation2 + $0x1328] sm:$0xff] }
 0x240   :  { %7473 = vmatprep.subr.bf16.mxu0 %v14022_v22  ;;  %7842 = vmatprep.subr.bf16.mxu1 %v14024_v24  ;;  %v965_v22 = vld [vmem:[#allocation2 + $0x11c0] sm:$0xff] }
 0x241   :  { %v969_v24 = vld [vmem:[#allocation2 + $0x11e0] sm:$0xff] }
 0x242   :  { %7465 = vmatmul.mubr.bf16.vlgmr.msra.gmra.mrb[0].mxu0 %v17278_v29  ;;  %7834 = vmatmul.mubr.bf16.vlgmr.msra.gmra.mrb[0].mxu1 %v17278_v29  ;;  %v14078_v31 = vcombine.high %v965_v22, %v969_v24  ;;  %v14077_v38 = vcombine.low %v965_v22, %v969_v24  ;;  %v1018_v22 = vld [vmem:[#allocation2 + $0x1368] sm:$0xff] }
 0x243   :  { %7474 = vmatpush1.bf16.msra.mxu0 %v14021_v32  ;;  %7843 = vmatpush1.bf16.msra.mxu1 %v14023_v34  ;;  %v14080_v32 = vcombine.high %v966_v26, %v970_v27  ;;  %v973_v34 = vld [vmem:[#allocation2 + $0x1200] sm:$0xff] }
 0x244   :  { %7475 = vmatprep.subr.bf16.mxu0 %v14030_v35  ;;  %7844 = vmatprep.subr.bf16.mxu1 %v14032_v63  ;;  %v977_v35 = vld [vmem:[#allocation2 + $0x1220] sm:$0xff]  ;;  %v974_v63 = vld [vmem:[#allocation2 + $0x1208] sm:$0xff] }
 0x245   :  { %7505 = vmatprep.mubr.bf16.mxu0 %v17280_v39  ;;  %7874 = vmatprep.mubr.bf16.mxu1 %v17280_v39  ;;  %v14086_v41 = vcombine.high %v973_v34, %v977_v35  ;;  %v14085_v48 = vcombine.low %v973_v34, %v977_v35  ;;  %v14087_v49 = vcombine.low %v974_v63, %v978_v37  ;;  %v1026_v34 = vld [vmem:[#allocation2 + $0x13a8] sm:$0xff] }
 0x247   :  { %7476 = vmatpush1.bf16.msra.mxu0 %v14029_v57  ;;  %7845 = vmatpush1.bf16.msra.mxu1 %v14031_v42  ;;  %v14088_v57 = vcombine.high %v974_v63, %v978_v37  ;;  %v981_v42 = vld [vmem:[#allocation2 + $0x1240] sm:$0xff] }
 0x248   :  { %7477 = vmatprep.subr.bf16.mxu0 %v14038_v45  ;;  %7846 = vmatprep.subr.bf16.mxu1 %v14040_v46  ;;  %v985_v45 = vld [vmem:[#allocation2 + $0x1260] sm:$0xff]  ;;  %v982_v46 = vld [vmem:[#allocation2 + $0x1248] sm:$0xff] }
 0x249   :  { %v14094_v50 = vcombine.high %v981_v42, %v985_v45  ;;  %v14093_v58 = vcombine.low %v981_v42, %v985_v45  ;;  %v14095_v23 = vcombine.low %v982_v46, %v986_v47  ;;  %v1030_v42 = vld [vmem:[#allocation2 + $0x13c8] sm:$0xff] }
 0x24a   :  { %v1034_v45 = vld [vmem:[#allocation2 + $0x13e8] sm:$0xff] }
 0x24b   :  { %7478 = vmatpush1.bf16.msra.mxu0 %v14037_v51  ;;  %7847 = vmatpush1.bf16.msra.mxu1 %v14039_v52  ;;  %v14096_v51 = vcombine.high %v982_v46, %v986_v47  ;;  %v989_v52 = vld [vmem:[#allocation2 + $0x1280] sm:$0xff] }
 0x24c   :  { %7479 = vmatprep.subr.bf16.mxu0 %v14046_v16  ;;  %7848 = vmatprep.subr.bf16.mxu1 %v14048_v55  ;;  %v993_v16 = vld [vmem:[#allocation2 + $0x12a0] sm:$0xff]  ;;  %v990_v55 = vld [vmem:[#allocation2 + $0x1288] sm:$0xff] }
 0x24d   :  { %v14102_v60 = vcombine.high %v989_v52, %v993_v16  ;;  %v14101_v3 = vcombine.low %v989_v52, %v993_v16  ;;  %v14103_v5 = vcombine.low %v990_v55, %v994_v56  ;;  %v1038_v16 = vld [vmem:[#allocation2 + $0x1408] sm:$0xff] }
 0x24f   :  { %7480 = vmatpush1.bf16.msra.mxu0 %v14045_v61  ;;  %7849 = vmatpush1.bf16.msra.mxu1 %v14047_v62  ;;  %v14104_v61 = vcombine.high %v990_v55, %v994_v56  ;;  %v997_v62 = vld [vmem:[#allocation2 + $0x12c0] sm:$0xff]  ;;  %v1042_v55 = vld [vmem:[#allocation2 + $0x1428] sm:$0xff] }
 0x250   :  { %7481 = vmatprep.subr.bf16.mxu0 %v14054_v0  ;;  %7850 = vmatprep.subr.bf16.mxu1 %v14056_v1  ;;  %v1001_v0 = vld [vmem:[#allocation2 + $0x12e0] sm:$0xff]  ;;  %v998_v1 = vld [vmem:[#allocation2 + $0x12c8] sm:$0xff] }
 0x251   :  { %v14110_v6 = vcombine.high %v997_v62, %v1001_v0  ;;  %v14109_v33 = vcombine.low %v997_v62, %v1001_v0  ;;  %v14111_v15 = vcombine.low %v998_v1, %v1002_v2  ;;  %v17295_v0 = vpack.c.bf16 %v17272_v19, %v17272_v19 }
 0x253   :  { %7482 = vmatpush1.bf16.msra.mxu0 %v14053_v7  ;;  %7851 = vmatpush1.bf16.msra.mxu1 %v14055_v8  ;;  %v14112_v7 = vcombine.high %v998_v1, %v1002_v2  ;;  %v1005_v8 = vld [vmem:[#allocation2 + $0x1300] sm:$0xff]  ;;  %v1046_v1 = vld [vmem:[#allocation2 + $0x1448] sm:$0xff] }
 0x254   :  { %7483 = vmatprep.subr.bf16.mxu0 %v14062_v11  ;;  %7852 = vmatprep.subr.bf16.mxu1 %v14064_v12  ;;  %v1009_v11 = vld [vmem:[#allocation2 + $0x1320] sm:$0xff]  ;;  %v1006_v12 = vld [vmem:[#allocation2 + $0x1308] sm:$0xff] }
 0x255   :  { %v14118_v17 = vcombine.high %v1005_v8, %v1009_v11  ;;  %v14117_v24 = vcombine.low %v1005_v8, %v1009_v11  ;;  %v14119_v26 = vcombine.low %v1006_v12, %v1010_v13  ;;  %v1050_v2 = vld [vmem:[#allocation2 + $0x1468] sm:$0xff]  ;;  %v1053_v8 = vld [vmem:[#allocation2 + $0x1480] sm:$0xff] }
 0x256   :  { %v1057_v11 = vld [vmem:[#allocation2 + $0x14a0] sm:$0xff] }
 0x257   :  { %7484 = vmatpush1.bf16.msra.mxu0 %v14061_v18  ;;  %7853 = vmatpush1.bf16.msra.mxu1 %v14063_v59  ;;  %v14120_v18 = vcombine.high %v1006_v12, %v1010_v13  ;;  %v1013_v59 = vld [vmem:[#allocation2 + $0x1340] sm:$0xff]  ;;  %v1054_v13 = vld [vmem:[#allocation2 + $0x1488] sm:$0xff] }
 0x258   :  { %7485 = vmatprep.subr.bf16.mxu0 %v14070_v20  ;;  %7854 = vmatprep.subr.bf16.mxu1 %v14072_v21  ;;  %v1017_v20 = vld [vmem:[#allocation2 + $0x1360] sm:$0xff]  ;;  %v1014_v21 = vld [vmem:[#allocation2 + $0x1348] sm:$0xff] }
 0x259   :  { %v14126_v27 = vcombine.high %v1013_v59, %v1017_v20  ;;  %v14125_v35 = vcombine.low %v1013_v59, %v1017_v20  ;;  %v14127_v63 = vcombine.low %v1014_v21, %v1018_v22  ;;  %v1061_v59 = vld [vmem:[#allocation2 + $0x14c0] sm:$0xff] }
 0x25a   :  { %v1065_v20 = vld [vmem:[#allocation2 + $0x14e0] sm:$0xff] }
 0x25b   :  { %7486 = vmatpush1.bf16.msra.mxu0 %v14069_v28  ;;  %7855 = vmatpush1.bf16.msra.mxu1 %v14071_v30  ;;  %v14128_v28 = vcombine.high %v1014_v21, %v1018_v22  ;;  %v1021_v30 = vld [vmem:[#allocation2 + $0x1380] sm:$0xff]  ;;  %v1062_v21 = vld [vmem:[#allocation2 + $0x14c8] sm:$0xff] }
 0x25c   :  { %7487 = vmatprep.subr.bf16.mxu0 %v14078_v31  ;;  %7856 = vmatprep.subr.bf16.mxu1 %v14080_v32  ;;  %v1025_v31 = vld [vmem:[#allocation2 + $0x13a0] sm:$0xff]  ;;  %v1022_v32 = vld [vmem:[#allocation2 + $0x1388] sm:$0xff] }
 0x25d   :  { %v14134_v37 = vcombine.high %v1021_v30, %v1025_v31  ;;  %v14133_v46 = vcombine.low %v1021_v30, %v1025_v31  ;;  %v14135_v47 = vcombine.low %v1022_v32, %v1026_v34  ;;  %v1066_v22 = vld [vmem:[#allocation2 + $0x14e8] sm:$0xff]  ;;  %v1069_v30 = vld [vmem:[#allocation2 + $0x1500] sm:$0xff] }
 0x25e   :  { %v1073_v31 = vld [vmem:[#allocation2 + $0x1520] sm:$0xff] }
 0x25f   :  { %7488 = vmatpush1.bf16.msra.mxu0 %v14077_v38  ;;  %7857 = vmatpush1.bf16.msra.mxu1 %v14079_v40  ;;  %v14136_v38 = vcombine.high %v1022_v32, %v1026_v34  ;;  %v1029_v40 = vld [vmem:[#allocation2 + $0x13c0] sm:$0xff]  ;;  %v1070_v32 = vld [vmem:[#allocation2 + $0x1508] sm:$0xff] }
 0x260   :  { %7489 = vmatprep.subr.bf16.mxu0 %v14086_v41  ;;  %7858 = vmatprep.subr.bf16.mxu1 %v14088_v57  ;;  %v1033_v41 = vld [vmem:[#allocation2 + $0x13e0] sm:$0xff]  ;;  %v319_v57 = vcombine.high %v17268_v10, %v17268_v10  ;;  %v14143_v10 = vcombine.low %v1030_v42, %v1034_v45  ;;  %v1074_v34 = vld [vmem:[#allocation2 + $0x1528] sm:$0xff] }
 0x261   :  { %v14141_v56 = vcombine.low %v1029_v40, %v1033_v41 }
 0x262   :  { %v17289_v52 = vrot.slane %v319_v57, %v17193_v53  ;;  %v1078_v57 = vld [vmem:[#allocation2 + $0x1548] sm:$0xff] }
 0x263   :  { %7490 = vmatpush1.bf16.msra.mxu0 %v14085_v48  ;;  %7859 = vmatpush1.bf16.msra.mxu1 %v14087_v49  ;;  %v14142_v48 = vcombine.high %v1029_v40, %v1033_v41  ;;  %v14144_v49 = vcombine.high %v1030_v42, %v1034_v45  ;;  %v1077_v40 = vld [vmem:[#allocation2 + $0x1540] sm:$0xff]  ;;  %v1082_v42 = vld [vmem:[#allocation2 + $0x1568] sm:$0xff]  ;;  %v14181_v45 = vcombine.low %v1069_v30, %v1073_v31 }
 0x264   :  { %7491 = vmatprep.subr.bf16.mxu0 %v14094_v50  ;;  %7860 = vmatprep.subr.bf16.mxu1 %v14096_v51  ;;  %v1037_v50 = vld [vmem:[#allocation2 + $0x1400] sm:$0xff]  ;;  %v335_v62 = vcombine.high %v17289_v52, %v17289_v52 }
 0x265   :  { %v1041_v51 = vld [vmem:[#allocation2 + $0x1420] sm:$0xff] }
 0x266   :  { %v17297_v12 = vpack.c.bf16 %v335_v62, %v335_v62  ;;  %v1081_v41 = vld [vmem:[#allocation2 + $0x1560] sm:$0xff]  ;;  %v1098_v62 = vld [vmem:[#allocation2 + $0x15e8] sm:$0xff] }
 0x267   :  { %7492 = vmatpush1.bf16.msra.mxu0 %v14093_v58  ;;  %7861 = vmatpush1.bf16.msra.mxu1 %v14095_v23  ;;  %v14150_v58 = vcombine.high %v1037_v50, %v1041_v51  ;;  %v14152_v23 = vcombine.high %v1038_v16, %v1042_v55 }
 0x268   :  { %7493 = vmatprep.subr.bf16.mxu0 %v14102_v60  ;;  %7862 = vmatprep.subr.bf16.mxu1 %v14104_v61  ;;  %v1045_v60 = vld [vmem:[#allocation2 + $0x1440] sm:$0xff] }
 0x269   :  { %v1049_v61 = vld [vmem:[#allocation2 + $0x1460] sm:$0xff] }
 0x26a   :  { %v14157_v19 = vcombine.low %v1045_v60, %v1049_v61 }
 0x26b   :  { %7494 = vmatpush1.bf16.msra.mxu0 %v14101_v3  ;;  %7863 = vmatpush1.bf16.msra.mxu1 %v14103_v5  ;;  %v14149_v3 = vcombine.low %v1037_v50, %v1041_v51  ;;  %v14151_v5 = vcombine.low %v1038_v16, %v1042_v55  ;;  %v1089_v50 = vld [vmem:[#allocation2 + $0x15a0] sm:$0xff]  ;;  %v1086_v51 = vld [vmem:[#allocation2 + $0x1588] sm:$0xff]  ;;  %v14189_v55 = vcombine.low %v1077_v40, %v1081_v41 }
 0x26c   :  { %7495 = vmatprep.subr.bf16.mxu0 %v14110_v6  ;;  %7864 = vmatprep.subr.bf16.mxu1 %v14112_v7  ;;  %v14158_v6 = vcombine.high %v1045_v60, %v1049_v61  ;;  %v14160_v7 = vcombine.high %v1046_v1, %v1050_v2  ;;  %v1090_v16 = vld [vmem:[#allocation2 + $0x15a8] sm:$0xff]  ;;  %v1097_v60 = vld [vmem:[#allocation2 + $0x15e0] sm:$0xff] }
 0x26d   :  { %v1094_v61 = vld [vmem:[#allocation2 + $0x15c8] sm:$0xff] }
 0x26f   :  { %7496 = vmatpush1.bf16.msra.mxu0 %v14109_v33  ;;  %7865 = vmatpush1.bf16.msra.mxu1 %v14111_v15  ;;  %v1058_v33 = vld [vmem:[#allocation2 + $0x14a8] sm:$0xff]  ;;  %v14159_v15 = vcombine.low %v1046_v1, %v1050_v2  ;;  %v14199_v2 = vcombine.low %v1086_v51, %v1090_v16 }
 0x270   :  { %7497 = vmatprep.subr.bf16.mxu0 %v14118_v17  ;;  %7866 = vmatprep.subr.bf16.mxu1 %v14120_v18  ;;  %v14166_v17 = vcombine.high %v1053_v8, %v1057_v11  ;;  %v14168_v18 = vcombine.high %v1054_v13, %v1058_v33 }
 0x273   :  { %7498 = vmatpush1.bf16.msra.mxu0 %v14117_v24  ;;  %7867 = vmatpush1.bf16.msra.mxu1 %v14119_v26  ;;  %v14165_v24 = vcombine.low %v1053_v8, %v1057_v11  ;;  %v14167_v26 = vcombine.low %v1054_v13, %v1058_v33  ;;  %v1102_v8 = vld [vmem:[#allocation2 + $0x1608] sm:$0xff]  ;;  %v14207_v33 = vcombine.low %v1094_v61, %v1098_v62 }
 0x274   :  { %7499 = vmatprep.subr.bf16.mxu0 %v14126_v27  ;;  %7868 = vmatprep.subr.bf16.mxu1 %v14128_v28  ;;  %v14174_v27 = vcombine.high %v1061_v59, %v1065_v20  ;;  %v14176_v28 = vcombine.high %v1062_v21, %v1066_v22  ;;  %v1106_v11 = vld [vmem:[#allocation2 + $0x1628] sm:$0xff] }
 0x277   :  { %7500 = vmatpush1.bf16.msra.mxu0 %v14125_v35  ;;  %7869 = vmatpush1.bf16.msra.mxu1 %v14127_v63  ;;  %v14173_v35 = vcombine.low %v1061_v59, %v1065_v20  ;;  %v14175_v63 = vcombine.low %v1062_v21, %v1066_v22  ;;  %v1110_v59 = vld [vmem:[#allocation2 + $0x1648] sm:$0xff]  ;;  %v14215_v22 = vcombine.low %v1102_v8, %v1106_v11 }
 0x278   :  { %7501 = vmatprep.subr.bf16.mxu0 %v14134_v37  ;;  %7870 = vmatprep.subr.bf16.mxu1 %v14136_v38  ;;  %v14182_v37 = vcombine.high %v1069_v30, %v1073_v31  ;;  %v14184_v38 = vcombine.high %v1070_v32, %v1074_v34  ;;  %v1114_v20 = vld [vmem:[#allocation2 + $0x1668] sm:$0xff] }
 0x279   :  { %v1118_v30 = vld [vmem:[#allocation2 + $0x1688] sm:$0xff] }
 0x27a   :  { %v1122_v31 = vld [vmem:[#allocation2 + $0x16a8] sm:$0xff] }
 0x27b   :  { %7502 = vmatpush1.bf16.msra.mxu0 %v14133_v46  ;;  %7871 = vmatpush1.bf16.msra.mxu1 %v14135_v47  ;;  %v14183_v46 = vcombine.low %v1070_v32, %v1074_v34  ;;  %v14190_v47 = vcombine.high %v1077_v40, %v1081_v41  ;;  %v14223_v34 = vcombine.low %v1110_v59, %v1114_v20  ;;  %v1126_v40 = vld [vmem:[#allocation2 + $0x16c8] sm:$0xff] }
 0x27c   :  { %7503 = vmatprep.subr.bf16.mxu0 %v14142_v48  ;;  %7872 = vmatprep.subr.bf16.mxu1 %v14144_v49  ;;  %v14192_v48 = vcombine.high %v1078_v57, %v1082_v42  ;;  %v1085_v49 = vld [vmem:[#allocation2 + $0x1580] sm:$0xff]  ;;  %v1130_v41 = vld [vmem:[#allocation2 + $0x16e8] sm:$0xff] }
 0x27d   :  { %v14197_v1 = vcombine.low %v1085_v49, %v1089_v50 }
 0x27f   :  { %7504 = vmatpush1.bf16.msra.mxu0 %v14141_v56  ;;  %7873 = vmatpush1.bf16.msra.mxu1 %v14143_v10  ;;  %v14191_v56 = vcombine.low %v1078_v57, %v1082_v42  ;;  %v14198_v10 = vcombine.high %v1085_v49, %v1089_v50  ;;  %v14231_v42 = vcombine.low %v1118_v30, %v1122_v31  ;;  %v1134_v49 = vld [vmem:[#allocation2 + $0x1708] sm:$0xff] }
 0x280   :  { %7514 = vmatprep.subr.bf16.mxu0 %v14150_v58  ;;  %7883 = vmatprep.subr.bf16.mxu1 %v14152_v23  ;;  %v14200_v58 = vcombine.high %v1086_v51, %v1090_v16  ;;  %v1093_v23 = vld [vmem:[#allocation2 + $0x15c0] sm:$0xff]  ;;  %v1138_v50 = vld [vmem:[#allocation2 + $0x1728] sm:$0xff]  ;;  %v14239_v16 = vcombine.low %v1126_v40, %v1130_v41 }
 0x281   :  { %v14205_v13 = vcombine.low %v1093_v23, %v1097_v60 }
 0x282   :  { %7506 = vmatmul.mubr.bf16.vlgmr.msra.gmra.mrb[0].mxu0 %v17295_v0  ;;  %7875 = vmatmul.mubr.bf16.vlgmr.msra.gmra.mrb[0].mxu1 %v17295_v0 }
 0x283   :  { %7515 = vmatpush1.bf16.msra.mxu0 %v14149_v3  ;;  %7884 = vmatpush1.bf16.msra.mxu1 %v14151_v5  ;;  %v14206_v3 = vcombine.high %v1093_v23, %v1097_v60  ;;  %v14208_v5 = vcombine.high %v1094_v61, %v1098_v62  ;;  %v1142_v23 = vld [vmem:[#allocation2 + $0x1748] sm:$0xff]  ;;  %v14247_v62 = vcombine.low %v1134_v49, %v1138_v50 }
 0x284   :  { %7516 = vmatprep.subr.bf16.mxu0 %v14158_v6  ;;  %7885 = vmatprep.subr.bf16.mxu1 %v14160_v7  ;;  %v1101_v6 = vld [vmem:[#allocation2 + $0x1600] sm:$0xff]  ;;  %v1146_v60 = vld [vmem:[#allocation2 + $0x1768] sm:$0xff] }
 0x285   :  { %7546 = vmatprep.mubr.bf16.mxu0 %v17297_v12  ;;  %7915 = vmatprep.mubr.bf16.mxu1 %v17297_v12  ;;  %v1105_v7 = vld [vmem:[#allocation2 + $0x1620] sm:$0xff] }
 0x286   :  { %v14213_v21 = vcombine.low %v1101_v6, %v1105_v7 }
 0x287   :  { %7517 = vmatpush1.bf16.msra.mxu0 %v14157_v19  ;;  %7886 = vmatpush1.bf16.msra.mxu1 %v14159_v15  ;;  %v14214_v19 = vcombine.high %v1101_v6, %v1105_v7  ;;  %v14216_v15 = vcombine.high %v1102_v8, %v1106_v11  ;;  %v1150_v6 = vld [vmem:[#allocation2 + $0x1788] sm:$0xff]  ;;  %v14255_v11 = vcombine.low %v1142_v23, %v1146_v60 }
 0x288   :  { %7518 = vmatprep.subr.bf16.mxu0 %v14166_v17  ;;  %7887 = vmatprep.subr.bf16.mxu1 %v14168_v18  ;;  %v1109_v17 = vld [vmem:[#allocation2 + $0x1640] sm:$0xff]  ;;  %v1154_v7 = vld [vmem:[#allocation2 + $0x17a8] sm:$0xff] }
 0x289   :  { %v1113_v18 = vld [vmem:[#allocation2 + $0x1660] sm:$0xff] }
 0x28a   :  { %v14221_v32 = vcombine.low %v1109_v17, %v1113_v18 }
 0x28b   :  { %7519 = vmatpush1.bf16.msra.mxu0 %v14165_v24  ;;  %7888 = vmatpush1.bf16.msra.mxu1 %v14167_v26  ;;  %v14222_v24 = vcombine.high %v1109_v17, %v1113_v18  ;;  %v14224_v26 = vcombine.high %v1110_v59, %v1114_v20  ;;  %v1158_v17 = vld [vmem:[#allocation2 + $0x17c8] sm:$0xff]  ;;  %v17306_v59 = vld [vmem:[%s18411_s14 + $0x18] sm:$0xff] }
 0x28c   :  { %7520 = vmatprep.subr.bf16.mxu0 %v14174_v27  ;;  %7889 = vmatprep.subr.bf16.mxu1 %v14176_v28  ;;  %v1117_v27 = vld [vmem:[#allocation2 + $0x1680] sm:$0xff]  ;;  %v1162_v18 = vld [vmem:[#allocation2 + $0x17e8] sm:$0xff] }
 0x28d   :  { %v1121_v28 = vld [vmem:[#allocation2 + $0x16a0] sm:$0xff] }
 0x28e   :  { %v14229_v57 = vcombine.low %v1117_v27, %v1121_v28 }
 0x28f   :  { %7521 = vmatpush1.bf16.msra.mxu0 %v14173_v35  ;;  %7890 = vmatpush1.bf16.msra.mxu1 %v14175_v63  ;;  %v14230_v35 = vcombine.high %v1117_v27, %v1121_v28  ;;  %v14232_v63 = vcombine.high %v1118_v30, %v1122_v31  ;;  %v1169_v27 = vld [vmem:[#allocation2 + $0x1820] sm:$0xff]  ;;  %v17310_v28 = vrot.slane %v17306_v59, %v17193_v53  ;;  %v1166_v30 = vld [vmem:[#allocation2 + $0x1808] sm:$0xff] }
 0x290   :  { %7522 = vmatprep.subr.bf16.mxu0 %v14182_v37  ;;  %7891 = vmatprep.subr.bf16.mxu1 %v14184_v38  ;;  %v1125_v37 = vld [vmem:[#allocation2 + $0x16c0] sm:$0xff]  ;;  %v1170_v31 = vld [vmem:[#allocation2 + $0x1828] sm:$0xff] }
 0x291   :  { %v1129_v38 = vld [vmem:[#allocation2 + $0x16e0] sm:$0xff] }
 0x292   :  { %v14237_v51 = vcombine.low %v1125_v37, %v1129_v38 }
 0x293   :  { %7523 = vmatpush1.bf16.msra.mxu0 %v14181_v45  ;;  %7892 = vmatpush1.bf16.msra.mxu1 %v14183_v46  ;;  %v14238_v45 = vcombine.high %v1125_v37, %v1129_v38  ;;  %v14240_v46 = vcombine.high %v1126_v40, %v1130_v41  ;;  %v1173_v37 = vld [vmem:[#allocation2 + $0x1840] sm:$0xff]  ;;  %v351_v40 = vcombine.high %v17310_v28, %v17310_v28 }
 0x294   :  { %7524 = vmatprep.subr.bf16.mxu0 %v14190_v47  ;;  %7893 = vmatprep.subr.bf16.mxu1 %v14192_v48  ;;  %v1133_v47 = vld [vmem:[#allocation2 + $0x1700] sm:$0xff]  ;;  %v17316_v41 = vpack.c.bf16 %v17289_v52, %v17289_v52 }
 0x295   :  { %v1137_v48 = vld [vmem:[#allocation2 + $0x1720] sm:$0xff] }
 0x296   :  { %v14245_v61 = vcombine.low %v1133_v47, %v1137_v48  ;;  %v1177_v38 = vld [vmem:[#allocation2 + $0x1860] sm:$0xff] }
 0x297   :  { %7525 = vmatpush1.bf16.msra.mxu0 %v14189_v55  ;;  %7894 = vmatpush1.bf16.msra.mxu1 %v14191_v56  ;;  %v14246_v55 = vcombine.high %v1133_v47, %v1137_v48  ;;  %v14248_v56 = vcombine.high %v1134_v49, %v1138_v50  ;;  %v14286_v47 = vcombine.high %v1173_v37, %v1177_v38  ;;  %v1181_v49 = vld [vmem:[#allocation2 + $0x1880] sm:$0xff] }
 0x298   :  { %7526 = vmatprep.subr.bf16.mxu0 %v14198_v10  ;;  %7895 = vmatprep.subr.bf16.mxu1 %v14200_v58  ;;  %v1141_v10 = vld [vmem:[#allocation2 + $0x1740] sm:$0xff]  ;;  %v14285_v52 = vcombine.low %v1173_v37, %v1177_v38 }
 0x299   :  { %v1145_v58 = vld [vmem:[#allocation2 + $0x1760] sm:$0xff] }
 0x29a   :  { %v14253_v8 = vcombine.low %v1141_v10, %v1145_v58  ;;  %v1185_v50 = vld [vmem:[#allocation2 + $0x18a0] sm:$0xff] }
 0x29b   :  { %7527 = vmatpush1.bf16.msra.mxu0 %v14197_v1  ;;  %7896 = vmatpush1.bf16.msra.mxu1 %v14199_v2  ;;  %v14254_v1 = vcombine.high %v1141_v10, %v1145_v58  ;;  %v14256_v2 = vcombine.high %v1142_v23, %v1146_v60  ;;  %v14294_v10 = vcombine.high %v1181_v49, %v1185_v50  ;;  %v1189_v23 = vld [vmem:[#allocation2 + $0x18c0] sm:$0xff] }
 0x29c   :  { %7528 = vmatprep.subr.bf16.mxu0 %v14206_v3  ;;  %7897 = vmatprep.subr.bf16.mxu1 %v14208_v5  ;;  %v1149_v3 = vld [vmem:[#allocation2 + $0x1780] sm:$0xff] }
 0x29d   :  { %v1153_v5 = vld [vmem:[#allocation2 + $0x17a0] sm:$0xff] }
 0x29e   :  { %v14261_v20 = vcombine.low %v1149_v3, %v1153_v5  ;;  %v1193_v60 = vld [vmem:[#allocation2 + $0x18e0] sm:$0xff] }
 0x29f   :  { %7529 = vmatpush1.bf16.msra.mxu0 %v14205_v13  ;;  %7898 = vmatpush1.bf16.msra.mxu1 %v14207_v33  ;;  %v14262_v13 = vcombine.high %v1149_v3, %v1153_v5  ;;  %v14264_v33 = vcombine.high %v1150_v6, %v1154_v7  ;;  %v14302_v3 = vcombine.high %v1189_v23, %v1193_v60 }
 0x2a0   :  { %7530 = vmatprep.subr.bf16.mxu0 %v14214_v19  ;;  %7899 = vmatprep.subr.bf16.mxu1 %v14216_v15  ;;  %v1157_v19 = vld [vmem:[#allocation2 + $0x17c0] sm:$0xff] }
 0x2a1   :  { %v1161_v15 = vld [vmem:[#allocation2 + $0x17e0] sm:$0xff] }
 0x2a3   :  { %7531 = vmatpush1.bf16.msra.mxu0 %v14213_v21  ;;  %7900 = vmatpush1.bf16.msra.mxu1 %v14215_v22  ;;  %v14263_v21 = vcombine.low %v1150_v6, %v1154_v7  ;;  %v14270_v22 = vcombine.high %v1157_v19, %v1161_v15  ;;  %v1197_v6 = vld [vmem:[#allocation2 + $0x1900] sm:$0xff] }
 0x2a4   :  { %7532 = vmatprep.subr.bf16.mxu0 %v14222_v24  ;;  %7901 = vmatprep.subr.bf16.mxu1 %v14224_v26  ;;  %v14272_v24 = vcombine.high %v1158_v17, %v1162_v18  ;;  %v1165_v26 = vld [vmem:[#allocation2 + $0x1800] sm:$0xff] }
 0x2a5   :  { %v1201_v7 = vld [vmem:[#allocation2 + $0x1920] sm:$0xff] }
 0x2a7   :  { %7533 = vmatpush1.bf16.msra.mxu0 %v14221_v32  ;;  %7902 = vmatpush1.bf16.msra.mxu1 %v14223_v34  ;;  %v14269_v32 = vcombine.low %v1157_v19, %v1161_v15  ;;  %v14271_v34 = vcombine.low %v1158_v17, %v1162_v18  ;;  %v14310_v19 = vcombine.high %v1197_v6, %v1201_v7  ;;  %v1205_v17 = vld [vmem:[#allocation2 + $0x1940] sm:$0xff] }
 0x2a8   :  { %7534 = vmatprep.subr.bf16.mxu0 %v14230_v35  ;;  %7903 = vmatprep.subr.bf16.mxu1 %v14232_v63  ;;  %v14278_v35 = vcombine.high %v1165_v26, %v1169_v27  ;;  %v14280_v63 = vcombine.high %v1166_v30, %v1170_v31  ;;  %v1209_v18 = vld [vmem:[#allocation2 + $0x1960] sm:$0xff] }
 0x2ab   :  { %7535 = vmatpush1.bf16.msra.mxu0 %v14229_v57  ;;  %7904 = vmatpush1.bf16.msra.mxu1 %v14231_v42  ;;  %v1174_v57 = vld [vmem:[#allocation2 + $0x1848] sm:$0xff] }
 0x2ac   :  { %7536 = vmatprep.subr.bf16.mxu0 %v14238_v45  ;;  %7905 = vmatprep.subr.bf16.mxu1 %v14240_v46  ;;  %v1178_v42 = vld [vmem:[#allocation2 + $0x1868] sm:$0xff]  ;;  %v14277_v45 = vcombine.low %v1165_v26, %v1169_v27  ;;  %v14279_v46 = vcombine.low %v1166_v30, %v1170_v31  ;;  %v14318_v26 = vcombine.high %v1205_v17, %v1209_v18  ;;  %v1213_v30 = vld [vmem:[#allocation2 + $0x1980] sm:$0xff] }
 0x2ad   :  { %v14288_v48 = vcombine.high %v1174_v57, %v1178_v42  ;;  %v1217_v31 = vld [vmem:[#allocation2 + $0x19a0] sm:$0xff] }
 0x2ae   :  { %v14326_v37 = vcombine.high %v1213_v30, %v1217_v31 }
 0x2af   :  { %7537 = vmatpush1.bf16.msra.mxu0 %v14237_v51  ;;  %7906 = vmatpush1.bf16.msra.mxu1 %v14239_v16  ;;  %v17318_v51 = vpack.c.bf16 %v351_v40, %v351_v40  ;;  %v1182_v16 = vld [vmem:[#allocation2 + $0x1888] sm:$0xff]  ;;  %v1221_v40 = vld [vmem:[#allocation2 + $0x19c0] sm:$0xff] }
 0x2b0   :  { %7538 = vmatprep.subr.bf16.mxu0 %v14246_v55  ;;  %7907 = vmatprep.subr.bf16.mxu1 %v14248_v56  ;;  %v1186_v55 = vld [vmem:[#allocation2 + $0x18a8] sm:$0xff]  ;;  %v14287_v56 = vcombine.low %v1174_v57, %v1178_v42  ;;  %v1225_v57 = vld [vmem:[#allocation2 + $0x19e0] sm:$0xff] }
 0x2b1   :  { %v14296_v58 = vcombine.high %v1182_v16, %v1186_v55  ;;  %v1222_v42 = vld [vmem:[#allocation2 + $0x19c8] sm:$0xff] }
 0x2b3   :  { %7539 = vmatpush1.bf16.msra.mxu0 %v14245_v61  ;;  %7908 = vmatpush1.bf16.msra.mxu1 %v14247_v62  ;;  %v1190_v61 = vld [vmem:[#allocation2 + $0x18c8] sm:$0xff] }
 0x2b4   :  { %7540 = vmatprep.subr.bf16.mxu0 %v14254_v1  ;;  %7909 = vmatprep.subr.bf16.mxu1 %v14256_v2  ;;  %v1194_v62 = vld [vmem:[#allocation2 + $0x18e8] sm:$0xff]  ;;  %v14293_v1 = vcombine.low %v1181_v49, %v1185_v50  ;;  %v14295_v2 = vcombine.low %v1182_v16, %v1186_v55  ;;  %v1229_v50 = vld [vmem:[#allocation2 + $0x1a00] sm:$0xff] }
 0x2b5   :  { %v14304_v5 = vcombine.high %v1190_v61, %v1194_v62  ;;  %v1233_v16 = vld [vmem:[#allocation2 + $0x1a20] sm:$0xff]  ;;  %v1230_v55 = vld [vmem:[#allocation2 + $0x1a08] sm:$0xff] }
 0x2b7   :  { %7541 = vmatpush1.bf16.msra.mxu0 %v14253_v8  ;;  %7910 = vmatpush1.bf16.msra.mxu1 %v14255_v11  ;;  %v1198_v8 = vld [vmem:[#allocation2 + $0x1908] sm:$0xff] }
 0x2b8   :  { %7542 = vmatprep.subr.bf16.mxu0 %v14262_v13  ;;  %7911 = vmatprep.subr.bf16.mxu1 %v14264_v33  ;;  %v1202_v11 = vld [vmem:[#allocation2 + $0x1928] sm:$0xff]  ;;  %v14301_v13 = vcombine.low %v1189_v23, %v1193_v60  ;;  %v14303_v33 = vcombine.low %v1190_v61, %v1194_v62  ;;  %v1237_v60 = vld [vmem:[#allocation2 + $0x1a40] sm:$0xff] }
 0x2b9   :  { %v14312_v15 = vcombine.high %v1198_v8, %v1202_v11  ;;  %v1241_v61 = vld [vmem:[#allocation2 + $0x1a60] sm:$0xff]  ;;  %v1238_v62 = vld [vmem:[#allocation2 + $0x1a48] sm:$0xff] }
 0x2bb   :  { %7543 = vmatpush1.bf16.msra.mxu0 %v14261_v20  ;;  %7912 = vmatpush1.bf16.msra.mxu1 %v14263_v21  ;;  %v1206_v20 = vld [vmem:[#allocation2 + $0x1948] sm:$0xff] }
 0x2bc   :  { %7544 = vmatprep.subr.bf16.mxu0 %v14270_v22  ;;  %7913 = vmatprep.subr.bf16.mxu1 %v14272_v24  ;;  %v1210_v21 = vld [vmem:[#allocation2 + $0x1968] sm:$0xff]  ;;  %v14309_v22 = vcombine.low %v1197_v6, %v1201_v7  ;;  %v14311_v24 = vcombine.low %v1198_v8, %v1202_v11  ;;  %v1245_v7 = vld [vmem:[#allocation2 + $0x1a80] sm:$0xff] }
 0x2bd   :  { %v14320_v27 = vcombine.high %v1206_v20, %v1210_v21  ;;  %v1249_v8 = vld [vmem:[#allocation2 + $0x1aa0] sm:$0xff]  ;;  %v1246_v11 = vld [vmem:[#allocation2 + $0x1a88] sm:$0xff] }
 0x2bf   :  { %7545 = vmatpush1.bf16.msra.mxu0 %v14269_v32  ;;  %7914 = vmatpush1.bf16.msra.mxu1 %v14271_v34  ;;  %v1214_v32 = vld [vmem:[#allocation2 + $0x1988] sm:$0xff] }
 0x2c0   :  { %7555 = vmatprep.subr.bf16.mxu0 %v14278_v35  ;;  %7924 = vmatprep.subr.bf16.mxu1 %v14280_v63  ;;  %v1218_v34 = vld [vmem:[#allocation2 + $0x19a8] sm:$0xff]  ;;  %v14317_v35 = vcombine.low %v1205_v17, %v1209_v18  ;;  %v14319_v63 = vcombine.low %v1206_v20, %v1210_v21  ;;  %v1253_v18 = vld [vmem:[#allocation2 + $0x1ac0] sm:$0xff] }
 0x2c1   :  { %v14328_v38 = vcombine.high %v1214_v32, %v1218_v34  ;;  %v1257_v20 = vld [vmem:[#allocation2 + $0x1ae0] sm:$0xff]  ;;  %v1254_v21 = vld [vmem:[#allocation2 + $0x1ac8] sm:$0xff] }
 0x2c2   :  { %7547 = vmatmul.mubr.bf16.vlgmr.msra.gmra.mrb[0].mxu0 %v17316_v41  ;;  %7916 = vmatmul.mubr.bf16.vlgmr.msra.gmra.mrb[0].mxu1 %v17316_v41 }
 0x2c3   :  { %7556 = vmatpush1.bf16.msra.mxu0 %v14277_v45  ;;  %7925 = vmatpush1.bf16.msra.mxu1 %v14279_v46  ;;  %v1226_v45 = vld [vmem:[#allocation2 + $0x19e8] sm:$0xff]  ;;  %v14325_v46 = vcombine.low %v1213_v30, %v1217_v31  ;;  %v1261_v31 = vld [vmem:[#allocation2 + $0x1b00] sm:$0xff] }
 0x2c4   :  { %7557 = vmatprep.subr.bf16.mxu0 %v14286_v47  ;;  %7926 = vmatprep.subr.bf16.mxu1 %v14288_v48  ;;  %v14327_v47 = vcombine.low %v1214_v32, %v1218_v34  ;;  %v14334_v48 = vcombine.high %v1221_v40, %v1225_v57  ;;  %v14336_v49 = vcombine.high %v1222_v42, %v1226_v45  ;;  %v1265_v32 = vld [vmem:[#allocation2 + $0x1b20] sm:$0xff]  ;;  %v1262_v34 = vld [vmem:[#allocation2 + $0x1b08] sm:$0xff] }
 0x2c5   :  { %7587 = vmatprep.mubr.bf16.mxu0 %v17318_v51  ;;  %7956 = vmatprep.mubr.bf16.mxu1 %v17318_v51 }
 0x2c7   :  { %7558 = vmatpush1.bf16.msra.mxu0 %v14285_v52  ;;  %7927 = vmatpush1.bf16.msra.mxu1 %v14287_v56  ;;  %v1234_v52 = vld [vmem:[#allocation2 + $0x1a28] sm:$0xff]  ;;  %v14333_v56 = vcombine.low %v1221_v40, %v1225_v57  ;;  %v1269_v57 = vld [vmem:[#allocation2 + $0x1b40] sm:$0xff] }
 0x2c8   :  { %7559 = vmatprep.subr.bf16.mxu0 %v14294_v10  ;;  %7928 = vmatprep.subr.bf16.mxu1 %v14296_v58  ;;  %v14335_v10 = vcombine.low %v1222_v42, %v1226_v45  ;;  %v14342_v58 = vcombine.high %v1229_v50, %v1233_v16  ;;  %v14344_v23 = vcombine.high %v1230_v55, %v1234_v52  ;;  %v1273_v42 = vld [vmem:[#allocation2 + $0x1b60] sm:$0xff]  ;;  %v1270_v45 = vld [vmem:[#allocation2 + $0x1b48] sm:$0xff] }
 0x2cb   :  { %7560 = vmatpush1.bf16.msra.mxu0 %v14293_v1  ;;  %7929 = vmatpush1.bf16.msra.mxu1 %v14295_v2  ;;  %v1242_v1 = vld [vmem:[#allocation2 + $0x1a68] sm:$0xff]  ;;  %v14341_v2 = vcombine.low %v1229_v50, %v1233_v16  ;;  %v1277_v16 = vld [vmem:[#allocation2 + $0x1b80] sm:$0xff] }
 0x2cc   :  { %7561 = vmatprep.subr.bf16.mxu0 %v14302_v3  ;;  %7930 = vmatprep.subr.bf16.mxu1 %v14304_v5  ;;  %v14343_v3 = vcombine.low %v1230_v55, %v1234_v52  ;;  %v14350_v5 = vcombine.high %v1237_v60, %v1241_v61  ;;  %v14352_v6 = vcombine.high %v1238_v62, %v1242_v1  ;;  %v1281_v55 = vld [vmem:[#allocation2 + $0x1ba0] sm:$0xff]  ;;  %v1278_v52 = vld [vmem:[#allocation2 + $0x1b88] sm:$0xff] }
 0x2cf   :  { %7562 = vmatpush1.bf16.msra.mxu0 %v14301_v13  ;;  %7931 = vmatpush1.bf16.msra.mxu1 %v14303_v33  ;;  %v1250_v13 = vld [vmem:[#allocation2 + $0x1aa8] sm:$0xff]  ;;  %v14349_v33 = vcombine.low %v1237_v60, %v1241_v61  ;;  %v1285_v61 = vld [vmem:[#allocation2 + $0x1bc0] sm:$0xff] }
 0x2d0   :  { %7563 = vmatprep.subr.bf16.mxu0 %v14310_v19  ;;  %7932 = vmatprep.subr.bf16.mxu1 %v14312_v15  ;;  %v14351_v19 = vcombine.low %v1238_v62, %v1242_v1  ;;  %v14358_v15 = vcombine.high %v1245_v7, %v1249_v8  ;;  %v14360_v17 = vcombine.high %v1246_v11, %v1250_v13  ;;  %v1289_v62 = vld [vmem:[#allocation2 + $0x1be0] sm:$0xff] }
 0x2d1   :  { %v336_v1 = vcombine.high %v17306_v59, %v17306_v59 }
 0x2d3   :  { %7564 = vmatpush1.bf16.msra.mxu0 %v14309_v22  ;;  %7933 = vmatpush1.bf16.msra.mxu1 %v14311_v24  ;;  %v1258_v22 = vld [vmem:[#allocation2 + $0x1ae8] sm:$0xff]  ;;  %v14357_v24 = vcombine.low %v1245_v7, %v1249_v8  ;;  %v14398_v7 = vcombine.high %v1285_v61, %v1289_v62 }
 0x2d4   :  { %7565 = vmatprep.subr.bf16.mxu0 %v14318_v26  ;;  %7934 = vmatprep.subr.bf16.mxu1 %v14320_v27  ;;  %v14359_v26 = vcombine.low %v1246_v11, %v1250_v13  ;;  %v14366_v27 = vcombine.high %v1253_v18, %v1257_v20  ;;  %v14368_v30 = vcombine.high %v1254_v21, %v1258_v22  ;;  %v1293_v11 = vld [vmem:[#allocation2 + $0x1c00] sm:$0xff] }
 0x2d5   :  { %v1297_v13 = vld [vmem:[#allocation2 + $0x1c20] sm:$0xff] }
 0x2d7   :  { %7566 = vmatpush1.bf16.msra.mxu0 %v14317_v35  ;;  %7935 = vmatpush1.bf16.msra.mxu1 %v14319_v63  ;;  %v1266_v35 = vld [vmem:[#allocation2 + $0x1b28] sm:$0xff]  ;;  %v14365_v63 = vcombine.low %v1253_v18, %v1257_v20  ;;  %v14406_v18 = vcombine.high %v1293_v11, %v1297_v13 }
 0x2d8   :  { %7567 = vmatprep.subr.bf16.mxu0 %v14326_v37  ;;  %7936 = vmatprep.subr.bf16.mxu1 %v14328_v38  ;;  %v14367_v37 = vcombine.low %v1254_v21, %v1258_v22  ;;  %v14374_v38 = vcombine.high %v1261_v31, %v1265_v32  ;;  %v14376_v40 = vcombine.high %v1262_v34, %v1266_v35  ;;  %v1301_v21 = vld [vmem:[#allocation2 + $0x1c40] sm:$0xff] }
 0x2d9   :  { %v1305_v22 = vld [vmem:[#allocation2 + $0x1c60] sm:$0xff] }
 0x2db   :  { %7568 = vmatpush1.bf16.msra.mxu0 %v14325_v46  ;;  %7937 = vmatpush1.bf16.msra.mxu1 %v14327_v47  ;;  %v1274_v46 = vld [vmem:[#allocation2 + $0x1b68] sm:$0xff]  ;;  %v14373_v47 = vcombine.low %v1261_v31, %v1265_v32  ;;  %v14414_v32 = vcombine.high %v1301_v21, %v1305_v22 }
 0x2dc   :  { %7569 = vmatprep.subr.bf16.mxu0 %v14334_v48  ;;  %7938 = vmatprep.subr.bf16.mxu1 %v14336_v49  ;;  %v14375_v48 = vcombine.low %v1262_v34, %v1266_v35  ;;  %v14382_v49 = vcombine.high %v1269_v57, %v1273_v42  ;;  %v14384_v50 = vcombine.high %v1270_v45, %v1274_v46  ;;  %v1309_v35 = vld [vmem:[#allocation2 + $0x1c80] sm:$0xff] }
 0x2df   :  { %7570 = vmatpush1.bf16.msra.mxu0 %v14333_v56  ;;  %7939 = vmatpush1.bf16.msra.mxu1 %v14335_v10  ;;  %v1282_v56 = vld [vmem:[#allocation2 + $0x1ba8] sm:$0xff]  ;;  %v14381_v10 = vcombine.low %v1269_v57, %v1273_v42 }
 0x2e0   :  { %7571 = vmatprep.subr.bf16.mxu0 %v14342_v58  ;;  %7940 = vmatprep.subr.bf16.mxu1 %v14344_v23  ;;  %v14383_v58 = vcombine.low %v1270_v45, %v1274_v46  ;;  %v14390_v23 = vcombine.high %v1277_v16, %v1281_v55  ;;  %v14392_v60 = vcombine.high %v1278_v52, %v1282_v56  ;;  %v1317_v46 = vld [vmem:[#allocation2 + $0x1cc0] sm:$0xff] }
 0x2e3   :  { %7572 = vmatpush1.bf16.msra.mxu0 %v14341_v2  ;;  %7941 = vmatpush1.bf16.msra.mxu1 %v14343_v3  ;;  %v1286_v2 = vld [vmem:[#allocation2 + $0x1bc8] sm:$0xff] }
 0x2e4   :  { %7573 = vmatprep.subr.bf16.mxu0 %v14350_v5  ;;  %7942 = vmatprep.subr.bf16.mxu1 %v14352_v6  ;;  %v1290_v3 = vld [vmem:[#allocation2 + $0x1be8] sm:$0xff]  ;;  %v14389_v5 = vcombine.low %v1277_v16, %v1281_v55  ;;  %v14391_v6 = vcombine.low %v1278_v52, %v1282_v56  ;;  %v1325_v56 = vld [vmem:[#allocation2 + $0x1d00] sm:$0xff] }
 0x2e5   :  { %v14400_v8 = vcombine.high %v1286_v2, %v1290_v3  ;;  %v14399_v59 = vcombine.low %v1286_v2, %v1290_v3  ;;  %v1333_v2 = vld [vmem:[#allocation2 + $0x1d40] sm:$0xff] }
 0x2e6   :  { %v1337_v3 = vld [vmem:[#allocation2 + $0x1d60] sm:$0xff] }
 0x2e7   :  { %7574 = vmatpush1.bf16.msra.mxu0 %v14349_v33  ;;  %7943 = vmatpush1.bf16.msra.mxu1 %v14351_v19  ;;  %v17327_v33 = vrot.slane %v336_v1, %v17193_v53  ;;  %v1294_v19 = vld [vmem:[#allocation2 + $0x1c08] sm:$0xff] }
 0x2e8   :  { %7575 = vmatprep.subr.bf16.mxu0 %v14358_v15  ;;  %7944 = vmatprep.subr.bf16.mxu1 %v14360_v17  ;;  %v1298_v15 = vld [vmem:[#allocation2 + $0x1c28] sm:$0xff]  ;;  %v14397_v17 = vcombine.low %v1285_v61, %v1289_v62 }
 0x2e9   :  { %v14408_v20 = vcombine.high %v1294_v19, %v1298_v15  ;;  %v1302_v53 = vld [vmem:[#allocation2 + $0x1c48] sm:$0xff]  ;;  %v14407_v31 = vcombine.low %v1294_v19, %v1298_v15  ;;  %v1341_v19 = vld [vmem:[#allocation2 + $0x1d80] sm:$0xff] }
 0x2ea   :  { %v1345_v15 = vld [vmem:[#allocation2 + $0x1da0] sm:$0xff] }
 0x2eb   :  { %7576 = vmatpush1.bf16.msra.mxu0 %v14357_v24  ;;  %7945 = vmatpush1.bf16.msra.mxu1 %v14359_v26  ;;  %v352_v24 = vcombine.high %v17327_v33, %v17327_v33  ;;  %v17333_v26 = vpack.c.bf16 %v17310_v28, %v17310_v28  ;;  %v14413_v28 = vcombine.low %v1301_v21, %v1305_v22 }
 0x2ec   :  { %7577 = vmatprep.subr.bf16.mxu0 %v14366_v27  ;;  %7946 = vmatprep.subr.bf16.mxu1 %v14368_v30  ;;  %v1306_v27 = vld [vmem:[#allocation2 + $0x1c68] sm:$0xff]  ;;  %v14405_v30 = vcombine.low %v1293_v11, %v1297_v13  ;;  %v14446_v11 = vcombine.high %v1333_v2, %v1337_v3  ;;  %v14454_v21 = vcombine.high %v1341_v19, %v1345_v15 }
 0x2ed   :  { %v14416_v34 = vcombine.high %v1302_v53, %v1306_v27  ;;  %v14415_v57 = vcombine.low %v1302_v53, %v1306_v27  ;;  %v1353_v53 = vld [vmem:[#allocation2 + $0x1de0] sm:$0xff]  ;;  %v1350_v27 = vld [vmem:[#allocation2 + $0x1dc8] sm:$0xff] }
 0x2ef   :  { %7578 = vmatpush1.bf16.msra.mxu0 %v14365_v63  ;;  %7947 = vmatpush1.bf16.msra.mxu1 %v14367_v37  ;;  %v1313_v63 = vld [vmem:[#allocation2 + $0x1ca0] sm:$0xff]  ;;  %v17335_v37 = vpack.c.bf16 %v352_v24, %v352_v24 }
 0x2f0   :  { %7579 = vmatprep.subr.bf16.mxu0 %v14374_v38  ;;  %7948 = vmatprep.subr.bf16.mxu1 %v14376_v40  ;;  %v1310_v38 = vld [vmem:[#allocation2 + $0x1c88] sm:$0xff]  ;;  %v14422_v42 = vcombine.high %v1309_v35, %v1313_v63  ;;  %v1349_v24 = vld [vmem:[#allocation2 + $0x1dc0] sm:$0xff] }
 0x2f1   :  { %v1314_v40 = vld [vmem:[#allocation2 + $0x1ca8] sm:$0xff] }
 0x2f2   :  { %v14424_v45 = vcombine.high %v1310_v38, %v1314_v40  ;;  %v14423_v16 = vcombine.low %v1310_v38, %v1314_v40  ;;  %v1361_v38 = vld [vmem:[#allocation2 + $0x1e20] sm:$0xff]  ;;  %v1358_v40 = vld [vmem:[#allocation2 + $0x1e08] sm:$0xff] }
 0x2f3   :  { %7580 = vmatpush1.bf16.msra.mxu0 %v14373_v47  ;;  %7949 = vmatpush1.bf16.msra.mxu1 %v14375_v48  ;;  %v1321_v47 = vld [vmem:[#allocation2 + $0x1ce0] sm:$0xff]  ;;  %v1318_v48 = vld [vmem:[#allocation2 + $0x1cc8] sm:$0xff] }
 0x2f4   :  { %7581 = vmatprep.subr.bf16.mxu0 %v14382_v49  ;;  %7950 = vmatprep.subr.bf16.mxu1 %v14384_v50  ;;  %v1322_v49 = vld [vmem:[#allocation2 + $0x1ce8] sm:$0xff]  ;;  %v14421_v50 = vcombine.low %v1309_v35, %v1313_v63  ;;  %v14430_v55 = vcombine.high %v1317_v46, %v1321_v47  ;;  %v1357_v63 = vld [vmem:[#allocation2 + $0x1e00] sm:$0xff] }
 0x2f5   :  { %v14432_v52 = vcombine.high %v1318_v48, %v1322_v49  ;;  %v14431_v61 = vcombine.low %v1318_v48, %v1322_v49  ;;  %v1369_v48 = vld [vmem:[#allocation2 + $0x1e60] sm:$0xff]  ;;  %v1366_v49 = vld [vmem:[#allocation2 + $0x1e48] sm:$0xff] }
 0x2f7   :  { %7582 = vmatpush1.bf16.msra.mxu0 %v14381_v10  ;;  %7951 = vmatpush1.bf16.msra.mxu1 %v14383_v58  ;;  %v1329_v10 = vld [vmem:[#allocation2 + $0x1d20] sm:$0xff]  ;;  %v1326_v58 = vld [vmem:[#allocation2 + $0x1d08] sm:$0xff] }
 0x2f8   :  { %7583 = vmatprep.subr.bf16.mxu0 %v14390_v23  ;;  %7952 = vmatprep.subr.bf16.mxu1 %v14392_v60  ;;  %v1330_v23 = vld [vmem:[#allocation2 + $0x1d28] sm:$0xff]  ;;  %v14429_v60 = vcombine.low %v1317_v46, %v1321_v47  ;;  %v14438_v62 = vcombine.high %v1325_v56, %v1329_v10  ;;  %v1365_v47 = vld [vmem:[#allocation2 + $0x1e40] sm:$0xff] }
 0x2f9   :  { %v14440_v1 = vcombine.high %v1326_v58, %v1330_v23 }
 0x2fb   :  { %7584 = vmatpush1.bf16.msra.mxu0 %v14389_v5  ;;  %7953 = vmatpush1.bf16.msra.mxu1 %v14391_v6  ;;  %v1334_v5 = vld [vmem:[#allocation2 + $0x1d48] sm:$0xff] }
 0x2fc   :  { %7585 = vmatprep.subr.bf16.mxu0 %v14398_v7  ;;  %7954 = vmatprep.subr.bf16.mxu1 %v14400_v8  ;;  %v1338_v6 = vld [vmem:[#allocation2 + $0x1d68] sm:$0xff]  ;;  %v14437_v7 = vcombine.low %v1325_v56, %v1329_v10  ;;  %v14439_v8 = vcombine.low %v1326_v58, %v1330_v23  ;;  %v1373_v10 = vld [vmem:[#allocation2 + $0x1e80] sm:$0xff] }
 0x2fd   :  { %v14448_v13 = vcombine.high %v1334_v5, %v1338_v6  ;;  %v1377_v58 = vld [vmem:[#allocation2 + $0x1ea0] sm:$0xff]  ;;  %v1374_v23 = vld [vmem:[#allocation2 + $0x1e88] sm:$0xff] }
 0x2ff   :  { %7586 = vmatpush1.bf16.msra.mxu0 %v14397_v17  ;;  %7955 = vmatpush1.bf16.msra.mxu1 %v14399_v59  ;;  %v1342_v17 = vld [vmem:[#allocation2 + $0x1d88] sm:$0xff] }
 0x300   :  { %7596 = vmatprep.subr.bf16.mxu0 %v14406_v18  ;;  %7965 = vmatprep.subr.bf16.mxu1 %v14408_v20  ;;  %v1346_v59 = vld [vmem:[#allocation2 + $0x1da8] sm:$0xff]  ;;  %v14445_v18 = vcombine.low %v1333_v2, %v1337_v3  ;;  %v14447_v20 = vcombine.low %v1334_v5, %v1338_v6  ;;  %v1381_v3 = vld [vmem:[#allocation2 + $0x1ec0] sm:$0xff] }
 0x301   :  { %v14456_v22 = vcombine.high %v1342_v17, %v1346_v59  ;;  %v1385_v5 = vld [vmem:[#allocation2 + $0x1ee0] sm:$0xff]  ;;  %v1382_v6 = vld [vmem:[#allocation2 + $0x1ec8] sm:$0xff] }
 0x302   :  { %7588 = vmatmul.mubr.bf16.vlgmr.msra.gmra.mrb[0].mxu0 %v17333_v26  ;;  %7957 = vmatmul.mubr.bf16.vlgmr.msra.gmra.mrb[0].mxu1 %v17333_v26 }
 0x303   :  { %7597 = vmatpush1.bf16.msra.mxu0 %v14405_v30  ;;  %7966 = vmatpush1.bf16.msra.mxu1 %v14407_v31  ;;  %v1354_v30 = vld [vmem:[#allocation2 + $0x1de8] sm:$0xff]  ;;  %v14453_v31 = vcombine.low %v1341_v19, %v1345_v15  ;;  %v1389_v15 = vld [vmem:[#allocation2 + $0x1f00] sm:$0xff] }
 0x304   :  { %7598 = vmatprep.subr.bf16.mxu0 %v14414_v32  ;;  %7967 = vmatprep.subr.bf16.mxu1 %v14416_v34  ;;  %v14455_v32 = vcombine.low %v1342_v17, %v1346_v59  ;;  %v14462_v34 = vcombine.high %v1349_v24, %v1353_v53  ;;  %v14464_v35 = vcombine.high %v1350_v27, %v1354_v30  ;;  %v1393_v17 = vld [vmem:[#allocation2 + $0x1f20] sm:$0xff]  ;;  %v1390_v59 = vld [vmem:[#allocation2 + $0x1f08] sm:$0xff] }
 0x305   :  { %7628 = vmatprep.mubr.bf16.mxu0 %v17335_v37  ;;  %7997 = vmatprep.mubr.bf16.mxu1 %v17335_v37 }
 0x307   :  { %7599 = vmatpush1.bf16.msra.mxu0 %v14413_v28  ;;  %7968 = vmatpush1.bf16.msra.mxu1 %v14415_v57  ;;  %v1362_v28 = vld [vmem:[#allocation2 + $0x1e28] sm:$0xff]  ;;  %v14461_v57 = vcombine.low %v1349_v24, %v1353_v53  ;;  %v1397_v53 = vld [vmem:[#allocation2 + $0x1f40] sm:$0xff] }
 0x308   :  { %7600 = vmatprep.subr.bf16.mxu0 %v14422_v42  ;;  %7969 = vmatprep.subr.bf16.mxu1 %v14424_v45  ;;  %v14463_v42 = vcombine.low %v1350_v27, %v1354_v30  ;;  %v14470_v45 = vcombine.high %v1357_v63, %v1361_v38  ;;  %v14472_v46 = vcombine.high %v1358_v40, %v1362_v28  ;;  %v1401_v27 = vld [vmem:[#allocation2 + $0x1f60] sm:$0xff]  ;;  %v1398_v30 = vld [vmem:[#allocation2 + $0x1f48] sm:$0xff] }
 0x30b   :  { %7601 = vmatpush1.bf16.msra.mxu0 %v14421_v50  ;;  %7970 = vmatpush1.bf16.msra.mxu1 %v14423_v16  ;;  %v1370_v50 = vld [vmem:[#allocation2 + $0x1e68] sm:$0xff]  ;;  %v14469_v16 = vcombine.low %v1357_v63, %v1361_v38  ;;  %v1405_v38 = vld [vmem:[#allocation2 + $0x1f80] sm:$0xff] }
 0x30c   :  { %7602 = vmatprep.subr.bf16.mxu0 %v14430_v55  ;;  %7971 = vmatprep.subr.bf16.mxu1 %v14432_v52  ;;  %v14471_v55 = vcombine.low %v1358_v40, %v1362_v28  ;;  %v14478_v52 = vcombine.high %v1365_v47, %v1369_v48  ;;  %v14480_v56 = vcombine.high %v1366_v49, %v1370_v50  ;;  %v1409_v40 = vld [vmem:[#allocation2 + $0x1fa0] sm:$0xff]  ;;  %v1406_v28 = vld [vmem:[#allocation2 + $0x1f88] sm:$0xff] }
 0x30f   :  { %7603 = vmatpush1.bf16.msra.mxu0 %v14429_v60  ;;  %7972 = vmatpush1.bf16.msra.mxu1 %v14431_v61  ;;  %v1378_v60 = vld [vmem:[#allocation2 + $0x1ea8] sm:$0xff]  ;;  %v14477_v61 = vcombine.low %v1365_v47, %v1369_v48  ;;  %v1413_v48 = vld [vmem:[#allocation2 + $0x1fc0] sm:$0xff] }
 0x310   :  { %7604 = vmatprep.subr.bf16.mxu0 %v14438_v62  ;;  %7973 = vmatprep.subr.bf16.mxu1 %v14440_v1  ;;  %v14479_v62 = vcombine.low %v1366_v49, %v1370_v50  ;;  %v14486_v1 = vcombine.high %v1373_v10, %v1377_v58  ;;  %v14488_v2 = vcombine.high %v1374_v23, %v1378_v60  ;;  %v1417_v49 = vld [vmem:[#allocation2 + $0x1fe0] sm:$0xff]  ;;  %v1414_v50 = vld [vmem:[#allocation2 + $0x1fc8] sm:$0xff] }
 0x313   :  { %7605 = vmatpush1.bf16.msra.mxu0 %v14437_v7  ;;  %7974 = vmatpush1.bf16.msra.mxu1 %v14439_v8  ;;  %v1386_v7 = vld [vmem:[#allocation2 + $0x1ee8] sm:$0xff]  ;;  %v14485_v8 = vcombine.low %v1373_v10, %v1377_v58  ;;  %v1421_v58 = vld [vmem:[#allocation2 + $0x2000] sm:$0xff] }
 0x314   :  { %7606 = vmatprep.subr.bf16.mxu0 %v14446_v11  ;;  %7975 = vmatprep.subr.bf16.mxu1 %v14448_v13  ;;  %v14487_v11 = vcombine.low %v1374_v23, %v1378_v60  ;;  %v14494_v13 = vcombine.high %v1381_v3, %v1385_v5  ;;  %v14496_v19 = vcombine.high %v1382_v6, %v1386_v7  ;;  %v1425_v23 = vld [vmem:[#allocation2 + $0x2020] sm:$0xff]  ;;  %v1422_v60 = vld [vmem:[#allocation2 + $0x2008] sm:$0xff] }
 0x317   :  { %7607 = vmatpush1.bf16.msra.mxu0 %v14445_v18  ;;  %7976 = vmatpush1.bf16.msra.mxu1 %v14447_v20  ;;  %v1394_v18 = vld [vmem:[#allocation2 + $0x1f28] sm:$0xff]  ;;  %v14493_v20 = vcombine.low %v1381_v3, %v1385_v5  ;;  %v14534_v3 = vcombine.high %v1421_v58, %v1425_v23 }
 0x318   :  { %7608 = vmatprep.subr.bf16.mxu0 %v14454_v21  ;;  %7977 = vmatprep.subr.bf16.mxu1 %v14456_v22  ;;  %v14495_v21 = vcombine.low %v1382_v6, %v1386_v7  ;;  %v14502_v22 = vcombine.high %v1389_v15, %v1393_v17  ;;  %v14504_v24 = vcombine.high %v1390_v59, %v1394_v18  ;;  %v1429_v6 = vld [vmem:[#allocation2 + $0x2040] sm:$0xff] }
 0x319   :  { %v1433_v7 = vld [vmem:[#allocation2 + $0x2060] sm:$0xff] }
 0x31b   :  { %7609 = vmatpush1.bf16.msra.mxu0 %v14453_v31  ;;  %7978 = vmatpush1.bf16.msra.mxu1 %v14455_v32  ;;  %v1402_v31 = vld [vmem:[#allocation2 + $0x1f68] sm:$0xff]  ;;  %v14501_v32 = vcombine.low %v1389_v15, %v1393_v17  ;;  %v14533_v15 = vcombine.low %v1421_v58, %v1425_v23 }
 0x31c   :  { %7610 = vmatprep.subr.bf16.mxu0 %v14462_v34  ;;  %7979 = vmatprep.subr.bf16.mxu1 %v14464_v35  ;;  %v14503_v34 = vcombine.low %v1390_v59, %v1394_v18  ;;  %v14510_v35 = vcombine.high %v1397_v53, %v1401_v27  ;;  %v14512_v63 = vcombine.high %v1398_v30, %v1402_v31 }
 0x31d   :  { %v14542_v59 = vcombine.high %v1429_v6, %v1433_v7 }
 0x31f   :  { %7611 = vmatpush1.bf16.msra.mxu0 %v14461_v57  ;;  %7980 = vmatpush1.bf16.msra.mxu1 %v14463_v42  ;;  %v1410_v57 = vld [vmem:[#allocation2 + $0x1fa8] sm:$0xff]  ;;  %v14509_v42 = vcombine.low %v1397_v53, %v1401_v27 }
 0x320   :  { %7612 = vmatprep.subr.bf16.mxu0 %v14470_v45  ;;  %7981 = vmatprep.subr.bf16.mxu1 %v14472_v46  ;;  %v14511_v45 = vcombine.low %v1398_v30, %v1402_v31  ;;  %v14518_v46 = vcombine.high %v1405_v38, %v1409_v40  ;;  %v14520_v47 = vcombine.high %v1406_v28, %v1410_v57  ;;  %v1442_v53 = vld [vmem:[#allocation2 + $0x20a8] sm:$0xff] }
 0x323   :  { %7613 = vmatpush1.bf16.msra.mxu0 %v14469_v16  ;;  %7982 = vmatpush1.bf16.msra.mxu1 %v14471_v55  ;;  %v1418_v16 = vld [vmem:[#allocation2 + $0x1fe8] sm:$0xff]  ;;  %v14517_v55 = vcombine.low %v1405_v38, %v1409_v40 }
 0x324   :  { %7614 = vmatprep.subr.bf16.mxu0 %v14478_v52  ;;  %7983 = vmatprep.subr.bf16.mxu1 %v14480_v56  ;;  %v14519_v52 = vcombine.low %v1406_v28, %v1410_v57  ;;  %v14526_v56 = vcombine.high %v1413_v48, %v1417_v49  ;;  %v14528_v10 = vcombine.high %v1414_v50, %v1418_v16 }
 0x327   :  { %7615 = vmatpush1.bf16.msra.mxu0 %v14477_v61  ;;  %7984 = vmatpush1.bf16.msra.mxu1 %v14479_v62  ;;  %v1426_v61 = vld [vmem:[#allocation2 + $0x2028] sm:$0xff]  ;;  %v17344_v62 = vld.sshfl [vmem:[%s18411_s14 + $0x20] sm:$0x33 pattern:$0x76325410] }
 0x328   :  { %7616 = vmatprep.subr.bf16.mxu0 %v14486_v1  ;;  %7985 = vmatprep.subr.bf16.mxu1 %v14488_v2  ;;  %v14525_v1 = vcombine.low %v1413_v48, %v1417_v49  ;;  %v14527_v2 = vcombine.low %v1414_v50, %v1418_v16  ;;  %v14536_v5 = vcombine.high %v1422_v60, %v1426_v61 }
 0x329   :  { %v14535_v17 = vcombine.low %v1422_v60, %v1426_v61 }
 0x32b   :  { %7617 = vmatpush1.bf16.msra.mxu0 %v14485_v8  ;;  %7986 = vmatpush1.bf16.msra.mxu1 %v14487_v11  ;;  %v360_v8 = vcombine.high %v17344_v62, %v17344_v62  ;;  %v17350_v11 = vpack.c.bf16 %v17327_v33, %v17327_v33  ;;  %v14541_v33 = vcombine.low %v1429_v6, %v1433_v7 }
 0x32c   :  { %7618 = vmatprep.subr.bf16.mxu0 %v14494_v13  ;;  %7987 = vmatprep.subr.bf16.mxu1 %v14496_v19  ;;  %v1430_v13 = vld [vmem:[#allocation2 + $0x2048] sm:$0xff] }
 0x32d   :  { %v1434_v19 = vld [vmem:[#allocation2 + $0x2068] sm:$0xff] }
 0x32e   :  { %v14544_v18 = vcombine.high %v1430_v13, %v1434_v19  ;;  %v14543_v27 = vcombine.low %v1430_v13, %v1434_v19  ;;  %v1477_v19 = vld [vmem:[#allocation2 + $0x21c0] sm:$0xff] }
 0x32f   :  { %7619 = vmatpush1.bf16.msra.mxu0 %v14493_v20  ;;  %7988 = vmatpush1.bf16.msra.mxu1 %v14495_v21  ;;  %v1437_v20 = vld [vmem:[#allocation2 + $0x2080] sm:$0xff] }
 0x330   :  { %7620 = vmatprep.subr.bf16.mxu0 %v14502_v22  ;;  %7989 = vmatprep.subr.bf16.mxu1 %v14504_v24  ;;  %v1441_v21 = vld [vmem:[#allocation2 + $0x20a0] sm:$0xff]  ;;  %v17352_v22 = vpack.c.bf16 %v360_v8, %v360_v8  ;;  %v1438_v24 = vld [vmem:[#allocation2 + $0x2088] sm:$0xff] }
 0x331   :  { %v14550_v30 = vcombine.high %v1437_v20, %v1441_v21  ;;  %v14552_v31 = vcombine.high %v1438_v24, %v1442_v53  ;;  %v14549_v38 = vcombine.low %v1437_v20, %v1441_v21  ;;  %v14551_v40 = vcombine.low %v1438_v24, %v1442_v53  ;;  %v1485_v53 = vld [vmem:[#allocation2 + $0x2200] sm:$0xff] }
 0x333   :  { %7621 = vmatpush1.bf16.msra.mxu0 %v14501_v32  ;;  %7990 = vmatpush1.bf16.msra.mxu1 %v14503_v34  ;;  %v1445_v32 = vld [vmem:[#allocation2 + $0x20c0] sm:$0xff] }
 0x334   :  { %7622 = vmatprep.subr.bf16.mxu0 %v14510_v35  ;;  %7991 = vmatprep.subr.bf16.mxu1 %v14512_v63  ;;  %v1449_v34 = vld [vmem:[#allocation2 + $0x20e0] sm:$0xff]  ;;  %v1446_v35 = vld [vmem:[#allocation2 + $0x20c8] sm:$0xff] }
 0x335   :  { %v1450_v63 = vld [vmem:[#allocation2 + $0x20e8] sm:$0xff]  ;;  %v14558_v28 = vcombine.high %v1445_v32, %v1449_v34  ;;  %v14557_v48 = vcombine.low %v1445_v32, %v1449_v34 }
 0x336   :  { %v14560_v57 = vcombine.high %v1446_v35, %v1450_v63  ;;  %v14559_v49 = vcombine.low %v1446_v35, %v1450_v63  ;;  %v1493_v63 = vld [vmem:[#allocation2 + $0x2240] sm:$0xff] }
 0x337   :  { %7623 = vmatpush1.bf16.msra.mxu0 %v14509_v42  ;;  %7992 = vmatpush1.bf16.msra.mxu1 %v14511_v45  ;;  %v1453_v42 = vld [vmem:[#allocation2 + $0x2100] sm:$0xff] }
 0x338   :  { %7624 = vmatprep.subr.bf16.mxu0 %v14518_v46  ;;  %7993 = vmatprep.subr.bf16.mxu1 %v14520_v47  ;;  %v1457_v45 = vld [vmem:[#allocation2 + $0x2120] sm:$0xff]  ;;  %v1454_v46 = vld [vmem:[#allocation2 + $0x2108] sm:$0xff] }
 0x339   :  { %v1458_v47 = vld [vmem:[#allocation2 + $0x2128] sm:$0xff]  ;;  %v14566_v50 = vcombine.high %v1453_v42, %v1457_v45  ;;  %v14565_v58 = vcombine.low %v1453_v42, %v1457_v45 }
 0x33a   :  { %v14568_v16 = vcombine.high %v1454_v46, %v1458_v47  ;;  %v14567_v23 = vcombine.low %v1454_v46, %v1458_v47  ;;  %v1501_v47 = vld [vmem:[#allocation2 + $0x2280] sm:$0xff] }
 0x33b   :  { %7625 = vmatpush1.bf16.msra.mxu0 %v14517_v55  ;;  %7994 = vmatpush1.bf16.msra.mxu1 %v14519_v52  ;;  %v1461_v55 = vld [vmem:[#allocation2 + $0x2140] sm:$0xff] }
 0x33c   :  { %7626 = vmatprep.subr.bf16.mxu0 %v14526_v56  ;;  %7995 = vmatprep.subr.bf16.mxu1 %v14528_v10  ;;  %v1465_v52 = vld [vmem:[#allocation2 + $0x2160] sm:$0xff]  ;;  %v1462_v56 = vld [vmem:[#allocation2 + $0x2148] sm:$0xff] }
 0x33d   :  { %v1466_v10 = vld [vmem:[#allocation2 + $0x2168] sm:$0xff]  ;;  %v14574_v60 = vcombine.high %v1461_v55, %v1465_v52  ;;  %v14573_v6 = vcombine.low %v1461_v55, %v1465_v52 }
 0x33e   :  { %v14576_v61 = vcombine.high %v1462_v56, %v1466_v10  ;;  %v14575_v7 = vcombine.low %v1462_v56, %v1466_v10  ;;  %v1509_v10 = vld [vmem:[#allocation2 + $0x22c0] sm:$0xff] }
 0x33f   :  { %7627 = vmatpush1.bf16.msra.mxu0 %v14525_v1  ;;  %7996 = vmatpush1.bf16.msra.mxu1 %v14527_v2  ;;  %v1469_v1 = vld [vmem:[#allocation2 + $0x2180] sm:$0xff] }
 0x340   :  { %7637 = vmatprep.subr.bf16.mxu0 %v14534_v3  ;;  %8006 = vmatprep.subr.bf16.mxu1 %v14536_v5  ;;  %v1473_v2 = vld [vmem:[#allocation2 + $0x21a0] sm:$0xff]  ;;  %v1470_v3 = vld [vmem:[#allocation2 + $0x2188] sm:$0xff] }
 0x341   :  { %v1474_v5 = vld [vmem:[#allocation2 + $0x21a8] sm:$0xff]  ;;  %v14582_v8 = vcombine.high %v1469_v1, %v1473_v2 }
 0x342   :  { %7629 = vmatmul.mubr.bf16.vlgmr.msra.gmra.mrb[0].mxu0 %v17350_v11  ;;  %7998 = vmatmul.mubr.bf16.vlgmr.msra.gmra.mrb[0].mxu1 %v17350_v11  ;;  %v14584_v13 = vcombine.high %v1470_v3, %v1474_v5  ;;  %v14583_v20 = vcombine.low %v1470_v3, %v1474_v5  ;;  %v1517_v5 = vld [vmem:[#allocation2 + $0x2300] sm:$0xff] }
 0x343   :  { %7638 = vmatpush1.bf16.msra.mxu0 %v14533_v15  ;;  %8007 = vmatpush1.bf16.msra.mxu1 %v14535_v17  ;;  %v1481_v15 = vld [vmem:[#allocation2 + $0x21e0] sm:$0xff]  ;;  %v1478_v17 = vld [vmem:[#allocation2 + $0x21c8] sm:$0xff] }
 0x344   :  { %7639 = vmatprep.subr.bf16.mxu0 %v14542_v59  ;;  %8008 = vmatprep.subr.bf16.mxu1 %v14544_v18  ;;  %v1482_v59 = vld [vmem:[#allocation2 + $0x21e8] sm:$0xff]  ;;  %v14581_v18 = vcombine.low %v1469_v1, %v1473_v2  ;;  %v14590_v21 = vcombine.high %v1477_v19, %v1481_v15 }
 0x345   :  { %7669 = vmatprep.mubr.bf16.mxu0 %v17352_v22  ;;  %8038 = vmatprep.mubr.bf16.mxu1 %v17352_v22  ;;  %v14592_v24 = vcombine.high %v1478_v17, %v1482_v59  ;;  %v14591_v32 = vcombine.low %v1478_v17, %v1482_v59  ;;  %v1525_v59 = vld [vmem:[#allocation2 + $0x2340] sm:$0xff] }
 0x347   :  { %7640 = vmatpush1.bf16.msra.mxu0 %v14541_v33  ;;  %8009 = vmatpush1.bf16.msra.mxu1 %v14543_v27  ;;  %v1489_v33 = vld [vmem:[#allocation2 + $0x2220] sm:$0xff]  ;;  %v1486_v27 = vld [vmem:[#allocation2 + $0x2208] sm:$0xff] }
 0x348   :  { %7641 = vmatprep.subr.bf16.mxu0 %v14550_v30  ;;  %8010 = vmatprep.subr.bf16.mxu1 %v14552_v31  ;;  %v1490_v30 = vld [vmem:[#allocation2 + $0x2228] sm:$0xff]  ;;  %v14589_v31 = vcombine.low %v1477_v19, %v1481_v15  ;;  %v14598_v34 = vcombine.high %v1485_v53, %v1489_v33 }
 0x349   :  { %v14600_v35 = vcombine.high %v1486_v27, %v1490_v30  ;;  %v14599_v42 = vcombine.low %v1486_v27, %v1490_v30  ;;  %v1533_v30 = vld [vmem:[#allocation2 + $0x2380] sm:$0xff] }
 0x34b   :  { %7642 = vmatpush1.bf16.msra.mxu0 %v14549_v38  ;;  %8011 = vmatpush1.bf16.msra.mxu1 %v14551_v40  ;;  %v1497_v38 = vld [vmem:[#allocation2 + $0x2260] sm:$0xff]  ;;  %v1494_v40 = vld [vmem:[#allocation2 + $0x2248] sm:$0xff] }
 0x34c   :  { %7643 = vmatprep.subr.bf16.mxu0 %v14558_v28  ;;  %8012 = vmatprep.subr.bf16.mxu1 %v14560_v57  ;;  %v1498_v28 = vld [vmem:[#allocation2 + $0x2268] sm:$0xff]  ;;  %v14597_v57 = vcombine.low %v1485_v53, %v1489_v33  ;;  %v14606_v45 = vcombine.high %v1493_v63, %v1497_v38 }
 0x34d   :  { %v14608_v46 = vcombine.high %v1494_v40, %v1498_v28  ;;  %v14607_v55 = vcombine.low %v1494_v40, %v1498_v28  ;;  %v1541_v28 = vld [vmem:[#allocation2 + $0x23c0] sm:$0xff] }
 0x34f   :  { %7644 = vmatpush1.bf16.msra.mxu0 %v14557_v48  ;;  %8013 = vmatpush1.bf16.msra.mxu1 %v14559_v49  ;;  %v1505_v48 = vld [vmem:[#allocation2 + $0x22a0] sm:$0xff]  ;;  %v1502_v49 = vld [vmem:[#allocation2 + $0x2288] sm:$0xff] }
 0x350   :  { %7645 = vmatprep.subr.bf16.mxu0 %v14566_v50  ;;  %8014 = vmatprep.subr.bf16.mxu1 %v14568_v16  ;;  %v1506_v50 = vld [vmem:[#allocation2 + $0x22a8] sm:$0xff]  ;;  %v14605_v16 = vcombine.low %v1493_v63, %v1497_v38  ;;  %v14614_v52 = vcombine.high %v1501_v47, %v1505_v48 }
 0x351   :  { %v14616_v56 = vcombine.high %v1502_v49, %v1506_v50  ;;  %v14615_v1 = vcombine.low %v1502_v49, %v1506_v50  ;;  %v399_v50 = vld [vmem:[#allocation2 + $0x10] sm:$0xff] }
 0x353   :  { %7646 = vmatpush1.bf16.msra.mxu0 %v14565_v58  ;;  %8015 = vmatpush1.bf16.msra.mxu1 %v14567_v23  ;;  %v1513_v58 = vld [vmem:[#allocation2 + $0x22e0] sm:$0xff]  ;;  %v1510_v23 = vld [vmem:[#allocation2 + $0x22c8] sm:$0xff] }
 0x354   :  { %7647 = vmatprep.subr.bf16.mxu0 %v14574_v60  ;;  %8016 = vmatprep.subr.bf16.mxu1 %v14576_v61  ;;  %v1514_v60 = vld [vmem:[#allocation2 + $0x22e8] sm:$0xff]  ;;  %v14613_v61 = vcombine.low %v1501_v47, %v1505_v48  ;;  %v14622_v2 = vcombine.high %v1509_v10, %v1513_v58 }
 0x355   :  { %v14624_v3 = vcombine.high %v1510_v23, %v1514_v60  ;;  %v14623_v19 = vcombine.low %v1510_v23, %v1514_v60  ;;  %v407_v60 = vld [vmem:[#allocation2 + $0x50] sm:$0xff] }
 0x357   :  { %7648 = vmatpush1.bf16.msra.mxu0 %v14573_v6  ;;  %8017 = vmatpush1.bf16.msra.mxu1 %v14575_v7  ;;  %v1521_v6 = vld [vmem:[#allocation2 + $0x2320] sm:$0xff]  ;;  %v1518_v7 = vld [vmem:[#allocation2 + $0x2308] sm:$0xff] }
 0x358   :  { %7649 = vmatprep.subr.bf16.mxu0 %v14582_v8  ;;  %8018 = vmatprep.subr.bf16.mxu1 %v14584_v13  ;;  %v1522_v8 = vld [vmem:[#allocation2 + $0x2328] sm:$0xff]  ;;  %v14621_v13 = vcombine.low %v1509_v10, %v1513_v58  ;;  %v14630_v15 = vcombine.high %v1517_v5, %v1521_v6 }
 0x359   :  { %v14632_v17 = vcombine.high %v1518_v7, %v1522_v8  ;;  %v14631_v53 = vcombine.low %v1518_v7, %v1522_v8 }
 0x35b   :  { %7650 = vmatpush1.bf16.msra.mxu0 %v14581_v18  ;;  %8019 = vmatpush1.bf16.msra.mxu1 %v14583_v20  ;;  %v1529_v18 = vld [vmem:[#allocation2 + $0x2360] sm:$0xff]  ;;  %v1526_v20 = vld [vmem:[#allocation2 + $0x2348] sm:$0xff] }
 0x35c   :  { %7651 = vmatprep.subr.bf16.mxu0 %v14590_v21  ;;  %8020 = vmatprep.subr.bf16.mxu1 %v14592_v24  ;;  %v1530_v21 = vld [vmem:[#allocation2 + $0x2368] sm:$0xff]  ;;  %v14629_v24 = vcombine.low %v1517_v5, %v1521_v6  ;;  %v14638_v33 = vcombine.high %v1525_v59, %v1529_v18 }
 0x35d   :  { %v14640_v27 = vcombine.high %v1526_v20, %v1530_v21  ;;  %v14639_v63 = vcombine.low %v1526_v20, %v1530_v21  ;;  %v423_v21 = vld [vmem:[#allocation2 + $0xd0] sm:$0xff] }
 0x35f   :  { %7652 = vmatpush1.bf16.msra.mxu0 %v14589_v31  ;;  %8021 = vmatpush1.bf16.msra.mxu1 %v14591_v32  ;;  %v1537_v31 = vld [vmem:[#allocation2 + $0x23a0] sm:$0xff]  ;;  %v1534_v32 = vld [vmem:[#allocation2 + $0x2388] sm:$0xff] }
 0x360   :  { %7653 = vmatprep.subr.bf16.mxu0 %v14598_v34  ;;  %8022 = vmatprep.subr.bf16.mxu1 %v14600_v35  ;;  %v1538_v34 = vld [vmem:[#allocation2 + $0x23a8] sm:$0xff]  ;;  %v14637_v35 = vcombine.low %v1525_v59, %v1529_v18  ;;  %v14646_v38 = vcombine.high %v1533_v30, %v1537_v31 }
 0x361   :  { %v14648_v40 = vcombine.high %v1534_v32, %v1538_v34  ;;  %v14647_v47 = vcombine.low %v1534_v32, %v1538_v34  ;;  %v431_v34 = vld [vmem:[#allocation2 + $0x110] sm:$0xff] }
 0x363   :  { %7654 = vmatpush1.bf16.msra.mxu0 %v14597_v57  ;;  %8023 = vmatpush1.bf16.msra.mxu1 %v14599_v42  ;;  %v1545_v57 = vld [vmem:[#allocation2 + $0x23e0] sm:$0xff]  ;;  %v1542_v42 = vld [vmem:[#allocation2 + $0x23c8] sm:$0xff] }
 0x364   :  { %7655 = vmatprep.subr.bf16.mxu0 %v14606_v45  ;;  %8024 = vmatprep.subr.bf16.mxu1 %v14608_v46  ;;  %v1546_v45 = vld [vmem:[#allocation2 + $0x23e8] sm:$0xff]  ;;  %v14645_v46 = vcombine.low %v1533_v30, %v1537_v31  ;;  %v14654_v48 = vcombine.high %v1541_v28, %v1545_v57 }
 0x365   :  { %v14656_v49 = vcombine.high %v1542_v42, %v1546_v45  ;;  %v14655_v10 = vcombine.low %v1542_v42, %v1546_v45  ;;  %v439_v42 = vld [vmem:[#allocation2 + $0x150] sm:$0xff] }
 0x366   :  { %v443_v45 = vld [vmem:[#allocation2 + $0x170] sm:$0xff] }
 0x367   :  { %7656 = vmatpush1.bf16.msra.mxu0 %v14605_v16  ;;  %8025 = vmatpush1.bf16.msra.mxu1 %v14607_v55  ;;  %v403_v16 = vld [vmem:[#allocation2 + $0x30] sm:$0xff]  ;;  %v400_v55 = vld [vmem:[#allocation2 + $0x18] sm:$0xff] }
 0x368   :  { %7657 = vmatprep.subr.bf16.mxu0 %v14614_v52  ;;  %8026 = vmatprep.subr.bf16.mxu1 %v14616_v56  ;;  %v404_v52 = vld [vmem:[#allocation2 + $0x38] sm:$0xff]  ;;  %v14653_v56 = vcombine.low %v1541_v28, %v1545_v57  ;;  %v13514_v58 = vcombine.high %v399_v50, %v403_v16  ;;  %v13513_v5 = vcombine.low %v399_v50, %v403_v16 }
 0x369   :  { %v13516_v23 = vcombine.high %v400_v55, %v404_v52  ;;  %v13515_v6 = vcombine.low %v400_v55, %v404_v52  ;;  %v13554_v50 = vcombine.high %v439_v42, %v443_v45  ;;  %v447_v55 = vld [vmem:[#allocation2 + $0x190] sm:$0xff] }
 0x36a   :  { %v451_v52 = vld [vmem:[#allocation2 + $0x1b0] sm:$0xff] }
 0x36b   :  { %7658 = vmatpush1.bf16.msra.mxu0 %v14613_v61  ;;  %8027 = vmatpush1.bf16.msra.mxu1 %v14615_v1  ;;  %v411_v61 = vld [vmem:[#allocation2 + $0x70] sm:$0xff]  ;;  %v17360_v1 = vpack.c.bf16 %v17344_v62, %v17344_v62 }
 0x36c   :  { %7659 = vmatprep.subr.bf16.mxu0 %v14622_v2  ;;  %8028 = vmatprep.subr.bf16.mxu1 %v14624_v3  ;;  %v408_v2 = vld [vmem:[#allocation2 + $0x58] sm:$0xff]  ;;  %v13522_v7 = vcombine.high %v407_v60, %v411_v61  ;;  %v13521_v62 = vcombine.low %v407_v60, %v411_v61  ;;  %v13562_v60 = vcombine.high %v447_v55, %v451_v52 }
 0x36d   :  { %v412_v3 = vld [vmem:[#allocation2 + $0x78] sm:$0xff] }
 0x36e   :  { %v13524_v8 = vcombine.high %v408_v2, %v412_v3  ;;  %v13523_v59 = vcombine.low %v408_v2, %v412_v3  ;;  %v455_v2 = vld [vmem:[#allocation2 + $0x1d0] sm:$0xff] }
 0x36f   :  { %7660 = vmatpush1.bf16.msra.mxu0 %v14621_v13  ;;  %8029 = vmatpush1.bf16.msra.mxu1 %v14623_v19  ;;  %v415_v13 = vld [vmem:[#allocation2 + $0x90] sm:$0xff] }
 0x370   :  { %7661 = vmatprep.subr.bf16.mxu0 %v14630_v15  ;;  %8030 = vmatprep.subr.bf16.mxu1 %v14632_v17  ;;  %v419_v19 = vld [vmem:[#allocation2 + $0xb0] sm:$0xff]  ;;  %v416_v15 = vld [vmem:[#allocation2 + $0x98] sm:$0xff] }
 0x371   :  { %v420_v17 = vld [vmem:[#allocation2 + $0xb8] sm:$0xff]  ;;  %v13530_v18 = vcombine.high %v415_v13, %v419_v19  ;;  %v459_v3 = vld [vmem:[#allocation2 + $0x1f0] sm:$0xff] }
 0x372   :  { %v13532_v20 = vcombine.high %v416_v15, %v420_v17  ;;  %v13531_v30 = vcombine.low %v416_v15, %v420_v17  ;;  %v463_v15 = vld [vmem:[#allocation2 + $0x210] sm:$0xff] }
 0x373   :  { %7662 = vmatpush1.bf16.msra.mxu0 %v14629_v24  ;;  %8031 = vmatpush1.bf16.msra.mxu1 %v14631_v53  ;;  %v427_v24 = vld [vmem:[#allocation2 + $0xf0] sm:$0xff]  ;;  %v424_v53 = vld [vmem:[#allocation2 + $0xd8] sm:$0xff] }
 0x374   :  { %7663 = vmatprep.subr.bf16.mxu0 %v14638_v33  ;;  %8032 = vmatprep.subr.bf16.mxu1 %v14640_v27  ;;  %v428_v33 = vld [vmem:[#allocation2 + $0xf8] sm:$0xff]  ;;  %v13529_v27 = vcombine.low %v415_v13, %v419_v19  ;;  %v13538_v31 = vcombine.high %v423_v21, %v427_v24  ;;  %v13570_v13 = vcombine.high %v455_v2, %v459_v3  ;;  %v467_v17 = vld [vmem:[#allocation2 + $0x230] sm:$0xff] }
 0x375   :  { %v13540_v32 = vcombine.high %v424_v53, %v428_v33  ;;  %v13539_v28 = vcombine.low %v424_v53, %v428_v33  ;;  %v471_v53 = vld [vmem:[#allocation2 + $0x250] sm:$0xff] }
 0x376   :  { %v475_v33 = vld [vmem:[#allocation2 + $0x270] sm:$0xff] }
 0x377   :  { %7664 = vmatpush1.bf16.msra.mxu0 %v14637_v35  ;;  %8033 = vmatpush1.bf16.msra.mxu1 %v14639_v63  ;;  %v435_v35 = vld [vmem:[#allocation2 + $0x130] sm:$0xff]  ;;  %v432_v63 = vld [vmem:[#allocation2 + $0x118] sm:$0xff] }
 0x378   :  { %7665 = vmatprep.subr.bf16.mxu0 %v14646_v38  ;;  %8034 = vmatprep.subr.bf16.mxu1 %v14648_v40  ;;  %v436_v38 = vld [vmem:[#allocation2 + $0x138] sm:$0xff]  ;;  %v13537_v40 = vcombine.low %v423_v21, %v427_v24  ;;  %v13546_v57 = vcombine.high %v431_v34, %v435_v35  ;;  %v13578_v21 = vcombine.high %v463_v15, %v467_v17 }
 0x37b   :  { %7666 = vmatpush1.bf16.msra.mxu0 %v14645_v46  ;;  %8035 = vmatpush1.bf16.msra.mxu1 %v14647_v47  ;;  %v440_v46 = vld [vmem:[#allocation2 + $0x158] sm:$0xff] }
 0x37c   :  { %7667 = vmatprep.subr.bf16.mxu0 %v14654_v48  ;;  %8036 = vmatprep.subr.bf16.mxu1 %v14656_v49  ;;  %v444_v47 = vld [vmem:[#allocation2 + $0x178] sm:$0xff]  ;;  %v13545_v48 = vcombine.low %v431_v34, %v435_v35  ;;  %v13547_v49 = vcombine.low %v432_v63, %v436_v38  ;;  %v13586_v34 = vcombine.high %v471_v53, %v475_v33 }
 0x37d   :  { %v13556_v16 = vcombine.high %v440_v46, %v444_v47 }
 0x37f   :  { %7668 = vmatpush1.bf16.msra.mxu0 %v14653_v56  ;;  %8037 = vmatpush1.bf16.msra.mxu1 %v14655_v10  ;;  %v448_v56 = vld [vmem:[#allocation2 + $0x198] sm:$0xff] }
 0x380   :  { %8047 = vmatprep.subr.bf16.mxu0 %v13514_v58  ;;  %8416 = vmatprep.subr.bf16.mxu1 %v13516_v23  ;;  %v452_v10 = vld [vmem:[#allocation2 + $0x1b8] sm:$0xff]  ;;  %v13553_v58 = vcombine.low %v439_v42, %v443_v45  ;;  %v13555_v23 = vcombine.low %v440_v46, %v444_v47  ;;  %v487_v46 = vld [vmem:[#allocation2 + $0x2d0] sm:$0xff] }
 0x381   :  { %v13564_v61 = vcombine.high %v448_v56, %v452_v10  ;;  %v491_v47 = vld [vmem:[#allocation2 + $0x2f0] sm:$0xff] }
 0x382   :  { %7670 = vmatmul.mubr.bf16.vlgmr.msra.gmra.mrb[0].mxu0 %v17360_v1  ;;  %8039 = vmatmul.mubr.bf16.vlgmr.msra.gmra.mrb[0].mxu1 %v17360_v1 }
 0x383   :  { %8048 = vmatpush1.bf16.msra.mxu0 %v13513_v5  ;;  %8417 = vmatpush1.bf16.msra.mxu1 %v13515_v6  ;;  %v456_v5 = vld [vmem:[#allocation2 + $0x1d8] sm:$0xff] }
 0x384   :  { %8049 = vmatprep.subr.bf16.mxu0 %v13522_v7  ;;  %8418 = vmatprep.subr.bf16.mxu1 %v13524_v8  ;;  %v460_v6 = vld [vmem:[#allocation2 + $0x1f8] sm:$0xff]  ;;  %v13561_v7 = vcombine.low %v447_v55, %v451_v52  ;;  %v13563_v8 = vcombine.low %v448_v56, %v452_v10  ;;  %v13602_v55 = vcombine.high %v487_v46, %v491_v47  ;;  %v495_v56 = vld [vmem:[#allocation2 + $0x310] sm:$0xff] }
 0x385   :  { %8079 = vmatprep.mubr.bf16.mxu0 %v17206_v9  ;;  %8448 = vmatprep.mubr.bf16.mxu1 %v17206_v9  ;;  %v13548_v9 = vcombine.high %v432_v63, %v436_v38  ;;  %v13572_v19 = vcombine.high %v456_v5, %v460_v6  ;;  %v479_v63 = vld [vmem:[#allocation2 + $0x290] sm:$0xff] }
 0x386   :  { %v483_v38 = vld [vmem:[#allocation2 + $0x2b0] sm:$0xff] }
 0x387   :  { %8050 = vmatpush1.bf16.msra.mxu0 %v13521_v62  ;;  %8419 = vmatpush1.bf16.msra.mxu1 %v13523_v59  ;;  %v464_v62 = vld [vmem:[#allocation2 + $0x218] sm:$0xff]  ;;  %v13594_v42 = vcombine.high %v479_v63, %v483_v38  ;;  %v499_v10 = vld [vmem:[#allocation2 + $0x330] sm:$0xff] }
 0x388   :  { %8051 = vmatprep.subr.bf16.mxu0 %v13530_v18  ;;  %8420 = vmatprep.subr.bf16.mxu1 %v13532_v20  ;;  %v468_v59 = vld [vmem:[#allocation2 + $0x238] sm:$0xff]  ;;  %v13569_v18 = vcombine.low %v455_v2, %v459_v3  ;;  %v13571_v20 = vcombine.low %v456_v5, %v460_v6  ;;  %v13610_v2 = vcombine.high %v495_v56, %v499_v10  ;;  %v503_v5 = vld [vmem:[#allocation2 + $0x350] sm:$0xff] }
 0x389   :  { %v13580_v24 = vcombine.high %v464_v62, %v468_v59  ;;  %v507_v6 = vld [vmem:[#allocation2 + $0x370] sm:$0xff] }
 0x38b   :  { %8052 = vmatpush1.bf16.msra.mxu0 %v13529_v27  ;;  %8421 = vmatpush1.bf16.msra.mxu1 %v13531_v30  ;;  %v472_v27 = vld [vmem:[#allocation2 + $0x258] sm:$0xff] }
 0x38c   :  { %8053 = vmatprep.subr.bf16.mxu0 %v13538_v31  ;;  %8422 = vmatprep.subr.bf16.mxu1 %v13540_v32  ;;  %v476_v30 = vld [vmem:[#allocation2 + $0x278] sm:$0xff]  ;;  %v13577_v31 = vcombine.low %v463_v15, %v467_v17  ;;  %v13579_v32 = vcombine.low %v464_v62, %v468_v59  ;;  %v13618_v15 = vcombine.high %v503_v5, %v507_v6  ;;  %v511_v62 = vld [vmem:[#allocation2 + $0x390] sm:$0xff] }
 0x38d   :  { %v13588_v35 = vcombine.high %v472_v27, %v476_v30  ;;  %v515_v59 = vld [vmem:[#allocation2 + $0x3b0] sm:$0xff] }
 0x38f   :  { %8054 = vmatpush1.bf16.msra.mxu0 %v13537_v40  ;;  %8423 = vmatpush1.bf16.msra.mxu1 %v13539_v28  ;;  %v480_v40 = vld [vmem:[#allocation2 + $0x298] sm:$0xff] }
 0x390   :  { %8055 = vmatprep.subr.bf16.mxu0 %v13546_v57  ;;  %8424 = vmatprep.subr.bf16.mxu1 %v13548_v9  ;;  %v484_v28 = vld [vmem:[#allocation2 + $0x2b8] sm:$0xff]  ;;  %v13585_v57 = vcombine.low %v471_v53, %v475_v33  ;;  %v13587_v9 = vcombine.low %v472_v27, %v476_v30  ;;  %v13626_v53 = vcombine.high %v511_v62, %v515_v59  ;;  %v519_v27 = vld [vmem:[#allocation2 + $0x3d0] sm:$0xff] }
 0x391   :  { %v13596_v45 = vcombine.high %v480_v40, %v484_v28  ;;  %v523_v30 = vld [vmem:[#allocation2 + $0x3f0] sm:$0xff] }
 0x393   :  { %8056 = vmatpush1.bf16.msra.mxu0 %v13545_v48  ;;  %8425 = vmatpush1.bf16.msra.mxu1 %v13547_v49  ;;  %v488_v48 = vld [vmem:[#allocation2 + $0x2d8] sm:$0xff] }
 0x394   :  { %8057 = vmatprep.subr.bf16.mxu0 %v13554_v50  ;;  %8426 = vmatprep.subr.bf16.mxu1 %v13556_v16  ;;  %v492_v49 = vld [vmem:[#allocation2 + $0x2f8] sm:$0xff]  ;;  %v13593_v50 = vcombine.low %v479_v63, %v483_v38  ;;  %v13595_v16 = vcombine.low %v480_v40, %v484_v28  ;;  %v13634_v63 = vcombine.high %v519_v27, %v523_v30  ;;  %v527_v40 = vld [vmem:[#allocation2 + $0x410] sm:$0xff] }
 0x395   :  { %v13604_v52 = vcombine.high %v488_v48, %v492_v49  ;;  %v531_v28 = vld [vmem:[#allocation2 + $0x430] sm:$0xff] }
 0x397   :  { %8058 = vmatpush1.bf16.msra.mxu0 %v13553_v58  ;;  %8427 = vmatpush1.bf16.msra.mxu1 %v13555_v23  ;;  %v496_v58 = vld [vmem:[#allocation2 + $0x318] sm:$0xff] }
 0x398   :  { %8059 = vmatprep.subr.bf16.mxu0 %v13562_v60  ;;  %8428 = vmatprep.subr.bf16.mxu1 %v13564_v61  ;;  %v500_v23 = vld [vmem:[#allocation2 + $0x338] sm:$0xff]  ;;  %v13601_v60 = vcombine.low %v487_v46, %v491_v47  ;;  %v13603_v61 = vcombine.low %v488_v48, %v492_v49  ;;  %v13642_v46 = vcombine.high %v527_v40, %v531_v28  ;;  %v535_v48 = vld [vmem:[#allocation2 + $0x450] sm:$0xff] }
 0x399   :  { %v13612_v3 = vcombine.high %v496_v58, %v500_v23  ;;  %v539_v49 = vld [vmem:[#allocation2 + $0x470] sm:$0xff] }
 0x39b   :  { %8060 = vmatpush1.bf16.msra.mxu0 %v13561_v7  ;;  %8429 = vmatpush1.bf16.msra.mxu1 %v13563_v8  ;;  %v504_v7 = vld [vmem:[#allocation2 + $0x358] sm:$0xff] }
 0x39c   :  { %8061 = vmatprep.subr.bf16.mxu0 %v13570_v13  ;;  %8430 = vmatprep.subr.bf16.mxu1 %v13572_v19  ;;  %v508_v8 = vld [vmem:[#allocation2 + $0x378] sm:$0xff]  ;;  %v13609_v13 = vcombine.low %v495_v56, %v499_v10  ;;  %v13611_v19 = vcombine.low %v496_v58, %v500_v23  ;;  %v13650_v56 = vcombine.high %v535_v48, %v539_v49  ;;  %v543_v58 = vld [vmem:[#allocation2 + $0x490] sm:$0xff] }
 0x39d   :  { %v13620_v17 = vcombine.high %v504_v7, %v508_v8  ;;  %v547_v23 = vld [vmem:[#allocation2 + $0x4b0] sm:$0xff] }
 0x39f   :  { %8062 = vmatpush1.bf16.msra.mxu0 %v13569_v18  ;;  %8431 = vmatpush1.bf16.msra.mxu1 %v13571_v20  ;;  %v512_v18 = vld [vmem:[#allocation2 + $0x398] sm:$0xff] }
 0x3a0   :  { %8063 = vmatprep.subr.bf16.mxu0 %v13578_v21  ;;  %8432 = vmatprep.subr.bf16.mxu1 %v13580_v24  ;;  %v516_v20 = vld [vmem:[#allocation2 + $0x3b8] sm:$0xff]  ;;  %v13617_v21 = vcombine.low %v503_v5, %v507_v6  ;;  %v13619_v24 = vcombine.low %v504_v7, %v508_v8  ;;  %v13658_v5 = vcombine.high %v543_v58, %v547_v23  ;;  %v551_v7 = vld [vmem:[#allocation2 + $0x4d0] sm:$0xff] }
 0x3a1   :  { %v13628_v33 = vcombine.high %v512_v18, %v516_v20  ;;  %v555_v8 = vld [vmem:[#allocation2 + $0x4f0] sm:$0xff] }
 0x3a3   :  { %8064 = vmatpush1.bf16.msra.mxu0 %v13577_v31  ;;  %8433 = vmatpush1.bf16.msra.mxu1 %v13579_v32  ;;  %v520_v31 = vld [vmem:[#allocation2 + $0x3d8] sm:$0xff] }
 0x3a4   :  { %8065 = vmatprep.subr.bf16.mxu0 %v13586_v34  ;;  %8434 = vmatprep.subr.bf16.mxu1 %v13588_v35  ;;  %v524_v32 = vld [vmem:[#allocation2 + $0x3f8] sm:$0xff]  ;;  %v13625_v34 = vcombine.low %v511_v62, %v515_v59  ;;  %v13627_v35 = vcombine.low %v512_v18, %v516_v20  ;;  %v559_v59 = vld [vmem:[#allocation2 + $0x510] sm:$0xff] }
 0x3a5   :  { %v13636_v38 = vcombine.high %v520_v31, %v524_v32  ;;  %v563_v18 = vld [vmem:[#allocation2 + $0x530] sm:$0xff]  ;;  %v560_v20 = vld [vmem:[#allocation2 + $0x518] sm:$0xff] }
 0x3a7   :  { %8066 = vmatpush1.bf16.msra.mxu0 %v13585_v57  ;;  %8435 = vmatpush1.bf16.msra.mxu1 %v13587_v9  ;;  %v528_v57 = vld [vmem:[#allocation2 + $0x418] sm:$0xff] }
 0x3a8   :  { %8067 = vmatprep.subr.bf16.mxu0 %v13594_v42  ;;  %8436 = vmatprep.subr.bf16.mxu1 %v13596_v45  ;;  %v532_v9 = vld [vmem:[#allocation2 + $0x438] sm:$0xff]  ;;  %v13633_v42 = vcombine.low %v519_v27, %v523_v30  ;;  %v13635_v45 = vcombine.low %v520_v31, %v524_v32  ;;  %v567_v27 = vld [vmem:[#allocation2 + $0x550] sm:$0xff] }
 0x3a9   :  { %v13644_v47 = vcombine.high %v528_v57, %v532_v9  ;;  %v571_v30 = vld [vmem:[#allocation2 + $0x570] sm:$0xff]  ;;  %v568_v31 = vld [vmem:[#allocation2 + $0x558] sm:$0xff] }
 0x3aa   :  { %v572_v32 = vld [vmem:[#allocation2 + $0x578] sm:$0xff] }
 0x3ab   :  { %8068 = vmatpush1.bf16.msra.mxu0 %v13593_v50  ;;  %8437 = vmatpush1.bf16.msra.mxu1 %v13595_v16  ;;  %v536_v50 = vld [vmem:[#allocation2 + $0x458] sm:$0xff] }
 0x3ac   :  { %8069 = vmatprep.subr.bf16.mxu0 %v13602_v55  ;;  %8438 = vmatprep.subr.bf16.mxu1 %v13604_v52  ;;  %v540_v16 = vld [vmem:[#allocation2 + $0x478] sm:$0xff]  ;;  %v13641_v55 = vcombine.low %v527_v40, %v531_v28  ;;  %v13643_v52 = vcombine.low %v528_v57, %v532_v9  ;;  %v575_v40 = vld [vmem:[#allocation2 + $0x590] sm:$0xff] }
 0x3ad   :  { %v13652_v10 = vcombine.high %v536_v50, %v540_v16  ;;  %v579_v28 = vld [vmem:[#allocation2 + $0x5b0] sm:$0xff]  ;;  %v576_v57 = vld [vmem:[#allocation2 + $0x598] sm:$0xff] }
 0x3ae   :  { %v580_v9 = vld [vmem:[#allocation2 + $0x5b8] sm:$0xff] }
 0x3af   :  { %8070 = vmatpush1.bf16.msra.mxu0 %v13601_v60  ;;  %8439 = vmatpush1.bf16.msra.mxu1 %v13603_v61  ;;  %v544_v60 = vld [vmem:[#allocation2 + $0x498] sm:$0xff] }
 0x3b0   :  { %8071 = vmatprep.subr.bf16.mxu0 %v13610_v2  ;;  %8440 = vmatprep.subr.bf16.mxu1 %v13612_v3  ;;  %v548_v61 = vld [vmem:[#allocation2 + $0x4b8] sm:$0xff]  ;;  %v13649_v2 = vcombine.low %v535_v48, %v539_v49  ;;  %v13651_v3 = vcombine.low %v536_v50, %v540_v16  ;;  %v583_v48 = vld [vmem:[#allocation2 + $0x5d0] sm:$0xff] }
 0x3b1   :  { %v13660_v6 = vcombine.high %v544_v60, %v548_v61  ;;  %v587_v49 = vld [vmem:[#allocation2 + $0x5f0] sm:$0xff]  ;;  %v584_v50 = vld [vmem:[#allocation2 + $0x5d8] sm:$0xff] }
 0x3b2   :  { %v588_v16 = vld [vmem:[#allocation2 + $0x5f8] sm:$0xff] }
 0x3b3   :  { %8072 = vmatpush1.bf16.msra.mxu0 %v13609_v13  ;;  %8441 = vmatpush1.bf16.msra.mxu1 %v13611_v19  ;;  %v552_v13 = vld [vmem:[#allocation2 + $0x4d8] sm:$0xff] }
 0x3b4   :  { %8073 = vmatprep.subr.bf16.mxu0 %v13618_v15  ;;  %8442 = vmatprep.subr.bf16.mxu1 %v13620_v17  ;;  %v556_v19 = vld [vmem:[#allocation2 + $0x4f8] sm:$0xff]  ;;  %v13657_v15 = vcombine.low %v543_v58, %v547_v23  ;;  %v13666_v17 = vcombine.high %v551_v7, %v555_v8  ;;  %v591_v58 = vld [vmem:[#allocation2 + $0x610] sm:$0xff] }
 0x3b5   :  { %v13668_v62 = vcombine.high %v552_v13, %v556_v19  ;;  %v595_v23 = vld [vmem:[#allocation2 + $0x630] sm:$0xff] }
 0x3b7   :  { %8074 = vmatpush1.bf16.msra.mxu0 %v13617_v21  ;;  %8443 = vmatpush1.bf16.msra.mxu1 %v13619_v24  ;;  %v564_v21 = vld [vmem:[#allocation2 + $0x538] sm:$0xff]  ;;  %v13665_v24 = vcombine.low %v551_v7, %v555_v8  ;;  %v599_v7 = vld [vmem:[#allocation2 + $0x650] sm:$0xff] }
 0x3b8   :  { %8075 = vmatprep.subr.bf16.mxu0 %v13626_v53  ;;  %8444 = vmatprep.subr.bf16.mxu1 %v13628_v33  ;;  %v13667_v53 = vcombine.low %v552_v13, %v556_v19  ;;  %v13674_v33 = vcombine.high %v559_v59, %v563_v18  ;;  %v603_v8 = vld [vmem:[#allocation2 + $0x670] sm:$0xff]  ;;  %v600_v13 = vld [vmem:[#allocation2 + $0x658] sm:$0xff] }
 0x3b9   :  { %v604_v19 = vld [vmem:[#allocation2 + $0x678] sm:$0xff] }
 0x3bb   :  { %8076 = vmatpush1.bf16.msra.mxu0 %v13625_v34  ;;  %8445 = vmatpush1.bf16.msra.mxu1 %v13627_v35  ;;  %v13673_v34 = vcombine.low %v559_v59, %v563_v18  ;;  %v13675_v35 = vcombine.low %v560_v20, %v564_v21  ;;  %v607_v59 = vld [vmem:[#allocation2 + $0x690] sm:$0xff] }
 0x3bc   :  { %8077 = vmatprep.subr.bf16.mxu0 %v13634_v63  ;;  %8446 = vmatprep.subr.bf16.mxu1 %v13636_v38  ;;  %v13682_v63 = vcombine.high %v567_v27, %v571_v30  ;;  %v13684_v38 = vcombine.high %v568_v31, %v572_v32  ;;  %v611_v18 = vld [vmem:[#allocation2 + $0x6b0] sm:$0xff] }
 0x3bf   :  { %8078 = vmatpush1.bf16.msra.mxu0 %v13633_v42  ;;  %8447 = vmatpush1.bf16.msra.mxu1 %v13635_v45  ;;  %v13681_v42 = vcombine.low %v567_v27, %v571_v30  ;;  %v13683_v45 = vcombine.low %v568_v31, %v572_v32  ;;  %v615_v27 = vld [vmem:[#allocation2 + $0x6d0] sm:$0xff]  ;;  %v616_v31 = vld [vmem:[#allocation2 + $0x6d8] sm:$0xff] }
 0x3c0   :  { %8088 = vmatprep.subr.bf16.mxu0 %v13642_v46  ;;  %8457 = vmatprep.subr.bf16.mxu1 %v13644_v47  ;;  %v13690_v46 = vcombine.high %v575_v40, %v579_v28  ;;  %v13692_v47 = vcombine.high %v576_v57, %v580_v9  ;;  %v619_v30 = vld [vmem:[#allocation2 + $0x6f0] sm:$0xff]  ;;  %v620_v32 = vld [vmem:[#allocation2 + $0x6f8] sm:$0xff] }
 0x3c2   :  { %8080 = vmatmul.mubr.bf16.vlgmr.msra.gmra.mrb[4].mxu0 %v17219_v25  ;;  %8449 = vmatmul.mubr.bf16.vlgmr.msra.gmra.mrb[4].mxu1 %v17219_v25  ;;  %v13659_v25 = vcombine.low %v544_v60, %v548_v61  ;;  %v592_v60 = vld [vmem:[#allocation2 + $0x618] sm:$0xff] }
 0x3c3   :  { %8089 = vmatpush1.bf16.msra.mxu0 %v13641_v55  ;;  %8458 = vmatpush1.bf16.msra.mxu1 %v13643_v52  ;;  %v13689_v55 = vcombine.low %v575_v40, %v579_v28  ;;  %v13691_v52 = vcombine.low %v576_v57, %v580_v9  ;;  %v596_v61 = vld [vmem:[#allocation2 + $0x638] sm:$0xff]  ;;  %v623_v40 = vld [vmem:[#allocation2 + $0x710] sm:$0xff] }
 0x3c4   :  { %8090 = vmatprep.subr.bf16.mxu0 %v13650_v56  ;;  %8459 = vmatprep.subr.bf16.mxu1 %v13652_v10  ;;  %v13698_v56 = vcombine.high %v583_v48, %v587_v49  ;;  %v13700_v10 = vcombine.high %v584_v50, %v588_v16  ;;  %v627_v28 = vld [vmem:[#allocation2 + $0x730] sm:$0xff]  ;;  %v624_v57 = vld [vmem:[#allocation2 + $0x718] sm:$0xff] }
 0x3c5   :  { %8120 = vmatprep.mubr.bf16.mxu0 %v17221_v36  ;;  %8489 = vmatprep.mubr.bf16.mxu1 %v17221_v36  ;;  %v13676_v36 = vcombine.high %v560_v20, %v564_v21  ;;  %v608_v20 = vld [vmem:[#allocation2 + $0x698] sm:$0xff] }
 0x3c6   :  { %v612_v21 = vld [vmem:[#allocation2 + $0x6b8] sm:$0xff] }
 0x3c7   :  { %8091 = vmatpush1.bf16.msra.mxu0 %v13649_v2  ;;  %8460 = vmatpush1.bf16.msra.mxu1 %v13651_v3  ;;  %v13697_v2 = vcombine.low %v583_v48, %v587_v49  ;;  %v13699_v3 = vcombine.low %v584_v50, %v588_v16  ;;  %v628_v9 = vld [vmem:[#allocation2 + $0x738] sm:$0xff]  ;;  %v631_v48 = vld [vmem:[#allocation2 + $0x750] sm:$0xff] }
 0x3c8   :  { %8092 = vmatprep.subr.bf16.mxu0 %v13658_v5  ;;  %8461 = vmatprep.subr.bf16.mxu1 %v13660_v6  ;;  %v13706_v5 = vcombine.high %v591_v58, %v595_v23  ;;  %v13708_v6 = vcombine.high %v592_v60, %v596_v61  ;;  %v635_v49 = vld [vmem:[#allocation2 + $0x770] sm:$0xff]  ;;  %v632_v50 = vld [vmem:[#allocation2 + $0x758] sm:$0xff] }
 0x3c9   :  { %v636_v16 = vld [vmem:[#allocation2 + $0x778] sm:$0xff] }
 0x3cb   :  { %8093 = vmatpush1.bf16.msra.mxu0 %v13657_v15  ;;  %8462 = vmatpush1.bf16.msra.mxu1 %v13659_v25  ;;  %v13705_v15 = vcombine.low %v591_v58, %v595_v23  ;;  %v13707_v25 = vcombine.low %v592_v60, %v596_v61  ;;  %v639_v58 = vld [vmem:[#allocation2 + $0x790] sm:$0xff]  ;;  %v640_v60 = vld [vmem:[#allocation2 + $0x798] sm:$0xff] }
 0x3cc   :  { %8094 = vmatprep.subr.bf16.mxu0 %v13666_v17  ;;  %8463 = vmatprep.subr.bf16.mxu1 %v13668_v62  ;;  %v13714_v17 = vcombine.high %v599_v7, %v603_v8  ;;  %v13716_v62 = vcombine.high %v600_v13, %v604_v19  ;;  %v643_v23 = vld [vmem:[#allocation2 + $0x7b0] sm:$0xff]  ;;  %v644_v61 = vld [vmem:[#allocation2 + $0x7b8] sm:$0xff] }
 0x3cf   :  { %8095 = vmatpush1.bf16.msra.mxu0 %v13665_v24  ;;  %8464 = vmatpush1.bf16.msra.mxu1 %v13667_v53  ;;  %v13713_v24 = vcombine.low %v599_v7, %v603_v8  ;;  %v13715_v53 = vcombine.low %v600_v13, %v604_v19  ;;  %v647_v7 = vld [vmem:[#allocation2 + $0x7d0] sm:$0xff]  ;;  %v648_v13 = vld [vmem:[#allocation2 + $0x7d8] sm:$0xff] }
 0x3d0   :  { %8096 = vmatprep.subr.bf16.mxu0 %v13674_v33  ;;  %8465 = vmatprep.subr.bf16.mxu1 %v13676_v36  ;;  %v13722_v33 = vcombine.high %v607_v59, %v611_v18  ;;  %v13724_v36 = vcombine.high %v608_v20, %v612_v21  ;;  %v651_v8 = vld [vmem:[#allocation2 + $0x7f0] sm:$0xff]  ;;  %v652_v19 = vld [vmem:[#allocation2 + $0x7f8] sm:$0xff] }
 0x3d3   :  { %8097 = vmatpush1.bf16.msra.mxu0 %v13673_v34  ;;  %8466 = vmatpush1.bf16.msra.mxu1 %v13675_v35  ;;  %v13721_v34 = vcombine.low %v607_v59, %v611_v18  ;;  %v13723_v35 = vcombine.low %v608_v20, %v612_v21  ;;  %v655_v59 = vld [vmem:[#allocation2 + $0x810] sm:$0xff]  ;;  %v656_v20 = vld [vmem:[#allocation2 + $0x818] sm:$0xff] }
 0x3d4   :  { %8098 = vmatprep.subr.bf16.mxu0 %v13682_v63  ;;  %8467 = vmatprep.subr.bf16.mxu1 %v13684_v38  ;;  %v13730_v63 = vcombine.high %v615_v27, %v619_v30  ;;  %v13732_v38 = vcombine.high %v616_v31, %v620_v32  ;;  %v659_v18 = vld [vmem:[#allocation2 + $0x830] sm:$0xff]  ;;  %v660_v21 = vld [vmem:[#allocation2 + $0x838] sm:$0xff] }
 0x3d7   :  { %8099 = vmatpush1.bf16.msra.mxu0 %v13681_v42  ;;  %8468 = vmatpush1.bf16.msra.mxu1 %v13683_v45  ;;  %v13729_v42 = vcombine.low %v615_v27, %v619_v30  ;;  %v13731_v45 = vcombine.low %v616_v31, %v620_v32  ;;  %v663_v27 = vld [vmem:[#allocation2 + $0x850] sm:$0xff]  ;;  %v664_v31 = vld [vmem:[#allocation2 + $0x858] sm:$0xff] }
 0x3d8   :  { %8100 = vmatprep.subr.bf16.mxu0 %v13690_v46  ;;  %8469 = vmatprep.subr.bf16.mxu1 %v13692_v47  ;;  %v13738_v46 = vcombine.high %v623_v40, %v627_v28  ;;  %v13740_v47 = vcombine.high %v624_v57, %v628_v9  ;;  %v667_v30 = vld [vmem:[#allocation2 + $0x870] sm:$0xff]  ;;  %v668_v32 = vld [vmem:[#allocation2 + $0x878] sm:$0xff] }
 0x3db   :  { %8101 = vmatpush1.bf16.msra.mxu0 %v13689_v55  ;;  %8470 = vmatpush1.bf16.msra.mxu1 %v13691_v52  ;;  %v13737_v55 = vcombine.low %v623_v40, %v627_v28  ;;  %v13739_v52 = vcombine.low %v624_v57, %v628_v9  ;;  %v671_v40 = vld [vmem:[#allocation2 + $0x890] sm:$0xff]  ;;  %v672_v57 = vld [vmem:[#allocation2 + $0x898] sm:$0xff] }
 0x3dc   :  { %8102 = vmatprep.subr.bf16.mxu0 %v13698_v56  ;;  %8471 = vmatprep.subr.bf16.mxu1 %v13700_v10  ;;  %v13746_v56 = vcombine.high %v631_v48, %v635_v49  ;;  %v13748_v10 = vcombine.high %v632_v50, %v636_v16  ;;  %v675_v28 = vld [vmem:[#allocation2 + $0x8b0] sm:$0xff]  ;;  %v676_v9 = vld [vmem:[#allocation2 + $0x8b8] sm:$0xff] }
 0x3df   :  { %8103 = vmatpush1.bf16.msra.mxu0 %v13697_v2  ;;  %8472 = vmatpush1.bf16.msra.mxu1 %v13699_v3  ;;  %v13745_v2 = vcombine.low %v631_v48, %v635_v49  ;;  %v13747_v3 = vcombine.low %v632_v50, %v636_v16  ;;  %v679_v48 = vld [vmem:[#allocation2 + $0x8d0] sm:$0xff]  ;;  %v680_v50 = vld [vmem:[#allocation2 + $0x8d8] sm:$0xff] }
 0x3e0   :  { %8104 = vmatprep.subr.bf16.mxu0 %v13706_v5  ;;  %8473 = vmatprep.subr.bf16.mxu1 %v13708_v6  ;;  %v13754_v5 = vcombine.high %v639_v58, %v643_v23  ;;  %v13756_v6 = vcombine.high %v640_v60, %v644_v61  ;;  %v683_v49 = vld [vmem:[#allocation2 + $0x8f0] sm:$0xff]  ;;  %v684_v16 = vld [vmem:[#allocation2 + $0x8f8] sm:$0xff] }
 0x3e3   :  { %8105 = vmatpush1.bf16.msra.mxu0 %v13705_v15  ;;  %8474 = vmatpush1.bf16.msra.mxu1 %v13707_v25  ;;  %v13753_v15 = vcombine.low %v639_v58, %v643_v23  ;;  %v13755_v25 = vcombine.low %v640_v60, %v644_v61  ;;  %v691_v58 = vld [vmem:[#allocation2 + $0x930] sm:$0xff]  ;;  %v688_v23 = vld [vmem:[#allocation2 + $0x918] sm:$0xff]  ;;  %v13793_v61 = vcombine.low %v679_v48, %v683_v49 }
 0x3e4   :  { %8106 = vmatprep.subr.bf16.mxu0 %v13714_v17  ;;  %8475 = vmatprep.subr.bf16.mxu1 %v13716_v62  ;;  %v13762_v17 = vcombine.high %v647_v7, %v651_v8  ;;  %v13764_v62 = vcombine.high %v648_v13, %v652_v19  ;;  %v692_v60 = vld [vmem:[#allocation2 + $0x938] sm:$0xff] }
 0x3e7   :  { %8107 = vmatpush1.bf16.msra.mxu0 %v13713_v24  ;;  %8476 = vmatpush1.bf16.msra.mxu1 %v13715_v53  ;;  %v13761_v24 = vcombine.low %v647_v7, %v651_v8  ;;  %v13763_v53 = vcombine.low %v648_v13, %v652_v19  ;;  %v696_v7 = vld [vmem:[#allocation2 + $0x958] sm:$0xff]  ;;  %v13803_v19 = vcombine.low %v688_v23, %v692_v60 }
 0x3e8   :  { %8108 = vmatprep.subr.bf16.mxu0 %v13722_v33  ;;  %8477 = vmatprep.subr.bf16.mxu1 %v13724_v36  ;;  %v13770_v33 = vcombine.high %v655_v59, %v659_v18  ;;  %v13772_v36 = vcombine.high %v656_v20, %v660_v21  ;;  %v700_v8 = vld [vmem:[#allocation2 + $0x978] sm:$0xff] }
 0x3eb   :  { %8109 = vmatpush1.bf16.msra.mxu0 %v13721_v34  ;;  %8478 = vmatpush1.bf16.msra.mxu1 %v13723_v35  ;;  %v13769_v34 = vcombine.low %v655_v59, %v659_v18  ;;  %v13771_v35 = vcombine.low %v656_v20, %v660_v21  ;;  %v704_v59 = vld [vmem:[#allocation2 + $0x998] sm:$0xff]  ;;  %v13811_v21 = vcombine.low %v696_v7, %v700_v8 }
 0x3ec   :  { %8110 = vmatprep.subr.bf16.mxu0 %v13730_v63  ;;  %8479 = vmatprep.subr.bf16.mxu1 %v13732_v38  ;;  %v13778_v63 = vcombine.high %v663_v27, %v667_v30  ;;  %v13780_v38 = vcombine.high %v664_v31, %v668_v32  ;;  %v708_v18 = vld [vmem:[#allocation2 + $0x9b8] sm:$0xff] }
 0x3ef   :  { %8111 = vmatpush1.bf16.msra.mxu0 %v13729_v42  ;;  %8480 = vmatpush1.bf16.msra.mxu1 %v13731_v45  ;;  %v13777_v42 = vcombine.low %v663_v27, %v667_v30  ;;  %v13779_v45 = vcombine.low %v664_v31, %v668_v32  ;;  %v712_v27 = vld [vmem:[#allocation2 + $0x9d8] sm:$0xff]  ;;  %v13819_v32 = vcombine.low %v704_v59, %v708_v18 }
 0x3f0   :  { %8112 = vmatprep.subr.bf16.mxu0 %v13738_v46  ;;  %8481 = vmatprep.subr.bf16.mxu1 %v13740_v47  ;;  %v13786_v46 = vcombine.high %v671_v40, %v675_v28  ;;  %v13788_v47 = vcombine.high %v672_v57, %v676_v9  ;;  %v716_v30 = vld [vmem:[#allocation2 + $0x9f8] sm:$0xff] }
 0x3f3   :  { %8113 = vmatpush1.bf16.msra.mxu0 %v13737_v55  ;;  %8482 = vmatpush1.bf16.msra.mxu1 %v13739_v52  ;;  %v13785_v55 = vcombine.low %v671_v40, %v675_v28  ;;  %v13794_v52 = vcombine.high %v679_v48, %v683_v49  ;;  %v720_v40 = vld [vmem:[#allocation2 + $0xa18] sm:$0xff] }
 0x3f4   :  { %8114 = vmatprep.subr.bf16.mxu0 %v13746_v56  ;;  %8483 = vmatprep.subr.bf16.mxu1 %v13748_v10  ;;  %v13796_v56 = vcombine.high %v680_v50, %v684_v16  ;;  %v687_v10 = vld [vmem:[#allocation2 + $0x910] sm:$0xff]  ;;  %v724_v28 = vld [vmem:[#allocation2 + $0xa38] sm:$0xff] }
 0x3f5   :  { %v13801_v13 = vcombine.low %v687_v10, %v691_v58  ;;  %v728_v48 = vld [vmem:[#allocation2 + $0xa58] sm:$0xff] }
 0x3f6   :  { %v732_v49 = vld [vmem:[#allocation2 + $0xa78] sm:$0xff] }
 0x3f7   :  { %8115 = vmatpush1.bf16.msra.mxu0 %v13745_v2  ;;  %8484 = vmatpush1.bf16.msra.mxu1 %v13747_v3  ;;  %v13795_v2 = vcombine.low %v680_v50, %v684_v16  ;;  %v13802_v3 = vcombine.high %v687_v10, %v691_v58  ;;  %v13835_v16 = vcombine.low %v720_v40, %v724_v28  ;;  %v736_v10 = vld [vmem:[#allocation2 + $0xa98] sm:$0xff] }
 0x3f8   :  { %8116 = vmatprep.subr.bf16.mxu0 %v13754_v5  ;;  %8485 = vmatprep.subr.bf16.mxu1 %v13756_v6  ;;  %v695_v5 = vld [vmem:[#allocation2 + $0x950] sm:$0xff]  ;;  %v740_v58 = vld [vmem:[#allocation2 + $0xab8] sm:$0xff] }
 0x3f9   :  { %v699_v6 = vld [vmem:[#allocation2 + $0x970] sm:$0xff] }
 0x3fa   :  { %v13809_v20 = vcombine.low %v695_v5, %v699_v6 }
 0x3fb   :  { %8117 = vmatpush1.bf16.msra.mxu0 %v13753_v15  ;;  %8486 = vmatpush1.bf16.msra.mxu1 %v13755_v25  ;;  %v13810_v15 = vcombine.high %v695_v5, %v699_v6  ;;  %v13812_v25 = vcombine.high %v696_v7, %v700_v8  ;;  %v744_v5 = vld [vmem:[#allocation2 + $0xad8] sm:$0xff]  ;;  %v13851_v8 = vcombine.low %v736_v10, %v740_v58 }
 0x3fc   :  { %8118 = vmatprep.subr.bf16.mxu0 %v13762_v17  ;;  %8487 = vmatprep.subr.bf16.mxu1 %v13764_v62  ;;  %v703_v17 = vld [vmem:[#allocation2 + $0x990] sm:$0xff]  ;;  %v748_v6 = vld [vmem:[#allocation2 + $0xaf8] sm:$0xff] }
 0x3fd   :  { %v707_v62 = vld [vmem:[#allocation2 + $0x9b0] sm:$0xff] }
 0x3fe   :  { %v13817_v31 = vcombine.low %v703_v17, %v707_v62 }
 0x3ff   :  { %8119 = vmatpush1.bf16.msra.mxu0 %v13761_v24  ;;  %8488 = vmatpush1.bf16.msra.mxu1 %v13763_v53  ;;  %v13818_v24 = vcombine.high %v703_v17, %v707_v62  ;;  %v13820_v53 = vcombine.high %v704_v59, %v708_v18  ;;  %v752_v17 = vld [vmem:[#allocation2 + $0xb18] sm:$0xff]  ;;  %v13859_v18 = vcombine.low %v744_v5, %v748_v6 }
 0x400   :  { %8129 = vmatprep.subr.bf16.mxu0 %v13770_v33  ;;  %8498 = vmatprep.subr.bf16.mxu1 %v13772_v36  ;;  %v711_v33 = vld [vmem:[#allocation2 + $0x9d0] sm:$0xff]  ;;  %v756_v62 = vld [vmem:[#allocation2 + $0xb38] sm:$0xff] }
 0x401   :  { %v715_v36 = vld [vmem:[#allocation2 + $0x9f0] sm:$0xff] }
 0x402   :  { %8121 = vmatmul.mubr.bf16.vlgmr.msra.gmra.mrb[4].mxu0 %v17240_v43  ;;  %8490 = vmatmul.mubr.bf16.vlgmr.msra.gmra.mrb[4].mxu1 %v17240_v43  ;;  %v13787_v43 = vcombine.low %v672_v57, %v676_v9  ;;  %v13825_v57 = vcombine.low %v711_v33, %v715_v36  ;;  %v13827_v9 = vcombine.low %v712_v27, %v716_v30 }
 0x403   :  { %8130 = vmatpush1.bf16.msra.mxu0 %v13769_v34  ;;  %8499 = vmatpush1.bf16.msra.mxu1 %v13771_v35  ;;  %v13826_v34 = vcombine.high %v711_v33, %v715_v36  ;;  %v13828_v35 = vcombine.high %v712_v27, %v716_v30  ;;  %v760_v33 = vld [vmem:[#allocation2 + $0xb58] sm:$0xff]  ;;  %v13867_v30 = vcombine.low %v752_v17, %v756_v62 }
 0x404   :  { %8131 = vmatprep.subr.bf16.mxu0 %v13778_v63  ;;  %8500 = vmatprep.subr.bf16.mxu1 %v13780_v38  ;;  %v719_v63 = vld [vmem:[#allocation2 + $0xa10] sm:$0xff]  ;;  %v764_v36 = vld [vmem:[#allocation2 + $0xb78] sm:$0xff] }
 0x405   :  { %8161 = vmatprep.mubr.bf16.mxu0 %v17242_v54  ;;  %8530 = vmatprep.mubr.bf16.mxu1 %v17242_v54  ;;  %v13804_v54 = vcombine.high %v688_v23, %v692_v60  ;;  %v723_v38 = vld [vmem:[#allocation2 + $0xa30] sm:$0xff]  ;;  %v13843_v60 = vcombine.low %v728_v48, %v732_v49 }
 0x406   :  { %v13833_v50 = vcombine.low %v719_v63, %v723_v38 }
 0x407   :  { %8132 = vmatpush1.bf16.msra.mxu0 %v13777_v42  ;;  %8501 = vmatpush1.bf16.msra.mxu1 %v13779_v45  ;;  %v13834_v42 = vcombine.high %v719_v63, %v723_v38  ;;  %v13836_v45 = vcombine.high %v720_v40, %v724_v28  ;;  %v768_v63 = vld [vmem:[#allocation2 + $0xb98] sm:$0xff]  ;;  %v13875_v28 = vcombine.low %v760_v33, %v764_v36 }
 0x408   :  { %8133 = vmatprep.subr.bf16.mxu0 %v13786_v46  ;;  %8502 = vmatprep.subr.bf16.mxu1 %v13788_v47  ;;  %v727_v46 = vld [vmem:[#allocation2 + $0xa50] sm:$0xff]  ;;  %v772_v38 = vld [vmem:[#allocation2 + $0xbb8] sm:$0xff] }
 0x409   :  { %v731_v47 = vld [vmem:[#allocation2 + $0xa70] sm:$0xff] }
 0x40a   :  { %v13841_v23 = vcombine.low %v727_v46, %v731_v47 }
 0x40b   :  { %8134 = vmatpush1.bf16.msra.mxu0 %v13785_v55  ;;  %8503 = vmatpush1.bf16.msra.mxu1 %v13787_v43  ;;  %v13842_v55 = vcombine.high %v727_v46, %v731_v47  ;;  %v13844_v43 = vcombine.high %v728_v48, %v732_v49  ;;  %v776_v46 = vld [vmem:[#allocation2 + $0xbd8] sm:$0xff]  ;;  %v13883_v49 = vcombine.low %v768_v63, %v772_v38 }
 0x40c   :  { %8135 = vmatprep.subr.bf16.mxu0 %v13794_v52  ;;  %8504 = vmatprep.subr.bf16.mxu1 %v13796_v56  ;;  %v735_v52 = vld [vmem:[#allocation2 + $0xa90] sm:$0xff]  ;;  %v780_v47 = vld [vmem:[#allocation2 + $0xbf8] sm:$0xff] }
 0x40d   :  { %v739_v56 = vld [vmem:[#allocation2 + $0xab0] sm:$0xff] }
 0x40e   :  { %v13849_v7 = vcombine.low %v735_v52, %v739_v56 }
 0x40f   :  { %8136 = vmatpush1.bf16.msra.mxu0 %v13793_v61  ;;  %8505 = vmatpush1.bf16.msra.mxu1 %v13795_v2  ;;  %v13850_v61 = vcombine.high %v735_v52, %v739_v56  ;;  %v13852_v2 = vcombine.high %v736_v10, %v740_v58  ;;  %v784_v52 = vld [vmem:[#allocation2 + $0xc18] sm:$0xff]  ;;  %v13891_v58 = vcombine.low %v776_v46, %v780_v47 }
 0x410   :  { %8137 = vmatprep.subr.bf16.mxu0 %v13802_v3  ;;  %8506 = vmatprep.subr.bf16.mxu1 %v13804_v54  ;;  %v743_v3 = vld [vmem:[#allocation2 + $0xad0] sm:$0xff]  ;;  %v788_v56 = vld [vmem:[#allocation2 + $0xc38] sm:$0xff] }
 0x411   :  { %v747_v54 = vld [vmem:[#allocation2 + $0xaf0] sm:$0xff] }
 0x412   :  { %v13857_v59 = vcombine.low %v743_v3, %v747_v54 }
 0x413   :  { %8138 = vmatpush1.bf16.msra.mxu0 %v13801_v13  ;;  %8507 = vmatpush1.bf16.msra.mxu1 %v13803_v19  ;;  %v13858_v13 = vcombine.high %v743_v3, %v747_v54  ;;  %v13860_v19 = vcombine.high %v744_v5, %v748_v6  ;;  %v792_v3 = vld [vmem:[#allocation2 + $0xc58] sm:$0xff]  ;;  %v13899_v6 = vcombine.low %v784_v52, %v788_v56 }
 0x414   :  { %8139 = vmatprep.subr.bf16.mxu0 %v13810_v15  ;;  %8508 = vmatprep.subr.bf16.mxu1 %v13812_v25  ;;  %v751_v15 = vld [vmem:[#allocation2 + $0xb10] sm:$0xff]  ;;  %v796_v54 = vld [vmem:[#allocation2 + $0xc78] sm:$0xff] }
 0x415   :  { %v755_v25 = vld [vmem:[#allocation2 + $0xb30] sm:$0xff] }
 0x416   :  { %v13865_v27 = vcombine.low %v751_v15, %v755_v25 }
 0x417   :  { %8140 = vmatpush1.bf16.msra.mxu0 %v13809_v20  ;;  %8509 = vmatpush1.bf16.msra.mxu1 %v13811_v21  ;;  %v13866_v20 = vcombine.high %v751_v15, %v755_v25  ;;  %v13868_v21 = vcombine.high %v752_v17, %v756_v62  ;;  %v800_v15 = vld [vmem:[#allocation2 + $0xc98] sm:$0xff]  ;;  %v13907_v62 = vcombine.low %v792_v3, %v796_v54 }
 0x418   :  { %8141 = vmatprep.subr.bf16.mxu0 %v13818_v24  ;;  %8510 = vmatprep.subr.bf16.mxu1 %v13820_v53  ;;  %v759_v24 = vld [vmem:[#allocation2 + $0xb50] sm:$0xff]  ;;  %v804_v25 = vld [vmem:[#allocation2 + $0xcb8] sm:$0xff] }
 0x419   :  { %v763_v53 = vld [vmem:[#allocation2 + $0xb70] sm:$0xff] }
 0x41a   :  { %v13873_v40 = vcombine.low %v759_v24, %v763_v53 }
 0x41b   :  { %8142 = vmatpush1.bf16.msra.mxu0 %v13817_v31  ;;  %8511 = vmatpush1.bf16.msra.mxu1 %v13819_v32  ;;  %v13874_v31 = vcombine.high %v759_v24, %v763_v53  ;;  %v13876_v32 = vcombine.high %v760_v33, %v764_v36  ;;  %v808_v24 = vld [vmem:[#allocation2 + $0xcd8] sm:$0xff] }
 0x41c   :  { %8143 = vmatprep.subr.bf16.mxu0 %v13826_v34  ;;  %8512 = vmatprep.subr.bf16.mxu1 %v13828_v35  ;;  %v767_v34 = vld [vmem:[#allocation2 + $0xb90] sm:$0xff]  ;;  %v812_v53 = vld [vmem:[#allocation2 + $0xcf8] sm:$0xff] }
 0x41d   :  { %v771_v35 = vld [vmem:[#allocation2 + $0xbb0] sm:$0xff] }
 0x41e   :  { %v13881_v48 = vcombine.low %v767_v34, %v771_v35 }
 0x41f   :  { %8144 = vmatpush1.bf16.msra.mxu0 %v13825_v57  ;;  %8513 = vmatpush1.bf16.msra.mxu1 %v13827_v9  ;;  %v13882_v57 = vcombine.high %v767_v34, %v771_v35  ;;  %v13884_v9 = vcombine.high %v768_v63, %v772_v38  ;;  %v820_v34 = vld [vmem:[#allocation2 + $0xd38] sm:$0xff]  ;;  %v13923_v63 = vcombine.low %v808_v24, %v812_v53 }
 0x420   :  { %8145 = vmatprep.subr.bf16.mxu0 %v13834_v42  ;;  %8514 = vmatprep.subr.bf16.mxu1 %v13836_v45  ;;  %v775_v42 = vld [vmem:[#allocation2 + $0xbd0] sm:$0xff] }
 0x421   :  { %v779_v45 = vld [vmem:[#allocation2 + $0xbf0] sm:$0xff] }
 0x422   :  { %v13889_v10 = vcombine.low %v775_v42, %v779_v45 }
 0x423   :  { %8146 = vmatpush1.bf16.msra.mxu0 %v13833_v50  ;;  %8515 = vmatpush1.bf16.msra.mxu1 %v13835_v16  ;;  %v13890_v50 = vcombine.high %v775_v42, %v779_v45  ;;  %v13892_v16 = vcombine.high %v776_v46, %v780_v47 }
 0x424   :  { %8147 = vmatprep.subr.bf16.mxu0 %v13842_v55  ;;  %8516 = vmatprep.subr.bf16.mxu1 %v13844_v43  ;;  %v783_v55 = vld [vmem:[#allocation2 + $0xc10] sm:$0xff] }
 0x425   :  { %v787_v43 = vld [vmem:[#allocation2 + $0xc30] sm:$0xff] }
 0x426   :  { %v13897_v5 = vcombine.low %v783_v55, %v787_v43 }
 0x427   :  { %8148 = vmatpush1.bf16.msra.mxu0 %v13841_v23  ;;  %8517 = vmatpush1.bf16.msra.mxu1 %v13843_v60  ;;  %v13898_v23 = vcombine.high %v783_v55, %v787_v43  ;;  %v13900_v60 = vcombine.high %v784_v52, %v788_v56 }
 0x428   :  { %8149 = vmatprep.subr.bf16.mxu0 %v13850_v61  ;;  %8518 = vmatprep.subr.bf16.mxu1 %v13852_v2  ;;  %v791_v61 = vld [vmem:[#allocation2 + $0xc50] sm:$0xff] }
 0x429   :  { %v795_v2 = vld [vmem:[#allocation2 + $0xc70] sm:$0xff] }
 0x42a   :  { %v13905_v17 = vcombine.low %v791_v61, %v795_v2 }
 0x42b   :  { %8150 = vmatpush1.bf16.msra.mxu0 %v13849_v7  ;;  %8519 = vmatpush1.bf16.msra.mxu1 %v13851_v8  ;;  %v13906_v7 = vcombine.high %v791_v61, %v795_v2  ;;  %v13908_v8 = vcombine.high %v792_v3, %v796_v54  ;;  %v840_v2 = vld [vmem:[#allocation2 + $0xdd8] sm:$0xff] }
 0x42c   :  { %8151 = vmatprep.subr.bf16.mxu0 %v13858_v13  ;;  %8520 = vmatprep.subr.bf16.mxu1 %v13860_v19  ;;  %v799_v13 = vld [vmem:[#allocation2 + $0xc90] sm:$0xff]  ;;  %v844_v3 = vld [vmem:[#allocation2 + $0xdf8] sm:$0xff] }
 0x42d   :  { %v803_v19 = vld [vmem:[#allocation2 + $0xcb0] sm:$0xff] }
 0x42e   :  { %v13913_v33 = vcombine.low %v799_v13, %v803_v19 }
 0x42f   :  { %8152 = vmatpush1.bf16.msra.mxu0 %v13857_v59  ;;  %8521 = vmatpush1.bf16.msra.mxu1 %v13859_v18  ;;  %v13914_v59 = vcombine.high %v799_v13, %v803_v19  ;;  %v13916_v18 = vcombine.high %v800_v15, %v804_v25 }
 0x430   :  { %8153 = vmatprep.subr.bf16.mxu0 %v13866_v20  ;;  %8522 = vmatprep.subr.bf16.mxu1 %v13868_v21  ;;  %v807_v20 = vld [vmem:[#allocation2 + $0xcd0] sm:$0xff] }
 0x431   :  { %v811_v21 = vld [vmem:[#allocation2 + $0xcf0] sm:$0xff] }
 0x432   :  { %v13922_v36 = vcombine.high %v807_v20, %v811_v21  ;;  %v13921_v35 = vcombine.low %v807_v20, %v811_v21  ;;  %v13955_v21 = vcombine.low %v840_v2, %v844_v3 }
 0x433   :  { %8154 = vmatpush1.bf16.msra.mxu0 %v13865_v27  ;;  %8523 = vmatpush1.bf16.msra.mxu1 %v13867_v30  ;;  %v13924_v27 = vcombine.high %v808_v24, %v812_v53  ;;  %v815_v30 = vld [vmem:[#allocation2 + $0xd10] sm:$0xff] }
 0x434   :  { %8155 = vmatprep.subr.bf16.mxu0 %v13874_v31  ;;  %8524 = vmatprep.subr.bf16.mxu1 %v13876_v32  ;;  %v819_v31 = vld [vmem:[#allocation2 + $0xd30] sm:$0xff]  ;;  %v816_v32 = vld [vmem:[#allocation2 + $0xd18] sm:$0xff] }
 0x435   :  { %v13930_v38 = vcombine.high %v815_v30, %v819_v31  ;;  %v13929_v42 = vcombine.low %v815_v30, %v819_v31  ;;  %v13931_v45 = vcombine.low %v816_v32, %v820_v34 }
 0x437   :  { %8156 = vmatpush1.bf16.msra.mxu0 %v13873_v40  ;;  %8525 = vmatpush1.bf16.msra.mxu1 %v13875_v28  ;;  %v823_v40 = vld [vmem:[#allocation2 + $0xd50] sm:$0xff] }
 0x438   :  { %8157 = vmatprep.subr.bf16.mxu0 %v13882_v57  ;;  %8526 = vmatprep.subr.bf16.mxu1 %v13884_v9  ;;  %v827_v28 = vld [vmem:[#allocation2 + $0xd70] sm:$0xff]  ;;  %v824_v57 = vld [vmem:[#allocation2 + $0xd58] sm:$0xff] }
 0x439   :  { %v828_v9 = vld [vmem:[#allocation2 + $0xd78] sm:$0xff]  ;;  %v13938_v46 = vcombine.high %v823_v40, %v827_v28  ;;  %v13937_v55 = vcombine.low %v823_v40, %v827_v28 }
 0x43a   :  { %v13940_v47 = vcombine.high %v824_v57, %v828_v9  ;;  %v13939_v43 = vcombine.low %v824_v57, %v828_v9 }
 0x43b   :  { %8158 = vmatpush1.bf16.msra.mxu0 %v13881_v48  ;;  %8527 = vmatpush1.bf16.msra.mxu1 %v13883_v49  ;;  %v831_v48 = vld [vmem:[#allocation2 + $0xd90] sm:$0xff] }
 0x43c   :  { %8159 = vmatprep.subr.bf16.mxu0 %v13890_v50  ;;  %8528 = vmatprep.subr.bf16.mxu1 %v13892_v16  ;;  %v835_v49 = vld [vmem:[#allocation2 + $0xdb0] sm:$0xff]  ;;  %v832_v50 = vld [vmem:[#allocation2 + $0xd98] sm:$0xff] }
 0x43d   :  { %v836_v16 = vld [vmem:[#allocation2 + $0xdb8] sm:$0xff]  ;;  %v13946_v52 = vcombine.high %v831_v48, %v835_v49 }
 0x43e   :  { %v13947_v13 = vcombine.low %v832_v50, %v836_v16 }
 0x43f   :  { %8160 = vmatpush1.bf16.msra.mxu0 %v13889_v10  ;;  %8529 = vmatpush1.bf16.msra.mxu1 %v13891_v58  ;;  %v13948_v10 = vcombine.high %v832_v50, %v836_v16  ;;  %v839_v58 = vld [vmem:[#allocation2 + $0xdd0] sm:$0xff] }
 0x440   :  { %8170 = vmatprep.subr.bf16.mxu0 %v13898_v23  ;;  %8539 = vmatprep.subr.bf16.mxu1 %v13900_v60  ;;  %v843_v23 = vld [vmem:[#allocation2 + $0xdf0] sm:$0xff] }
 0x441   :  { %v13954_v19 = vcombine.high %v839_v58, %v843_v23  ;;  %v13953_v20 = vcombine.low %v839_v58, %v843_v23 }
 0x442   :  { %8162 = vmatmul.mubr.bf16.vlgmr.msra.gmra.mrb[4].mxu0 %v17257_v4  ;;  %8531 = vmatmul.mubr.bf16.vlgmr.msra.gmra.mrb[4].mxu1 %v17257_v4  ;;  %v13915_v4 = vcombine.low %v800_v15, %v804_v25  ;;  %v13956_v25 = vcombine.high %v840_v2, %v844_v3 }
 0x443   :  { %8171 = vmatpush1.bf16.msra.mxu0 %v13897_v5  ;;  %8540 = vmatpush1.bf16.msra.mxu1 %v13899_v6  ;;  %v13945_v6 = vcombine.low %v831_v48, %v835_v49 }
 0x444   :  { %8172 = vmatprep.subr.bf16.mxu0 %v13906_v7  ;;  %8541 = vmatprep.subr.bf16.mxu1 %v13908_v8 }
 0x445   :  { %8202 = vmatprep.mubr.bf16.mxu0 %v17259_v14  ;;  %8571 = vmatprep.mubr.bf16.mxu1 %v17259_v14  ;;  %v13932_v14 = vcombine.high %v816_v32, %v820_v34 }
 0x447   :  { %8173 = vmatpush1.bf16.msra.mxu0 %v13905_v17  ;;  %8542 = vmatpush1.bf16.msra.mxu1 %v13907_v62  ;;  %v847_v17 = vld [vmem:[#allocation2 + $0xe10] sm:$0xff] }
 0x448   :  { %8174 = vmatprep.subr.bf16.mxu0 %v13914_v59  ;;  %8543 = vmatprep.subr.bf16.mxu1 %v13916_v18  ;;  %v851_v62 = vld [vmem:[#allocation2 + $0xe30] sm:$0xff]  ;;  %v848_v59 = vld [vmem:[#allocation2 + $0xe18] sm:$0xff] }
 0x449   :  { %v852_v18 = vld [vmem:[#allocation2 + $0xe38] sm:$0xff]  ;;  %v13962_v24 = vcombine.high %v847_v17, %v851_v62  ;;  %v13961_v30 = vcombine.low %v847_v17, %v851_v62  ;;  %v895_v17 = vld [vmem:[#allocation2 + $0xf90] sm:$0xff] }
 0x44a   :  { %v13964_v53 = vcombine.high %v848_v59, %v852_v18  ;;  %v13963_v31 = vcombine.low %v848_v59, %v852_v18  ;;  %v899_v62 = vld [vmem:[#allocation2 + $0xfb0] sm:$0xff]  ;;  %v896_v59 = vld [vmem:[#allocation2 + $0xf98] sm:$0xff] }
 0x44b   :  { %8175 = vmatpush1.bf16.msra.mxu0 %v13913_v33  ;;  %8544 = vmatpush1.bf16.msra.mxu1 %v13915_v4  ;;  %v855_v33 = vld [vmem:[#allocation2 + $0xe50] sm:$0xff]  ;;  %v900_v18 = vld [vmem:[#allocation2 + $0xfb8] sm:$0xff] }
 0x44c   :  { %8176 = vmatprep.subr.bf16.mxu0 %v13922_v36  ;;  %8545 = vmatprep.subr.bf16.mxu1 %v13924_v27  ;;  %v859_v4 = vld [vmem:[#allocation2 + $0xe70] sm:$0xff]  ;;  %v856_v36 = vld [vmem:[#allocation2 + $0xe58] sm:$0xff] }
 0x44d   :  { %v860_v27 = vld [vmem:[#allocation2 + $0xe78] sm:$0xff]  ;;  %v13970_v32 = vcombine.high %v855_v33, %v859_v4  ;;  %v13969_v40 = vcombine.low %v855_v33, %v859_v4  ;;  %v903_v33 = vld [vmem:[#allocation2 + $0xfd0] sm:$0xff] }
 0x44e   :  { %v13972_v34 = vcombine.high %v856_v36, %v860_v27  ;;  %v13971_v28 = vcombine.low %v856_v36, %v860_v27  ;;  %v907_v4 = vld [vmem:[#allocation2 + $0xff0] sm:$0xff]  ;;  %v904_v36 = vld [vmem:[#allocation2 + $0xfd8] sm:$0xff] }
 0x44f   :  { %8177 = vmatpush1.bf16.msra.mxu0 %v13921_v35  ;;  %8546 = vmatpush1.bf16.msra.mxu1 %v13923_v63  ;;  %v863_v35 = vld [vmem:[#allocation2 + $0xe90] sm:$0xff]  ;;  %v908_v27 = vld [vmem:[#allocation2 + $0xff8] sm:$0xff] }
 0x450   :  { %8178 = vmatprep.subr.bf16.mxu0 %v13930_v38  ;;  %8547 = vmatprep.subr.bf16.mxu1 %v13932_v14  ;;  %v867_v63 = vld [vmem:[#allocation2 + $0xeb0] sm:$0xff]  ;;  %v864_v38 = vld [vmem:[#allocation2 + $0xe98] sm:$0xff] }
 0x451   :  { %v868_v14 = vld [vmem:[#allocation2 + $0xeb8] sm:$0xff]  ;;  %v13978_v57 = vcombine.high %v863_v35, %v867_v63  ;;  %v13977_v48 = vcombine.low %v863_v35, %v867_v63  ;;  %v911_v35 = vld [vmem:[#allocation2 + $0x1010] sm:$0xff] }
 0x452   :  { %v13980_v9 = vcombine.high %v864_v38, %v868_v14  ;;  %v13979_v49 = vcombine.low %v864_v38, %v868_v14  ;;  %v915_v63 = vld [vmem:[#allocation2 + $0x1030] sm:$0xff]  ;;  %v912_v38 = vld [vmem:[#allocation2 + $0x1018] sm:$0xff] }
 0x453   :  { %8179 = vmatpush1.bf16.msra.mxu0 %v13929_v42  ;;  %8548 = vmatpush1.bf16.msra.mxu1 %v13931_v45  ;;  %v871_v42 = vld [vmem:[#allocation2 + $0xed0] sm:$0xff]  ;;  %v916_v14 = vld [vmem:[#allocation2 + $0x1038] sm:$0xff] }
 0x454   :  { %8180 = vmatprep.subr.bf16.mxu0 %v13938_v46  ;;  %8549 = vmatprep.subr.bf16.mxu1 %v13940_v47  ;;  %v875_v45 = vld [vmem:[#allocation2 + $0xef0] sm:$0xff]  ;;  %v872_v46 = vld [vmem:[#allocation2 + $0xed8] sm:$0xff] }
 0x455   :  { %v17378_v56 = vpop.f32.mrb[0].mxu0  ;;  %v17380_v60 = vpop.f32.mrb[0].mxu1  ;;  %v876_v47 = vld [vmem:[#allocation2 + $0xef8] sm:$0xff]  ;;  %v13986_v50 = vcombine.high %v871_v42, %v875_v45  ;;  %v13985_v58 = vcombine.low %v871_v42, %v875_v45  ;;  %v919_v42 = vld [vmem:[#allocation2 + $0x1050] sm:$0xff] }
 0x456   :  { %v17382_v61 = vpop.f32.mrb[1].mxu0  ;;  %v17384_v54 = vpop.f32.mrb[1].mxu1  ;;  %v13988_v16 = vcombine.high %v872_v46, %v876_v47  ;;  %v13987_v23 = vcombine.low %v872_v46, %v876_v47  ;;  %v923_v45 = vld [vmem:[#allocation2 + $0x1070] sm:$0xff]  ;;  %v920_v46 = vld [vmem:[#allocation2 + $0x1058] sm:$0xff] }
 0x457   :  { %v7675_v5 = vpop.f32.mrb[2].mxu0  ;;  %8181 = vmatpush1.bf16.msra.mxu0 %v13937_v55  ;;  %v8044_v7 = vpop.f32.mrb[2].mxu1  ;;  %8550 = vmatpush1.bf16.msra.mxu1 %v13939_v43  ;;  %v879_v55 = vld [vmem:[#allocation2 + $0xf10] sm:$0xff]  ;;  %v924_v47 = vld [vmem:[#allocation2 + $0x1078] sm:$0xff] }
 0x458   :  { %v7676_v8 = vpop.f32.mrb[3].mxu0  ;;  %8182 = vmatprep.subr.bf16.mxu0 %v13946_v52  ;;  %v8045_v15 = vpop.f32.mrb[3].mxu1  ;;  %8551 = vmatprep.subr.bf16.mxu1 %v13948_v10  ;;  %v883_v43 = vld [vmem:[#allocation2 + $0xf30] sm:$0xff]  ;;  %v880_v52 = vld [vmem:[#allocation2 + $0xf18] sm:$0xff] }
 0x459   :  { %v884_v10 = vld [vmem:[#allocation2 + $0xf38] sm:$0xff]  ;;  %v13994_v2 = vcombine.high %v879_v55, %v883_v43  ;;  %v887_v5 = vld [vmem:[#allocation2 + $0xf50] sm:$0xff] }
 0x45a   :  { %v13996_v3 = vcombine.high %v880_v52, %v884_v10  ;;  %v888_v7 = vld [vmem:[#allocation2 + $0xf58] sm:$0xff] }
 0x45b   :  { %8183 = vmatpush1.bf16.msra.mxu0 %v13945_v6  ;;  %8552 = vmatpush1.bf16.msra.mxu1 %v13947_v13  ;;  %v891_v6 = vld [vmem:[#allocation2 + $0xf70] sm:$0xff]  ;;  %v892_v8 = vld [vmem:[#allocation2 + $0xf78] sm:$0xff]  ;;  %v13993_v13 = vcombine.low %v879_v55, %v883_v43 }
 0x45c   :  { %8184 = vmatprep.subr.bf16.mxu0 %v13954_v19  ;;  %8553 = vmatprep.subr.bf16.mxu1 %v13956_v25  ;;  %v13995_v19 = vcombine.low %v880_v52, %v884_v10  ;;  %v14002_v15 = vcombine.high %v887_v5, %v891_v6  ;;  %v14004_v25 = vcombine.high %v888_v7, %v892_v8  ;;  %v927_v55 = vld [vmem:[#allocation2 + $0x1090] sm:$0xff]  ;;  %v928_v52 = vld [vmem:[#allocation2 + $0x1098] sm:$0xff] }
 0x45d   :  { %v931_v43 = vld [vmem:[#allocation2 + $0x10b0] sm:$0xff]  ;;  %v932_v10 = vld [vmem:[#allocation2 + $0x10b8] sm:$0xff] }
 0x45f   :  { %8185 = vmatpush1.bf16.msra.mxu0 %v13953_v20  ;;  %8554 = vmatpush1.bf16.msra.mxu1 %v13955_v21  ;;  %v14001_v20 = vcombine.low %v887_v5, %v891_v6  ;;  %v14003_v21 = vcombine.low %v888_v7, %v892_v8  ;;  %v935_v5 = vld [vmem:[#allocation2 + $0x10d0] sm:$0xff]  ;;  %v936_v7 = vld [vmem:[#allocation2 + $0x10d8] sm:$0xff] }
 0x460   :  { %8186 = vmatprep.subr.bf16.mxu0 %v13962_v24  ;;  %8555 = vmatprep.subr.bf16.mxu1 %v13964_v53  ;;  %v14010_v24 = vcombine.high %v895_v17, %v899_v62  ;;  %v14012_v53 = vcombine.high %v896_v59, %v900_v18  ;;  %v939_v6 = vld [vmem:[#allocation2 + $0x10f0] sm:$0xff]  ;;  %v940_v8 = vld [vmem:[#allocation2 + $0x10f8] sm:$0xff] }
 0x463   :  { %8187 = vmatpush1.bf16.msra.mxu0 %v13961_v30  ;;  %8556 = vmatpush1.bf16.msra.mxu1 %v13963_v31  ;;  %v14009_v30 = vcombine.low %v895_v17, %v899_v62  ;;  %v14011_v31 = vcombine.low %v896_v59, %v900_v18  ;;  %v947_v17 = vld [vmem:[#allocation2 + $0x1130] sm:$0xff]  ;;  %v944_v62 = vld [vmem:[#allocation2 + $0x1118] sm:$0xff]  ;;  %v14049_v18 = vcombine.low %v935_v5, %v939_v6 }
 0x464   :  { %8188 = vmatprep.subr.bf16.mxu0 %v13970_v32  ;;  %8557 = vmatprep.subr.bf16.mxu1 %v13972_v34  ;;  %v14018_v32 = vcombine.high %v903_v33, %v907_v4  ;;  %v14020_v34 = vcombine.high %v904_v36, %v908_v27  ;;  %v948_v59 = vld [vmem:[#allocation2 + $0x1138] sm:$0xff] }
 0x467   :  { %8189 = vmatpush1.bf16.msra.mxu0 %v13969_v40  ;;  %8558 = vmatpush1.bf16.msra.mxu1 %v13971_v28  ;;  %v14017_v40 = vcombine.low %v903_v33, %v907_v4  ;;  %v14019_v28 = vcombine.low %v904_v36, %v908_v27  ;;  %v952_v33 = vld [vmem:[#allocation2 + $0x1158] sm:$0xff]  ;;  %v14059_v27 = vcombine.low %v944_v62, %v948_v59 }
 0x468   :  { %8190 = vmatprep.subr.bf16.mxu0 %v13978_v57  ;;  %8559 = vmatprep.subr.bf16.mxu1 %v13980_v9  ;;  %v14026_v57 = vcombine.high %v911_v35, %v915_v63  ;;  %v14028_v9 = vcombine.high %v912_v38, %v916_v14  ;;  %v956_v4 = vld [vmem:[#allocation2 + $0x1178] sm:$0xff] }
 0x46b   :  { %8191 = vmatpush1.bf16.msra.mxu0 %v13977_v48  ;;  %8560 = vmatpush1.bf16.msra.mxu1 %v13979_v49  ;;  %v14025_v48 = vcombine.low %v911_v35, %v915_v63  ;;  %v14027_v49 = vcombine.low %v912_v38, %v916_v14  ;;  %v960_v35 = vld [vmem:[#allocation2 + $0x1198] sm:$0xff]  ;;  %v14067_v14 = vcombine.low %v952_v33, %v956_v4 }
 0x46c   :  { %8192 = vmatprep.subr.bf16.mxu0 %v13986_v50  ;;  %8561 = vmatprep.subr.bf16.mxu1 %v13988_v16  ;;  %v14034_v50 = vcombine.high %v919_v42, %v923_v45  ;;  %v14036_v16 = vcombine.high %v920_v46, %v924_v47  ;;  %v964_v63 = vld [vmem:[#allocation2 + $0x11b8] sm:$0xff] }
 0x46f   :  { %8193 = vmatpush1.bf16.msra.mxu0 %v13985_v58  ;;  %8562 = vmatpush1.bf16.msra.mxu1 %v13987_v23  ;;  %v14033_v58 = vcombine.low %v919_v42, %v923_v45  ;;  %v14035_v23 = vcombine.low %v920_v46, %v924_v47  ;;  %v968_v42 = vld [vmem:[#allocation2 + $0x11d8] sm:$0xff]  ;;  %v14075_v47 = vcombine.low %v960_v35, %v964_v63 }
 0x470   :  { %8194 = vmatprep.subr.bf16.mxu0 %v13994_v2  ;;  %8563 = vmatprep.subr.bf16.mxu1 %v13996_v3  ;;  %v14042_v2 = vcombine.high %v927_v55, %v931_v43  ;;  %v14044_v3 = vcombine.high %v928_v52, %v932_v10  ;;  %v972_v45 = vld [vmem:[#allocation2 + $0x11f8] sm:$0xff] }
 0x473   :  { %8195 = vmatpush1.bf16.msra.mxu0 %v13993_v13  ;;  %8564 = vmatpush1.bf16.msra.mxu1 %v13995_v19  ;;  %v14041_v13 = vcombine.low %v927_v55, %v931_v43  ;;  %v14050_v19 = vcombine.high %v935_v5, %v939_v6  ;;  %v976_v55 = vld [vmem:[#allocation2 + $0x1218] sm:$0xff] }
 0x474   :  { %8196 = vmatprep.subr.bf16.mxu0 %v14002_v15  ;;  %8565 = vmatprep.subr.bf16.mxu1 %v14004_v25  ;;  %v14052_v15 = vcombine.high %v936_v7, %v940_v8  ;;  %v943_v25 = vld [vmem:[#allocation2 + $0x1110] sm:$0xff]  ;;  %v980_v43 = vld [vmem:[#allocation2 + $0x1238] sm:$0xff] }
 0x475   :  { %v14057_v36 = vcombine.low %v943_v25, %v947_v17  ;;  %v984_v5 = vld [vmem:[#allocation2 + $0x1258] sm:$0xff] }
 0x476   :  { %v988_v6 = vld [vmem:[#allocation2 + $0x1278] sm:$0xff] }
 0x477   :  { %8197 = vmatpush1.bf16.msra.mxu0 %v14001_v20  ;;  %8566 = vmatpush1.bf16.msra.mxu1 %v14003_v21  ;;  %v14051_v20 = vcombine.low %v936_v7, %v940_v8  ;;  %v14058_v21 = vcombine.high %v943_v25, %v947_v17  ;;  %v14091_v8 = vcombine.low %v976_v55, %v980_v43  ;;  %v992_v25 = vld [vmem:[#allocation2 + $0x1298] sm:$0xff] }
 0x478   :  { %8198 = vmatprep.subr.bf16.mxu0 %v14010_v24  ;;  %8567 = vmatprep.subr.bf16.mxu1 %v14012_v53  ;;  %v951_v24 = vld [vmem:[#allocation2 + $0x1150] sm:$0xff]  ;;  %v996_v17 = vld [vmem:[#allocation2 + $0x12b8] sm:$0xff] }
 0x479   :  { %v955_v53 = vld [vmem:[#allocation2 + $0x1170] sm:$0xff] }
 0x47a   :  { %v14065_v38 = vcombine.low %v951_v24, %v955_v53 }
 0x47b   :  { %8199 = vmatpush1.bf16.msra.mxu0 %v14009_v30  ;;  %8568 = vmatpush1.bf16.msra.mxu1 %v14011_v31  ;;  %v14066_v30 = vcombine.high %v951_v24, %v955_v53  ;;  %v14068_v31 = vcombine.high %v952_v33, %v956_v4  ;;  %v1000_v24 = vld [vmem:[#allocation2 + $0x12d8] sm:$0xff]  ;;  %v14107_v4 = vcombine.low %v992_v25, %v996_v17 }
 0x47c   :  { %8200 = vmatprep.subr.bf16.mxu0 %v14018_v32  ;;  %8569 = vmatprep.subr.bf16.mxu1 %v14020_v34  ;;  %v959_v32 = vld [vmem:[#allocation2 + $0x1190] sm:$0xff]  ;;  %v1004_v53 = vld [vmem:[#allocation2 + $0x12f8] sm:$0xff] }
 0x47d   :  { %v963_v34 = vld [vmem:[#allocation2 + $0x11b0] sm:$0xff] }
 0x47e   :  { %v14073_v46 = vcombine.low %v959_v32, %v963_v34 }
 0x47f   :  { %8201 = vmatpush1.bf16.msra.mxu0 %v14017_v40  ;;  %8570 = vmatpush1.bf16.msra.mxu1 %v14019_v28  ;;  %v14074_v40 = vcombine.high %v959_v32, %v963_v34  ;;  %v14076_v28 = vcombine.high %v960_v35, %v964_v63  ;;  %v1008_v32 = vld [vmem:[#allocation2 + $0x1318] sm:$0xff]  ;;  %v14115_v63 = vcombine.low %v1000_v24, %v1004_v53 }
 0x480   :  { %8211 = vmatprep.subr.bf16.mxu0 %v14026_v57  ;;  %8580 = vmatprep.subr.bf16.mxu1 %v14028_v9  ;;  %v967_v57 = vld [vmem:[#allocation2 + $0x11d0] sm:$0xff]  ;;  %v1012_v34 = vld [vmem:[#allocation2 + $0x1338] sm:$0xff] }
 0x481   :  { %v971_v9 = vld [vmem:[#allocation2 + $0x11f0] sm:$0xff] }
 0x482   :  { %8203 = vmatmul.mubr.bf16.vlgmr.msra.gmra.mrb[4].mxu0 %v17278_v29  ;;  %8572 = vmatmul.mubr.bf16.vlgmr.msra.gmra.mrb[4].mxu1 %v17278_v29  ;;  %v14043_v29 = vcombine.low %v928_v52, %v932_v10  ;;  %v14081_v52 = vcombine.low %v967_v57, %v971_v9  ;;  %v14083_v10 = vcombine.low %v968_v42, %v972_v45 }
 0x483   :  { %8212 = vmatpush1.bf16.msra.mxu0 %v14025_v48  ;;  %8581 = vmatpush1.bf16.msra.mxu1 %v14027_v49  ;;  %v14082_v48 = vcombine.high %v967_v57, %v971_v9  ;;  %v14084_v49 = vcombine.high %v968_v42, %v972_v45  ;;  %v1016_v57 = vld [vmem:[#allocation2 + $0x1358] sm:$0xff]  ;;  %v14123_v45 = vcombine.low %v1008_v32, %v1012_v34 }
 0x484   :  { %8213 = vmatprep.subr.bf16.mxu0 %v14034_v50  ;;  %8582 = vmatprep.subr.bf16.mxu1 %v14036_v16  ;;  %v975_v50 = vld [vmem:[#allocation2 + $0x1210] sm:$0xff]  ;;  %v1020_v9 = vld [vmem:[#allocation2 + $0x1378] sm:$0xff] }
 0x485   :  { %8243 = vmatprep.mubr.bf16.mxu0 %v17280_v39  ;;  %8612 = vmatprep.mubr.bf16.mxu1 %v17280_v39  ;;  %v14060_v39 = vcombine.high %v944_v62, %v948_v59  ;;  %v979_v16 = vld [vmem:[#allocation2 + $0x1230] sm:$0xff]  ;;  %v14099_v59 = vcombine.low %v984_v5, %v988_v6 }
 0x486   :  { %v14089_v7 = vcombine.low %v975_v50, %v979_v16 }
 0x487   :  { %8214 = vmatpush1.bf16.msra.mxu0 %v14033_v58  ;;  %8583 = vmatpush1.bf16.msra.mxu1 %v14035_v23  ;;  %v14090_v58 = vcombine.high %v975_v50, %v979_v16  ;;  %v14092_v23 = vcombine.high %v976_v55, %v980_v43  ;;  %v1024_v50 = vld [vmem:[#allocation2 + $0x1398] sm:$0xff]  ;;  %v14131_v43 = vcombine.low %v1016_v57, %v1020_v9 }
 0x488   :  { %8215 = vmatprep.subr.bf16.mxu0 %v14042_v2  ;;  %8584 = vmatprep.subr.bf16.mxu1 %v14044_v3  ;;  %v983_v2 = vld [vmem:[#allocation2 + $0x1250] sm:$0xff]  ;;  %v1028_v16 = vld [vmem:[#allocation2 + $0x13b8] sm:$0xff] }
 0x489   :  { %v987_v3 = vld [vmem:[#allocation2 + $0x1270] sm:$0xff] }
 0x48a   :  { %v14097_v62 = vcombine.low %v983_v2, %v987_v3 }
 0x48b   :  { %8216 = vmatpush1.bf16.msra.mxu0 %v14041_v13  ;;  %8585 = vmatpush1.bf16.msra.mxu1 %v14043_v29  ;;  %v14098_v13 = vcombine.high %v983_v2, %v987_v3  ;;  %v14100_v29 = vcombine.high %v984_v5, %v988_v6  ;;  %v1032_v2 = vld [vmem:[#allocation2 + $0x13d8] sm:$0xff]  ;;  %v14139_v6 = vcombine.low %v1024_v50, %v1028_v16 }
 0x48c   :  { %8217 = vmatprep.subr.bf16.mxu0 %v14050_v19  ;;  %8586 = vmatprep.subr.bf16.mxu1 %v14052_v15  ;;  %v991_v19 = vld [vmem:[#allocation2 + $0x1290] sm:$0xff]  ;;  %v1036_v3 = vld [vmem:[#allocation2 + $0x13f8] sm:$0xff] }
 0x48d   :  { %v995_v15 = vld [vmem:[#allocation2 + $0x12b0] sm:$0xff] }
 0x48e   :  { %v14105_v33 = vcombine.low %v991_v19, %v995_v15 }
 0x48f   :  { %8218 = vmatpush1.bf16.msra.mxu0 %v14049_v18  ;;  %8587 = vmatpush1.bf16.msra.mxu1 %v14051_v20  ;;  %v14106_v18 = vcombine.high %v991_v19, %v995_v15  ;;  %v14108_v20 = vcombine.high %v992_v25, %v996_v17  ;;  %v1040_v19 = vld [vmem:[#allocation2 + $0x1418] sm:$0xff]  ;;  %v14147_v17 = vcombine.low %v1032_v2, %v1036_v3 }
 0x490   :  { %8219 = vmatprep.subr.bf16.mxu0 %v14058_v21  ;;  %8588 = vmatprep.subr.bf16.mxu1 %v14060_v39  ;;  %v999_v21 = vld [vmem:[#allocation2 + $0x12d0] sm:$0xff]  ;;  %v1044_v15 = vld [vmem:[#allocation2 + $0x1438] sm:$0xff] }
 0x491   :  { %v1003_v39 = vld [vmem:[#allocation2 + $0x12f0] sm:$0xff] }
 0x492   :  { %v14113_v35 = vcombine.low %v999_v21, %v1003_v39 }
 0x493   :  { %8220 = vmatpush1.bf16.msra.mxu0 %v14057_v36  ;;  %8589 = vmatpush1.bf16.msra.mxu1 %v14059_v27  ;;  %v14114_v36 = vcombine.high %v999_v21, %v1003_v39  ;;  %v14116_v27 = vcombine.high %v1000_v24, %v1004_v53  ;;  %v1048_v21 = vld [vmem:[#allocation2 + $0x1458] sm:$0xff]  ;;  %v14155_v53 = vcombine.low %v1040_v19, %v1044_v15 }
 0x494   :  { %8221 = vmatprep.subr.bf16.mxu0 %v14066_v30  ;;  %8590 = vmatprep.subr.bf16.mxu1 %v14068_v31  ;;  %v1007_v30 = vld [vmem:[#allocation2 + $0x1310] sm:$0xff]  ;;  %v1052_v39 = vld [vmem:[#allocation2 + $0x1478] sm:$0xff] }
 0x495   :  { %v1011_v31 = vld [vmem:[#allocation2 + $0x1330] sm:$0xff] }
 0x496   :  { %v14121_v42 = vcombine.low %v1007_v30, %v1011_v31 }
 0x497   :  { %8222 = vmatpush1.bf16.msra.mxu0 %v14065_v38  ;;  %8591 = vmatpush1.bf16.msra.mxu1 %v14067_v14  ;;  %v14122_v38 = vcombine.high %v1007_v30, %v1011_v31  ;;  %v14124_v14 = vcombine.high %v1008_v32, %v1012_v34  ;;  %v1056_v30 = vld [vmem:[#allocation2 + $0x1498] sm:$0xff]  ;;  %v14163_v34 = vcombine.low %v1048_v21, %v1052_v39 }
 0x498   :  { %8223 = vmatprep.subr.bf16.mxu0 %v14074_v40  ;;  %8592 = vmatprep.subr.bf16.mxu1 %v14076_v28  ;;  %v1015_v40 = vld [vmem:[#allocation2 + $0x1350] sm:$0xff]  ;;  %v1060_v31 = vld [vmem:[#allocation2 + $0x14b8] sm:$0xff] }
 0x499   :  { %v1019_v28 = vld [vmem:[#allocation2 + $0x1370] sm:$0xff] }
 0x49a   :  { %v14129_v55 = vcombine.low %v1015_v40, %v1019_v28 }
 0x49b   :  { %8224 = vmatpush1.bf16.msra.mxu0 %v14073_v46  ;;  %8593 = vmatpush1.bf16.msra.mxu1 %v14075_v47  ;;  %v14130_v46 = vcombine.high %v1015_v40, %v1019_v28  ;;  %v14132_v47 = vcombine.high %v1016_v57, %v1020_v9  ;;  %v1064_v40 = vld [vmem:[#allocation2 + $0x14d8] sm:$0xff] }
 0x49c   :  { %8225 = vmatprep.subr.bf16.mxu0 %v14082_v48  ;;  %8594 = vmatprep.subr.bf16.mxu1 %v14084_v49  ;;  %v1023_v48 = vld [vmem:[#allocation2 + $0x1390] sm:$0xff]  ;;  %v1068_v28 = vld [vmem:[#allocation2 + $0x14f8] sm:$0xff] }
 0x49d   :  { %v1027_v49 = vld [vmem:[#allocation2 + $0x13b0] sm:$0xff] }
 0x49e   :  { %v14137_v5 = vcombine.low %v1023_v48, %v1027_v49 }
 0x49f   :  { %8226 = vmatpush1.bf16.msra.mxu0 %v14081_v52  ;;  %8595 = vmatpush1.bf16.msra.mxu1 %v14083_v10  ;;  %v14138_v52 = vcombine.high %v1023_v48, %v1027_v49  ;;  %v14140_v10 = vcombine.high %v1024_v50, %v1028_v16  ;;  %v1076_v48 = vld [vmem:[#allocation2 + $0x1538] sm:$0xff]  ;;  %v14179_v50 = vcombine.low %v1064_v40, %v1068_v28 }
 0x4a0   :  { %8227 = vmatprep.subr.bf16.mxu0 %v14090_v58  ;;  %8596 = vmatprep.subr.bf16.mxu1 %v14092_v23  ;;  %v1031_v58 = vld [vmem:[#allocation2 + $0x13d0] sm:$0xff] }
 0x4a1   :  { %v1035_v23 = vld [vmem:[#allocation2 + $0x13f0] sm:$0xff] }
 0x4a2   :  { %v14145_v25 = vcombine.low %v1031_v58, %v1035_v23 }
 0x4a3   :  { %8228 = vmatpush1.bf16.msra.mxu0 %v14089_v7  ;;  %8597 = vmatpush1.bf16.msra.mxu1 %v14091_v8  ;;  %v14146_v7 = vcombine.high %v1031_v58, %v1035_v23  ;;  %v14148_v8 = vcombine.high %v1032_v2, %v1036_v3 }
 0x4a4   :  { %8229 = vmatprep.subr.bf16.mxu0 %v14098_v13  ;;  %8598 = vmatprep.subr.bf16.mxu1 %v14100_v29  ;;  %v1039_v13 = vld [vmem:[#allocation2 + $0x1410] sm:$0xff] }
 0x4a5   :  { %v1043_v29 = vld [vmem:[#allocation2 + $0x1430] sm:$0xff] }
 0x4a6   :  { %v14153_v24 = vcombine.low %v1039_v13, %v1043_v29 }
 0x4a7   :  { %8230 = vmatpush1.bf16.msra.mxu0 %v14097_v62  ;;  %8599 = vmatpush1.bf16.msra.mxu1 %v14099_v59  ;;  %v14154_v62 = vcombine.high %v1039_v13, %v1043_v29  ;;  %v14156_v59 = vcombine.high %v1040_v19, %v1044_v15 }
 0x4a8   :  { %8231 = vmatprep.subr.bf16.mxu0 %v14106_v18  ;;  %8600 = vmatprep.subr.bf16.mxu1 %v14108_v20  ;;  %v1047_v18 = vld [vmem:[#allocation2 + $0x1450] sm:$0xff] }
 0x4a9   :  { %v1051_v20 = vld [vmem:[#allocation2 + $0x1470] sm:$0xff] }
 0x4aa   :  { %v14161_v32 = vcombine.low %v1047_v18, %v1051_v20 }
 0x4ab   :  { %8232 = vmatpush1.bf16.msra.mxu0 %v14105_v33  ;;  %8601 = vmatpush1.bf16.msra.mxu1 %v14107_v4  ;;  %v14162_v33 = vcombine.high %v1047_v18, %v1051_v20  ;;  %v14164_v4 = vcombine.high %v1048_v21, %v1052_v39 }
 0x4ac   :  { %8233 = vmatprep.subr.bf16.mxu0 %v14114_v36  ;;  %8602 = vmatprep.subr.bf16.mxu1 %v14116_v27  ;;  %v1055_v36 = vld [vmem:[#allocation2 + $0x1490] sm:$0xff] }
 0x4ad   :  { %v1059_v27 = vld [vmem:[#allocation2 + $0x14b0] sm:$0xff] }
 0x4ae   :  { %v14169_v57 = vcombine.low %v1055_v36, %v1059_v27 }
 0x4af   :  { %8234 = vmatpush1.bf16.msra.mxu0 %v14113_v35  ;;  %8603 = vmatpush1.bf16.msra.mxu1 %v14115_v63  ;;  %v14170_v35 = vcombine.high %v1055_v36, %v1059_v27  ;;  %v14172_v63 = vcombine.high %v1056_v30, %v1060_v31 }
 0x4b0   :  { %8235 = vmatprep.subr.bf16.mxu0 %v14122_v38  ;;  %8604 = vmatprep.subr.bf16.mxu1 %v14124_v14  ;;  %v1063_v38 = vld [vmem:[#allocation2 + $0x14d0] sm:$0xff] }
 0x4b1   :  { %v1067_v14 = vld [vmem:[#allocation2 + $0x14f0] sm:$0xff] }
 0x4b2   :  { %v14178_v9 = vcombine.high %v1063_v38, %v1067_v14  ;;  %v14177_v49 = vcombine.low %v1063_v38, %v1067_v14 }
 0x4b3   :  { %8236 = vmatpush1.bf16.msra.mxu0 %v14121_v42  ;;  %8605 = vmatpush1.bf16.msra.mxu1 %v14123_v45  ;;  %v14180_v42 = vcombine.high %v1064_v40, %v1068_v28  ;;  %v1071_v45 = vld [vmem:[#allocation2 + $0x1510] sm:$0xff] }
 0x4b4   :  { %8237 = vmatprep.subr.bf16.mxu0 %v14130_v46  ;;  %8606 = vmatprep.subr.bf16.mxu1 %v14132_v47  ;;  %v1075_v46 = vld [vmem:[#allocation2 + $0x1530] sm:$0xff]  ;;  %v1072_v47 = vld [vmem:[#allocation2 + $0x1518] sm:$0xff] }
 0x4b5   :  { %v14186_v16 = vcombine.high %v1071_v45, %v1075_v46  ;;  %v14185_v58 = vcombine.low %v1071_v45, %v1075_v46  ;;  %v14187_v23 = vcombine.low %v1072_v47, %v1076_v48 }
 0x4b7   :  { %8238 = vmatpush1.bf16.msra.mxu0 %v14129_v55  ;;  %8607 = vmatpush1.bf16.msra.mxu1 %v14131_v43  ;;  %v1079_v55 = vld [vmem:[#allocation2 + $0x1550] sm:$0xff] }
 0x4b8   :  { %8239 = vmatprep.subr.bf16.mxu0 %v14138_v52  ;;  %8608 = vmatprep.subr.bf16.mxu1 %v14140_v10  ;;  %v1083_v43 = vld [vmem:[#allocation2 + $0x1570] sm:$0xff]  ;;  %v1080_v52 = vld [vmem:[#allocation2 + $0x1558] sm:$0xff] }
 0x4b9   :  { %v1084_v10 = vld [vmem:[#allocation2 + $0x1578] sm:$0xff]  ;;  %v14194_v2 = vcombine.high %v1079_v55, %v1083_v43  ;;  %v14193_v13 = vcombine.low %v1079_v55, %v1083_v43 }
 0x4ba   :  { %v14196_v3 = vcombine.high %v1080_v52, %v1084_v10  ;;  %v14195_v29 = vcombine.low %v1080_v52, %v1084_v10 }
 0x4bb   :  { %8240 = vmatpush1.bf16.msra.mxu0 %v14137_v5  ;;  %8609 = vmatpush1.bf16.msra.mxu1 %v14139_v6  ;;  %v1087_v5 = vld [vmem:[#allocation2 + $0x1590] sm:$0xff] }
 0x4bc   :  { %8241 = vmatprep.subr.bf16.mxu0 %v14146_v7  ;;  %8610 = vmatprep.subr.bf16.mxu1 %v14148_v8  ;;  %v1091_v6 = vld [vmem:[#allocation2 + $0x15b0] sm:$0xff]  ;;  %v1088_v7 = vld [vmem:[#allocation2 + $0x1598] sm:$0xff] }
 0x4bd   :  { %v1092_v8 = vld [vmem:[#allocation2 + $0x15b8] sm:$0xff]  ;;  %v14202_v19 = vcombine.high %v1087_v5, %v1091_v6  ;;  %v14201_v18 = vcombine.low %v1087_v5, %v1091_v6 }
 0x4be   :  { %v14204_v15 = vcombine.high %v1088_v7, %v1092_v8  ;;  %v14203_v20 = vcombine.low %v1088_v7, %v1092_v8 }
 0x4bf   :  { %8242 = vmatpush1.bf16.msra.mxu0 %v14145_v25  ;;  %8611 = vmatpush1.bf16.msra.mxu1 %v14147_v17  ;;  %v1095_v25 = vld [vmem:[#allocation2 + $0x15d0] sm:$0xff] }
 0x4c0   :  { %8252 = vmatprep.subr.bf16.mxu0 %v14154_v62  ;;  %8621 = vmatprep.subr.bf16.mxu1 %v14156_v59  ;;  %v1099_v17 = vld [vmem:[#allocation2 + $0x15f0] sm:$0xff]  ;;  %v1096_v62 = vld [vmem:[#allocation2 + $0x15d8] sm:$0xff] }
 0x4c1   :  { %v1100_v59 = vld [vmem:[#allocation2 + $0x15f8] sm:$0xff]  ;;  %v14210_v21 = vcombine.high %v1095_v25, %v1099_v17  ;;  %v14209_v36 = vcombine.low %v1095_v25, %v1099_v17 }
 0x4c2   :  { %8244 = vmatmul.mubr.bf16.vlgmr.msra.gmra.mrb[4].mxu0 %v17295_v0  ;;  %8613 = vmatmul.mubr.bf16.vlgmr.msra.gmra.mrb[4].mxu1 %v17295_v0  ;;  %v14171_v0 = vcombine.low %v1056_v30, %v1060_v31  ;;  %v14212_v39 = vcombine.high %v1096_v62, %v1100_v59  ;;  %v14211_v27 = vcombine.low %v1096_v62, %v1100_v59 }
 0x4c3   :  { %8253 = vmatpush1.bf16.msra.mxu0 %v14153_v24  ;;  %8622 = vmatpush1.bf16.msra.mxu1 %v14155_v53  ;;  %v1103_v24 = vld [vmem:[#allocation2 + $0x1610] sm:$0xff] }
 0x4c4   :  { %8254 = vmatprep.subr.bf16.mxu0 %v14162_v33  ;;  %8623 = vmatprep.subr.bf16.mxu1 %v14164_v4  ;;  %v1107_v53 = vld [vmem:[#allocation2 + $0x1630] sm:$0xff]  ;;  %v1104_v33 = vld [vmem:[#allocation2 + $0x1618] sm:$0xff] }
 0x4c5   :  { %8284 = vmatprep.mubr.bf16.mxu0 %v17297_v12  ;;  %8653 = vmatprep.mubr.bf16.mxu1 %v17297_v12  ;;  %v14188_v12 = vcombine.high %v1072_v47, %v1076_v48  ;;  %v1108_v4 = vld [vmem:[#allocation2 + $0x1638] sm:$0xff]  ;;  %v14218_v30 = vcombine.high %v1103_v24, %v1107_v53  ;;  %v14217_v38 = vcombine.low %v1103_v24, %v1107_v53 }
 0x4c6   :  { %v14220_v31 = vcombine.high %v1104_v33, %v1108_v4  ;;  %v14219_v14 = vcombine.low %v1104_v33, %v1108_v4 }
 0x4c7   :  { %8255 = vmatpush1.bf16.msra.mxu0 %v14161_v32  ;;  %8624 = vmatpush1.bf16.msra.mxu1 %v14163_v34  ;;  %v1111_v32 = vld [vmem:[#allocation2 + $0x1650] sm:$0xff] }
 0x4c8   :  { %8256 = vmatprep.subr.bf16.mxu0 %v14170_v35  ;;  %8625 = vmatprep.subr.bf16.mxu1 %v14172_v63  ;;  %v1115_v34 = vld [vmem:[#allocation2 + $0x1670] sm:$0xff]  ;;  %v1112_v35 = vld [vmem:[#allocation2 + $0x1658] sm:$0xff] }
 0x4c9   :  { %v1116_v63 = vld [vmem:[#allocation2 + $0x1678] sm:$0xff]  ;;  %v14226_v40 = vcombine.high %v1111_v32, %v1115_v34  ;;  %v14225_v45 = vcombine.low %v1111_v32, %v1115_v34 }
 0x4ca   :  { %v14228_v28 = vcombine.high %v1112_v35, %v1116_v63  ;;  %v14227_v46 = vcombine.low %v1112_v35, %v1116_v63 }
 0x4cb   :  { %8257 = vmatpush1.bf16.msra.mxu0 %v14169_v57  ;;  %8626 = vmatpush1.bf16.msra.mxu1 %v14171_v0  ;;  %v1119_v57 = vld [vmem:[#allocation2 + $0x1690] sm:$0xff] }
 0x4cc   :  { %8258 = vmatprep.subr.bf16.mxu0 %v14178_v9  ;;  %8627 = vmatprep.subr.bf16.mxu1 %v14180_v42  ;;  %v1123_v0 = vld [vmem:[#allocation2 + $0x16b0] sm:$0xff]  ;;  %v1120_v9 = vld [vmem:[#allocation2 + $0x1698] sm:$0xff] }
 0x4cd   :  { %v1124_v42 = vld [vmem:[#allocation2 + $0x16b8] sm:$0xff]  ;;  %v14234_v47 = vcombine.high %v1119_v57, %v1123_v0  ;;  %v14233_v55 = vcombine.low %v1119_v57, %v1123_v0 }
 0x4ce   :  { %v14236_v48 = vcombine.high %v1120_v9, %v1124_v42  ;;  %v14235_v43 = vcombine.low %v1120_v9, %v1124_v42 }
 0x4cf   :  { %8259 = vmatpush1.bf16.msra.mxu0 %v14177_v49  ;;  %8628 = vmatpush1.bf16.msra.mxu1 %v14179_v50  ;;  %v1127_v49 = vld [vmem:[#allocation2 + $0x16d0] sm:$0xff] }
 0x4d0   :  { %8260 = vmatprep.subr.bf16.mxu0 %v14186_v16  ;;  %8629 = vmatprep.subr.bf16.mxu1 %v14188_v12  ;;  %v1131_v50 = vld [vmem:[#allocation2 + $0x16f0] sm:$0xff]  ;;  %v1128_v16 = vld [vmem:[#allocation2 + $0x16d8] sm:$0xff] }
 0x4d1   :  { %v1132_v12 = vld [vmem:[#allocation2 + $0x16f8] sm:$0xff]  ;;  %v14242_v52 = vcombine.high %v1127_v49, %v1131_v50  ;;  %v14241_v5 = vcombine.low %v1127_v49, %v1131_v50 }
 0x4d2   :  { %v14244_v10 = vcombine.high %v1128_v16, %v1132_v12  ;;  %v14243_v6 = vcombine.low %v1128_v16, %v1132_v12 }
 0x4d3   :  { %8261 = vmatpush1.bf16.msra.mxu0 %v14185_v58  ;;  %8630 = vmatpush1.bf16.msra.mxu1 %v14187_v23  ;;  %v1135_v58 = vld [vmem:[#allocation2 + $0x1710] sm:$0xff] }
 0x4d4   :  { %8262 = vmatprep.subr.bf16.mxu0 %v14194_v2  ;;  %8631 = vmatprep.subr.bf16.mxu1 %v14196_v3  ;;  %v1139_v23 = vld [vmem:[#allocation2 + $0x1730] sm:$0xff]  ;;  %v1136_v2 = vld [vmem:[#allocation2 + $0x1718] sm:$0xff] }
 0x4d5   :  { %v1140_v3 = vld [vmem:[#allocation2 + $0x1738] sm:$0xff]  ;;  %v14250_v7 = vcombine.high %v1135_v58, %v1139_v23  ;;  %v14249_v25 = vcombine.low %v1135_v58, %v1139_v23 }
 0x4d6   :  { %v14252_v8 = vcombine.high %v1136_v2, %v1140_v3  ;;  %v14251_v17 = vcombine.low %v1136_v2, %v1140_v3 }
 0x4d7   :  { %8263 = vmatpush1.bf16.msra.mxu0 %v14193_v13  ;;  %8632 = vmatpush1.bf16.msra.mxu1 %v14195_v29  ;;  %v1143_v13 = vld [vmem:[#allocation2 + $0x1750] sm:$0xff] }
 0x4d8   :  { %8264 = vmatprep.subr.bf16.mxu0 %v14202_v19  ;;  %8633 = vmatprep.subr.bf16.mxu1 %v14204_v15  ;;  %v1147_v29 = vld [vmem:[#allocation2 + $0x1770] sm:$0xff]  ;;  %v1144_v19 = vld [vmem:[#allocation2 + $0x1758] sm:$0xff] }
 0x4d9   :  { %v1148_v15 = vld [vmem:[#allocation2 + $0x1778] sm:$0xff]  ;;  %v14258_v62 = vcombine.high %v1143_v13, %v1147_v29  ;;  %v14257_v24 = vcombine.low %v1143_v13, %v1147_v29 }
 0x4da   :  { %v14260_v59 = vcombine.high %v1144_v19, %v1148_v15  ;;  %v14259_v53 = vcombine.low %v1144_v19, %v1148_v15  ;;  %v1199_v15 = vld [vmem:[#allocation2 + $0x1910] sm:$0xff] }
 0x4db   :  { %8265 = vmatpush1.bf16.msra.mxu0 %v14201_v18  ;;  %8634 = vmatpush1.bf16.msra.mxu1 %v14203_v20  ;;  %v1151_v18 = vld [vmem:[#allocation2 + $0x1790] sm:$0xff] }
 0x4dc   :  { %8266 = vmatprep.subr.bf16.mxu0 %v14210_v21  ;;  %8635 = vmatprep.subr.bf16.mxu1 %v14212_v39  ;;  %v1155_v20 = vld [vmem:[#allocation2 + $0x17b0] sm:$0xff]  ;;  %v1152_v21 = vld [vmem:[#allocation2 + $0x1798] sm:$0xff] }
 0x4dd   :  { %v1156_v39 = vld [vmem:[#allocation2 + $0x17b8] sm:$0xff]  ;;  %v14266_v33 = vcombine.high %v1151_v18, %v1155_v20  ;;  %v14265_v32 = vcombine.low %v1151_v18, %v1155_v20 }
 0x4de   :  { %v14268_v4 = vcombine.high %v1152_v21, %v1156_v39  ;;  %v14267_v34 = vcombine.low %v1152_v21, %v1156_v39  ;;  %v1207_v21 = vld [vmem:[#allocation2 + $0x1950] sm:$0xff] }
 0x4df   :  { %8267 = vmatpush1.bf16.msra.mxu0 %v14209_v36  ;;  %8636 = vmatpush1.bf16.msra.mxu1 %v14211_v27  ;;  %v1159_v36 = vld [vmem:[#allocation2 + $0x17d0] sm:$0xff] }
 0x4e0   :  { %8268 = vmatprep.subr.bf16.mxu0 %v14218_v30  ;;  %8637 = vmatprep.subr.bf16.mxu1 %v14220_v31  ;;  %v1163_v27 = vld [vmem:[#allocation2 + $0x17f0] sm:$0xff]  ;;  %v1160_v30 = vld [vmem:[#allocation2 + $0x17d8] sm:$0xff] }
 0x4e1   :  { %v1164_v31 = vld [vmem:[#allocation2 + $0x17f8] sm:$0xff]  ;;  %v14274_v35 = vcombine.high %v1159_v36, %v1163_v27  ;;  %v14273_v57 = vcombine.low %v1159_v36, %v1163_v27  ;;  %v1211_v39 = vld [vmem:[#allocation2 + $0x1970] sm:$0xff] }
 0x4e2   :  { %v14276_v63 = vcombine.high %v1160_v30, %v1164_v31  ;;  %v14275_v0 = vcombine.low %v1160_v30, %v1164_v31  ;;  %v14322_v36 = vcombine.high %v1207_v21, %v1211_v39  ;;  %v1215_v30 = vld [vmem:[#allocation2 + $0x1990] sm:$0xff] }
 0x4e3   :  { %8269 = vmatpush1.bf16.msra.mxu0 %v14217_v38  ;;  %8638 = vmatpush1.bf16.msra.mxu1 %v14219_v14  ;;  %v1167_v38 = vld [vmem:[#allocation2 + $0x1810] sm:$0xff] }
 0x4e4   :  { %8270 = vmatprep.subr.bf16.mxu0 %v14226_v40  ;;  %8639 = vmatprep.subr.bf16.mxu1 %v14228_v28  ;;  %v1171_v14 = vld [vmem:[#allocation2 + $0x1830] sm:$0xff]  ;;  %v1168_v40 = vld [vmem:[#allocation2 + $0x1818] sm:$0xff] }
 0x4e5   :  { %v1172_v28 = vld [vmem:[#allocation2 + $0x1838] sm:$0xff]  ;;  %v14282_v9 = vcombine.high %v1167_v38, %v1171_v14  ;;  %v14281_v49 = vcombine.low %v1167_v38, %v1171_v14  ;;  %v1219_v31 = vld [vmem:[#allocation2 + $0x19b0] sm:$0xff] }
 0x4e6   :  { %v14284_v42 = vcombine.high %v1168_v40, %v1172_v28  ;;  %v14283_v50 = vcombine.low %v1168_v40, %v1172_v28  ;;  %v14330_v38 = vcombine.high %v1215_v30, %v1219_v31  ;;  %v1223_v40 = vld [vmem:[#allocation2 + $0x19d0] sm:$0xff] }
 0x4e7   :  { %8271 = vmatpush1.bf16.msra.mxu0 %v14225_v45  ;;  %8640 = vmatpush1.bf16.msra.mxu1 %v14227_v46  ;;  %v1175_v45 = vld [vmem:[#allocation2 + $0x1850] sm:$0xff] }
 0x4e8   :  { %8272 = vmatprep.subr.bf16.mxu0 %v14234_v47  ;;  %8641 = vmatprep.subr.bf16.mxu1 %v14236_v48  ;;  %v1179_v46 = vld [vmem:[#allocation2 + $0x1870] sm:$0xff]  ;;  %v1176_v47 = vld [vmem:[#allocation2 + $0x1858] sm:$0xff] }
 0x4e9   :  { %v1180_v48 = vld [vmem:[#allocation2 + $0x1878] sm:$0xff]  ;;  %v14290_v16 = vcombine.high %v1175_v45, %v1179_v46  ;;  %v14289_v58 = vcombine.low %v1175_v45, %v1179_v46  ;;  %v1227_v28 = vld [vmem:[#allocation2 + $0x19f0] sm:$0xff] }
 0x4ea   :  { %v14292_v12 = vcombine.high %v1176_v47, %v1180_v48  ;;  %v14291_v23 = vcombine.low %v1176_v47, %v1180_v48  ;;  %v14338_v45 = vcombine.high %v1223_v40, %v1227_v28  ;;  %v1231_v47 = vld [vmem:[#allocation2 + $0x1a10] sm:$0xff] }
 0x4eb   :  { %8273 = vmatpush1.bf16.msra.mxu0 %v14233_v55  ;;  %8642 = vmatpush1.bf16.msra.mxu1 %v14235_v43  ;;  %v1183_v55 = vld [vmem:[#allocation2 + $0x1890] sm:$0xff] }
 0x4ec   :  { %8274 = vmatprep.subr.bf16.mxu0 %v14242_v52  ;;  %8643 = vmatprep.subr.bf16.mxu1 %v14244_v10  ;;  %v1187_v43 = vld [vmem:[#allocation2 + $0x18b0] sm:$0xff]  ;;  %v1184_v52 = vld [vmem:[#allocation2 + $0x1898] sm:$0xff] }
 0x4ed   :  { %v1188_v10 = vld [vmem:[#allocation2 + $0x18b8] sm:$0xff]  ;;  %v14298_v2 = vcombine.high %v1183_v55, %v1187_v43  ;;  %v14297_v13 = vcombine.low %v1183_v55, %v1187_v43  ;;  %v1235_v48 = vld [vmem:[#allocation2 + $0x1a30] sm:$0xff] }
 0x4ee   :  { %v14300_v3 = vcombine.high %v1184_v52, %v1188_v10  ;;  %v14346_v55 = vcombine.high %v1231_v47, %v1235_v48 }
 0x4ef   :  { %8275 = vmatpush1.bf16.msra.mxu0 %v14241_v5  ;;  %8644 = vmatpush1.bf16.msra.mxu1 %v14243_v6  ;;  %v1191_v5 = vld [vmem:[#allocation2 + $0x18d0] sm:$0xff] }
 0x4f0   :  { %8276 = vmatprep.subr.bf16.mxu0 %v14250_v7  ;;  %8645 = vmatprep.subr.bf16.mxu1 %v14252_v8  ;;  %v1195_v6 = vld [vmem:[#allocation2 + $0x18f0] sm:$0xff]  ;;  %v1192_v7 = vld [vmem:[#allocation2 + $0x18d8] sm:$0xff] }
 0x4f1   :  { %v1196_v8 = vld [vmem:[#allocation2 + $0x18f8] sm:$0xff]  ;;  %v14306_v29 = vcombine.high %v1191_v5, %v1195_v6 }
 0x4f2   :  { %v14308_v19 = vcombine.high %v1192_v7, %v1196_v8  ;;  %v14307_v18 = vcombine.low %v1192_v7, %v1196_v8  ;;  %v1247_v7 = vld [vmem:[#allocation2 + $0x1a90] sm:$0xff] }
 0x4f3   :  { %8277 = vmatpush1.bf16.msra.mxu0 %v14249_v25  ;;  %8646 = vmatpush1.bf16.msra.mxu1 %v14251_v17  ;;  %v1203_v25 = vld [vmem:[#allocation2 + $0x1930] sm:$0xff]  ;;  %v1200_v17 = vld [vmem:[#allocation2 + $0x1918] sm:$0xff] }
 0x4f4   :  { %8278 = vmatprep.subr.bf16.mxu0 %v14258_v62  ;;  %8647 = vmatprep.subr.bf16.mxu1 %v14260_v59  ;;  %v1204_v62 = vld [vmem:[#allocation2 + $0x1938] sm:$0xff]  ;;  %v14305_v59 = vcombine.low %v1191_v5, %v1195_v6  ;;  %v14314_v20 = vcombine.high %v1199_v15, %v1203_v25  ;;  %v1251_v8 = vld [vmem:[#allocation2 + $0x1ab0] sm:$0xff] }
 0x4f7   :  { %8279 = vmatpush1.bf16.msra.mxu0 %v14257_v24  ;;  %8648 = vmatpush1.bf16.msra.mxu1 %v14259_v53  ;;  %v1208_v24 = vld [vmem:[#allocation2 + $0x1958] sm:$0xff] }
 0x4f8   :  { %8280 = vmatprep.subr.bf16.mxu0 %v14266_v33  ;;  %8649 = vmatprep.subr.bf16.mxu1 %v14268_v4  ;;  %v1212_v53 = vld [vmem:[#allocation2 + $0x1978] sm:$0xff]  ;;  %v14313_v33 = vcombine.low %v1199_v15, %v1203_v25  ;;  %v14315_v4 = vcombine.low %v1200_v17, %v1204_v62  ;;  %v14362_v15 = vcombine.high %v1247_v7, %v1251_v8 }
 0x4f9   :  { %v14324_v27 = vcombine.high %v1208_v24, %v1212_v53 }
 0x4fb   :  { %8281 = vmatpush1.bf16.msra.mxu0 %v14265_v32  ;;  %8650 = vmatpush1.bf16.msra.mxu1 %v14267_v34  ;;  %v1216_v32 = vld [vmem:[#allocation2 + $0x1998] sm:$0xff] }
 0x4fc   :  { %8282 = vmatprep.subr.bf16.mxu0 %v14274_v35  ;;  %8651 = vmatprep.subr.bf16.mxu1 %v14276_v63  ;;  %v1220_v34 = vld [vmem:[#allocation2 + $0x19b8] sm:$0xff]  ;;  %v14321_v35 = vcombine.low %v1207_v21, %v1211_v39  ;;  %v14323_v63 = vcombine.low %v1208_v24, %v1212_v53  ;;  %v1263_v24 = vld [vmem:[#allocation2 + $0x1b10] sm:$0xff] }
 0x4fd   :  { %v14332_v14 = vcombine.high %v1216_v32, %v1220_v34  ;;  %v1267_v53 = vld [vmem:[#allocation2 + $0x1b30] sm:$0xff] }
 0x4ff   :  { %8283 = vmatpush1.bf16.msra.mxu0 %v14273_v57  ;;  %8652 = vmatpush1.bf16.msra.mxu1 %v14275_v0  ;;  %v1224_v57 = vld [vmem:[#allocation2 + $0x19d8] sm:$0xff] }
 0x500   :  { %8293 = vmatprep.subr.bf16.mxu0 %v14282_v9  ;;  %8662 = vmatprep.subr.bf16.mxu1 %v14284_v42  ;;  %v1228_v0 = vld [vmem:[#allocation2 + $0x19f8] sm:$0xff]  ;;  %v14329_v9 = vcombine.low %v1215_v30, %v1219_v31  ;;  %v14331_v42 = vcombine.low %v1216_v32, %v1220_v34  ;;  %v14378_v30 = vcombine.high %v1263_v24, %v1267_v53  ;;  %v1271_v32 = vld [vmem:[#allocation2 + $0x1b50] sm:$0xff] }
 0x501   :  { %v14340_v46 = vcombine.high %v1224_v57, %v1228_v0  ;;  %v1275_v34 = vld [vmem:[#allocation2 + $0x1b70] sm:$0xff] }
 0x502   :  { %8285 = vmatmul.mubr.bf16.vlgmr.msra.gmra.mrb[4].mxu0 %v17316_v41  ;;  %8654 = vmatmul.mubr.bf16.vlgmr.msra.gmra.mrb[4].mxu1 %v17316_v41  ;;  %v14299_v41 = vcombine.low %v1184_v52, %v1188_v10  ;;  %v1239_v52 = vld [vmem:[#allocation2 + $0x1a50] sm:$0xff] }
 0x503   :  { %8294 = vmatpush1.bf16.msra.mxu0 %v14281_v49  ;;  %8663 = vmatpush1.bf16.msra.mxu1 %v14283_v50  ;;  %v1232_v49 = vld [vmem:[#allocation2 + $0x1a18] sm:$0xff]  ;;  %v1243_v10 = vld [vmem:[#allocation2 + $0x1a70] sm:$0xff] }
 0x504   :  { %8295 = vmatprep.subr.bf16.mxu0 %v14290_v16  ;;  %8664 = vmatprep.subr.bf16.mxu1 %v14292_v12  ;;  %v1236_v50 = vld [vmem:[#allocation2 + $0x1a38] sm:$0xff]  ;;  %v14337_v16 = vcombine.low %v1223_v40, %v1227_v28  ;;  %v14339_v12 = vcombine.low %v1224_v57, %v1228_v0  ;;  %v14354_v5 = vcombine.high %v1239_v52, %v1243_v10  ;;  %v1279_v57 = vld [vmem:[#allocation2 + $0x1b90] sm:$0xff] }
 0x505   :  { %8325 = vmatprep.mubr.bf16.mxu0 %v17318_v51  ;;  %8694 = vmatprep.mubr.bf16.mxu1 %v17318_v51  ;;  %v14316_v51 = vcombine.high %v1200_v17, %v1204_v62  ;;  %v14348_v43 = vcombine.high %v1232_v49, %v1236_v50  ;;  %v1255_v17 = vld [vmem:[#allocation2 + $0x1ad0] sm:$0xff]  ;;  %v14386_v40 = vcombine.high %v1271_v32, %v1275_v34 }
 0x506   :  { %v1259_v62 = vld [vmem:[#allocation2 + $0x1af0] sm:$0xff] }
 0x507   :  { %8296 = vmatpush1.bf16.msra.mxu0 %v14289_v58  ;;  %8665 = vmatpush1.bf16.msra.mxu1 %v14291_v23  ;;  %v1240_v58 = vld [vmem:[#allocation2 + $0x1a58] sm:$0xff]  ;;  %v14370_v21 = vcombine.high %v1255_v17, %v1259_v62  ;;  %v1283_v0 = vld [vmem:[#allocation2 + $0x1bb0] sm:$0xff] }
 0x508   :  { %8297 = vmatprep.subr.bf16.mxu0 %v14298_v2  ;;  %8666 = vmatprep.subr.bf16.mxu1 %v14300_v3  ;;  %v1244_v23 = vld [vmem:[#allocation2 + $0x1a78] sm:$0xff]  ;;  %v14345_v2 = vcombine.low %v1231_v47, %v1235_v48  ;;  %v14347_v3 = vcombine.low %v1232_v49, %v1236_v50  ;;  %v14394_v47 = vcombine.high %v1279_v57, %v1283_v0  ;;  %v1287_v49 = vld [vmem:[#allocation2 + $0x1bd0] sm:$0xff] }
 0x509   :  { %v14356_v6 = vcombine.high %v1240_v58, %v1244_v23  ;;  %v1291_v50 = vld [vmem:[#allocation2 + $0x1bf0] sm:$0xff] }
 0x50b   :  { %8298 = vmatpush1.bf16.msra.mxu0 %v14297_v13  ;;  %8667 = vmatpush1.bf16.msra.mxu1 %v14299_v41  ;;  %v1248_v13 = vld [vmem:[#allocation2 + $0x1a98] sm:$0xff] }
 0x50c   :  { %8299 = vmatprep.subr.bf16.mxu0 %v14306_v29  ;;  %8668 = vmatprep.subr.bf16.mxu1 %v14308_v19  ;;  %v1252_v41 = vld [vmem:[#allocation2 + $0x1ab8] sm:$0xff]  ;;  %v14353_v29 = vcombine.low %v1239_v52, %v1243_v10  ;;  %v14355_v19 = vcombine.low %v1240_v58, %v1244_v23  ;;  %v14402_v52 = vcombine.high %v1287_v49, %v1291_v50  ;;  %v1295_v58 = vld [vmem:[#allocation2 + $0x1c10] sm:$0xff] }
 0x50d   :  { %v14364_v25 = vcombine.high %v1248_v13, %v1252_v41  ;;  %v1299_v23 = vld [vmem:[#allocation2 + $0x1c30] sm:$0xff] }
 0x50f   :  { %8300 = vmatpush1.bf16.msra.mxu0 %v14305_v59  ;;  %8669 = vmatpush1.bf16.msra.mxu1 %v14307_v18  ;;  %v1256_v59 = vld [vmem:[#allocation2 + $0x1ad8] sm:$0xff] }
 0x510   :  { %8301 = vmatprep.subr.bf16.mxu0 %v14314_v20  ;;  %8670 = vmatprep.subr.bf16.mxu1 %v14316_v51  ;;  %v1260_v18 = vld [vmem:[#allocation2 + $0x1af8] sm:$0xff]  ;;  %v14361_v20 = vcombine.low %v1247_v7, %v1251_v8  ;;  %v14363_v51 = vcombine.low %v1248_v13, %v1252_v41  ;;  %v14410_v7 = vcombine.high %v1295_v58, %v1299_v23  ;;  %v1303_v13 = vld [vmem:[#allocation2 + $0x1c50] sm:$0xff] }
 0x511   :  { %v14372_v39 = vcombine.high %v1256_v59, %v1260_v18  ;;  %v1307_v41 = vld [vmem:[#allocation2 + $0x1c70] sm:$0xff] }
 0x513   :  { %8302 = vmatpush1.bf16.msra.mxu0 %v14313_v33  ;;  %8671 = vmatpush1.bf16.msra.mxu1 %v14315_v4  ;;  %v1264_v33 = vld [vmem:[#allocation2 + $0x1b18] sm:$0xff] }
 0x514   :  { %8303 = vmatprep.subr.bf16.mxu0 %v14322_v36  ;;  %8672 = vmatprep.subr.bf16.mxu1 %v14324_v27  ;;  %v1268_v4 = vld [vmem:[#allocation2 + $0x1b38] sm:$0xff]  ;;  %v14369_v36 = vcombine.low %v1255_v17, %v1259_v62  ;;  %v14371_v27 = vcombine.low %v1256_v59, %v1260_v18  ;;  %v14418_v17 = vcombine.high %v1303_v13, %v1307_v41  ;;  %v1311_v59 = vld [vmem:[#allocation2 + $0x1c90] sm:$0xff] }
 0x515   :  { %v14380_v31 = vcombine.high %v1264_v33, %v1268_v4  ;;  %v1315_v18 = vld [vmem:[#allocation2 + $0x1cb0] sm:$0xff] }
 0x517   :  { %8304 = vmatpush1.bf16.msra.mxu0 %v14321_v35  ;;  %8673 = vmatpush1.bf16.msra.mxu1 %v14323_v63  ;;  %v1272_v35 = vld [vmem:[#allocation2 + $0x1b58] sm:$0xff] }
 0x518   :  { %8305 = vmatprep.subr.bf16.mxu0 %v14330_v38  ;;  %8674 = vmatprep.subr.bf16.mxu1 %v14332_v14  ;;  %v1276_v63 = vld [vmem:[#allocation2 + $0x1b78] sm:$0xff]  ;;  %v14377_v38 = vcombine.low %v1263_v24, %v1267_v53  ;;  %v14379_v14 = vcombine.low %v1264_v33, %v1268_v4  ;;  %v14426_v24 = vcombine.high %v1311_v59, %v1315_v18  ;;  %v1319_v33 = vld [vmem:[#allocation2 + $0x1cd0] sm:$0xff] }
 0x519   :  { %v14388_v28 = vcombine.high %v1272_v35, %v1276_v63  ;;  %v1323_v4 = vld [vmem:[#allocation2 + $0x1cf0] sm:$0xff] }
 0x51b   :  { %8306 = vmatpush1.bf16.msra.mxu0 %v14329_v9  ;;  %8675 = vmatpush1.bf16.msra.mxu1 %v14331_v42  ;;  %v1280_v9 = vld [vmem:[#allocation2 + $0x1b98] sm:$0xff] }
 0x51c   :  { %8307 = vmatprep.subr.bf16.mxu0 %v14338_v45  ;;  %8676 = vmatprep.subr.bf16.mxu1 %v14340_v46  ;;  %v1284_v42 = vld [vmem:[#allocation2 + $0x1bb8] sm:$0xff]  ;;  %v14385_v45 = vcombine.low %v1271_v32, %v1275_v34  ;;  %v14387_v46 = vcombine.low %v1272_v35, %v1276_v63  ;;  %v1327_v34 = vld [vmem:[#allocation2 + $0x1d10] sm:$0xff] }
 0x51d   :  { %v14396_v48 = vcombine.high %v1280_v9, %v1284_v42  ;;  %v1331_v35 = vld [vmem:[#allocation2 + $0x1d30] sm:$0xff]  ;;  %v1328_v63 = vld [vmem:[#allocation2 + $0x1d18] sm:$0xff] }
 0x51f   :  { %8308 = vmatpush1.bf16.msra.mxu0 %v14337_v16  ;;  %8677 = vmatpush1.bf16.msra.mxu1 %v14339_v12  ;;  %v1288_v16 = vld [vmem:[#allocation2 + $0x1bd8] sm:$0xff] }
 0x520   :  { %8309 = vmatprep.subr.bf16.mxu0 %v14346_v55  ;;  %8678 = vmatprep.subr.bf16.mxu1 %v14348_v43  ;;  %v1292_v12 = vld [vmem:[#allocation2 + $0x1bf8] sm:$0xff]  ;;  %v14393_v55 = vcombine.low %v1279_v57, %v1283_v0  ;;  %v14395_v43 = vcombine.low %v1280_v9, %v1284_v42  ;;  %v1335_v57 = vld [vmem:[#allocation2 + $0x1d50] sm:$0xff] }
 0x521   :  { %v14404_v10 = vcombine.high %v1288_v16, %v1292_v12  ;;  %v1339_v0 = vld [vmem:[#allocation2 + $0x1d70] sm:$0xff]  ;;  %v1336_v9 = vld [vmem:[#allocation2 + $0x1d58] sm:$0xff] }
 0x522   :  { %v1340_v42 = vld [vmem:[#allocation2 + $0x1d78] sm:$0xff] }
 0x523   :  { %8310 = vmatpush1.bf16.msra.mxu0 %v14345_v2  ;;  %8679 = vmatpush1.bf16.msra.mxu1 %v14347_v3  ;;  %v1296_v2 = vld [vmem:[#allocation2 + $0x1c18] sm:$0xff] }
 0x524   :  { %8311 = vmatprep.subr.bf16.mxu0 %v14354_v5  ;;  %8680 = vmatprep.subr.bf16.mxu1 %v14356_v6  ;;  %v1300_v3 = vld [vmem:[#allocation2 + $0x1c38] sm:$0xff]  ;;  %v14401_v5 = vcombine.low %v1287_v49, %v1291_v50  ;;  %v14403_v6 = vcombine.low %v1288_v16, %v1292_v12  ;;  %v1343_v49 = vld [vmem:[#allocation2 + $0x1d90] sm:$0xff] }
 0x525   :  { %v14412_v8 = vcombine.high %v1296_v2, %v1300_v3  ;;  %v1347_v50 = vld [vmem:[#allocation2 + $0x1db0] sm:$0xff]  ;;  %v1344_v16 = vld [vmem:[#allocation2 + $0x1d98] sm:$0xff] }
 0x526   :  { %v1348_v12 = vld [vmem:[#allocation2 + $0x1db8] sm:$0xff] }
 0x527   :  { %8312 = vmatpush1.bf16.msra.mxu0 %v14353_v29  ;;  %8681 = vmatpush1.bf16.msra.mxu1 %v14355_v19  ;;  %v1304_v29 = vld [vmem:[#allocation2 + $0x1c58] sm:$0xff] }
 0x528   :  { %8313 = vmatprep.subr.bf16.mxu0 %v14362_v15  ;;  %8682 = vmatprep.subr.bf16.mxu1 %v14364_v25  ;;  %v1308_v19 = vld [vmem:[#allocation2 + $0x1c78] sm:$0xff]  ;;  %v14409_v15 = vcombine.low %v1295_v58, %v1299_v23  ;;  %v14411_v25 = vcombine.low %v1296_v2, %v1300_v3  ;;  %v1351_v58 = vld [vmem:[#allocation2 + $0x1dd0] sm:$0xff] }
 0x529   :  { %v14420_v62 = vcombine.high %v1304_v29, %v1308_v19  ;;  %v1355_v23 = vld [vmem:[#allocation2 + $0x1df0] sm:$0xff]  ;;  %v1352_v2 = vld [vmem:[#allocation2 + $0x1dd8] sm:$0xff] }
 0x52a   :  { %v1356_v3 = vld [vmem:[#allocation2 + $0x1df8] sm:$0xff] }
 0x52b   :  { %8314 = vmatpush1.bf16.msra.mxu0 %v14361_v20  ;;  %8683 = vmatpush1.bf16.msra.mxu1 %v14363_v51  ;;  %v1312_v20 = vld [vmem:[#allocation2 + $0x1c98] sm:$0xff] }
 0x52c   :  { %8315 = vmatprep.subr.bf16.mxu0 %v14370_v21  ;;  %8684 = vmatprep.subr.bf16.mxu1 %v14372_v39  ;;  %v1316_v51 = vld [vmem:[#allocation2 + $0x1cb8] sm:$0xff]  ;;  %v14417_v21 = vcombine.low %v1303_v13, %v1307_v41  ;;  %v14419_v39 = vcombine.low %v1304_v29, %v1308_v19  ;;  %v1359_v13 = vld [vmem:[#allocation2 + $0x1e10] sm:$0xff] }
 0x52d   :  { %v14428_v53 = vcombine.high %v1312_v20, %v1316_v51  ;;  %v1363_v41 = vld [vmem:[#allocation2 + $0x1e30] sm:$0xff]  ;;  %v1360_v29 = vld [vmem:[#allocation2 + $0x1e18] sm:$0xff] }
 0x52e   :  { %v1364_v19 = vld [vmem:[#allocation2 + $0x1e38] sm:$0xff] }
 0x52f   :  { %8316 = vmatpush1.bf16.msra.mxu0 %v14369_v36  ;;  %8685 = vmatpush1.bf16.msra.mxu1 %v14371_v27  ;;  %v1320_v36 = vld [vmem:[#allocation2 + $0x1cd8] sm:$0xff] }
 0x530   :  { %8317 = vmatprep.subr.bf16.mxu0 %v14378_v30  ;;  %8686 = vmatprep.subr.bf16.mxu1 %v14380_v31  ;;  %v1324_v27 = vld [vmem:[#allocation2 + $0x1cf8] sm:$0xff]  ;;  %v14425_v30 = vcombine.low %v1311_v59, %v1315_v18  ;;  %v14434_v31 = vcombine.high %v1319_v33, %v1323_v4  ;;  %v1367_v59 = vld [vmem:[#allocation2 + $0x1e50] sm:$0xff] }
 0x531   :  { %v14436_v32 = vcombine.high %v1320_v36, %v1324_v27  ;;  %v1371_v18 = vld [vmem:[#allocation2 + $0x1e70] sm:$0xff] }
 0x533   :  { %8318 = vmatpush1.bf16.msra.mxu0 %v14377_v38  ;;  %8687 = vmatpush1.bf16.msra.mxu1 %v14379_v14  ;;  %v1332_v38 = vld [vmem:[#allocation2 + $0x1d38] sm:$0xff]  ;;  %v14433_v14 = vcombine.low %v1319_v33, %v1323_v4  ;;  %v1375_v33 = vld [vmem:[#allocation2 + $0x1e90] sm:$0xff] }
 0x534   :  { %8319 = vmatprep.subr.bf16.mxu0 %v14386_v40  ;;  %8688 = vmatprep.subr.bf16.mxu1 %v14388_v28  ;;  %v14435_v40 = vcombine.low %v1320_v36, %v1324_v27  ;;  %v14442_v28 = vcombine.high %v1327_v34, %v1331_v35  ;;  %v1379_v4 = vld [vmem:[#allocation2 + $0x1eb0] sm:$0xff]  ;;  %v1376_v36 = vld [vmem:[#allocation2 + $0x1e98] sm:$0xff] }
 0x535   :  { %v1380_v27 = vld [vmem:[#allocation2 + $0x1eb8] sm:$0xff] }
 0x537   :  { %8320 = vmatpush1.bf16.msra.mxu0 %v14385_v45  ;;  %8689 = vmatpush1.bf16.msra.mxu1 %v14387_v46  ;;  %v14441_v45 = vcombine.low %v1327_v34, %v1331_v35  ;;  %v14443_v46 = vcombine.low %v1328_v63, %v1332_v38  ;;  %v1383_v34 = vld [vmem:[#allocation2 + $0x1ed0] sm:$0xff] }
 0x538   :  { %8321 = vmatprep.subr.bf16.mxu0 %v14394_v47  ;;  %8690 = vmatprep.subr.bf16.mxu1 %v14396_v48  ;;  %v14450_v47 = vcombine.high %v1335_v57, %v1339_v0  ;;  %v14452_v48 = vcombine.high %v1336_v9, %v1340_v42  ;;  %v1387_v35 = vld [vmem:[#allocation2 + $0x1ef0] sm:$0xff] }
 0x53b   :  { %8322 = vmatpush1.bf16.msra.mxu0 %v14393_v55  ;;  %8691 = vmatpush1.bf16.msra.mxu1 %v14395_v43  ;;  %v14449_v55 = vcombine.low %v1335_v57, %v1339_v0  ;;  %v14451_v43 = vcombine.low %v1336_v9, %v1340_v42  ;;  %v1391_v57 = vld [vmem:[#allocation2 + $0x1f10] sm:$0xff]  ;;  %v1392_v9 = vld [vmem:[#allocation2 + $0x1f18] sm:$0xff] }
 0x53c   :  { %8323 = vmatprep.subr.bf16.mxu0 %v14402_v52  ;;  %8692 = vmatprep.subr.bf16.mxu1 %v14404_v10  ;;  %v14458_v52 = vcombine.high %v1343_v49, %v1347_v50  ;;  %v14460_v10 = vcombine.high %v1344_v16, %v1348_v12  ;;  %v1395_v0 = vld [vmem:[#allocation2 + $0x1f30] sm:$0xff]  ;;  %v1396_v42 = vld [vmem:[#allocation2 + $0x1f38] sm:$0xff] }
 0x53f   :  { %8324 = vmatpush1.bf16.msra.mxu0 %v14401_v5  ;;  %8693 = vmatpush1.bf16.msra.mxu1 %v14403_v6  ;;  %v14457_v5 = vcombine.low %v1343_v49, %v1347_v50  ;;  %v14459_v6 = vcombine.low %v1344_v16, %v1348_v12  ;;  %v1399_v49 = vld [vmem:[#allocation2 + $0x1f50] sm:$0xff]  ;;  %v1400_v16 = vld [vmem:[#allocation2 + $0x1f58] sm:$0xff] }
 0x540   :  { %8334 = vmatprep.subr.bf16.mxu0 %v14410_v7  ;;  %8703 = vmatprep.subr.bf16.mxu1 %v14412_v8  ;;  %v14466_v7 = vcombine.high %v1351_v58, %v1355_v23  ;;  %v14468_v8 = vcombine.high %v1352_v2, %v1356_v3  ;;  %v1403_v50 = vld [vmem:[#allocation2 + $0x1f70] sm:$0xff]  ;;  %v1404_v12 = vld [vmem:[#allocation2 + $0x1f78] sm:$0xff] }
 0x542   :  { %8326 = vmatmul.mubr.bf16.vlgmr.msra.gmra.mrb[4].mxu0 %v17333_v26  ;;  %8695 = vmatmul.mubr.bf16.vlgmr.msra.gmra.mrb[4].mxu1 %v17333_v26  ;;  %v14427_v26 = vcombine.low %v1312_v20, %v1316_v51  ;;  %v1368_v20 = vld [vmem:[#allocation2 + $0x1e58] sm:$0xff] }
 0x543   :  { %8335 = vmatpush1.bf16.msra.mxu0 %v14409_v15  ;;  %8704 = vmatpush1.bf16.msra.mxu1 %v14411_v25  ;;  %v14465_v15 = vcombine.low %v1351_v58, %v1355_v23  ;;  %v14467_v25 = vcombine.low %v1352_v2, %v1356_v3  ;;  %v1372_v51 = vld [vmem:[#allocation2 + $0x1e78] sm:$0xff]  ;;  %v1407_v58 = vld [vmem:[#allocation2 + $0x1f90] sm:$0xff] }
 0x544   :  { %8336 = vmatprep.subr.bf16.mxu0 %v14418_v17  ;;  %8705 = vmatprep.subr.bf16.mxu1 %v14420_v62  ;;  %v14474_v17 = vcombine.high %v1359_v13, %v1363_v41  ;;  %v14476_v62 = vcombine.high %v1360_v29, %v1364_v19  ;;  %v1411_v23 = vld [vmem:[#allocation2 + $0x1fb0] sm:$0xff]  ;;  %v1408_v2 = vld [vmem:[#allocation2 + $0x1f98] sm:$0xff] }
 0x545   :  { %8366 = vmatprep.mubr.bf16.mxu0 %v17335_v37  ;;  %8735 = vmatprep.mubr.bf16.mxu1 %v17335_v37  ;;  %v14444_v37 = vcombine.high %v1328_v63, %v1332_v38  ;;  %v1384_v63 = vld [vmem:[#allocation2 + $0x1ed8] sm:$0xff] }
 0x546   :  { %v1388_v38 = vld [vmem:[#allocation2 + $0x1ef8] sm:$0xff] }
 0x547   :  { %8337 = vmatpush1.bf16.msra.mxu0 %v14417_v21  ;;  %8706 = vmatpush1.bf16.msra.mxu1 %v14419_v39  ;;  %v14473_v21 = vcombine.low %v1359_v13, %v1363_v41  ;;  %v14475_v39 = vcombine.low %v1360_v29, %v1364_v19  ;;  %v1412_v3 = vld [vmem:[#allocation2 + $0x1fb8] sm:$0xff]  ;;  %v1415_v13 = vld [vmem:[#allocation2 + $0x1fd0] sm:$0xff] }
 0x548   :  { %8338 = vmatprep.subr.bf16.mxu0 %v14426_v24  ;;  %8707 = vmatprep.subr.bf16.mxu1 %v14428_v53  ;;  %v14482_v24 = vcombine.high %v1367_v59, %v1371_v18  ;;  %v14484_v53 = vcombine.high %v1368_v20, %v1372_v51  ;;  %v1419_v41 = vld [vmem:[#allocation2 + $0x1ff0] sm:$0xff]  ;;  %v1416_v29 = vld [vmem:[#allocation2 + $0x1fd8] sm:$0xff] }
 0x549   :  { %v1420_v19 = vld [vmem:[#allocation2 + $0x1ff8] sm:$0xff] }
 0x54b   :  { %8339 = vmatpush1.bf16.msra.mxu0 %v14425_v30  ;;  %8708 = vmatpush1.bf16.msra.mxu1 %v14427_v26  ;;  %v14481_v30 = vcombine.low %v1367_v59, %v1371_v18  ;;  %v14483_v26 = vcombine.low %v1368_v20, %v1372_v51  ;;  %v1423_v59 = vld [vmem:[#allocation2 + $0x2010] sm:$0xff]  ;;  %v1424_v20 = vld [vmem:[#allocation2 + $0x2018] sm:$0xff] }
 0x54c   :  { %8340 = vmatprep.subr.bf16.mxu0 %v14434_v31  ;;  %8709 = vmatprep.subr.bf16.mxu1 %v14436_v32  ;;  %v14490_v31 = vcombine.high %v1375_v33, %v1379_v4  ;;  %v14492_v32 = vcombine.high %v1376_v36, %v1380_v27  ;;  %v1427_v18 = vld [vmem:[#allocation2 + $0x2030] sm:$0xff]  ;;  %v1428_v51 = vld [vmem:[#allocation2 + $0x2038] sm:$0xff] }
 0x54f   :  { %8341 = vmatpush1.bf16.msra.mxu0 %v14433_v14  ;;  %8710 = vmatpush1.bf16.msra.mxu1 %v14435_v40  ;;  %v14489_v14 = vcombine.low %v1375_v33, %v1379_v4  ;;  %v14491_v40 = vcombine.low %v1376_v36, %v1380_v27  ;;  %v1431_v33 = vld [vmem:[#allocation2 + $0x2050] sm:$0xff]  ;;  %v1432_v36 = vld [vmem:[#allocation2 + $0x2058] sm:$0xff] }
 0x550   :  { %8342 = vmatprep.subr.bf16.mxu0 %v14442_v28  ;;  %8711 = vmatprep.subr.bf16.mxu1 %v14444_v37  ;;  %v14498_v28 = vcombine.high %v1383_v34, %v1387_v35  ;;  %v14500_v37 = vcombine.high %v1384_v63, %v1388_v38  ;;  %v1435_v4 = vld [vmem:[#allocation2 + $0x2070] sm:$0xff]  ;;  %v1436_v27 = vld [vmem:[#allocation2 + $0x2078] sm:$0xff] }
 0x553   :  { %8343 = vmatpush1.bf16.msra.mxu0 %v14441_v45  ;;  %8712 = vmatpush1.bf16.msra.mxu1 %v14443_v46  ;;  %v14497_v45 = vcombine.low %v1383_v34, %v1387_v35  ;;  %v14499_v46 = vcombine.low %v1384_v63, %v1388_v38  ;;  %v1439_v34 = vld [vmem:[#allocation2 + $0x2090] sm:$0xff]  ;;  %v1440_v63 = vld [vmem:[#allocation2 + $0x2098] sm:$0xff] }
 0x554   :  { %8344 = vmatprep.subr.bf16.mxu0 %v14450_v47  ;;  %8713 = vmatprep.subr.bf16.mxu1 %v14452_v48  ;;  %v14506_v47 = vcombine.high %v1391_v57, %v1395_v0  ;;  %v14508_v48 = vcombine.high %v1392_v9, %v1396_v42  ;;  %v1443_v35 = vld [vmem:[#allocation2 + $0x20b0] sm:$0xff]  ;;  %v1444_v38 = vld [vmem:[#allocation2 + $0x20b8] sm:$0xff] }
 0x557   :  { %8345 = vmatpush1.bf16.msra.mxu0 %v14449_v55  ;;  %8714 = vmatpush1.bf16.msra.mxu1 %v14451_v43  ;;  %v14505_v55 = vcombine.low %v1391_v57, %v1395_v0  ;;  %v14507_v43 = vcombine.low %v1392_v9, %v1396_v42  ;;  %v1447_v57 = vld [vmem:[#allocation2 + $0x20d0] sm:$0xff]  ;;  %v1448_v9 = vld [vmem:[#allocation2 + $0x20d8] sm:$0xff] }
 0x558   :  { %8346 = vmatprep.subr.bf16.mxu0 %v14458_v52  ;;  %8715 = vmatprep.subr.bf16.mxu1 %v14460_v10  ;;  %v14514_v52 = vcombine.high %v1399_v49, %v1403_v50  ;;  %v14516_v10 = vcombine.high %v1400_v16, %v1404_v12  ;;  %v1451_v0 = vld [vmem:[#allocation2 + $0x20f0] sm:$0xff]  ;;  %v1452_v42 = vld [vmem:[#allocation2 + $0x20f8] sm:$0xff] }
 0x55b   :  { %8347 = vmatpush1.bf16.msra.mxu0 %v14457_v5  ;;  %8716 = vmatpush1.bf16.msra.mxu1 %v14459_v6  ;;  %v14513_v5 = vcombine.low %v1399_v49, %v1403_v50  ;;  %v14515_v6 = vcombine.low %v1400_v16, %v1404_v12  ;;  %v1459_v49 = vld [vmem:[#allocation2 + $0x2130] sm:$0xff]  ;;  %v1456_v50 = vld [vmem:[#allocation2 + $0x2118] sm:$0xff]  ;;  %v14561_v12 = vcombine.low %v1447_v57, %v1451_v0 }
 0x55c   :  { %8348 = vmatprep.subr.bf16.mxu0 %v14466_v7  ;;  %8717 = vmatprep.subr.bf16.mxu1 %v14468_v8  ;;  %v14522_v7 = vcombine.high %v1407_v58, %v1411_v23  ;;  %v14524_v8 = vcombine.high %v1408_v2, %v1412_v3  ;;  %v1460_v16 = vld [vmem:[#allocation2 + $0x2138] sm:$0xff] }
 0x55f   :  { %8349 = vmatpush1.bf16.msra.mxu0 %v14465_v15  ;;  %8718 = vmatpush1.bf16.msra.mxu1 %v14467_v25  ;;  %v14521_v15 = vcombine.low %v1407_v58, %v1411_v23  ;;  %v14523_v25 = vcombine.low %v1408_v2, %v1412_v3  ;;  %v1464_v58 = vld [vmem:[#allocation2 + $0x2158] sm:$0xff]  ;;  %v14571_v3 = vcombine.low %v1456_v50, %v1460_v16 }
 0x560   :  { %8350 = vmatprep.subr.bf16.mxu0 %v14474_v17  ;;  %8719 = vmatprep.subr.bf16.mxu1 %v14476_v62  ;;  %v14530_v17 = vcombine.high %v1415_v13, %v1419_v41  ;;  %v14532_v62 = vcombine.high %v1416_v29, %v1420_v19  ;;  %v1468_v23 = vld [vmem:[#allocation2 + $0x2178] sm:$0xff] }
 0x563   :  { %8351 = vmatpush1.bf16.msra.mxu0 %v14473_v21  ;;  %8720 = vmatpush1.bf16.msra.mxu1 %v14475_v39  ;;  %v14529_v21 = vcombine.low %v1415_v13, %v1419_v41  ;;  %v14531_v39 = vcombine.low %v1416_v29, %v1420_v19  ;;  %v1472_v13 = vld [vmem:[#allocation2 + $0x2198] sm:$0xff]  ;;  %v14579_v19 = vcombine.low %v1464_v58, %v1468_v23 }
 0x564   :  { %8352 = vmatprep.subr.bf16.mxu0 %v14482_v24  ;;  %8721 = vmatprep.subr.bf16.mxu1 %v14484_v53  ;;  %v14538_v24 = vcombine.high %v1423_v59, %v1427_v18  ;;  %v14540_v53 = vcombine.high %v1424_v20, %v1428_v51  ;;  %v1476_v41 = vld [vmem:[#allocation2 + $0x21b8] sm:$0xff] }
 0x567   :  { %8353 = vmatpush1.bf16.msra.mxu0 %v14481_v30  ;;  %8722 = vmatpush1.bf16.msra.mxu1 %v14483_v26  ;;  %v14537_v30 = vcombine.low %v1423_v59, %v1427_v18  ;;  %v14539_v26 = vcombine.low %v1424_v20, %v1428_v51  ;;  %v1480_v59 = vld [vmem:[#allocation2 + $0x21d8] sm:$0xff]  ;;  %v14587_v51 = vcombine.low %v1472_v13, %v1476_v41 }
 0x568   :  { %8354 = vmatprep.subr.bf16.mxu0 %v14490_v31  ;;  %8723 = vmatprep.subr.bf16.mxu1 %v14492_v32  ;;  %v14546_v31 = vcombine.high %v1431_v33, %v1435_v4  ;;  %v14548_v32 = vcombine.high %v1432_v36, %v1436_v27  ;;  %v1484_v18 = vld [vmem:[#allocation2 + $0x21f8] sm:$0xff] }
 0x56b   :  { %8355 = vmatpush1.bf16.msra.mxu0 %v14489_v14  ;;  %8724 = vmatpush1.bf16.msra.mxu1 %v14491_v40  ;;  %v14545_v14 = vcombine.low %v1431_v33, %v1435_v4  ;;  %v14547_v40 = vcombine.low %v1432_v36, %v1436_v27  ;;  %v1488_v33 = vld [vmem:[#allocation2 + $0x2218] sm:$0xff]  ;;  %v14595_v27 = vcombine.low %v1480_v59, %v1484_v18 }
 0x56c   :  { %8356 = vmatprep.subr.bf16.mxu0 %v14498_v28  ;;  %8725 = vmatprep.subr.bf16.mxu1 %v14500_v37  ;;  %v14554_v28 = vcombine.high %v1439_v34, %v1443_v35  ;;  %v14556_v37 = vcombine.high %v1440_v63, %v1444_v38  ;;  %v1492_v4 = vld [vmem:[#allocation2 + $0x2238] sm:$0xff] }
 0x56f   :  { %8357 = vmatpush1.bf16.msra.mxu0 %v14497_v45  ;;  %8726 = vmatpush1.bf16.msra.mxu1 %v14499_v46  ;;  %v14553_v45 = vcombine.low %v1439_v34, %v1443_v35  ;;  %v14562_v46 = vcombine.high %v1447_v57, %v1451_v0  ;;  %v1496_v34 = vld [vmem:[#allocation2 + $0x2258] sm:$0xff] }
 0x570   :  { %8358 = vmatprep.subr.bf16.mxu0 %v14506_v47  ;;  %8727 = vmatprep.subr.bf16.mxu1 %v14508_v48  ;;  %v14564_v47 = vcombine.high %v1448_v9, %v1452_v42  ;;  %v1455_v48 = vld [vmem:[#allocation2 + $0x2110] sm:$0xff]  ;;  %v1500_v35 = vld [vmem:[#allocation2 + $0x2278] sm:$0xff] }
 0x571   :  { %v14569_v2 = vcombine.low %v1455_v48, %v1459_v49  ;;  %v1504_v57 = vld [vmem:[#allocation2 + $0x2298] sm:$0xff] }
 0x572   :  { %v1508_v0 = vld [vmem:[#allocation2 + $0x22b8] sm:$0xff] }
 0x573   :  { %8359 = vmatpush1.bf16.msra.mxu0 %v14505_v55  ;;  %8728 = vmatpush1.bf16.msra.mxu1 %v14507_v43  ;;  %v14563_v55 = vcombine.low %v1448_v9, %v1452_v42  ;;  %v14570_v43 = vcombine.high %v1455_v48, %v1459_v49  ;;  %v8843_v42 = vmul.f32 %v17382_v61, %v17382_v61  ;;  %v1511_v48 = vld [vmem:[#allocation2 + $0x22d0] sm:$0xff] }
 0x574   :  { %8360 = vmatprep.subr.bf16.mxu0 %v14514_v52  ;;  %8729 = vmatprep.subr.bf16.mxu1 %v14516_v10  ;;  %v1463_v52 = vld [vmem:[#allocation2 + $0x2150] sm:$0xff] }
 0x575   :  { %v1467_v10 = vld [vmem:[#allocation2 + $0x2170] sm:$0xff] }
 0x576   :  { %v14577_v29 = vcombine.low %v1463_v52, %v1467_v10  ;;  %v1515_v49 = vld [vmem:[#allocation2 + $0x22f0] sm:$0xff] }
 0x577   :  { %8361 = vmatpush1.bf16.msra.mxu0 %v14513_v5  ;;  %8730 = vmatpush1.bf16.msra.mxu1 %v14515_v6  ;;  %v14578_v5 = vcombine.high %v1463_v52, %v1467_v10  ;;  %v14580_v6 = vcombine.high %v1464_v58, %v1468_v23  ;;  %v1519_v58 = vld [vmem:[#allocation2 + $0x2310] sm:$0xff] }
 0x578   :  { %8362 = vmatprep.subr.bf16.mxu0 %v14522_v7  ;;  %8731 = vmatprep.subr.bf16.mxu1 %v14524_v8  ;;  %v1471_v7 = vld [vmem:[#allocation2 + $0x2190] sm:$0xff] }
 0x579   :  { %v1475_v8 = vld [vmem:[#allocation2 + $0x21b0] sm:$0xff] }
 0x57a   :  { %v14585_v20 = vcombine.low %v1471_v7, %v1475_v8  ;;  %v1523_v23 = vld [vmem:[#allocation2 + $0x2330] sm:$0xff] }
 0x57b   :  { %8363 = vmatpush1.bf16.msra.mxu0 %v14521_v15  ;;  %8732 = vmatpush1.bf16.msra.mxu1 %v14523_v25  ;;  %v14586_v15 = vcombine.high %v1471_v7, %v1475_v8  ;;  %v14588_v25 = vcombine.high %v1472_v13, %v1476_v41  ;;  %v8807_v7 = vsel %vm8785_vm0, %v17384_v54, 0.0  ;;  %v14625_v8 = vcombine.low %v1511_v48, %v1515_v49 }
 0x57c   :  { %8364 = vmatprep.subr.bf16.mxu0 %v14530_v17  ;;  %8733 = vmatprep.subr.bf16.mxu1 %v14532_v62  ;;  %v1479_v17 = vld [vmem:[#allocation2 + $0x21d0] sm:$0xff] }
 0x57d   :  { %v1483_v62 = vld [vmem:[#allocation2 + $0x21f0] sm:$0xff] }
 0x57e   :  { %v14593_v36 = vcombine.low %v1479_v17, %v1483_v62 }
 0x57f   :  { %8365 = vmatpush1.bf16.msra.mxu0 %v14529_v21  ;;  %8734 = vmatpush1.bf16.msra.mxu1 %v14531_v39  ;;  %v14594_v21 = vcombine.high %v1479_v17, %v1483_v62  ;;  %v14596_v39 = vcombine.high %v1480_v59, %v1484_v18  ;;  %v1531_v17 = vld [vmem:[#allocation2 + $0x2370] sm:$0xff]  ;;  %v8808_v62 = vrot.slane %v8807_v7, 4  ;;  %v1528_v59 = vld [vmem:[#allocation2 + $0x2358] sm:$0xff] }
 0x580   :  { %8375 = vmatprep.subr.bf16.mxu0 %v14538_v24  ;;  %8744 = vmatprep.subr.bf16.mxu1 %v14540_v53  ;;  %v1487_v24 = vld [vmem:[#allocation2 + $0x2210] sm:$0xff]  ;;  %v1532_v18 = vld [vmem:[#allocation2 + $0x2378] sm:$0xff] }
 0x581   :  { %v1491_v53 = vld [vmem:[#allocation2 + $0x2230] sm:$0xff] }
 0x582   :  { %8367 = vmatmul.mubr.bf16.vlgmr.msra.gmra.mrb[4].mxu0 %v17350_v11  ;;  %8736 = vmatmul.mubr.bf16.vlgmr.msra.gmra.mrb[4].mxu1 %v17350_v11  ;;  %v14555_v11 = vcombine.low %v1440_v63, %v1444_v38  ;;  %v14601_v63 = vcombine.low %v1487_v24, %v1491_v53  ;;  %v14603_v38 = vcombine.low %v1488_v33, %v1492_v4 }
 0x583   :  { %8376 = vmatpush1.bf16.msra.mxu0 %v14537_v30  ;;  %8745 = vmatpush1.bf16.msra.mxu1 %v14539_v26  ;;  %v14602_v30 = vcombine.high %v1487_v24, %v1491_v53  ;;  %v14604_v26 = vcombine.high %v1488_v33, %v1492_v4  ;;  %v14644_v33 = vcombine.high %v1528_v59, %v1532_v18  ;;  %v1535_v4 = vld [vmem:[#allocation2 + $0x2390] sm:$0xff] }
 0x584   :  { %8377 = vmatprep.subr.bf16.mxu0 %v14546_v31  ;;  %8746 = vmatprep.subr.bf16.mxu1 %v14548_v32  ;;  %v1495_v31 = vld [vmem:[#allocation2 + $0x2250] sm:$0xff] }
 0x585   :  { %8407 = vmatprep.mubr.bf16.mxu0 %v17352_v22  ;;  %8776 = vmatprep.mubr.bf16.mxu1 %v17352_v22  ;;  %v14572_v22 = vcombine.high %v1456_v50, %v1460_v16  ;;  %v1499_v32 = vld [vmem:[#allocation2 + $0x2270] sm:$0xff]  ;;  %v1512_v50 = vld [vmem:[#allocation2 + $0x22d8] sm:$0xff] }
 0x586   :  { %v14609_v9 = vcombine.low %v1495_v31, %v1499_v32  ;;  %v1516_v16 = vld [vmem:[#allocation2 + $0x22f8] sm:$0xff] }
 0x587   :  { %8378 = vmatpush1.bf16.msra.mxu0 %v14545_v14  ;;  %8747 = vmatpush1.bf16.msra.mxu1 %v14547_v40  ;;  %v14610_v14 = vcombine.high %v1495_v31, %v1499_v32  ;;  %v14612_v40 = vcombine.high %v1496_v34, %v1500_v35  ;;  %v14628_v10 = vcombine.high %v1512_v50, %v1516_v16 }
 0x588   :  { %8379 = vmatprep.subr.bf16.mxu0 %v14554_v28  ;;  %8748 = vmatprep.subr.bf16.mxu1 %v14556_v37  ;;  %v1503_v28 = vld [vmem:[#allocation2 + $0x2290] sm:$0xff]  ;;  %v14627_v41 = vcombine.low %v1512_v50, %v1516_v16  ;;  %v8932_v50 = vld [vmem:[%s18412_s4 + $0x88] sm:$0xff] }
 0x589   :  { %v1507_v37 = vld [vmem:[#allocation2 + $0x22b0] sm:$0xff] }
 0x58b   :  { %8380 = vmatpush1.bf16.msra.mxu0 %v14553_v45  ;;  %8749 = vmatpush1.bf16.msra.mxu1 %v14555_v11  ;;  %v14611_v45 = vcombine.low %v1496_v34, %v1500_v35  ;;  %v14618_v11 = vcombine.high %v1503_v28, %v1507_v37  ;;  %v14643_v35 = vcombine.low %v1528_v59, %v1532_v18  ;;  %v8917_v59 = vld [vmem:[%s18412_s4 + $0x10] sm:$0xff]  ;;  %v8918_v18 = vld [vmem:[%s18412_s4 + $0x18] sm:$0xff] }
 0x58c   :  { %8381 = vmatprep.subr.bf16.mxu0 %v14562_v46  ;;  %8750 = vmatprep.subr.bf16.mxu1 %v14564_v47  ;;  %v8845_v46 = vmul.f32 %v17384_v54, %v17384_v54  ;;  %v14620_v47 = vcombine.high %v1504_v57, %v1508_v0 }
 0x58e   :  { %v8871_v52 = vsel %vm8785_vm0, %v8845_v46, 0.0 }
 0x58f   :  { %8382 = vmatpush1.bf16.msra.mxu0 %v14561_v12  ;;  %8751 = vmatpush1.bf16.msra.mxu1 %v14563_v55  ;;  %v14617_v12 = vcombine.low %v1503_v28, %v1507_v37  ;;  %v8857_v55 = vsel %vm8785_vm0, %v8843_v42, 0.0  ;;  %v8872_v13 = vrot.slane %v8871_v52, 4  ;;  %v1547_v28 = vld [vmem:[#allocation2 + $0x23f0] sm:$0xff] }
 0x590   :  { %8383 = vmatprep.subr.bf16.mxu0 %v14570_v43  ;;  %8752 = vmatprep.subr.bf16.mxu1 %v14572_v22  ;;  %v14619_v43 = vcombine.low %v1504_v57, %v1508_v0  ;;  %v14626_v22 = vcombine.high %v1511_v48, %v1515_v49  ;;  %v1544_v57 = vld [vmem:[#allocation2 + $0x23d8] sm:$0xff]  ;;  %v8931_v49 = vld [vmem:[%s18412_s4 + $0x80] sm:$0xff] }
 0x591   :  { %v1548_v0 = vld [vmem:[#allocation2 + $0x23f8] sm:$0xff] }
 0x592   :  { %v14660_v48 = vcombine.high %v1544_v57, %v1548_v0 }
 0x593   :  { %8384 = vmatpush1.bf16.msra.mxu0 %v14569_v2  ;;  %8753 = vmatpush1.bf16.msra.mxu1 %v14571_v3  ;;  %v8793_v2 = vsel %vm8785_vm0, %v17382_v61, 0.0  ;;  %v1520_v3 = vld [vmem:[#allocation2 + $0x2318] sm:$0xff] }
 0x594   :  { %8385 = vmatprep.subr.bf16.mxu0 %v14578_v5  ;;  %8754 = vmatprep.subr.bf16.mxu1 %v14580_v6  ;;  %v1524_v5 = vld [vmem:[#allocation2 + $0x2338] sm:$0xff]  ;;  %v8858_v6 = vrot.slane %v8857_v55, 4 }
 0x597   :  { %8386 = vmatpush1.bf16.msra.mxu0 %v14577_v29  ;;  %8755 = vmatpush1.bf16.msra.mxu1 %v14579_v19  ;;  %v14634_v29 = vcombine.high %v1519_v58, %v1523_v23  ;;  %v8794_v19 = vrot.slane %v8793_v2, 4 }
 0x598   :  { %8387 = vmatprep.subr.bf16.mxu0 %v14586_v15  ;;  %8756 = vmatprep.subr.bf16.mxu1 %v14588_v25  ;;  %v14636_v15 = vcombine.high %v1520_v3, %v1524_v5  ;;  %v1527_v25 = vld [vmem:[#allocation2 + $0x2350] sm:$0xff] }
 0x599   :  { %v14642_v24 = vcombine.high %v1527_v25, %v1531_v17  ;;  %v8795_v53 = vadd.f32 %v8794_v19, %v8793_v2  ;;  %v14641_v32 = vcombine.low %v1527_v25, %v1531_v17  ;;  %v8966_v25 = vld [vmem:[%s18412_s4 + $0x198] sm:$0xff] }
 0x59b   :  { %8388 = vmatpush1.bf16.msra.mxu0 %v14585_v20  ;;  %8757 = vmatpush1.bf16.msra.mxu1 %v14587_v51  ;;  %v8859_v20 = vadd.f32 %v8858_v6, %v8857_v55  ;;  %v14633_v51 = vcombine.low %v1519_v58, %v1523_v23  ;;  %v8964_v55 = vld [vmem:[%s18412_s4 + $0x188] sm:$0xff]  ;;  %v8915_v58 = vld [vmem:[%s18412_s4] sm:$0xff] }
 0x59c   :  { %8389 = vmatprep.subr.bf16.mxu0 %v14594_v21  ;;  %8758 = vmatprep.subr.bf16.mxu1 %v14596_v39  ;;  %v8873_v21 = vadd.f32 %v8872_v13, %v8871_v52  ;;  %v14635_v39 = vcombine.low %v1520_v3, %v1524_v5  ;;  %v14659_v52 = vcombine.low %v1544_v57, %v1548_v0  ;;  %v8916_v23 = vld [vmem:[%s18412_s4 + $0x8] sm:$0xff]  ;;  %v8947_v6 = vld [vmem:[%s18412_s4 + $0x100] sm:$0xff]  ;;  %v8933_v13 = vld [vmem:[%s18412_s4 + $0x90] sm:$0xff] }
 0x59d   :  { %v8860_v31 = vrot.slane %v8859_v20, 2  ;;  %v8938_v57 = vld [vmem:[%s18412_s4 + $0xb8] sm:$0xff] }
 0x59e   :  { %v8874_v34 = vrot.slane %v8873_v21, 2 }
 0x59f   :  { %8390 = vmatpush1.bf16.msra.mxu0 %v14593_v36  ;;  %8759 = vmatpush1.bf16.msra.mxu1 %v14595_v27  ;;  %v1539_v36 = vld [vmem:[#allocation2 + $0x23b0] sm:$0xff]  ;;  %v8809_v27 = vadd.f32 %v8808_v62, %v8807_v7  ;;  %v8861_v42 = vadd.f32 %v8860_v31, %v8859_v20  ;;  %v8948_v7 = vld [vmem:[%s18412_s4 + $0x108] sm:$0xff] }
 0x5a0   :  { %8391 = vmatprep.subr.bf16.mxu0 %v14602_v30  ;;  %8760 = vmatprep.subr.bf16.mxu1 %v14604_v26  ;;  %v1536_v30 = vld [vmem:[#allocation2 + $0x2398] sm:$0xff]  ;;  %v8875_v46 = vadd.f32 %v8874_v34, %v8873_v21  ;;  %v15461_v17 = vpack.c.bf16 %v8948_v7, %v8947_v6  ;;  %v8949_v20 = vld [vmem:[%s18412_s4 + $0x110] sm:$0xff] }
 0x5a1   :  { %v1540_v26 = vld [vmem:[#allocation2 + $0x23b8] sm:$0xff]  ;;  %v8810_v37 = vrot.slane %v8809_v27, 2 }
 0x5a2   :  { %v8876_v2 = vrot.slane %v8875_v46, 1 }
 0x5a3   :  { %8392 = vmatpush1.bf16.msra.mxu0 %v14601_v63  ;;  %8761 = vmatpush1.bf16.msra.mxu1 %v14603_v38  ;;  %v14650_v63 = vcombine.high %v1535_v4, %v1539_v36  ;;  %v8796_v38 = vrot.slane %v8795_v53, 2  ;;  %v8811_v16 = vadd.f32 %v8810_v37, %v8809_v27  ;;  %v8967_v27 = vld [vmem:[%s18412_s4 + $0x1a0] sm:$0xff]  ;;  %v8937_v37 = vld [vmem:[%s18412_s4 + $0xb0] sm:$0xff] }
 0x5a4   :  { %8393 = vmatprep.subr.bf16.mxu0 %v14610_v14  ;;  %8762 = vmatprep.subr.bf16.mxu1 %v14612_v40  ;;  %v14652_v14 = vcombine.high %v1536_v30, %v1540_v26  ;;  %v1543_v40 = vld [vmem:[#allocation2 + $0x23d0] sm:$0xff]  ;;  %v8877_v62 = vadd.f32 %v8876_v2, %v8875_v46  ;;  %v8786_v46 = vsel %vm8785_vm0, %v17378_v56, 0.0  ;;  %v8972_v2 = vld [vmem:[%s18412_s4 + $0x1c8] sm:$0xff] }
 0x5a7   :  { %8394 = vmatpush1.bf16.msra.mxu0 %v14609_v9  ;;  %8763 = vmatpush1.bf16.msra.mxu1 %v14611_v45  ;;  %v14649_v9 = vcombine.low %v1535_v4, %v1539_v36  ;;  %v14651_v45 = vcombine.low %v1536_v30, %v1540_v26  ;;  %v8968_v30 = vld [vmem:[%s18412_s4 + $0x1a8] sm:$0xff]  ;;  %v8844_v26 = vmul.f32 %v17380_v60, %v17380_v60 }
 0x5a8   :  { %8395 = vmatprep.subr.bf16.mxu0 %v14618_v11  ;;  %8764 = vmatprep.subr.bf16.mxu1 %v14620_v47  ;;  %v14658_v11 = vcombine.high %v1543_v40, %v1547_v28  ;;  %v8797_v47 = vadd.f32 %v8796_v38, %v8795_v53  ;;  %v8936_v53 = vld [vmem:[%s18412_s4 + $0xa8] sm:$0xff]  ;;  %v8919_v38 = vld [vmem:[%s18412_s4 + $0x20] sm:$0xff] }
 0x5aa   :  { %v8798_v5 = vrot.slane %v8797_v47, 1 }
 0x5ab   :  { %8396 = vmatpush1.bf16.msra.mxu0 %v14617_v12  ;;  %8765 = vmatpush1.bf16.msra.mxu1 %v14619_v43  ;;  %v8963_v12 = vld [vmem:[%s18412_s4 + $0x180] sm:$0xff]  ;;  %v14657_v43 = vcombine.low %v1543_v40, %v1547_v28  ;;  %v15467_v40 = vpack.c.bf16 %v8968_v30, %v8967_v27  ;;  %v8952_v28 = vld [vmem:[%s18412_s4 + $0x128] sm:$0xff] }
 0x5ac   :  { %8397 = vmatprep.subr.bf16.mxu0 %v14626_v22  ;;  %8766 = vmatprep.subr.bf16.mxu1 %v14628_v10  ;;  %v8862_v22 = vrot.slane %v8861_v42, 1  ;;  %v15427_v10 = vpack.c.bf16 %v8932_v50, %v8931_v49  ;;  %v15459_v3 = vpack.c.bf16 %v8964_v55, %v8963_v12  ;;  %v8921_v49 = vld [vmem:[%s18412_s4 + $0x30] sm:$0xff]  ;;  %v8922_v50 = vld [vmem:[%s18412_s4 + $0x38] sm:$0xff]  ;;  %v8800_v55 = vsel %vm8785_vm0, %v17380_v60, 0.0 }
 0x5ad   :  { %v8801_v6 = vrot.slane %v8800_v55, 4 }
 0x5ae   :  { %v8863_v19 = vadd.f32 %v8862_v22, %v8861_v42  ;;  %v8970_v42 = vld [vmem:[%s18412_s4 + $0x1b8] sm:$0xff] }
 0x5af   :  { %8398 = vmatpush1.bf16.msra.mxu0 %v14625_v8  ;;  %8767 = vmatpush1.bf16.msra.mxu1 %v14627_v41  ;;  %v8812_v8 = vrot.slane %v8811_v16, 1  ;;  %v8934_v41 = vld [vmem:[%s18412_s4 + $0x98] sm:$0xff] }
 0x5b0   :  { %8399 = vmatprep.subr.bf16.mxu0 %v14634_v29  ;;  %8768 = vmatprep.subr.bf16.mxu1 %v14636_v15  ;;  %v15429_v29 = vpack.c.bf16 %v8916_v23, %v8915_v58  ;;  %v8965_v15 = vld [vmem:[%s18412_s4 + $0x190] sm:$0xff]  ;;  %v15431_v21 = vpack.c.bf16 %v8934_v41, %v8933_v13  ;;  %v8954_v22 = vld [vmem:[%s18412_s4 + $0x138] sm:$0xff]  ;;  %v8971_v23 = vld [vmem:[%s18412_s4 + $0x1c0] sm:$0xff] }
 0x5b1   :  { %v8813_v4 = vadd.f32 %v8812_v8, %v8811_v16  ;;  %v15463_v36 = vpack.c.bf16 %v8966_v25, %v8965_v15  ;;  %v8953_v16 = vld [vmem:[%s18412_s4 + $0x130] sm:$0xff]  ;;  %v8923_v13 = vld [vmem:[%s18412_s4 + $0x40] sm:$0xff]  ;;  %v8924_v41 = vld [vmem:[%s18412_s4 + $0x48] sm:$0xff]  ;;  %v15475_v15 = vpack.c.bf16 %v8972_v2, %v8971_v23 }
 0x5b2   :  { %v15473_v7 = vpack.c.bf16 %v8954_v22, %v8953_v16  ;;  %v8956_v25 = vld [vmem:[%s18412_s4 + $0x148] sm:$0xff]  ;;  %v8929_v22 = vld [vmem:[%s18412_s4 + $0x70] sm:$0xff]  ;;  %v8962_v23 = vld [vmem:[%s18412_s4 + $0x178] sm:$0xff] }
 0x5b3   :  { %8400 = vmatpush1.bf16.msra.mxu0 %v14633_v51  ;;  %8769 = vmatpush1.bf16.msra.mxu1 %v14635_v39  ;;  %v8799_v51 = vadd.f32 %v8798_v5, %v8797_v47  ;;  %v8950_v39 = vld [vmem:[%s18412_s4 + $0x118] sm:$0xff]  ;;  %v8910_v34 = vsel %vm8906_vm1, %v8813_v4, %v8877_v62  ;;  %v15441_v5 = vpack.c.bf16 %v8922_v50, %v8921_v49 }
 0x5b4   :  { %8401 = vmatprep.subr.bf16.mxu0 %v14642_v24  ;;  %8770 = vmatprep.subr.bf16.mxu1 %v14644_v33  ;;  %v8935_v24 = vld [vmem:[%s18412_s4 + $0xa0] sm:$0xff]  ;;  %v8842_v33 = vmul.f32 %v17378_v56, %v17378_v56  ;;  %v8942_v62 = vld [vmem:[%s18412_s4 + $0xd8] sm:$0xff] }
 0x5b5   :  { %v8908_v31 = vsel %vm8906_vm1, %v8799_v51, %v8863_v19  ;;  %v8926_v4 = vld [vmem:[%s18412_s4 + $0x58] sm:$0xff] }
 0x5b6   :  { %v8850_v0 = vsel %vm8785_vm0, %v8842_v33, 0.0  ;;  %v8925_v33 = vld [vmem:[%s18412_s4 + $0x50] sm:$0xff]  ;;  %v8978_v49 = vld [vmem:[%s18412_s4 + $0x1f8] sm:$0xff] }
 0x5b7   :  { %8402 = vmatpush1.bf16.msra.mxu0 %v14641_v32  ;;  %8771 = vmatpush1.bf16.msra.mxu1 %v14643_v35  ;;  %v15433_v32 = vpack.c.bf16 %v8918_v18, %v8917_v59  ;;  %v15465_v35 = vpack.c.bf16 %v8950_v39, %v8949_v20  ;;  %v8851_v12 = vrot.slane %v8850_v0, 4  ;;  %v8973_v18 = vld [vmem:[%s18412_s4 + $0x1d0] sm:$0xff]  ;;  %v8974_v20 = vld [vmem:[%s18412_s4 + $0x1d8] sm:$0xff]  ;;  %v8802_v39 = vadd.f32 %v8801_v6, %v8800_v55 }
 0x5b8   :  { %8403 = vmatprep.subr.bf16.mxu0 %v14650_v63  ;;  %8772 = vmatprep.subr.bf16.mxu1 %v14652_v14  ;;  %v15435_v63 = vpack.c.bf16 %v8936_v53, %v8935_v24  ;;  %v8920_v14 = vld [vmem:[%s18412_s4 + $0x28] sm:$0xff]  ;;  %v15479_v30 = vpack.c.bf16 %v8974_v20, %v8973_v18 }
 0x5b9   :  { %v8852_v19 = vadd.f32 %v8851_v12, %v8850_v0  ;;  %v8959_v0 = vld [vmem:[%s18412_s4 + $0x160] sm:$0xff]  ;;  %v9012_v20 = vld [vmem:[%s18412_s4 + $0x308] sm:$0xff] }
 0x5bb   :  { %8404 = vmatpush1.bf16.msra.mxu0 %v14649_v9  ;;  %8773 = vmatpush1.bf16.msra.mxu1 %v14651_v45  ;;  %v8969_v9 = vld [vmem:[%s18412_s4 + $0x1b0] sm:$0xff]  ;;  %v8864_v45 = vsel %vm8785_vm0, %v8844_v26, 0.0  ;;  %v8853_v27 = vrot.slane %v8852_v19, 2  ;;  %v8958_v26 = vld [vmem:[%s18412_s4 + $0x158] sm:$0xff] }
 0x5bc   :  { %8405 = vmatprep.subr.bf16.mxu0 %v14658_v11  ;;  %8774 = vmatprep.subr.bf16.mxu1 %v14660_v48  ;;  %v15437_v11 = vpack.c.bf16 %v8920_v14, %v8919_v38  ;;  %v15439_v48 = vpack.c.bf16 %v8938_v57, %v8937_v37  ;;  %v8865_v58 = vrot.slane %v8864_v45, 4  ;;  %v15449_v14 = vpack.c.bf16 %v8926_v4, %v8925_v33  ;;  %v8927_v37 = vld [vmem:[%s18412_s4 + $0x60] sm:$0xff]  ;;  %v8928_v57 = vld [vmem:[%s18412_s4 + $0x68] sm:$0xff] }
 0x5bd   :  { %v15453_v16 = vpack.c.bf16 %v8928_v57, %v8927_v37 }
 0x5be   :  { %v8866_v59 = vadd.f32 %v8865_v58, %v8864_v45  ;;  %v8960_v45 = vld [vmem:[%s18412_s4 + $0x168] sm:$0xff] }
 0x5bf   :  { %8406 = vmatpush1.bf16.msra.mxu0 %v14657_v43  ;;  %8775 = vmatpush1.bf16.msra.mxu1 %v14659_v52  ;;  %v15471_v43 = vpack.c.bf16 %v8970_v42, %v8969_v9  ;;  %v8939_v52 = vld [vmem:[%s18412_s4 + $0xc0] sm:$0xff]  ;;  %v8854_v9 = vadd.f32 %v8853_v27, %v8852_v19  ;;  %v15485_v55 = vpack.c.bf16 %v8960_v45, %v8959_v0 }
 0x5c0   :  { %15428 = vmatprep.subr.bf16.mxu0 %v15427_v10  ;;  %15460 = vmatprep.subr.bf16.mxu1 %v15459_v3  ;;  %v8940_v10 = vld [vmem:[%s18412_s4 + $0xc8] sm:$0xff]  ;;  %v8787_v3 = vrot.slane %v8786_v46, 4  ;;  %v9015_v45 = vld [vmem:[%s18412_s4 + $0x320] sm:$0xff] }
 0x5c1   :  { %v15443_v8 = vpack.c.bf16 %v8940_v10, %v8939_v52  ;;  %v8930_v52 = vld [vmem:[%s18412_s4 + $0x78] sm:$0xff]  ;;  %v8961_v10 = vld [vmem:[%s18412_s4 + $0x170] sm:$0xff]  ;;  %v8855_v2 = vrot.slane %v8854_v9, 1 }
 0x5c2   :  { %8408 = vmatmul.mubr.bf16.vlgmr.msra.gmra.mrb[4].mxu0 %v17360_v1  ;;  %8777 = vmatmul.mubr.bf16.vlgmr.msra.gmra.mrb[4].mxu1 %v17360_v1  ;;  %v8951_v1 = vld [vmem:[%s18412_s4 + $0x120] sm:$0xff]  ;;  %v8788_v51 = vadd.f32 %v8787_v3, %v8786_v46  ;;  %v8946_v46 = vld [vmem:[%s18412_s4 + $0xf8] sm:$0xff]  ;;  %v15489_v19 = vpack.c.bf16 %v8962_v23, %v8961_v10  ;;  %v9017_v10 = vld [vmem:[%s18412_s4 + $0x330] sm:$0xff] }
 0x5c3   :  { %15430 = vmatpush3.bf16.msra.mxu0 %v15429_v29  ;;  %9107 = vmatprep.mubr.f32.mxu0 %v8908_v31  ;;  %v15469_v47 = vpack.c.bf16 %v8952_v28, %v8951_v1  ;;  %v8955_v29 = vld [vmem:[%s18412_s4 + $0x140] sm:$0xff]  ;;  %v8803_v1 = vrot.slane %v8802_v39, 2  ;;  %v9018_v23 = vld [vmem:[%s18412_s4 + $0x338] sm:$0xff] }
 0x5c4   :  { %15462 = vmatpush3.bf16.msra.mxu1 %v15461_v17  ;;  %9177 = vmatprep.mubr.f32.mxu1 %v8910_v34  ;;  %v8941_v17 = vld [vmem:[%s18412_s4 + $0xd0] sm:$0xff]  ;;  %v15477_v24 = vpack.c.bf16 %v8956_v25, %v8955_v29  ;;  %v8943_v31 = vld [vmem:[%s18412_s4 + $0xe0] sm:$0xff]  ;;  %v8867_v34 = vrot.slane %v8866_v59, 2  ;;  %v8789_v38 = vrot.slane %v8788_v51, 2 }
 0x5c5   :  { %15432 = vmatprep.subr.bf16.mxu0 %v15431_v21  ;;  %15464 = vmatprep.subr.bf16.mxu1 %v15463_v36  ;;  %v15445_v21 = vpack.c.bf16 %v8924_v41, %v8923_v13  ;;  %v15447_v53 = vpack.c.bf16 %v8942_v62, %v8941_v17  ;;  %v8957_v36 = vld [vmem:[%s18412_s4 + $0x150] sm:$0xff]  ;;  %v8804_v12 = vadd.f32 %v8803_v1, %v8802_v39  ;;  %v8995_v3 = vld [vmem:[%s18412_s4 + $0x280] sm:$0xff]  ;;  %v8980_v17 = vld [vmem:[%s18412_s4 + $0x208] sm:$0xff] }
 0x5c6   :  { %v8790_v50 = vadd.f32 %v8789_v38, %v8788_v51  ;;  %v15457_v41 = vpack.c.bf16 %v8930_v52, %v8929_v22  ;;  %v8979_v25 = vld [vmem:[%s18412_s4 + $0x200] sm:$0xff]  ;;  %v8997_v51 = vld [vmem:[%s18412_s4 + $0x290] sm:$0xff]  ;;  %v8986_v52 = vld [vmem:[%s18412_s4 + $0x238] sm:$0xff] }
 0x5c7   :  { %15434 = vmatpush3.bf16.msra.mxu0 %v15433_v32  ;;  %v8944_v32 = vld [vmem:[%s18412_s4 + $0xe8] sm:$0xff]  ;;  %v8805_v29 = vrot.slane %v8804_v12, 1  ;;  %v9011_v62 = vld [vmem:[%s18412_s4 + $0x300] sm:$0xff]  ;;  %v15493_v4 = vpack.c.bf16 %v8980_v17, %v8979_v25  ;;  %v8985_v22 = vld [vmem:[%s18412_s4 + $0x230] sm:$0xff] }
 0x5c8   :  { %15466 = vmatpush3.bf16.msra.mxu1 %v15465_v35  ;;  %15436 = vmatprep.subr.bf16.mxu0 %v15435_v63  ;;  %v8975_v35 = vld [vmem:[%s18412_s4 + $0x1e0] sm:$0xff]  ;;  %v8976_v63 = vld [vmem:[%s18412_s4 + $0x1e8] sm:$0xff]  ;;  %v15451_v28 = vpack.c.bf16 %v8944_v32, %v8943_v31  ;;  %v8791_v13 = vrot.slane %v8790_v50, 1  ;;  %v15525_v27 = vpack.c.bf16 %v9012_v20, %v9011_v62  ;;  %v8982_v31 = vld [vmem:[%s18412_s4 + $0x218] sm:$0xff] }
 0x5c9   :  { %15468 = vmatprep.subr.bf16.mxu1 %v15467_v40  ;;  %v15481_v40 = vpack.c.bf16 %v8958_v26, %v8957_v36  ;;  %v15483_v42 = vpack.c.bf16 %v8976_v63, %v8975_v35  ;;  %v8806_v36 = vadd.f32 %v8805_v29, %v8804_v12  ;;  %v8981_v26 = vld [vmem:[%s18412_s4 + $0x210] sm:$0xff]  ;;  %v9014_v63 = vld [vmem:[%s18412_s4 + $0x318] sm:$0xff]  ;;  %v8999_v38 = vld [vmem:[%s18412_s4 + $0x2a0] sm:$0xff] }
 0x5ca   :  { %v8792_v33 = vadd.f32 %v8791_v13, %v8790_v50  ;;  %v9013_v32 = vld [vmem:[%s18412_s4 + $0x310] sm:$0xff]  ;;  %v15497_v37 = vpack.c.bf16 %v8982_v31, %v8981_v26  ;;  %v9034_v50 = vld [vmem:[%s18412_s4 + $0x3b8] sm:$0xff]  ;;  %v8987_v13 = vld [vmem:[%s18412_s4 + $0x240] sm:$0xff] }
 0x5cb   :  { %15438 = vmatpush3.bf16.msra.mxu0 %v15437_v11  ;;  %v8945_v11 = vld [vmem:[%s18412_s4 + $0xf0] sm:$0xff]  ;;  %v15529_v57 = vpack.c.bf16 %v9014_v63, %v9013_v32  ;;  %v9020_v25 = vld [vmem:[%s18412_s4 + $0x348] sm:$0xff]  ;;  %v9039_v26 = vld [vmem:[%s18412_s4 + $0x3e0] sm:$0xff] }
 0x5cc   :  { %15470 = vmatpush3.bf16.msra.mxu1 %v15469_v47  ;;  %15440 = vmatprep.subr.bf16.mxu0 %v15439_v48  ;;  %v8868_v47 = vadd.f32 %v8867_v34, %v8866_v59  ;;  %v8977_v48 = vld [vmem:[%s18412_s4 + $0x1f0] sm:$0xff]  ;;  %v8856_v59 = vadd.f32 %v8855_v2, %v8854_v9  ;;  %v8983_v9 = vld [vmem:[%s18412_s4 + $0x220] sm:$0xff]  ;;  %v15537_v2 = vpack.c.bf16 %v9018_v23, %v9017_v10  ;;  %v9040_v32 = vld [vmem:[%s18412_s4 + $0x3e8] sm:$0xff] }
 0x5cd   :  { %15472 = vmatprep.subr.bf16.mxu1 %v15471_v43  ;;  %v15455_v43 = vpack.c.bf16 %v8946_v46, %v8945_v11  ;;  %v15487_v58 = vpack.c.bf16 %v8978_v49, %v8977_v48  ;;  %v9016_v46 = vld [vmem:[%s18412_s4 + $0x328] sm:$0xff]  ;;  %v9002_v48 = vld [vmem:[%s18412_s4 + $0x2b8] sm:$0xff]  ;;  %v9033_v49 = vld [vmem:[%s18412_s4 + $0x3b0] sm:$0xff]  ;;  %v15547_v63 = vpack.c.bf16 %v9040_v32, %v9039_v26 }
 0x5ce   :  { %v8869_v6 = vrot.slane %v8868_v47, 1  ;;  %v8907_v34 = vsel %vm8906_vm1, %v8792_v33, %v8856_v59  ;;  %v15533_v12 = vpack.c.bf16 %v9016_v46, %v9015_v45  ;;  %v9005_v62 = vld [vmem:[%s18412_s4 + $0x2d0] sm:$0xff]  ;;  %v9006_v59 = vld [vmem:[%s18412_s4 + $0x2d8] sm:$0xff] }
 0x5cf   :  { %15442 = vmatpush3.bf16.msra.mxu0 %v15441_v5  ;;  %v8996_v5 = vld [vmem:[%s18412_s4 + $0x288] sm:$0xff]  ;;  %v15511_v20 = vpack.c.bf16 %v9006_v59, %v9005_v62  ;;  %v9021_v33 = vld [vmem:[%s18412_s4 + $0x350] sm:$0xff] }
 0x5d0   :  { %15474 = vmatpush3.bf16.msra.mxu1 %v15473_v7  ;;  %15444 = vmatprep.subr.bf16.mxu0 %v15443_v8  ;;  %v9027_v7 = vld [vmem:[%s18412_s4 + $0x380] sm:$0xff]  ;;  %v9028_v8 = vld [vmem:[%s18412_s4 + $0x388] sm:$0xff]  ;;  %v8870_v39 = vadd.f32 %v8869_v6, %v8868_v47  ;;  %v9001_v47 = vld [vmem:[%s18412_s4 + $0x2b0] sm:$0xff] }
 0x5d1   :  { %15476 = vmatprep.subr.bf16.mxu1 %v15475_v15  ;;  %v15491_v15 = vpack.c.bf16 %v8996_v5, %v8995_v3  ;;  %v15523_v18 = vpack.c.bf16 %v9028_v8, %v9027_v7  ;;  %v9003_v3 = vld [vmem:[%s18412_s4 + $0x2c0] sm:$0xff]  ;;  %v9004_v5 = vld [vmem:[%s18412_s4 + $0x2c8] sm:$0xff]  ;;  %v8993_v45 = vld [vmem:[%s18412_s4 + $0x270] sm:$0xff] }
 0x5d2   :  { %v8909_v1 = vsel %vm8906_vm1, %v8806_v36, %v8870_v39  ;;  %v9035_v6 = vld [vmem:[%s18412_s4 + $0x3c0] sm:$0xff]  ;;  %v15507_v7 = vpack.c.bf16 %v9004_v5, %v9003_v3  ;;  %v9036_v8 = vld [vmem:[%s18412_s4 + $0x3c8] sm:$0xff]  ;;  %v8990_v39 = vld [vmem:[%s18412_s4 + $0x258] sm:$0xff] }
 0x5d3   :  { %15446 = vmatpush3.bf16.msra.mxu0 %v15445_v21  ;;  %v8998_v21 = vld [vmem:[%s18412_s4 + $0x298] sm:$0xff]  ;;  %v15539_v29 = vpack.c.bf16 %v9036_v8, %v9035_v6  ;;  %v9025_v46 = vld [vmem:[%s18412_s4 + $0x370] sm:$0xff] }
 0x5d4   :  { %15478 = vmatpush3.bf16.msra.mxu1 %v15477_v24  ;;  %15448 = vmatprep.subr.bf16.mxu0 %v15447_v53  ;;  %v9029_v24 = vld [vmem:[%s18412_s4 + $0x390] sm:$0xff]  ;;  %v9030_v53 = vld [vmem:[%s18412_s4 + $0x398] sm:$0xff] }
 0x5d5   :  { %15480 = vmatprep.subr.bf16.mxu1 %v15479_v30  ;;  %v15495_v30 = vpack.c.bf16 %v8998_v21, %v8997_v51  ;;  %v15527_v35 = vpack.c.bf16 %v9030_v53, %v9029_v24  ;;  %v9038_v51 = vld [vmem:[%s18412_s4 + $0x3d8] sm:$0xff]  ;;  %v8989_v21 = vld [vmem:[%s18412_s4 + $0x250] sm:$0xff] }
 0x5d6   :  { %v15513_v53 = vpack.c.bf16 %v8990_v39, %v8989_v21 }
 0x5d7   :  { %15450 = vmatpush3.bf16.msra.mxu0 %v15449_v14  ;;  %v9000_v14 = vld [vmem:[%s18412_s4 + $0x2a8] sm:$0xff] }
 0x5d8   :  { %15482 = vmatpush3.bf16.msra.mxu1 %v15481_v40  ;;  %15452 = vmatprep.subr.bf16.mxu0 %v15451_v28  ;;  %v9031_v40 = vld [vmem:[%s18412_s4 + $0x3a0] sm:$0xff]  ;;  %v9032_v28 = vld [vmem:[%s18412_s4 + $0x3a8] sm:$0xff]  ;;  %v15499_v0 = vpack.c.bf16 %v9000_v14, %v8999_v38 }
 0x5d9   :  { %15484 = vmatprep.subr.bf16.mxu1 %v15483_v42  ;;  %v8984_v42 = vld [vmem:[%s18412_s4 + $0x228] sm:$0xff]  ;;  %v15531_v11 = vpack.c.bf16 %v9032_v28, %v9031_v40  ;;  %v9023_v14 = vld [vmem:[%s18412_s4 + $0x360] sm:$0xff]  ;;  %v9009_v40 = vld [vmem:[%s18412_s4 + $0x2f0] sm:$0xff] }
 0x5db   :  { %15454 = vmatpush3.bf16.msra.mxu0 %v15453_v16  ;;  %v15501_v16 = vpack.c.bf16 %v8984_v42, %v8983_v9 }
 0x5dc   :  { %15486 = vmatpush3.bf16.msra.mxu1 %v15485_v55  ;;  %15456 = vmatprep.subr.bf16.mxu0 %v15455_v43  ;;  %v15503_v55 = vpack.c.bf16 %v9002_v48, %v9001_v47  ;;  %v15535_v43 = vpack.c.bf16 %v9034_v50, %v9033_v49  ;;  %v9026_v48 = vld [vmem:[%s18412_s4 + $0x378] sm:$0xff] }
 0x5dd   :  { %15488 = vmatprep.subr.bf16.mxu1 %v15487_v58  ;;  %v15505_v58 = vpack.c.bf16 %v8986_v52, %v8985_v22  ;;  %v15553_v49 = vpack.c.bf16 %v9026_v48, %v9025_v46 }
 0x5df   :  { %15458 = vmatpush3.bf16.msra.mxu0 %v15457_v41  ;;  %v8988_v41 = vld [vmem:[%s18412_s4 + $0x248] sm:$0xff] }
 0x5e0   :  { %15490 = vmatpush3.bf16.msra.mxu1 %v15489_v19  ;;  %15492 = vmatprep.subr.bf16.mxu0 %v15491_v15  ;;  %v15509_v19 = vpack.c.bf16 %v8988_v41, %v8987_v13  ;;  %v9019_v15 = vld [vmem:[%s18412_s4 + $0x340] sm:$0xff] }
 0x5e1   :  { %15524 = vmatprep.subr.bf16.mxu1 %v15523_v18  ;;  %v15541_v17 = vpack.c.bf16 %v9020_v25, %v9019_v15  ;;  %v9037_v18 = vld [vmem:[%s18412_s4 + $0x3d0] sm:$0xff] }
 0x5e2   :  { %9108 = vmatmul.mubr.f32.vlgmr.msra.gmra.mrb[8].mxu0 %v8907_v34  ;;  %v15543_v24 = vpack.c.bf16 %v9038_v51, %v9037_v18  ;;  %v8991_v34 = vld [vmem:[%s18412_s4 + $0x260] sm:$0xff] }
 0x5e3   :  { %9178 = vmatmul.mubr.f32.vlgmr.msra.gmra.mrb[8].mxu1 %v8909_v1  ;;  %15494 = vmatpush3.bf16.msra.mxu0 %v15493_v4  ;;  %v9022_v4 = vld [vmem:[%s18412_s4 + $0x358] sm:$0xff]  ;;  %v9024_v1 = vld [vmem:[%s18412_s4 + $0x368] sm:$0xff] }
 0x5e4   :  { %15526 = vmatpush3.bf16.msra.mxu1 %v15525_v27  ;;  %15496 = vmatprep.subr.bf16.mxu0 %v15495_v30  ;;  %v15545_v36 = vpack.c.bf16 %v9022_v4, %v9021_v33  ;;  %v9007_v27 = vld [vmem:[%s18412_s4 + $0x2e0] sm:$0xff]  ;;  %v9008_v30 = vld [vmem:[%s18412_s4 + $0x2e8] sm:$0xff]  ;;  %v15549_v28 = vpack.c.bf16 %v9024_v1, %v9023_v14 }
 0x5e5   :  { %15528 = vmatprep.subr.bf16.mxu1 %v15527_v35  ;;  %v15515_v31 = vpack.c.bf16 %v9008_v30, %v9007_v27  ;;  %v8992_v35 = vld [vmem:[%s18412_s4 + $0x268] sm:$0xff] }
 0x5e6   :  { %v15517_v38 = vpack.c.bf16 %v8992_v35, %v8991_v34 }
 0x5e7   :  { %15498 = vmatpush3.bf16.msra.mxu0 %v15497_v37  ;;  %v9010_v37 = vld [vmem:[%s18412_s4 + $0x2f8] sm:$0xff] }
 0x5e8   :  { %15530 = vmatpush3.bf16.msra.mxu1 %v15529_v57  ;;  %15500 = vmatprep.subr.bf16.mxu0 %v15499_v0  ;;  %v9041_v57 = vld [vmem:[%s18412_s4 + $0x3f0] sm:$0xff]  ;;  %v9042_v0 = vld [vmem:[%s18412_s4 + $0x3f8] sm:$0xff]  ;;  %v15519_v9 = vpack.c.bf16 %v9010_v37, %v9009_v40 }
 0x5e9   :  { %15532 = vmatprep.subr.bf16.mxu1 %v15531_v11  ;;  %v15551_v42 = vpack.c.bf16 %v9042_v0, %v9041_v57  ;;  %v8994_v11 = vld [vmem:[%s18412_s4 + $0x278] sm:$0xff] }
 0x5ea   :  { %v15521_v47 = vpack.c.bf16 %v8994_v11, %v8993_v45 }
 0x5eb   :  { %15502 = vmatpush3.bf16.msra.mxu0 %v15501_v16 }
 0x5ec   :  { %15534 = vmatpush3.bf16.msra.mxu1 %v15533_v12  ;;  %15504 = vmatprep.subr.bf16.mxu0 %v15503_v55 }
 0x5ed   :  { %15536 = vmatprep.subr.bf16.mxu1 %v15535_v43 }
 0x5ef   :  { %15506 = vmatpush3.bf16.msra.mxu0 %v15505_v58 }
 0x5f0   :  { %15538 = vmatpush3.bf16.msra.mxu1 %v15537_v2  ;;  %15508 = vmatprep.subr.bf16.mxu0 %v15507_v7 }
 0x5f1   :  { %15540 = vmatprep.subr.bf16.mxu1 %v15539_v29 }
 0x5f3   :  { %15510 = vmatpush3.bf16.msra.mxu0 %v15509_v19 }
 0x5f4   :  { %15542 = vmatpush3.bf16.msra.mxu1 %v15541_v17  ;;  %15512 = vmatprep.subr.bf16.mxu0 %v15511_v20 }
 0x5f5   :  { %15544 = vmatprep.subr.bf16.mxu1 %v15543_v24 }
 0x5f7   :  { %15514 = vmatpush3.bf16.msra.mxu0 %v15513_v53 }
 0x5f8   :  { %15546 = vmatpush3.bf16.msra.mxu1 %v15545_v36  ;;  %15516 = vmatprep.subr.bf16.mxu0 %v15515_v31 }
 0x5f9   :  { %15548 = vmatprep.subr.bf16.mxu1 %v15547_v63 }
 0x5fb   :  { %15518 = vmatpush3.bf16.msra.mxu0 %v15517_v38 }
 0x5fc   :  { %15550 = vmatpush3.bf16.msra.mxu1 %v15549_v28  ;;  %15520 = vmatprep.subr.bf16.mxu0 %v15519_v9 }
 0x5fd   :  { %15552 = vmatprep.subr.bf16.mxu1 %v15551_v42 }
 0x5ff   :  { %15522 = vmatpush3.bf16.msra.mxu0 %v15521_v47 }
 0x600   :  { %15554 = vmatpush3.bf16.msra.mxu1 %v15553_v49 }
 0x695   :  { %v17816_v50 = vpop.f32.mrb[4].mxu0  ;;  %v17822_v55 = vpop.f32.mrb[4].mxu1 }
 0x696   :  { %v8814_v16 = vsel %vm8785_vm0, %v17816_v50, 0.0  ;;  %v8846_v12 = vmul.f32 %v17816_v50, %v17816_v50  ;;  %v17824_v43 = vpop.f32.mrb[5].mxu0  ;;  %v8828_v52 = vsel %vm8785_vm0, %v17822_v55, 0.0  ;;  %v8848_v10 = vmul.f32 %v17822_v55, %v17822_v55  ;;  %v17832_v23 = vpop.f32.mrb[5].mxu1 }
 0x697   :  { %v8815_v22 = vrot.slane %v8814_v16, 4  ;;  %v8821_v58 = vsel %vm8785_vm0, %v17824_v43, 0.0  ;;  %v8413_v2 = vpop.f32.mrb[6].mxu0  ;;  %v8829_v5 = vrot.slane %v8828_v52, 4  ;;  %v8847_v7 = vmul.f32 %v17824_v43, %v17824_v43  ;;  %v8782_v8 = vpop.f32.mrb[6].mxu1 }
 0x698   :  { %v8878_v3 = vsel %vm8785_vm0, %v8846_v12, 0.0  ;;  %v8822_v6 = vrot.slane %v8821_v58, 4  ;;  %v8414_v13 = vpop.f32.mrb[7].mxu0  ;;  %v8892_v19 = vsel %vm8785_vm0, %v8848_v10, 0.0  ;;  %v8835_v15 = vsel %vm8785_vm0, %v17832_v23, 0.0  ;;  %v8783_v25 = vpop.f32.mrb[7].mxu1 }
 0x699   :  { %v8816_v41 = vadd.f32 %v8815_v22, %v8814_v16  ;;  %v8879_v29 = vrot.slane %v8878_v3, 4  ;;  %v8830_v17 = vadd.f32 %v8829_v5, %v8828_v52  ;;  %v8893_v62 = vrot.slane %v8892_v19, 4 }
 0x69a   :  { %v8823_v59 = vadd.f32 %v8822_v6, %v8821_v58  ;;  %v8885_v18 = vsel %vm8785_vm0, %v8847_v7, 0.0  ;;  %v8836_v39 = vrot.slane %v8835_v15, 4  ;;  %v8849_v33 = vmul.f32 %v17832_v23, %v17832_v23 }
 0x69b   :  { %v8817_v20 = vrot.slane %v8816_v41, 2  ;;  %v8880_v51 = vadd.f32 %v8879_v29, %v8878_v3  ;;  %v8886_v21 = vrot.slane %v8885_v18, 4  ;;  %v8894_v24 = vadd.f32 %v8893_v62, %v8892_v19 }
 0x69c   :  { %v8824_v53 = vrot.slane %v8823_v59, 2  ;;  %v8837_v27 = vadd.f32 %v8836_v39, %v8835_v15  ;;  %v8899_v32 = vsel %vm8785_vm0, %v8849_v33, 0.0  ;;  %v8831_v35 = vrot.slane %v8830_v17, 2  ;;  %v9353_v39 = vld [vmem:[#allocation10 + $0x40] sm:$0xff] }
 0x69d   :  { %v8881_v4 = vrot.slane %v8880_v51, 2  ;;  %v8887_v36 = vadd.f32 %v8886_v21, %v8885_v18  ;;  %v8818_v30 = vadd.f32 %v8817_v20, %v8816_v41  ;;  %v8895_v26 = vrot.slane %v8894_v24, 2  ;;  %v9354_v18 = vld [vmem:[#allocation10 + $0x48] sm:$0xff]  ;;  %v9345_v21 = vld [vmem:[#allocation10] sm:$0xff] }
 0x69e   :  { %v8825_v31 = vadd.f32 %v8824_v53, %v8823_v59  ;;  %v8838_v38 = vrot.slane %v8837_v27, 2  ;;  %v8900_v14 = vrot.slane %v8899_v32, 4  ;;  %v8832_v42 = vadd.f32 %v8831_v35, %v8830_v17  ;;  %v9346_v59 = vld [vmem:[#allocation10 + $0x8] sm:$0xff] }
 0x69f   :  { %v8882_v34 = vadd.f32 %v8881_v4, %v8880_v51  ;;  %v8888_v63 = vrot.slane %v8887_v36, 2  ;;  %v8896_v1 = vadd.f32 %v8895_v26, %v8894_v24  ;;  %v8819_v57 = vrot.slane %v8818_v30, 1  ;;  %v9350_v20 = vld [vmem:[#allocation10 + $0x28] sm:$0xff]  ;;  %v9349_v4 = vld [vmem:[#allocation10 + $0x20] sm:$0xff]  ;;  %v9348_v26 = vld [vmem:[#allocation10 + $0x18] sm:$0xff] }
 0x6a0   :  { %v8826_v40 = vrot.slane %v8825_v31, 1  ;;  %v8839_v0 = vadd.f32 %v8838_v38, %v8837_v27  ;;  %v8901_v9 = vadd.f32 %v8900_v14, %v8899_v32  ;;  %v8833_v52 = vrot.slane %v8832_v42, 1  ;;  %v9358_v24 = vld [vmem:[#allocation10 + $0x68] sm:$0xff] }
 0x6a1   :  { %v8889_v28 = vadd.f32 %v8888_v63, %v8887_v36  ;;  %v8883_v37 = vrot.slane %v8882_v34, 1  ;;  %v8897_v49 = vrot.slane %v8896_v1, 1  ;;  %v8820_v22 = vadd.f32 %v8819_v57, %v8818_v30  ;;  %v9357_v36 = vld [vmem:[#allocation10 + $0x60] sm:$0xff] }
 0x6a2   :  { %v8902_v11 = vrot.slane %v8901_v9, 2  ;;  %v8827_v47 = vadd.f32 %v8826_v40, %v8825_v31  ;;  %v8840_v16 = vrot.slane %v8839_v0, 1  ;;  %v8834_v7 = vadd.f32 %v8833_v52, %v8832_v42  ;;  %v9356_v31 = vld [vmem:[#allocation10 + $0x58] sm:$0xff]  ;;  %v9355_v52 = vld [vmem:[#allocation10 + $0x50] sm:$0xff] }
 0x6a3   :  { %v8890_v45 = vrot.slane %v8889_v28, 1  ;;  %v8884_v46 = vadd.f32 %v8883_v37, %v8882_v34  ;;  %v8898_v3 = vadd.f32 %v8897_v49, %v8896_v1  ;;  %v15555_v51 = vpack.c.bf16 %v9354_v18, %v9346_v59  ;;  %v15939_v34 = vld [vmem:[#allocation4 + $0x4] ss:$16 sps:$4 sm:$0xff]   ;;  %v15948_v59 = vld [vmem:[#allocation4 + $0x2c] ss:$16 sps:$4 sm:$0xff]  }
 0x6a4   :  { %v8903_v12 = vadd.f32 %v8902_v11, %v8901_v9  ;;  %v8841_v5 = vadd.f32 %v8840_v16, %v8839_v0  ;;  %v15557_v53 = vpack.c.bf16 %v9353_v39, %v9345_v21  ;;  %v15563_v33 = vpack.c.bf16 %v9358_v24, %v9350_v20  ;;  %v9338_v16 = vld [vmem:[#allocation16 + $0x1] sm:$0x1]  ;;  %v15957_v20 = vld [vmem:[#allocation4 + $0x64] ss:$16 sps:$4 sm:$0xff]   ;;  %v15954_v21 = vld [vmem:[#allocation4 + $0x4c] ss:$16 sps:$4 sm:$0xff]  }
 0x6a5   :  { %v8891_v48 = vadd.f32 %v8890_v45, %v8889_v28  ;;  %v8911_v2 = vsel %vm8906_vm1, %v8820_v22, %v8884_v46  ;;  %v8913_v13 = vsel %vm8906_vm1, %v8834_v7, %v8898_v3  ;;  %v16851_v27 = vmov 0.0   ;;  %15556 = vmatprep.subr.bf16.mxu1 %v15555_v51  ;;  %v9347_v22 = vld [vmem:[#allocation10 + $0x10] sm:$0xff]  ;;  %v15946_v51 = vld [vmem:[#allocation4 + $0x28] ss:$16 sps:$4 sm:$0xff]  }
 0x6a6   :  { %v8904_v58 = vrot.slane %v8903_v12, 1  ;;  %v15565_v30 = vpack.c.bf16 %v9357_v36, %v9349_v4  ;;  %15564 = vmatprep.subr.bf16.mxu0 %v15563_v33  ;;  %v15559_v32 = vpack.c.bf16 %v9356_v31, %v9348_v26  ;;  %v9351_v7 = vld [vmem:[#allocation10 + $0x30] sm:$0xff]  ;;  %v15960_v33 = vld [vmem:[#allocation4 + $0x6c] ss:$16 sps:$4 sm:$0xff]  }
 0x6a7   :  { %v8912_v10 = vsel %vm8906_vm1, %v8827_v47, %v8891_v48  ;;  %v9331_v47 = vld [vmem:[#allocation16] sm:$0x1]  ;;  %v15963_v24 = vld [vmem:[#allocation4 + $0x84] ss:$16 sps:$4 sm:$0xff]   ;;  %v15966_v26 = vld [vmem:[#allocation4 + $0x8c] ss:$16 sps:$4 sm:$0xff]  }
 0x6a8   :  { %9247 = vmatprep.mubr.f32.mxu0 %v8912_v10  ;;  %v8905_v6 = vadd.f32 %v8904_v58, %v8903_v12  ;;  %v9352_v58 = vld [vmem:[#allocation10 + $0x38] sm:$0xff]  ;;  %v15949_v18 = vld [vmem:[#allocation4 + $0x40] ss:$16 sps:$4 sm:$0xff]   ;;  %v15969_v36 = vld [vmem:[#allocation4 + $0xa4] ss:$16 sps:$4 sm:$0xff]  }
 0x6a9   :  { %9248 = vmatmul.mubr.f32.vlgmr.msra.gmra.mrb[10].mxu0 %v8911_v2  ;;  %v9360_v2 = vld [vmem:[#allocation10 + $0x78] sm:$0xff]  ;;  %v15955_v39 = vld [vmem:[#allocation4 + $0x60] ss:$16 sps:$4 sm:$0xff]  }
 0x6aa   :  { %v8914_v8 = vsel %vm8906_vm1, %v8841_v5, %v8905_v6  ;;  %9571 = vmatprep.mubr.f32.mxu0 %v16851_v27  ;;  %15566 = vmatpush1.bf16.msra.mxu0 %v15565_v30  ;;  %v15561_v5 = vpack.c.bf16 %v9355_v52, %v9347_v22  ;;  %v15567_v6 = vpack.c.bf16 %v9360_v2, %v9352_v58  ;;  %v15961_v4 = vld [vmem:[#allocation4 + $0x80] ss:$16 sps:$4 sm:$0xff]   ;;  %v15958_v30 = vld [vmem:[#allocation4 + $0x68] ss:$16 sps:$4 sm:$0xff]   ;;  %v16002_v22 = vld [vmem:[#allocation4 + $0x14c] ss:$16 sps:$4 sm:$0xff]  }
 0x6ab   :  { %9317 = vmatprep.mubr.f32.mxu1 %v8914_v8  ;;  %11297 = vmatprep.subr.bf16.mxu0 %v15939_v34  ;;  %v9359_v8 = vld [vmem:[#allocation10 + $0x70] sm:$0xff]  ;;  %v15964_v34 = vld [vmem:[#allocation4 + $0x88] ss:$16 sps:$4 sm:$0xff]   ;;  %v16008_v2 = vld [vmem:[#allocation4 + $0x16c] ss:$16 sps:$4 sm:$0xff]  }
 0x6ac   :  { %9318 = vmatmul.mubr.f32.vlgmr.msra.gmra.mrb[10].mxu1 %v8913_v13  ;;  %v15937_v13 = vld [vmem:[#allocation4] ss:$16 sps:$4 sm:$0xff]   ;;  %v16000_v58 = vld [vmem:[#allocation4 + $0x148] ss:$16 sps:$4 sm:$0xff]  }
 0x6ad   :  { %9429 = vmatprep.mubr.f32.mxu1 %v16851_v27  ;;  %15558 = vmatpush1.bf16.msra.mxu1 %v15557_v53  ;;  %v15952_v53 = vld [vmem:[#allocation4 + $0x48] ss:$16 sps:$4 sm:$0xff]   ;;  %v15967_v31 = vld [vmem:[#allocation4 + $0xa0] ss:$16 sps:$4 sm:$0xff]  }
 0x6ae   :  { %15560 = vmatprep.subr.bf16.mxu1 %v15559_v32  ;;  %v15975_v32 = vld [vmem:[#allocation4 + $0xc4] ss:$16 sps:$4 sm:$0xff]   ;;  %v16003_v52 = vld [vmem:[#allocation4 + $0x160] ss:$16 sps:$4 sm:$0xff]  }
 0x6b5   :  { %v15048_v41 = vpop.f32.mrb[8].mxu0 }
 0x6b6   :  { %v15083_v29 = vpop.f32.mrb[8].mxu1  ;;  %v15049_v19 = vpop.f32.mrb[9].mxu0 }
 0x6b7   :  { %v15050_v15 = vadd.f32 %v15049_v19, %v15048_v41  ;;  %v15084_v25 = vpop.f32.mrb[9].mxu1  ;;  %v15569_v19 = vpack.c.bf16 %v9359_v8, %v9351_v7  ;;  %v16012_v7 = vld [vmem:[#allocation4 + $0x188] ss:$16 sps:$4 sm:$0xff]   ;;  %v16017_v8 = vld [vmem:[#allocation4 + $0x1a4] ss:$16 sps:$4 sm:$0xff]  }
 0x6b8   :  { %v15085_v17 = vadd.f32 %v15084_v25, %v15083_v29  ;;  %v15945_v29 = vld [vmem:[#allocation4 + $0x24] ss:$16 sps:$4 sm:$0xff]   ;;  %v15943_v25 = vld [vmem:[#allocation4 + $0x20] ss:$16 sps:$4 sm:$0xff]  }
 0x6ba   :  { %v9180_v62 = vadd.f32 %v15085_v17, %v15050_v15  ;;  %v15942_v15 = vld [vmem:[#allocation4 + $0xc] ss:$16 sps:$4 sm:$0xff]   ;;  %v15951_v17 = vld [vmem:[#allocation4 + $0x44] ss:$16 sps:$4 sm:$0xff]  }
 0x77c   :  { %v15118_v35 = vpop.f32.mrb[10].mxu0 }
 0x77d   :  { %v15119_v63 = vpop.f32.mrb[11].mxu0 }
 0x77e   :  { %v15120_v38 = vadd.f32 %v15119_v63, %v15118_v35  ;;  %v15972_v35 = vld [vmem:[#allocation4 + $0xac] ss:$16 sps:$4 sm:$0xff]   ;;  %v15973_v63 = vld [vmem:[#allocation4 + $0xc0] ss:$16 sps:$4 sm:$0xff]  }
 0x77f   :  { %v15153_v1 = vpop.f32.mrb[10].mxu1 }
 0x780   :  { %v9250_v14 = vadd.f32 %v15120_v38, %v9180_v62  ;;  %v15154_v40 = vpop.f32.mrb[11].mxu1  ;;  %v15940_v62 = vld [vmem:[#allocation4 + $0x8] ss:$16 sps:$4 sm:$0xff]   ;;  %v15981_v38 = vld [vmem:[#allocation4 + $0xe4] ss:$16 sps:$4 sm:$0xff]  }
 0x781   :  { %v15155_v28 = vadd.f32 %v15154_v40, %v15153_v1  ;;  %v15978_v1 = vld [vmem:[#allocation4 + $0xcc] ss:$16 sps:$4 sm:$0xff]   ;;  %v15979_v40 = vld [vmem:[#allocation4 + $0xe0] ss:$16 sps:$4 sm:$0xff]  }
 0x783   :  { %v9320_v37 = vadd.f32 %v15155_v28, %v9250_v14  ;;  %v15970_v14 = vld [vmem:[#allocation4 + $0xa8] ss:$16 sps:$4 sm:$0xff]   ;;  %v15987_v28 = vld [vmem:[#allocation4 + $0x104] ss:$16 sps:$4 sm:$0xff]  }
 0x785   :  { %v9324_v57 = vmul.f32 0.0078125, %v9320_v37  ;;  %v15976_v37 = vld [vmem:[#allocation4 + $0xc8] ss:$16 sps:$4 sm:$0xff]  }
 0x787   :  { %v9325_v0 = vmul.f32 %v9324_v57, %v9324_v57 }
 0x789   :  { %v9327_v9 = vrot.slane %v9325_v0, 7  ;;  %v15985_v0 = vld [vmem:[#allocation4 + $0x100] ss:$16 sps:$4 sm:$0xff]  }
 0x78b   :  { %v9329_v42 = vsub.f32 %v9324_v57, %v9327_v9  ;;  %v15993_v9 = vld [vmem:[#allocation4 + $0x124] ss:$16 sps:$4 sm:$0xff]  }
 0x78d   :  { %v9330_v45 = vmax.f32 %v9329_v42, 0.0  ;;  %v15982_v42 = vld [vmem:[#allocation4 + $0xe8] ss:$16 sps:$4 sm:$0xff]  }
 0x78f   :  { %v9332_v11 = vadd.f32 1e-05, %v9330_v45  ;;  %v15990_v45 = vld [vmem:[#allocation4 + $0x10c] ss:$16 sps:$4 sm:$0xff]  }
 0x791   :  { %16443 = vrsqrt.f32 %v9332_v11  ;;  %v15991_v11 = vld [vmem:[#allocation4 + $0x120] ss:$16 sps:$4 sm:$0xff]  }
 0x79b   :  { %v16444_v46 = vpop.eup %16443 }
 0x79c   :  { %v9335_v48 = vrot.slane %v16444_v46, 1  ;;  %v15999_v46 = vld [vmem:[#allocation4 + $0x144] ss:$16 sps:$4 sm:$0xff]  }
 0x79e   :  { %v9337_v49 = vmul.f32 %v9335_v48, %v9331_v47  ;;  %v15988_v47 = vld [vmem:[#allocation4 + $0x108] ss:$16 sps:$4 sm:$0xff]   ;;  %v15996_v48 = vld [vmem:[#allocation4 + $0x12c] ss:$16 sps:$4 sm:$0xff]  }
 0x7a0   :  { %v9339_v12 = vmul.f32 %v9337_v49, %v9324_v57  ;;  %v15984_v57 = vld [vmem:[#allocation4 + $0xec] ss:$16 sps:$4 sm:$0xff]  }
 0x7a2   :  { %v9340_v10 = vsub.f32 %v9338_v16, %v9339_v12  ;;  %v16005_v16 = vld [vmem:[#allocation4 + $0x164] ss:$16 sps:$4 sm:$0xff]   ;;  %v15994_v12 = vld [vmem:[#allocation4 + $0x128] ss:$16 sps:$4 sm:$0xff]  }
 0x7a4   :  { %v9342_v3 = vrot.slane %v9340_v10, 7  ;;  %v16011_v10 = vld [vmem:[#allocation4 + $0x184] ss:$16 sps:$4 sm:$0xff]  }
 0x7a6   :  { %v9344_v41 = vsel %vm8906_vm1, %v9337_v49, %v9342_v3  ;;  %v15997_v49 = vld [vmem:[#allocation4 + $0x140] ss:$16 sps:$4 sm:$0xff]  }
 0x7a7   :  { %14661 = vmatmul.mubr.msk.f32.vlgmr.msra.gmra.mrb[12].mxu1 %vm9361_vm2, %v9344_v41  ;;  %14663 = vmatmul.mubr.msk.f32.vlgmr.msra.gmra.mrb[12].mxu0 %vm9361_vm2, %v9344_v41  ;;  %v16009_v3 = vld [vmem:[#allocation4 + $0x180] ss:$16 sps:$4 sm:$0xff]  }
 0x7a8   :  { %15562 = vmatpush1.bf16.msra.mxu1 %v15561_v5  ;;  %9500 = vmatprep.mubr.f32.mxu1 %v16851_v27  ;;  %v16006_v5 = vld [vmem:[#allocation4 + $0x168] ss:$16 sps:$4 sm:$0xff]  }
 0x7a9   :  { %15568 = vmatprep.subr.bf16.mxu1 %v15567_v6  ;;  %11298 = vmatpush1.bf16.msra.mxu0 %v15937_v13  ;;  %v16014_v6 = vld [vmem:[#allocation4 + $0x18c] ss:$16 sps:$4 sm:$0xff]  }
 0x7aa   :  { %11299 = vmatprep.subr.bf16.mxu0 %v15945_v29  ;;  %v16020_v13 = vld [vmem:[#allocation4 + $0x1ac] ss:$16 sps:$4 sm:$0xff]   ;;  %v16018_v29 = vld [vmem:[#allocation4 + $0x1a8] ss:$16 sps:$4 sm:$0xff]  }
 0x7ab   :  { %14662 = vmatmul.mubr.msk.f32.vlgmr.msra.gmra.mrb[14].mxu1 %vm9361_vm2, %v9344_v41 }
 0x7ac   :  { %15570 = vmatpush1.bf16.msra.mxu1 %v15569_v19  ;;  %9642 = vmatprep.mubr.f32.mxu1 %v16851_v27  ;;  %v16023_v19 = vld [vmem:[#allocation4 + $0x1c4] ss:$16 sps:$4 sm:$0xff]  }
 0x7ad   :  { %11461 = vmatprep.subr.bf16.mxu1 %v15942_v15  ;;  %11300 = vmatpush1.bf16.msra.mxu0 %v15943_v25  ;;  %v16026_v15 = vld [vmem:[#allocation4 + $0x1cc] ss:$16 sps:$4 sm:$0xff]   ;;  %v16021_v25 = vld [vmem:[#allocation4 + $0x1c0] ss:$16 sps:$4 sm:$0xff]  }
 0x7ae   :  { %11301 = vmatprep.subr.bf16.mxu0 %v15951_v17  ;;  %v16024_v17 = vld [vmem:[#allocation4 + $0x1c8] ss:$16 sps:$4 sm:$0xff]  }
 0x7af   :  { %14664 = vmatmul.mubr.msk.f32.vlgmr.msra.gmra.mrb[16].mxu1 %vm9361_vm2, %v9344_v41  ;;  %v16015_v41 = vld [vmem:[#allocation4 + $0x1a0] ss:$16 sps:$4 sm:$0xff]  }
 0x7b0   :  { %11462 = vmatpush1.bf16.msra.mxu1 %v15940_v62  ;;  %v16029_v62 = vld [vmem:[#allocation4 + $0x1e4] ss:$16 sps:$4 sm:$0xff]  }
 0x7b1   :  { %11463 = vmatprep.subr.bf16.mxu1 %v15948_v59  ;;  %11302 = vmatpush1.bf16.msra.mxu0 %v15949_v18  ;;  %v16032_v59 = vld [vmem:[#allocation4 + $0x1ec] ss:$16 sps:$4 sm:$0xff]   ;;  %v16027_v18 = vld [vmem:[#allocation4 + $0x1e0] ss:$16 sps:$4 sm:$0xff]  }
 0x7b2   :  { %11303 = vmatprep.subr.bf16.mxu0 %v15957_v20  ;;  %v16030_v20 = vld [vmem:[#allocation4 + $0x1e8] ss:$16 sps:$4 sm:$0xff]  }
 0x7b4   :  { %11464 = vmatpush1.bf16.msra.mxu1 %v15946_v51  ;;  %v16035_v51 = vld [vmem:[#allocation4 + $0x204] ss:$16 sps:$4 sm:$0xff]  }
 0x7b5   :  { %11465 = vmatprep.subr.bf16.mxu1 %v15954_v21  ;;  %11304 = vmatpush1.bf16.msra.mxu0 %v15955_v39  ;;  %v16038_v21 = vld [vmem:[#allocation4 + $0x20c] ss:$16 sps:$4 sm:$0xff]   ;;  %v17858_v39 = vsub.s32 0, %v17190_v44 }
 0x7b6   :  { %11305 = vmatprep.subr.bf16.mxu0 %v15963_v24  ;;  %v17861_v24 = vsub.s32 1, %v17190_v44 }
 0x7b8   :  { %11466 = vmatpush1.bf16.msra.mxu1 %v15952_v53 }
 0x7b9   :  { %11467 = vmatprep.subr.bf16.mxu1 %v15960_v33  ;;  %11306 = vmatpush1.bf16.msra.mxu0 %v15961_v4 }
 0x7ba   :  { %11307 = vmatprep.subr.bf16.mxu0 %v15969_v36 }
 0x7bc   :  { %11468 = vmatpush1.bf16.msra.mxu1 %v15958_v30 }
 0x7bd   :  { %11469 = vmatprep.subr.bf16.mxu1 %v15966_v26  ;;  %11308 = vmatpush1.bf16.msra.mxu0 %v15967_v31 }
 0x7be   :  { %11309 = vmatprep.subr.bf16.mxu0 %v15975_v32 }
 0x7c0   :  { %11470 = vmatpush1.bf16.msra.mxu1 %v15964_v34 }
 0x7c1   :  { %11471 = vmatprep.subr.bf16.mxu1 %v15972_v35  ;;  %11310 = vmatpush1.bf16.msra.mxu0 %v15973_v63 }
 0x7c2   :  { %11311 = vmatprep.subr.bf16.mxu0 %v15981_v38 }
 0x7c4   :  { %11472 = vmatpush1.bf16.msra.mxu1 %v15970_v14 }
 0x7c5   :  { %11473 = vmatprep.subr.bf16.mxu1 %v15978_v1  ;;  %11312 = vmatpush1.bf16.msra.mxu0 %v15979_v40 }
 0x7c6   :  { %11313 = vmatprep.subr.bf16.mxu0 %v15987_v28 }
 0x7c8   :  { %11474 = vmatpush1.bf16.msra.mxu1 %v15976_v37 }
 0x7c9   :  { %11475 = vmatprep.subr.bf16.mxu1 %v15984_v57  ;;  %11314 = vmatpush1.bf16.msra.mxu0 %v15985_v0 }
 0x7ca   :  { %11315 = vmatprep.subr.bf16.mxu0 %v15993_v9 }
 0x7cc   :  { %11476 = vmatpush1.bf16.msra.mxu1 %v15982_v42 }
 0x7cd   :  { %11477 = vmatprep.subr.bf16.mxu1 %v15990_v45  ;;  %11316 = vmatpush1.bf16.msra.mxu0 %v15991_v11 }
 0x7ce   :  { %11317 = vmatprep.subr.bf16.mxu0 %v15999_v46 }
 0x7d0   :  { %11478 = vmatpush1.bf16.msra.mxu1 %v15988_v47 }
 0x7d1   :  { %11479 = vmatprep.subr.bf16.mxu1 %v15996_v48  ;;  %11318 = vmatpush1.bf16.msra.mxu0 %v15997_v49 }
 0x7d2   :  { %11319 = vmatprep.subr.bf16.mxu0 %v16005_v16 }
 0x7d4   :  { %11480 = vmatpush1.bf16.msra.mxu1 %v15994_v12 }
 0x7d5   :  { %11481 = vmatprep.subr.bf16.mxu1 %v16002_v22  ;;  %11320 = vmatpush1.bf16.msra.mxu0 %v16003_v52 }
 0x7d6   :  { %11321 = vmatprep.subr.bf16.mxu0 %v16011_v10 }
 0x7d8   :  { %11482 = vmatpush1.bf16.msra.mxu1 %v16000_v58 }
 0x7d9   :  { %11483 = vmatprep.subr.bf16.mxu1 %v16008_v2  ;;  %11322 = vmatpush1.bf16.msra.mxu0 %v16009_v3 }
 0x7da   :  { %11323 = vmatprep.subr.bf16.mxu0 %v16017_v8  ;;  %v16033_v8 = vld [vmem:[#allocation4 + $0x200] ss:$16 sps:$4 sm:$0xff]  }
 0x7dc   :  { %11484 = vmatpush1.bf16.msra.mxu1 %v16006_v5 }
 0x7dd   :  { %11485 = vmatprep.subr.bf16.mxu1 %v16014_v6  ;;  %11324 = vmatpush1.bf16.msra.mxu0 %v16015_v41 }
 0x7de   :  { %11325 = vmatprep.subr.bf16.mxu0 %v16023_v19  ;;  %v16041_v19 = vld [vmem:[#allocation4 + $0x224] ss:$16 sps:$4 sm:$0xff]  }
 0x7e0   :  { %11486 = vmatpush1.bf16.msra.mxu1 %v16012_v7 }
 0x7e1   :  { %11487 = vmatprep.subr.bf16.mxu1 %v16020_v13  ;;  %11326 = vmatpush1.bf16.msra.mxu0 %v16021_v25  ;;  %v16036_v13 = vld [vmem:[#allocation4 + $0x208] ss:$16 sps:$4 sm:$0xff]   ;;  %v16044_v25 = vld [vmem:[#allocation4 + $0x22c] ss:$16 sps:$4 sm:$0xff]  }
 0x7e2   :  { %11327 = vmatprep.subr.bf16.mxu0 %v16029_v62  ;;  %v16047_v62 = vld [vmem:[#allocation4 + $0x244] ss:$16 sps:$4 sm:$0xff]  }
 0x7e4   :  { %11488 = vmatpush1.bf16.msra.mxu1 %v16018_v29 }
 0x7e5   :  { %11489 = vmatprep.subr.bf16.mxu1 %v16026_v15  ;;  %11328 = vmatpush1.bf16.msra.mxu0 %v16027_v18  ;;  %v16045_v18 = vld [vmem:[#allocation4 + $0x240] ss:$16 sps:$4 sm:$0xff]  }
 0x7e6   :  { %11338 = vmatprep.subr.bf16.mxu0 %v16035_v51  ;;  %v16053_v51 = vld [vmem:[#allocation4 + $0x264] ss:$16 sps:$4 sm:$0xff]  }
 0x7e8   :  { %11490 = vmatpush1.bf16.msra.mxu1 %v16024_v17  ;;  %v16042_v17 = vld [vmem:[#allocation4 + $0x228] ss:$16 sps:$4 sm:$0xff]  }
 0x7e9   :  { %11491 = vmatprep.subr.bf16.mxu1 %v16032_v59  ;;  %v16050_v59 = vld [vmem:[#allocation4 + $0x24c] ss:$16 sps:$4 sm:$0xff]  }
 0x7ec   :  { %11492 = vmatpush1.bf16.msra.mxu1 %v16030_v20  ;;  %v16048_v20 = vld [vmem:[#allocation4 + $0x248] ss:$16 sps:$4 sm:$0xff]  }
 0x7ed   :  { %11502 = vmatprep.subr.bf16.mxu1 %v16038_v21  ;;  %v16056_v21 = vld [vmem:[#allocation4 + $0x26c] ss:$16 sps:$4 sm:$0xff]  }
 0x87a   :  { %v9431_v53 = vpop.f32.mrb[12].mxu1  ;;  %v9573_v33 = vpop.f32.mrb[12].mxu0 }
 0x87b   :  { %v9652_v4 = vrot.slane %v9431_v53, %v17858_v39  ;;  %v9668_v36 = vrot.slane %v9573_v33, %v17858_v39  ;;  %v9433_v30 = vpop.f32.mrb[13].mxu1  ;;  %v9575_v26 = vpop.f32.mrb[13].mxu0  ;;  %v9692_v35 = vrot.slane %v9431_v53, %v17861_v24  ;;  %v9708_v44 = vrot.slane %v9573_v33, %v17861_v24  ;;  %v16051_v53 = vld [vmem:[#allocation4 + $0x260] ss:$16 sps:$4 sm:$0xff]   ;;  %v16054_v33 = vld [vmem:[#allocation4 + $0x268] ss:$16 sps:$4 sm:$0xff]  }
 0x87c   :  { %v9656_v31 = vrot.slane %v9433_v30, %v17858_v39  ;;  %v9672_v32 = vrot.slane %v9575_v26, %v17858_v39  ;;  %v9696_v14 = vrot.slane %v9433_v30, %v17861_v24  ;;  %v9712_v40 = vrot.slane %v9575_v26, %v17861_v24  ;;  %v16057_v30 = vld [vmem:[#allocation4 + $0x280] ss:$16 sps:$4 sm:$0xff]   ;;  %v16060_v26 = vld [vmem:[#allocation4 + $0x288] ss:$16 sps:$4 sm:$0xff]  }
 0x87d   :  { %v9681_v34 = vmul.f32 %v9652_v4, %v17378_v56  ;;  %v9685_v63 = vmul.f32 %v9668_v36, %v17816_v50  ;;  %v16059_v4 = vld [vmem:[#allocation4 + $0x284] ss:$16 sps:$4 sm:$0xff]   ;;  %v16062_v36 = vld [vmem:[#allocation4 + $0x28c] ss:$16 sps:$4 sm:$0xff]  }
 0x87e   :  { %v9682_v38 = vmul.f32 %v9656_v31, %v17382_v61  ;;  %v9686_v1 = vmul.f32 %v9672_v32, %v17824_v43  ;;  %v9502_v28 = vpop.f32.mrb[14].mxu1  ;;  %v16065_v31 = vld [vmem:[#allocation4 + $0x2a4] ss:$16 sps:$4 sm:$0xff]   ;;  %v16068_v32 = vld [vmem:[#allocation4 + $0x2ac] ss:$16 sps:$4 sm:$0xff]  }
 0x87f   :  { %v9721_v37 = vadd.f32 %v9692_v35, %v9681_v34  ;;  %v17875_v57 = vadd.f32 %v9708_v44, %v9685_v63  ;;  %v9660_v56 = vrot.slane %v9502_v28, %v17858_v39  ;;  %v9504_v0 = vpop.f32.mrb[15].mxu1  ;;  %v9700_v61 = vrot.slane %v9502_v28, %v17861_v24  ;;  %v16063_v34 = vld [vmem:[#allocation4 + $0x2a0] ss:$16 sps:$4 sm:$0xff]   ;;  %v16066_v35 = vld [vmem:[#allocation4 + $0x2a8] ss:$16 sps:$4 sm:$0xff]  }
 0x880   :  { %v9722_v9 = vadd.f32 %v9696_v14, %v9682_v38  ;;  %v17878_v42 = vadd.f32 %v9712_v40, %v9686_v1  ;;  %v9664_v50 = vrot.slane %v9504_v0, %v17858_v39  ;;  %v9704_v11 = vrot.slane %v9504_v0, %v17861_v24  ;;  %v16071_v63 = vld [vmem:[#allocation4 + $0x2c4] ss:$16 sps:$4 sm:$0xff]   ;;  %v16074_v44 = vld [vmem:[#allocation4 + $0x2cc] ss:$16 sps:$4 sm:$0xff]   ;;  %v16069_v38 = vld [vmem:[#allocation4 + $0x2c0] ss:$16 sps:$4 sm:$0xff]  }
 0x881   :  { %v9737_v45 = vmul.f32 0.03, %v9721_v37  ;;  %vm9729_vm3 = vcmp.ge.f32.partialorder %v9721_v37, 0.0  ;;  %v9683_v46 = vmul.f32 %v9660_v56, %v17380_v60  ;;  %v16072_v14 = vld [vmem:[#allocation4 + $0x2c8] ss:$16 sps:$4 sm:$0xff]   ;;  %vm9733_vm8 = vcmp.ge.f32.partialorder %v17875_v57, 0.0 }
 0x882   :  { %v9738_v43 = vmul.f32 0.03, %v9722_v9  ;;  %v9684_v47 = vmul.f32 %v9664_v50, %v17384_v54  ;;  %v9644_v48 = vpop.f32.mrb[16].mxu1  ;;  %vm9730_vm4 = vcmp.ge.f32.partialorder %v9722_v9, 0.0  ;;  %v16077_v1 = vld [vmem:[#allocation4 + $0x2e4] ss:$16 sps:$4 sm:$0xff]  }
 0x883   :  { %v9676_v49 = vrot.slane %v9644_v48, %v17858_v39  ;;  %v9646_v16 = vpop.f32.mrb[17].mxu1  ;;  %v17886_v12 = vadd.f32 %v9700_v61, %v9683_v46  ;;  %v9716_v58 = vrot.slane %v9644_v48, %v17861_v24  ;;  %v9745_v3 = vsel %vm9729_vm3, %v9721_v37, %v9737_v45  ;;  %v16080_v40 = vld [vmem:[#allocation4 + $0x2ec] ss:$16 sps:$4 sm:$0xff]   ;;  %v16075_v28 = vld [vmem:[#allocation4 + $0x2e0] ss:$16 sps:$4 sm:$0xff]  }
 0x884   :  { %v9724_v22 = vadd.f32 %v9704_v11, %v9684_v47  ;;  %v9680_v52 = vrot.slane %v9646_v16, %v17858_v39  ;;  %v9746_v2 = vsel %vm9730_vm4, %v9722_v9, %v9738_v43  ;;  %v9720_v54 = vrot.slane %v9646_v16, %v17861_v24  ;;  %v16078_v37 = vld [vmem:[#allocation4 + $0x2e8] ss:$16 sps:$4 sm:$0xff]   ;;  %v16083_v56 = vld [vmem:[#allocation4 + $0x304] ss:$16 sps:$4 sm:$0xff]   ;;  %v16086_v0 = vld [vmem:[#allocation4 + $0x30c] ss:$16 sps:$4 sm:$0xff]  }
 0x885   :  { %v9687_v10 = vmul.f32 %v9676_v49, %v17822_v55  ;;  %v9754_v7 = vpack.c.bf16 %v9746_v2, %v9746_v2  ;;  %v9753_v29 = vpack.c.bf16 %v9745_v3, %v9745_v3  ;;  %v16081_v9 = vld [vmem:[#allocation4 + $0x300] ss:$16 sps:$4 sm:$0xff]   ;;  %v16084_v50 = vld [vmem:[#allocation4 + $0x308] ss:$16 sps:$4 sm:$0xff]   ;;  %v16089_v45 = vld [vmem:[#allocation4 + $0x324] ss:$16 sps:$4 sm:$0xff]  }
 0x886   :  { %v9740_v5 = vmul.f32 0.03, %v9724_v22  ;;  %v9688_v60 = vmul.f32 %v9680_v52, %v17832_v23  ;;  %vm9732_vm5 = vcmp.ge.f32.partialorder %v9724_v22, 0.0  ;;  %v16039_v23 = vld [vmem:[#allocation4 + $0x220] ss:$16 sps:$4 sm:$0xff]   ;;  %vm9731_vm6 = vcmp.ge.f32.partialorder %v17886_v12, 0.0 }
 0x887   :  { %v17893_v6 = vadd.f32 %v9716_v58, %v9687_v10  ;;  %11329 = vmatprep.mubr.bf16.mxu0 %v9754_v7  ;;  %11493 = vmatprep.mubr.bf16.mxu1 %v9754_v7  ;;  %v16092_v61 = vld [vmem:[#allocation4 + $0x32c] ss:$16 sps:$4 sm:$0xff]   ;;  %v16087_v11 = vld [vmem:[#allocation4 + $0x320] ss:$16 sps:$4 sm:$0xff]   ;;  %v16090_v43 = vld [vmem:[#allocation4 + $0x328] ss:$16 sps:$4 sm:$0xff]  }
 0x888   :  { %v17895_v41 = vadd.f32 %v9720_v54, %v9688_v60  ;;  %v9748_v55 = vsel %vm9732_vm5, %v9724_v22, %v9740_v5  ;;  %11330 = vmatmul.mubr.bf16.vlgmr.msra.gmra.mrb[16].mxu0 %v9753_v29  ;;  %11494 = vmatmul.mubr.bf16.vlgmr.msra.gmra.mrb[20].mxu1 %v9753_v29  ;;  %v16095_v46 = vld [vmem:[#allocation4 + $0x344] ss:$16 sps:$4 sm:$0xff]   ;;  %v16098_v47 = vld [vmem:[#allocation4 + $0x34c] ss:$16 sps:$4 sm:$0xff]   ;;  %v16093_v48 = vld [vmem:[#allocation4 + $0x340] ss:$16 sps:$4 sm:$0xff]  }
 0x889   :  { %v9756_v15 = vpack.c.bf16 %v9748_v55, %v9748_v55  ;;  %11339 = vmatpush1.bf16.msra.mxu0 %v16033_v8  ;;  %11503 = vmatpush1.bf16.msra.mxu1 %v16036_v13  ;;  %v16096_v49 = vld [vmem:[#allocation4 + $0x348] ss:$16 sps:$4 sm:$0xff]   ;;  %v16101_v16 = vld [vmem:[#allocation4 + $0x364] ss:$16 sps:$4 sm:$0xff]   ;;  %v16104_v22 = vld [vmem:[#allocation4 + $0x36c] ss:$16 sps:$4 sm:$0xff]  }
 0x88a   :  { %11340 = vmatprep.subr.bf16.mxu0 %v16041_v19  ;;  %11504 = vmatprep.subr.bf16.mxu1 %v16044_v25  ;;  %v16099_v52 = vld [vmem:[#allocation4 + $0x360] ss:$16 sps:$4 sm:$0xff]   ;;  %v16102_v10 = vld [vmem:[#allocation4 + $0x368] ss:$16 sps:$4 sm:$0xff]   ;;  %v16107_v58 = vld [vmem:[#allocation4 + $0x384] ss:$16 sps:$4 sm:$0xff]  }
 0x88b   :  { %11370 = vmatprep.mubr.bf16.mxu0 %v9756_v15  ;;  %11534 = vmatprep.mubr.bf16.mxu1 %v9756_v15  ;;  %v16110_v2 = vld [vmem:[#allocation4 + $0x38c] ss:$16 sps:$4 sm:$0xff]   ;;  %v16105_v3 = vld [vmem:[#allocation4 + $0x380] ss:$16 sps:$4 sm:$0xff]   ;;  %v16108_v5 = vld [vmem:[#allocation4 + $0x388] ss:$16 sps:$4 sm:$0xff]  }
 0x88c   :  { %v16113_v60 = vld [vmem:[#allocation4 + $0x3a4] ss:$16 sps:$4 sm:$0xff]   ;;  %v16116_v54 = vld [vmem:[#allocation4 + $0x3ac] ss:$16 sps:$4 sm:$0xff]   ;;  %v16111_v7 = vld [vmem:[#allocation4 + $0x3a0] ss:$16 sps:$4 sm:$0xff]  }
 0x88d   :  { %11341 = vmatpush1.bf16.msra.mxu0 %v16039_v23  ;;  %11505 = vmatpush1.bf16.msra.mxu1 %v16042_v17  ;;  %v16114_v8 = vld [vmem:[#allocation4 + $0x3a8] ss:$16 sps:$4 sm:$0xff]   ;;  %v16119_v13 = vld [vmem:[#allocation4 + $0x3c4] ss:$16 sps:$4 sm:$0xff]   ;;  %v16122_v29 = vld [vmem:[#allocation4 + $0x3cc] ss:$16 sps:$4 sm:$0xff]  }
 0x88e   :  { %11342 = vmatprep.subr.bf16.mxu0 %v16047_v62  ;;  %11506 = vmatprep.subr.bf16.mxu1 %v16050_v59  ;;  %v16117_v19 = vld [vmem:[#allocation4 + $0x3c0] ss:$16 sps:$4 sm:$0xff]   ;;  %v16120_v55 = vld [vmem:[#allocation4 + $0x3c8] ss:$16 sps:$4 sm:$0xff]   ;;  %v16125_v15 = vld [vmem:[#allocation4 + $0x3e4] ss:$16 sps:$4 sm:$0xff]  }
 0x88f   :  { %v16128_v25 = vld [vmem:[#allocation4 + $0x3ec] ss:$16 sps:$4 sm:$0xff]   ;;  %v9739_v23 = vmul.f32 0.03, %v17886_v12  ;;  %v9742_v17 = vmul.f32 0.03, %v17878_v42 }
 0x890   :  { %v16123_v62 = vld [vmem:[#allocation4 + $0x3e0] ss:$16 sps:$4 sm:$0xff]   ;;  %v16126_v59 = vld [vmem:[#allocation4 + $0x3e8] ss:$16 sps:$4 sm:$0xff]   ;;  %vm9734_vm7 = vcmp.ge.f32.partialorder %v17878_v42, 0.0  ;;  %vm9736_vm9 = vcmp.ge.f32.partialorder %v17895_v41, 0.0 }
 0x891   :  { %11343 = vmatpush1.bf16.msra.mxu0 %v16045_v18  ;;  %11507 = vmatpush1.bf16.msra.mxu1 %v16048_v20  ;;  %v16131_v18 = vld [vmem:[#allocation4 + $0x404] ss:$16 sps:$4 sm:$0xff]   ;;  %v16134_v20 = vld [vmem:[#allocation4 + $0x40c] ss:$16 sps:$4 sm:$0xff]   ;;  %vm9735_vm10 = vcmp.ge.f32.partialorder %v17893_v6, 0.0  ;;  %vm12771_vm3 = vcmask 523264  }
 0x892   :  { %11344 = vmatprep.subr.bf16.mxu0 %v16053_v51  ;;  %11508 = vmatprep.subr.bf16.mxu1 %v16056_v21  ;;  %v9747_v51 = vsel %vm9731_vm6, %v17886_v12, %v9739_v23  ;;  %v9750_v21 = vsel %vm9734_vm7, %v17878_v42, %v9742_v17  ;;  %v16138_v12 = vld [vmem:[#allocation4 + $0x428] ss:$16 sps:$4 sm:$0xff]   ;;  %v16146_v42 = vld [vmem:[#allocation4 + $0x44c] ss:$16 sps:$4 sm:$0xff]   ;;  %v16201_v23 = vld [vmem:[#allocation4 + $0x580] ss:$16 sps:$4 sm:$0xff]  }
 0x893   :  { %v16204_v17 = vld [vmem:[#allocation4 + $0x588] ss:$16 sps:$4 sm:$0xff]   ;;  %vm16853_vm6 = vmmov 0  }
 0x895   :  { %11345 = vmatpush1.bf16.msra.mxu0 %v16051_v53  ;;  %11509 = vmatpush1.bf16.msra.mxu1 %v16054_v33  ;;  %v16129_v53 = vld [vmem:[#allocation4 + $0x400] ss:$16 sps:$4 sm:$0xff]   ;;  %v9755_v33 = vpack.c.bf16 %v9747_v51, %v9747_v51  ;;  %v16215_v51 = vld [vmem:[#allocation4 + $0x5c4] ss:$16 sps:$4 sm:$0xff]  }
 0x896   :  { %11346 = vmatprep.subr.bf16.mxu0 %v16059_v4  ;;  %11510 = vmatprep.subr.bf16.mxu1 %v16062_v36  ;;  %v16132_v4 = vld [vmem:[#allocation4 + $0x408] ss:$16 sps:$4 sm:$0xff]   ;;  %v9758_v36 = vpack.c.bf16 %v9750_v21, %v9750_v21  ;;  %v16218_v21 = vld [vmem:[#allocation4 + $0x5cc] ss:$16 sps:$4 sm:$0xff]  }
 0x899   :  { %11347 = vmatpush1.bf16.msra.mxu0 %v16057_v30  ;;  %11511 = vmatpush1.bf16.msra.mxu1 %v16060_v26  ;;  %v16137_v30 = vld [vmem:[#allocation4 + $0x424] ss:$16 sps:$4 sm:$0xff]   ;;  %v16140_v26 = vld [vmem:[#allocation4 + $0x42c] ss:$16 sps:$4 sm:$0xff]  }
 0x89a   :  { %11348 = vmatprep.subr.bf16.mxu0 %v16065_v31  ;;  %11512 = vmatprep.subr.bf16.mxu1 %v16068_v32  ;;  %v16135_v31 = vld [vmem:[#allocation4 + $0x420] ss:$16 sps:$4 sm:$0xff]   ;;  %v16143_v32 = vld [vmem:[#allocation4 + $0x444] ss:$16 sps:$4 sm:$0xff]  }
 0x89d   :  { %11349 = vmatpush1.bf16.msra.mxu0 %v16063_v34  ;;  %11513 = vmatpush1.bf16.msra.mxu1 %v16066_v35  ;;  %v16141_v34 = vld [vmem:[#allocation4 + $0x440] ss:$16 sps:$4 sm:$0xff]   ;;  %v16144_v35 = vld [vmem:[#allocation4 + $0x448] ss:$16 sps:$4 sm:$0xff]  }
 0x89e   :  { %11350 = vmatprep.subr.bf16.mxu0 %v16071_v63  ;;  %11514 = vmatprep.subr.bf16.mxu1 %v16074_v44  ;;  %v16149_v63 = vld [vmem:[#allocation4 + $0x464] ss:$16 sps:$4 sm:$0xff]   ;;  %v16152_v44 = vld [vmem:[#allocation4 + $0x46c] ss:$16 sps:$4 sm:$0xff]  }
 0x8a1   :  { %11351 = vmatpush1.bf16.msra.mxu0 %v16069_v38  ;;  %11515 = vmatpush1.bf16.msra.mxu1 %v16072_v14  ;;  %v16147_v38 = vld [vmem:[#allocation4 + $0x460] ss:$16 sps:$4 sm:$0xff]   ;;  %v16150_v14 = vld [vmem:[#allocation4 + $0x468] ss:$16 sps:$4 sm:$0xff]  }
 0x8a2   :  { %11352 = vmatprep.subr.bf16.mxu0 %v16077_v1  ;;  %11516 = vmatprep.subr.bf16.mxu1 %v16080_v40  ;;  %v16155_v1 = vld [vmem:[#allocation4 + $0x484] ss:$16 sps:$4 sm:$0xff]   ;;  %v16158_v40 = vld [vmem:[#allocation4 + $0x48c] ss:$16 sps:$4 sm:$0xff]  }
 0x8a5   :  { %11353 = vmatpush1.bf16.msra.mxu0 %v16075_v28  ;;  %11517 = vmatpush1.bf16.msra.mxu1 %v16078_v37  ;;  %v16153_v28 = vld [vmem:[#allocation4 + $0x480] ss:$16 sps:$4 sm:$0xff]   ;;  %v16156_v37 = vld [vmem:[#allocation4 + $0x488] ss:$16 sps:$4 sm:$0xff]  }
 0x8a6   :  { %11354 = vmatprep.subr.bf16.mxu0 %v16083_v56  ;;  %11518 = vmatprep.subr.bf16.mxu1 %v16086_v0  ;;  %v16161_v56 = vld [vmem:[#allocation4 + $0x4a4] ss:$16 sps:$4 sm:$0xff]   ;;  %v16164_v0 = vld [vmem:[#allocation4 + $0x4ac] ss:$16 sps:$4 sm:$0xff]  }
 0x8a9   :  { %11355 = vmatpush1.bf16.msra.mxu0 %v16081_v9  ;;  %11519 = vmatpush1.bf16.msra.mxu1 %v16084_v50  ;;  %v16159_v9 = vld [vmem:[#allocation4 + $0x4a0] ss:$16 sps:$4 sm:$0xff]   ;;  %v16162_v50 = vld [vmem:[#allocation4 + $0x4a8] ss:$16 sps:$4 sm:$0xff]  }
 0x8aa   :  { %11356 = vmatprep.subr.bf16.mxu0 %v16089_v45  ;;  %11520 = vmatprep.subr.bf16.mxu1 %v16092_v61  ;;  %v16167_v45 = vld [vmem:[#allocation4 + $0x4c4] ss:$16 sps:$4 sm:$0xff]   ;;  %v16170_v61 = vld [vmem:[#allocation4 + $0x4cc] ss:$16 sps:$4 sm:$0xff]  }
 0x8ad   :  { %11357 = vmatpush1.bf16.msra.mxu0 %v16087_v11  ;;  %11521 = vmatpush1.bf16.msra.mxu1 %v16090_v43  ;;  %v16165_v11 = vld [vmem:[#allocation4 + $0x4c0] ss:$16 sps:$4 sm:$0xff]   ;;  %v16168_v43 = vld [vmem:[#allocation4 + $0x4c8] ss:$16 sps:$4 sm:$0xff]  }
 0x8ae   :  { %11358 = vmatprep.subr.bf16.mxu0 %v16095_v46  ;;  %11522 = vmatprep.subr.bf16.mxu1 %v16098_v47  ;;  %v16173_v46 = vld [vmem:[#allocation4 + $0x4e4] ss:$16 sps:$4 sm:$0xff]   ;;  %v16176_v47 = vld [vmem:[#allocation4 + $0x4ec] ss:$16 sps:$4 sm:$0xff]  }
 0x8b1   :  { %11359 = vmatpush1.bf16.msra.mxu0 %v16093_v48  ;;  %11523 = vmatpush1.bf16.msra.mxu1 %v16096_v49  ;;  %v16171_v48 = vld [vmem:[#allocation4 + $0x4e0] ss:$16 sps:$4 sm:$0xff]   ;;  %v16174_v49 = vld [vmem:[#allocation4 + $0x4e8] ss:$16 sps:$4 sm:$0xff]  }
 0x8b2   :  { %11360 = vmatprep.subr.bf16.mxu0 %v16101_v16  ;;  %11524 = vmatprep.subr.bf16.mxu1 %v16104_v22  ;;  %v16179_v16 = vld [vmem:[#allocation4 + $0x504] ss:$16 sps:$4 sm:$0xff]   ;;  %v16182_v22 = vld [vmem:[#allocation4 + $0x50c] ss:$16 sps:$4 sm:$0xff]  }
 0x8b5   :  { %11361 = vmatpush1.bf16.msra.mxu0 %v16099_v52  ;;  %11525 = vmatpush1.bf16.msra.mxu1 %v16102_v10  ;;  %v16177_v52 = vld [vmem:[#allocation4 + $0x500] ss:$16 sps:$4 sm:$0xff]   ;;  %v16180_v10 = vld [vmem:[#allocation4 + $0x508] ss:$16 sps:$4 sm:$0xff]  }
 0x8b6   :  { %11362 = vmatprep.subr.bf16.mxu0 %v16107_v58  ;;  %11526 = vmatprep.subr.bf16.mxu1 %v16110_v2  ;;  %v16185_v58 = vld [vmem:[#allocation4 + $0x524] ss:$16 sps:$4 sm:$0xff]   ;;  %v16188_v2 = vld [vmem:[#allocation4 + $0x52c] ss:$16 sps:$4 sm:$0xff]  }
 0x8b9   :  { %11363 = vmatpush1.bf16.msra.mxu0 %v16105_v3  ;;  %11527 = vmatpush1.bf16.msra.mxu1 %v16108_v5  ;;  %v16183_v3 = vld [vmem:[#allocation4 + $0x520] ss:$16 sps:$4 sm:$0xff]   ;;  %v16186_v5 = vld [vmem:[#allocation4 + $0x528] ss:$16 sps:$4 sm:$0xff]  }
 0x8ba   :  { %11364 = vmatprep.subr.bf16.mxu0 %v16113_v60  ;;  %11528 = vmatprep.subr.bf16.mxu1 %v16116_v54  ;;  %v16191_v60 = vld [vmem:[#allocation4 + $0x544] ss:$16 sps:$4 sm:$0xff]   ;;  %v16194_v54 = vld [vmem:[#allocation4 + $0x54c] ss:$16 sps:$4 sm:$0xff]  }
 0x8bd   :  { %11365 = vmatpush1.bf16.msra.mxu0 %v16111_v7  ;;  %11529 = vmatpush1.bf16.msra.mxu1 %v16114_v8  ;;  %v16189_v7 = vld [vmem:[#allocation4 + $0x540] ss:$16 sps:$4 sm:$0xff]   ;;  %v16192_v8 = vld [vmem:[#allocation4 + $0x548] ss:$16 sps:$4 sm:$0xff]  }
 0x8be   :  { %11366 = vmatprep.subr.bf16.mxu0 %v16119_v13  ;;  %11530 = vmatprep.subr.bf16.mxu1 %v16122_v29  ;;  %v16197_v13 = vld [vmem:[#allocation4 + $0x564] ss:$16 sps:$4 sm:$0xff]   ;;  %v16200_v29 = vld [vmem:[#allocation4 + $0x56c] ss:$16 sps:$4 sm:$0xff]  }
 0x8c1   :  { %11367 = vmatpush1.bf16.msra.mxu0 %v16117_v19  ;;  %11531 = vmatpush1.bf16.msra.mxu1 %v16120_v55  ;;  %v16195_v19 = vld [vmem:[#allocation4 + $0x560] ss:$16 sps:$4 sm:$0xff]   ;;  %v16198_v55 = vld [vmem:[#allocation4 + $0x568] ss:$16 sps:$4 sm:$0xff]  }
 0x8c2   :  { %11368 = vmatprep.subr.bf16.mxu0 %v16125_v15  ;;  %11532 = vmatprep.subr.bf16.mxu1 %v16128_v25  ;;  %v16203_v15 = vld [vmem:[#allocation4 + $0x584] ss:$16 sps:$4 sm:$0xff]   ;;  %v16206_v25 = vld [vmem:[#allocation4 + $0x58c] ss:$16 sps:$4 sm:$0xff]  }
 0x8c5   :  { %11369 = vmatpush1.bf16.msra.mxu0 %v16123_v62  ;;  %11533 = vmatpush1.bf16.msra.mxu1 %v16126_v59  ;;  %v16209_v62 = vld [vmem:[#allocation4 + $0x5a4] ss:$16 sps:$4 sm:$0xff]   ;;  %v16212_v59 = vld [vmem:[#allocation4 + $0x5ac] ss:$16 sps:$4 sm:$0xff]  }
 0x8c6   :  { %11379 = vmatprep.subr.bf16.mxu0 %v16131_v18  ;;  %11543 = vmatprep.subr.bf16.mxu1 %v16134_v20  ;;  %v16207_v18 = vld [vmem:[#allocation4 + $0x5a0] ss:$16 sps:$4 sm:$0xff]   ;;  %v16210_v20 = vld [vmem:[#allocation4 + $0x5a8] ss:$16 sps:$4 sm:$0xff]  }
 0x8c8   :  { %11371 = vmatmul.mubr.bf16.vlgmr.msra.gmra.mrb[16].mxu0 %v9755_v33  ;;  %11535 = vmatmul.mubr.bf16.vlgmr.msra.gmra.mrb[20].mxu1 %v9755_v33  ;;  %v16216_v33 = vld [vmem:[#allocation4 + $0x5c8] ss:$16 sps:$4 sm:$0xff]  }
 0x8c9   :  { %11380 = vmatpush1.bf16.msra.mxu0 %v16129_v53  ;;  %11411 = vmatprep.mubr.bf16.mxu0 %v9758_v36  ;;  %v16213_v53 = vld [vmem:[#allocation4 + $0x5c0] ss:$16 sps:$4 sm:$0xff]  }
 0x8ca   :  { %11544 = vmatpush1.bf16.msra.mxu1 %v16132_v4  ;;  %11575 = vmatprep.mubr.bf16.mxu1 %v9758_v36  ;;  %v16221_v4 = vld [vmem:[#allocation4 + $0x5e4] ss:$16 sps:$4 sm:$0xff]   ;;  %v9741_v36 = vmul.f32 0.03, %v17875_v57 }
 0x8cb   :  { %11381 = vmatprep.subr.bf16.mxu0 %v16137_v30  ;;  %11545 = vmatprep.subr.bf16.mxu1 %v16140_v26  ;;  %v16224_v30 = vld [vmem:[#allocation4 + $0x5ec] ss:$16 sps:$4 sm:$0xff]   ;;  %v9744_v26 = vmul.f32 0.03, %v17895_v41 }
 0x8cd   :  { %11382 = vmatpush1.bf16.msra.mxu0 %v16135_v31  ;;  %v16219_v31 = vld [vmem:[#allocation4 + $0x5e0] ss:$16 sps:$4 sm:$0xff]  }
 0x8ce   :  { %11546 = vmatpush1.bf16.msra.mxu1 %v16138_v12  ;;  %11383 = vmatprep.subr.bf16.mxu0 %v16143_v32  ;;  %v16222_v12 = vld [vmem:[#allocation4 + $0x5e8] ss:$16 sps:$4 sm:$0xff]   ;;  %v16227_v32 = vld [vmem:[#allocation4 + $0x604] ss:$16 sps:$4 sm:$0xff]  }
 0x8cf   :  { %11547 = vmatprep.subr.bf16.mxu1 %v16146_v42  ;;  %v9749_v42 = vsel %vm9733_vm8, %v17875_v57, %v9741_v36  ;;  %v16234_v57 = vld [vmem:[#allocation4 + $0x628] ss:$16 sps:$4 sm:$0xff]   ;;  %vm13493_vm8 = vcmask 189440  }
 0x8d0   :  { %v16300_v36 = vld [vmem:[#allocation4 + $0x788] ss:$16 sps:$4 sm:$0xff]  }
 0x8d1   :  { %11384 = vmatpush1.bf16.msra.mxu0 %v16141_v34  ;;  %v16230_v34 = vld [vmem:[#allocation4 + $0x60c] ss:$16 sps:$4 sm:$0xff]  }
 0x8d2   :  { %11548 = vmatpush1.bf16.msra.mxu1 %v16144_v35  ;;  %11385 = vmatprep.subr.bf16.mxu0 %v16149_v63  ;;  %v16225_v35 = vld [vmem:[#allocation4 + $0x600] ss:$16 sps:$4 sm:$0xff]   ;;  %v9752_v63 = vsel %vm9736_vm9, %v17895_v41, %v9744_v26  ;;  %v16308_v26 = vld [vmem:[#allocation4 + $0x7ac] ss:$16 sps:$4 sm:$0xff]  }
 0x8d3   :  { %11549 = vmatprep.subr.bf16.mxu1 %v16152_v44  ;;  %v9757_v44 = vpack.c.bf16 %v9749_v42, %v9749_v42  ;;  %v16237_v41 = vld [vmem:[#allocation4 + $0x640] ss:$16 sps:$4 sm:$0xff]   ;;  %v16314_v42 = vld [vmem:[#allocation4 + $0x7cc] ss:$16 sps:$4 sm:$0xff]  }
 0x8d5   :  { %11386 = vmatpush1.bf16.msra.mxu0 %v16147_v38  ;;  %v16228_v38 = vld [vmem:[#allocation4 + $0x608] ss:$16 sps:$4 sm:$0xff]  }
 0x8d6   :  { %11550 = vmatpush1.bf16.msra.mxu1 %v16150_v14  ;;  %11387 = vmatprep.subr.bf16.mxu0 %v16155_v1  ;;  %v16233_v14 = vld [vmem:[#allocation4 + $0x624] ss:$16 sps:$4 sm:$0xff]   ;;  %v9760_v1 = vpack.c.bf16 %v9752_v63, %v9752_v63 }
 0x8d7   :  { %11551 = vmatprep.subr.bf16.mxu1 %v16158_v40  ;;  %v16236_v40 = vld [vmem:[#allocation4 + $0x62c] ss:$16 sps:$4 sm:$0xff]   ;;  %v16317_v63 = vld [vmem:[#allocation4 + $0x7e4] ss:$16 sps:$4 sm:$0xff]  }
 0x8d9   :  { %11388 = vmatpush1.bf16.msra.mxu0 %v16153_v28  ;;  %v16231_v28 = vld [vmem:[#allocation4 + $0x620] ss:$16 sps:$4 sm:$0xff]  }
 0x8da   :  { %11552 = vmatpush1.bf16.msra.mxu1 %v16156_v37  ;;  %11389 = vmatprep.subr.bf16.mxu0 %v16161_v56  ;;  %v16239_v37 = vld [vmem:[#allocation4 + $0x644] ss:$16 sps:$4 sm:$0xff]   ;;  %v16242_v56 = vld [vmem:[#allocation4 + $0x64c] ss:$16 sps:$4 sm:$0xff]  }
 0x8db   :  { %11553 = vmatprep.subr.bf16.mxu1 %v16164_v0  ;;  %v16240_v0 = vld [vmem:[#allocation4 + $0x648] ss:$16 sps:$4 sm:$0xff]  }
 0x8dd   :  { %11390 = vmatpush1.bf16.msra.mxu0 %v16159_v9  ;;  %v16245_v9 = vld [vmem:[#allocation4 + $0x664] ss:$16 sps:$4 sm:$0xff]  }
 0x8de   :  { %11554 = vmatpush1.bf16.msra.mxu1 %v16162_v50  ;;  %11391 = vmatprep.subr.bf16.mxu0 %v16167_v45  ;;  %v16248_v50 = vld [vmem:[#allocation4 + $0x66c] ss:$16 sps:$4 sm:$0xff]   ;;  %v16243_v45 = vld [vmem:[#allocation4 + $0x660] ss:$16 sps:$4 sm:$0xff]  }
 0x8df   :  { %11555 = vmatprep.subr.bf16.mxu1 %v16170_v61  ;;  %v16246_v61 = vld [vmem:[#allocation4 + $0x668] ss:$16 sps:$4 sm:$0xff]  }
 0x8e1   :  { %11392 = vmatpush1.bf16.msra.mxu0 %v16165_v11  ;;  %v16251_v11 = vld [vmem:[#allocation4 + $0x684] ss:$16 sps:$4 sm:$0xff]  }
 0x8e2   :  { %11556 = vmatpush1.bf16.msra.mxu1 %v16168_v43  ;;  %11393 = vmatprep.subr.bf16.mxu0 %v16173_v46  ;;  %v16254_v43 = vld [vmem:[#allocation4 + $0x68c] ss:$16 sps:$4 sm:$0xff]   ;;  %v16249_v46 = vld [vmem:[#allocation4 + $0x680] ss:$16 sps:$4 sm:$0xff]  }
 0x8e3   :  { %11557 = vmatprep.subr.bf16.mxu1 %v16176_v47  ;;  %v16252_v47 = vld [vmem:[#allocation4 + $0x688] ss:$16 sps:$4 sm:$0xff]  }
 0x8e5   :  { %11394 = vmatpush1.bf16.msra.mxu0 %v16171_v48  ;;  %v16257_v48 = vld [vmem:[#allocation4 + $0x6a4] ss:$16 sps:$4 sm:$0xff]  }
 0x8e6   :  { %11558 = vmatpush1.bf16.msra.mxu1 %v16174_v49  ;;  %11395 = vmatprep.subr.bf16.mxu0 %v16179_v16  ;;  %v16260_v49 = vld [vmem:[#allocation4 + $0x6ac] ss:$16 sps:$4 sm:$0xff]   ;;  %v16255_v16 = vld [vmem:[#allocation4 + $0x6a0] ss:$16 sps:$4 sm:$0xff]  }
 0x8e7   :  { %11559 = vmatprep.subr.bf16.mxu1 %v16182_v22  ;;  %v16258_v22 = vld [vmem:[#allocation4 + $0x6a8] ss:$16 sps:$4 sm:$0xff]  }
 0x8e9   :  { %11396 = vmatpush1.bf16.msra.mxu0 %v16177_v52  ;;  %v16263_v52 = vld [vmem:[#allocation4 + $0x6c4] ss:$16 sps:$4 sm:$0xff]  }
 0x8ea   :  { %11560 = vmatpush1.bf16.msra.mxu1 %v16180_v10  ;;  %11397 = vmatprep.subr.bf16.mxu0 %v16185_v58  ;;  %v16266_v10 = vld [vmem:[#allocation4 + $0x6cc] ss:$16 sps:$4 sm:$0xff]   ;;  %v16261_v58 = vld [vmem:[#allocation4 + $0x6c0] ss:$16 sps:$4 sm:$0xff]  }
 0x8eb   :  { %11561 = vmatprep.subr.bf16.mxu1 %v16188_v2  ;;  %v16264_v2 = vld [vmem:[#allocation4 + $0x6c8] ss:$16 sps:$4 sm:$0xff]  }
 0x8ed   :  { %11398 = vmatpush1.bf16.msra.mxu0 %v16183_v3  ;;  %v16269_v3 = vld [vmem:[#allocation4 + $0x6e4] ss:$16 sps:$4 sm:$0xff]  }
 0x8ee   :  { %11562 = vmatpush1.bf16.msra.mxu1 %v16186_v5  ;;  %11399 = vmatprep.subr.bf16.mxu0 %v16191_v60  ;;  %v16272_v5 = vld [vmem:[#allocation4 + $0x6ec] ss:$16 sps:$4 sm:$0xff]   ;;  %v16267_v60 = vld [vmem:[#allocation4 + $0x6e0] ss:$16 sps:$4 sm:$0xff]  }
 0x8ef   :  { %11563 = vmatprep.subr.bf16.mxu1 %v16194_v54  ;;  %v16270_v54 = vld [vmem:[#allocation4 + $0x6e8] ss:$16 sps:$4 sm:$0xff]  }
 0x8f1   :  { %11400 = vmatpush1.bf16.msra.mxu0 %v16189_v7  ;;  %v16275_v7 = vld [vmem:[#allocation4 + $0x704] ss:$16 sps:$4 sm:$0xff]  }
 0x8f2   :  { %11564 = vmatpush1.bf16.msra.mxu1 %v16192_v8  ;;  %11401 = vmatprep.subr.bf16.mxu0 %v16197_v13  ;;  %v16278_v8 = vld [vmem:[#allocation4 + $0x70c] ss:$16 sps:$4 sm:$0xff]   ;;  %v16273_v13 = vld [vmem:[#allocation4 + $0x700] ss:$16 sps:$4 sm:$0xff]  }
 0x8f3   :  { %11565 = vmatprep.subr.bf16.mxu1 %v16200_v29  ;;  %v16276_v29 = vld [vmem:[#allocation4 + $0x708] ss:$16 sps:$4 sm:$0xff]  }
 0x8f5   :  { %11402 = vmatpush1.bf16.msra.mxu0 %v16195_v19  ;;  %v16281_v19 = vld [vmem:[#allocation4 + $0x724] ss:$16 sps:$4 sm:$0xff]  }
 0x8f6   :  { %11566 = vmatpush1.bf16.msra.mxu1 %v16198_v55  ;;  %11403 = vmatprep.subr.bf16.mxu0 %v16203_v15  ;;  %v16284_v55 = vld [vmem:[#allocation4 + $0x72c] ss:$16 sps:$4 sm:$0xff]   ;;  %v16279_v15 = vld [vmem:[#allocation4 + $0x720] ss:$16 sps:$4 sm:$0xff]  }
 0x8f7   :  { %11567 = vmatprep.subr.bf16.mxu1 %v16206_v25  ;;  %v16282_v25 = vld [vmem:[#allocation4 + $0x728] ss:$16 sps:$4 sm:$0xff]  }
 0x8f9   :  { %11404 = vmatpush1.bf16.msra.mxu0 %v16201_v23  ;;  %v16287_v23 = vld [vmem:[#allocation4 + $0x744] ss:$16 sps:$4 sm:$0xff]  }
 0x8fa   :  { %11568 = vmatpush1.bf16.msra.mxu1 %v16204_v17  ;;  %11405 = vmatprep.subr.bf16.mxu0 %v16209_v62  ;;  %v16290_v17 = vld [vmem:[#allocation4 + $0x74c] ss:$16 sps:$4 sm:$0xff]   ;;  %v16285_v62 = vld [vmem:[#allocation4 + $0x740] ss:$16 sps:$4 sm:$0xff]  }
 0x8fb   :  { %11569 = vmatprep.subr.bf16.mxu1 %v16212_v59  ;;  %v16288_v59 = vld [vmem:[#allocation4 + $0x748] ss:$16 sps:$4 sm:$0xff]  }
 0x8fd   :  { %11406 = vmatpush1.bf16.msra.mxu0 %v16207_v18  ;;  %v16293_v18 = vld [vmem:[#allocation4 + $0x764] ss:$16 sps:$4 sm:$0xff]  }
 0x8fe   :  { %11570 = vmatpush1.bf16.msra.mxu1 %v16210_v20  ;;  %11407 = vmatprep.subr.bf16.mxu0 %v16215_v51  ;;  %v16296_v20 = vld [vmem:[#allocation4 + $0x76c] ss:$16 sps:$4 sm:$0xff]   ;;  %v16291_v51 = vld [vmem:[#allocation4 + $0x760] ss:$16 sps:$4 sm:$0xff]  }
 0x8ff   :  { %11571 = vmatprep.subr.bf16.mxu1 %v16218_v21  ;;  %v16294_v21 = vld [vmem:[#allocation4 + $0x768] ss:$16 sps:$4 sm:$0xff]  }
 0x901   :  { %11408 = vmatpush1.bf16.msra.mxu0 %v16213_v53  ;;  %v16299_v53 = vld [vmem:[#allocation4 + $0x784] ss:$16 sps:$4 sm:$0xff]  }
 0x902   :  { %11572 = vmatpush1.bf16.msra.mxu1 %v16216_v33  ;;  %11409 = vmatprep.subr.bf16.mxu0 %v16221_v4  ;;  %v16302_v33 = vld [vmem:[#allocation4 + $0x78c] ss:$16 sps:$4 sm:$0xff]   ;;  %v16297_v4 = vld [vmem:[#allocation4 + $0x780] ss:$16 sps:$4 sm:$0xff]  }
 0x903   :  { %11573 = vmatprep.subr.bf16.mxu1 %v16224_v30  ;;  %v16305_v30 = vld [vmem:[#allocation4 + $0x7a4] ss:$16 sps:$4 sm:$0xff]  }
 0x905   :  { %11410 = vmatpush1.bf16.msra.mxu0 %v16219_v31  ;;  %v16303_v31 = vld [vmem:[#allocation4 + $0x7a0] ss:$16 sps:$4 sm:$0xff]  }
 0x906   :  { %11574 = vmatpush1.bf16.msra.mxu1 %v16222_v12  ;;  %11420 = vmatprep.subr.bf16.mxu0 %v16227_v32  ;;  %v16306_v12 = vld [vmem:[#allocation4 + $0x7a8] ss:$16 sps:$4 sm:$0xff]   ;;  %v16311_v32 = vld [vmem:[#allocation4 + $0x7c4] ss:$16 sps:$4 sm:$0xff]  }
 0x907   :  { %11584 = vmatprep.subr.bf16.mxu1 %v16230_v34  ;;  %v16309_v34 = vld [vmem:[#allocation4 + $0x7c0] ss:$16 sps:$4 sm:$0xff]  }
 0x908   :  { %11412 = vmatmul.mubr.bf16.vlgmr.msra.gmra.mrb[16].mxu0 %v9757_v44 }
 0x909   :  { %11576 = vmatmul.mubr.bf16.vlgmr.msra.gmra.mrb[20].mxu1 %v9757_v44  ;;  %11421 = vmatpush1.bf16.msra.mxu0 %v16225_v35  ;;  %v16312_v35 = vld [vmem:[#allocation4 + $0x7c8] ss:$16 sps:$4 sm:$0xff]   ;;  %v9743_v44 = vmul.f32 0.03, %v17893_v6 }
 0x90a   :  { %11452 = vmatprep.mubr.bf16.mxu0 %v9760_v1  ;;  %11585 = vmatpush1.bf16.msra.mxu1 %v16228_v38  ;;  %v16320_v38 = vld [vmem:[#allocation4 + $0x7ec] ss:$16 sps:$4 sm:$0xff]  }
 0x90b   :  { %11616 = vmatprep.mubr.bf16.mxu1 %v9760_v1  ;;  %11422 = vmatprep.subr.bf16.mxu0 %v16233_v14  ;;  %v11705_v14 = vld [vmem:[%s18413_s20 + $0x80] sm:$0xff]  ;;  %v11706_v1 = vld [vmem:[%s18413_s20 + $0x88] sm:$0xff] }
 0x90c   :  { %11586 = vmatprep.subr.bf16.mxu1 %v16236_v40  ;;  %v11737_v40 = vld [vmem:[%s18413_s20 + $0x180] sm:$0xff] }
 0x90d   :  { %11423 = vmatpush1.bf16.msra.mxu0 %v16231_v28  ;;  %v11738_v28 = vld [vmem:[%s18413_s20 + $0x188] sm:$0xff] }
 0x90e   :  { %11587 = vmatpush1.bf16.msra.mxu1 %v16234_v57  ;;  %11424 = vmatprep.subr.bf16.mxu0 %v16239_v37  ;;  %v16315_v57 = vld [vmem:[#allocation4 + $0x7e0] ss:$16 sps:$4 sm:$0xff]   ;;  %v16318_v37 = vld [vmem:[#allocation4 + $0x7e8] ss:$16 sps:$4 sm:$0xff]  }
 0x90f   :  { %11588 = vmatprep.subr.bf16.mxu1 %v16242_v56  ;;  %v15571_v56 = vpack.c.bf16 %v11706_v1, %v11705_v14  ;;  %v11729_v14 = vld [vmem:[%s18413_s20 + $0x140] sm:$0xff]  ;;  %v11730_v1 = vld [vmem:[%s18413_s20 + $0x148] sm:$0xff] }
 0x911   :  { %11425 = vmatpush1.bf16.msra.mxu0 %v16237_v41  ;;  %v11689_v41 = vld [vmem:[%s18413_s20] sm:$0xff] }
 0x912   :  { %11589 = vmatpush1.bf16.msra.mxu1 %v16240_v0  ;;  %11426 = vmatprep.subr.bf16.mxu0 %v16245_v9  ;;  %v11690_v0 = vld [vmem:[%s18413_s20 + $0x8] sm:$0xff]  ;;  %v11721_v9 = vld [vmem:[%s18413_s20 + $0x100] sm:$0xff] }
 0x913   :  { %11590 = vmatprep.subr.bf16.mxu1 %v16248_v50  ;;  %v9751_v50 = vsel %vm9735_vm10, %v17893_v6, %v9743_v44  ;;  %v11740_v6 = vld [vmem:[%s18413_s20 + $0x198] sm:$0xff] }
 0x915   :  { %11427 = vmatpush1.bf16.msra.mxu0 %v16243_v45  ;;  %v15603_v45 = vpack.c.bf16 %v11738_v28, %v11737_v40  ;;  %v15621_v40 = vpack.c.bf16 %v11730_v1, %v11729_v14  ;;  %v11715_v28 = vld [vmem:[%s18413_s20 + $0xd0] sm:$0xff] }
 0x916   :  { %11591 = vmatpush1.bf16.msra.mxu1 %v16246_v61  ;;  %11428 = vmatprep.subr.bf16.mxu0 %v16251_v11  ;;  %v11722_v61 = vld [vmem:[%s18413_s20 + $0x108] sm:$0xff]  ;;  %v11707_v11 = vld [vmem:[%s18413_s20 + $0x90] sm:$0xff] }
 0x917   :  { %11592 = vmatprep.subr.bf16.mxu1 %v16254_v43  ;;  %v11708_v43 = vld [vmem:[%s18413_s20 + $0x98] sm:$0xff] }
 0x919   :  { %11429 = vmatpush1.bf16.msra.mxu0 %v16249_v46  ;;  %v11739_v46 = vld [vmem:[%s18413_s20 + $0x190] sm:$0xff] }
 0x91a   :  { %11593 = vmatpush1.bf16.msra.mxu1 %v16252_v47  ;;  %11430 = vmatprep.subr.bf16.mxu0 %v16257_v48  ;;  %v15573_v47 = vpack.c.bf16 %v11690_v0, %v11689_v41  ;;  %v9759_v48 = vpack.c.bf16 %v9751_v50, %v9751_v50  ;;  %v11748_v41 = vld [vmem:[%s18413_s20 + $0x1d8] sm:$0xff]  ;;  %v11699_v0 = vld [vmem:[%s18413_s20 + $0x50] sm:$0xff] }
 0x91b   :  { %11594 = vmatprep.subr.bf16.mxu1 %v16260_v49  ;;  %v15605_v49 = vpack.c.bf16 %v11722_v61, %v11721_v9  ;;  %v11700_v9 = vld [vmem:[%s18413_s20 + $0x58] sm:$0xff]  ;;  %v11731_v61 = vld [vmem:[%s18413_s20 + $0x150] sm:$0xff] }
 0x91d   :  { %11431 = vmatpush1.bf16.msra.mxu0 %v16255_v16  ;;  %v15575_v16 = vpack.c.bf16 %v11708_v43, %v11707_v11  ;;  %v11732_v11 = vld [vmem:[%s18413_s20 + $0x158] sm:$0xff] }
 0x91e   :  { %11595 = vmatpush1.bf16.msra.mxu1 %v16258_v22  ;;  %11432 = vmatprep.subr.bf16.mxu0 %v16263_v52  ;;  %v11691_v22 = vld [vmem:[%s18413_s20 + $0x10] sm:$0xff]  ;;  %v11692_v52 = vld [vmem:[%s18413_s20 + $0x18] sm:$0xff]  ;;  %v15625_v43 = vpack.c.bf16 %v11732_v11, %v11731_v61 }
 0x91f   :  { %11596 = vmatprep.subr.bf16.mxu1 %v16266_v10  ;;  %v11723_v10 = vld [vmem:[%s18413_s20 + $0x110] sm:$0xff] }
 0x921   :  { %11433 = vmatpush1.bf16.msra.mxu0 %v16261_v58  ;;  %v15607_v58 = vpack.c.bf16 %v11740_v6, %v11739_v46  ;;  %v11717_v46 = vld [vmem:[%s18413_s20 + $0xe0] sm:$0xff]  ;;  %v11718_v6 = vld [vmem:[%s18413_s20 + $0xe8] sm:$0xff] }
 0x922   :  { %11597 = vmatpush1.bf16.msra.mxu1 %v16264_v2  ;;  %11434 = vmatprep.subr.bf16.mxu0 %v16269_v3  ;;  %v11724_v2 = vld [vmem:[%s18413_s20 + $0x118] sm:$0xff]  ;;  %v11709_v3 = vld [vmem:[%s18413_s20 + $0xa0] sm:$0xff] }
 0x923   :  { %11598 = vmatprep.subr.bf16.mxu1 %v16272_v5  ;;  %v11710_v5 = vld [vmem:[%s18413_s20 + $0xa8] sm:$0xff] }
 0x925   :  { %11435 = vmatpush1.bf16.msra.mxu0 %v16267_v60  ;;  %v11741_v60 = vld [vmem:[%s18413_s20 + $0x1a0] sm:$0xff] }
 0x926   :  { %11599 = vmatpush1.bf16.msra.mxu1 %v16270_v54  ;;  %11436 = vmatprep.subr.bf16.mxu0 %v16275_v7  ;;  %v11742_v54 = vld [vmem:[%s18413_s20 + $0x1a8] sm:$0xff]  ;;  %v15577_v7 = vpack.c.bf16 %v11692_v52, %v11691_v22 }
 0x927   :  { %11600 = vmatprep.subr.bf16.mxu1 %v16278_v8  ;;  %v15609_v8 = vpack.c.bf16 %v11724_v2, %v11723_v10  ;;  %v11702_v22 = vld [vmem:[%s18413_s20 + $0x68] sm:$0xff] }
 0x928   :  { %v11734_v2 = vld [vmem:[%s18413_s20 + $0x168] sm:$0xff] }
 0x929   :  { %11437 = vmatpush1.bf16.msra.mxu0 %v16273_v13  ;;  %v15579_v13 = vpack.c.bf16 %v11710_v5, %v11709_v3  ;;  %v11719_v3 = vld [vmem:[%s18413_s20 + $0xf0] sm:$0xff] }
 0x92a   :  { %11601 = vmatpush1.bf16.msra.mxu1 %v16276_v29  ;;  %11438 = vmatprep.subr.bf16.mxu0 %v16281_v19  ;;  %v11693_v29 = vld [vmem:[%s18413_s20 + $0x20] sm:$0xff]  ;;  %v11694_v19 = vld [vmem:[%s18413_s20 + $0x28] sm:$0xff] }
 0x92b   :  { %11602 = vmatprep.subr.bf16.mxu1 %v16284_v55  ;;  %v11725_v55 = vld [vmem:[%s18413_s20 + $0x120] sm:$0xff] }
 0x92d   :  { %11439 = vmatpush1.bf16.msra.mxu0 %v16279_v15  ;;  %v15611_v15 = vpack.c.bf16 %v11742_v54, %v11741_v60  ;;  %v11720_v60 = vld [vmem:[%s18413_s20 + $0xf8] sm:$0xff]  ;;  %v11751_v54 = vld [vmem:[%s18413_s20 + $0x1f0] sm:$0xff] }
 0x92e   :  { %11603 = vmatpush1.bf16.msra.mxu1 %v16282_v25  ;;  %11440 = vmatprep.subr.bf16.mxu0 %v16287_v23  ;;  %v11726_v25 = vld [vmem:[%s18413_s20 + $0x128] sm:$0xff]  ;;  %v11711_v23 = vld [vmem:[%s18413_s20 + $0xb0] sm:$0xff] }
 0x92f   :  { %11604 = vmatprep.subr.bf16.mxu1 %v16290_v17  ;;  %v11712_v17 = vld [vmem:[%s18413_s20 + $0xb8] sm:$0xff] }
 0x931   :  { %11441 = vmatpush1.bf16.msra.mxu0 %v16285_v62  ;;  %v11743_v62 = vld [vmem:[%s18413_s20 + $0x1b0] sm:$0xff] }
 0x932   :  { %11605 = vmatpush1.bf16.msra.mxu1 %v16288_v59  ;;  %11442 = vmatprep.subr.bf16.mxu0 %v16293_v18  ;;  %v11744_v59 = vld [vmem:[%s18413_s20 + $0x1b8] sm:$0xff]  ;;  %v15581_v18 = vpack.c.bf16 %v11694_v19, %v11693_v29  ;;  %v11703_v29 = vld [vmem:[%s18413_s20 + $0x70] sm:$0xff] }
 0x933   :  { %11606 = vmatprep.subr.bf16.mxu1 %v16296_v20  ;;  %v15613_v20 = vpack.c.bf16 %v11726_v25, %v11725_v55  ;;  %v11704_v19 = vld [vmem:[%s18413_s20 + $0x78] sm:$0xff]  ;;  %v11735_v55 = vld [vmem:[%s18413_s20 + $0x170] sm:$0xff] }
 0x934   :  { %v11736_v25 = vld [vmem:[%s18413_s20 + $0x178] sm:$0xff] }
 0x935   :  { %11443 = vmatpush1.bf16.msra.mxu0 %v16291_v51  ;;  %v15583_v51 = vpack.c.bf16 %v11712_v17, %v11711_v23  ;;  %v15633_v23 = vpack.c.bf16 %v11736_v25, %v11735_v55 }
 0x936   :  { %11607 = vmatpush1.bf16.msra.mxu1 %v16294_v21  ;;  %11444 = vmatprep.subr.bf16.mxu0 %v16299_v53  ;;  %v15615_v21 = vpack.c.bf16 %v11744_v59, %v11743_v62  ;;  %v11695_v53 = vld [vmem:[%s18413_s20 + $0x30] sm:$0xff] }
 0x937   :  { %11608 = vmatprep.subr.bf16.mxu1 %v16302_v33  ;;  %v11696_v33 = vld [vmem:[%s18413_s20 + $0x38] sm:$0xff] }
 0x939   :  { %11445 = vmatpush1.bf16.msra.mxu0 %v16297_v4  ;;  %v11727_v4 = vld [vmem:[%s18413_s20 + $0x130] sm:$0xff] }
 0x93a   :  { %11609 = vmatpush1.bf16.msra.mxu1 %v16300_v36  ;;  %11446 = vmatprep.subr.bf16.mxu0 %v16305_v30  ;;  %v15585_v36 = vpack.c.bf16 %v11696_v33, %v11695_v53  ;;  %v11728_v30 = vld [vmem:[%s18413_s20 + $0x138] sm:$0xff] }
 0x93b   :  { %11610 = vmatprep.subr.bf16.mxu1 %v16308_v26  ;;  %v15617_v26 = vpack.c.bf16 %v11728_v30, %v11727_v4 }
 0x93d   :  { %11447 = vmatpush1.bf16.msra.mxu0 %v16303_v31  ;;  %v11713_v31 = vld [vmem:[%s18413_s20 + $0xc0] sm:$0xff] }
 0x93e   :  { %11611 = vmatpush1.bf16.msra.mxu1 %v16306_v12  ;;  %11448 = vmatprep.subr.bf16.mxu0 %v16311_v32  ;;  %v11714_v12 = vld [vmem:[%s18413_s20 + $0xc8] sm:$0xff]  ;;  %v11745_v32 = vld [vmem:[%s18413_s20 + $0x1c0] sm:$0xff] }
 0x93f   :  { %11612 = vmatprep.subr.bf16.mxu1 %v16314_v42  ;;  %v15587_v42 = vpack.c.bf16 %v11714_v12, %v11713_v31 }
 0x941   :  { %11449 = vmatpush1.bf16.msra.mxu0 %v16309_v34  ;;  %v11746_v34 = vld [vmem:[%s18413_s20 + $0x1c8] sm:$0xff] }
 0x942   :  { %11613 = vmatpush1.bf16.msra.mxu1 %v16312_v35  ;;  %11450 = vmatprep.subr.bf16.mxu0 %v16317_v63  ;;  %v11697_v35 = vld [vmem:[%s18413_s20 + $0x40] sm:$0xff]  ;;  %v11698_v63 = vld [vmem:[%s18413_s20 + $0x48] sm:$0xff]  ;;  %v15619_v44 = vpack.c.bf16 %v11746_v34, %v11745_v32 }
 0x943   :  { %11614 = vmatprep.subr.bf16.mxu1 %v16320_v38  ;;  %v15589_v38 = vpack.c.bf16 %v11698_v63, %v11697_v35 }
 0x945   :  { %11451 = vmatpush1.bf16.msra.mxu0 %v16315_v57  ;;  %v11716_v57 = vld [vmem:[%s18413_s20 + $0xd8] sm:$0xff] }
 0x946   :  { %11615 = vmatpush1.bf16.msra.mxu1 %v16318_v37  ;;  %15572 = vmatprep.subr.bf16.mxu0 %v15571_v56  ;;  %v11747_v37 = vld [vmem:[%s18413_s20 + $0x1d0] sm:$0xff]  ;;  %v15591_v56 = vpack.c.bf16 %v11716_v57, %v11715_v28 }
 0x947   :  { %15604 = vmatprep.subr.bf16.mxu1 %v15603_v45  ;;  %v15623_v50 = vpack.c.bf16 %v11748_v41, %v11747_v37  ;;  %v15593_v45 = vpack.c.bf16 %v11700_v9, %v11699_v0 }
 0x948   :  { %11453 = vmatmul.mubr.bf16.vlgmr.msra.gmra.mrb[16].mxu0 %v9759_v48 }
 0x949   :  { %11617 = vmatmul.mubr.bf16.vlgmr.msra.gmra.mrb[20].mxu1 %v9759_v48  ;;  %15574 = vmatpush3.bf16.msra.mxu0 %v15573_v47  ;;  %v11749_v47 = vld [vmem:[%s18413_s20 + $0x1e0] sm:$0xff]  ;;  %v15595_v48 = vpack.c.bf16 %v11718_v6, %v11717_v46 }
 0x94a   :  { %15606 = vmatpush3.bf16.msra.mxu1 %v15605_v49  ;;  %15576 = vmatprep.subr.bf16.mxu0 %v15575_v16  ;;  %v11750_v49 = vld [vmem:[%s18413_s20 + $0x1e8] sm:$0xff]  ;;  %v11701_v16 = vld [vmem:[%s18413_s20 + $0x60] sm:$0xff] }
 0x94b   :  { %15608 = vmatprep.subr.bf16.mxu1 %v15607_v58  ;;  %v15627_v52 = vpack.c.bf16 %v11750_v49, %v11749_v47  ;;  %v15597_v10 = vpack.c.bf16 %v11702_v22, %v11701_v16  ;;  %v11733_v58 = vld [vmem:[%s18413_s20 + $0x160] sm:$0xff] }
 0x94c   :  { %v15629_v5 = vpack.c.bf16 %v11734_v2, %v11733_v58 }
 0x94d   :  { %15578 = vmatpush3.bf16.msra.mxu0 %v15577_v7  ;;  %v11752_v7 = vld [vmem:[%s18413_s20 + $0x1f8] sm:$0xff] }
 0x94e   :  { %15610 = vmatpush3.bf16.msra.mxu1 %v15609_v8  ;;  %15580 = vmatprep.subr.bf16.mxu0 %v15579_v13  ;;  %v15599_v8 = vpack.c.bf16 %v11720_v60, %v11719_v3  ;;  %v15631_v13 = vpack.c.bf16 %v11752_v7, %v11751_v54 }
 0x94f   :  { %15612 = vmatprep.subr.bf16.mxu1 %v15611_v15  ;;  %v15601_v15 = vpack.c.bf16 %v11704_v19, %v11703_v29 }
 0x951   :  { %15582 = vmatpush3.bf16.msra.mxu0 %v15581_v18 }
 0x952   :  { %15614 = vmatpush3.bf16.msra.mxu1 %v15613_v20  ;;  %15584 = vmatprep.subr.bf16.mxu0 %v15583_v51 }
 0x953   :  { %15616 = vmatprep.subr.bf16.mxu1 %v15615_v21 }
 0x955   :  { %15586 = vmatpush3.bf16.msra.mxu0 %v15585_v36 }
 0x956   :  { %15618 = vmatpush3.bf16.msra.mxu1 %v15617_v26  ;;  %15588 = vmatprep.subr.bf16.mxu0 %v15587_v42 }
 0x957   :  { %15620 = vmatprep.subr.bf16.mxu1 %v15619_v44 }
 0x959   :  { %15590 = vmatpush3.bf16.msra.mxu0 %v15589_v38 }
 0x95a   :  { %15622 = vmatpush3.bf16.msra.mxu1 %v15621_v40  ;;  %15592 = vmatprep.subr.bf16.mxu0 %v15591_v56 }
 0x95b   :  { %15624 = vmatprep.subr.bf16.mxu1 %v15623_v50 }
 0x95d   :  { %15594 = vmatpush3.bf16.msra.mxu0 %v15593_v45 }
 0x95e   :  { %15626 = vmatpush3.bf16.msra.mxu1 %v15625_v43  ;;  %15596 = vmatprep.subr.bf16.mxu0 %v15595_v48 }
 0x95f   :  { %15628 = vmatprep.subr.bf16.mxu1 %v15627_v52 }
 0x961   :  { %15598 = vmatpush3.bf16.msra.mxu0 %v15597_v10 }
 0x962   :  { %15630 = vmatpush3.bf16.msra.mxu1 %v15629_v5  ;;  %15600 = vmatprep.subr.bf16.mxu0 %v15599_v8 }
 0x963   :  { %15632 = vmatprep.subr.bf16.mxu1 %v15631_v13 }
 0x965   :  { %15602 = vmatpush3.bf16.msra.mxu0 %v15601_v15 }
 0x966   :  { %15634 = vmatpush3.bf16.msra.mxu1 %v15633_v23 }
 0xa1b   :  { %v18104_v17 = vpop.f32.mrb[16].mxu0 }
 0xa1c   :  { %v11625_v62 = vsel %vm8785_vm0, %v18104_v17, 0.0  ;;  %v11653_v59 = vmul.f32 %v18104_v17, %v18104_v17  ;;  %v18110_v18 = vpop.f32.mrb[20].mxu1  ;;  %v18112_v20 = vpop.f32.mrb[17].mxu0 }
 0xa1d   :  { %v11626_v51 = vrot.slane %v11625_v62, 4  ;;  %v11639_v21 = vsel %vm8785_vm0, %v18110_v18, 0.0  ;;  %v11655_v53 = vmul.f32 %v18110_v18, %v18110_v18  ;;  %v11632_v33 = vsel %vm8785_vm0, %v18112_v20, 0.0  ;;  %v18120_v4 = vpop.f32.mrb[21].mxu1  ;;  %v11458_v36 = vpop.f32.mrb[18].mxu0 }
 0xa1e   :  { %v11657_v30 = vsel %vm8785_vm0, %v11653_v59, 0.0  ;;  %v11640_v26 = vrot.slane %v11639_v21, 4  ;;  %v11633_v31 = vrot.slane %v11632_v33, 4  ;;  %v11654_v12 = vmul.f32 %v18112_v20, %v18112_v20  ;;  %v11622_v32 = vpop.f32.mrb[22].mxu1  ;;  %v11459_v42 = vpop.f32.mrb[19].mxu0 }
 0xa1f   :  { %v11627_v34 = vadd.f32 %v11626_v51, %v11625_v62  ;;  %v11658_v35 = vrot.slane %v11657_v30, 4  ;;  %v11671_v63 = vsel %vm8785_vm0, %v11655_v53, 0.0  ;;  %v11646_v44 = vsel %vm8785_vm0, %v18120_v4, 0.0  ;;  %v11623_v38 = vpop.f32.mrb[23].mxu1  ;;  %v11916_v32 = vld [vmem:[#allocation12 + $0x8] sm:$0xff] }
 0xa20   :  { %v11641_v14 = vadd.f32 %v11640_v26, %v11639_v21  ;;  %v11672_v1 = vrot.slane %v11671_v63, 4  ;;  %v11634_v40 = vadd.f32 %v11633_v31, %v11632_v33  ;;  %v11664_v28 = vsel %vm8785_vm0, %v11654_v12, 0.0  ;;  %v11920_v42 = vld [vmem:[#allocation12 + $0x28] sm:$0xff]  ;;  %v11919_v38 = vld [vmem:[#allocation12 + $0x20] sm:$0xff] }
 0xa21   :  { %v11628_v57 = vrot.slane %v11627_v34, 2  ;;  %v11659_v37 = vadd.f32 %v11658_v35, %v11657_v30  ;;  %v11665_v56 = vrot.slane %v11664_v28, 4  ;;  %v11647_v41 = vrot.slane %v11646_v44, 4 }
 0xa22   :  { %v11673_v0 = vadd.f32 %v11672_v1, %v11671_v63  ;;  %v11635_v9 = vrot.slane %v11634_v40, 2  ;;  %v11656_v50 = vmul.f32 %v18120_v4, %v18120_v4  ;;  %v11642_v49 = vrot.slane %v11641_v14, 2  ;;  %v11922_v63 = vld [vmem:[#allocation12 + $0x38] sm:$0xff] }
 0xa23   :  { %v11660_v45 = vrot.slane %v11659_v37, 2  ;;  %v11666_v61 = vadd.f32 %v11665_v56, %v11664_v28  ;;  %v11648_v11 = vadd.f32 %v11647_v41, %v11646_v44  ;;  %v11629_v43 = vadd.f32 %v11628_v57, %v11627_v34  ;;  %v11918_v34 = vld [vmem:[#allocation12 + $0x18] sm:$0xff]  ;;  %v11915_v44 = vld [vmem:[#allocation12] sm:$0xff]  ;;  %v11921_v28 = vld [vmem:[#allocation12 + $0x30] sm:$0xff] }
 0xa24   :  { %v11674_v46 = vrot.slane %v11673_v0, 2  ;;  %v11636_v6 = vadd.f32 %v11635_v9, %v11634_v40  ;;  %v11678_v47 = vsel %vm8785_vm0, %v11656_v50, 0.0  ;;  %v11643_v7 = vadd.f32 %v11642_v49, %v11641_v14  ;;  %v11917_v40 = vld [vmem:[#allocation12 + $0x10] sm:$0xff]  ;;  %v11928_v56 = vld [vmem:[#allocation12 + $0x68] sm:$0xff]  ;;  %v11926_v41 = vld [vmem:[#allocation12 + $0x58] sm:$0xff] }
 0xa25   :  { %v11661_v48 = vadd.f32 %v11660_v45, %v11659_v37  ;;  %v11667_v16 = vrot.slane %v11666_v61, 2  ;;  %v11649_v22 = vrot.slane %v11648_v11, 2  ;;  %v11679_v52 = vrot.slane %v11678_v47, 4  ;;  %v11924_v37 = vld [vmem:[#allocation12 + $0x48] sm:$0xff]  ;;  %v11930_v9 = vld [vmem:[#allocation12 + $0x78] sm:$0xff]  ;;  %v11923_v50 = vld [vmem:[#allocation12 + $0x40] sm:$0xff] }
 0xa26   :  { %v11675_v10 = vadd.f32 %v11674_v46, %v11673_v0  ;;  %v11637_v58 = vrot.slane %v11636_v6, 1  ;;  %v11630_v5 = vrot.slane %v11629_v43, 1  ;;  %v11644_v59 = vrot.slane %v11643_v7, 1  ;;  %v11927_v45 = vld [vmem:[#allocation12 + $0x60] sm:$0xff]  ;;  %v11929_v46 = vld [vmem:[#allocation12 + $0x70] sm:$0xff] }
 0xa27   :  { %v11668_v2 = vadd.f32 %v11667_v16, %v11666_v61  ;;  %v11662_v3 = vrot.slane %v11661_v48, 1  ;;  %v11650_v60 = vadd.f32 %v11649_v22, %v11648_v11  ;;  %v11680_v54 = vadd.f32 %v11679_v52, %v11678_v47  ;;  %v16323_v47 = vld [vmem:[#allocation6 + $0x4] ss:$8 sps:$4 sm:$0xff]  }
 0xa28   :  { %v11638_v19 = vadd.f32 %v11637_v58, %v11636_v6  ;;  %v11676_v15 = vrot.slane %v11675_v10, 1  ;;  %v11631_v62 = vadd.f32 %v11630_v5, %v11629_v43  ;;  %v11645_v26 = vadd.f32 %v11644_v59, %v11643_v7  ;;  %v11925_v43 = vld [vmem:[#allocation12 + $0x50] sm:$0xff] }
 0xa29   :  { %v11669_v8 = vrot.slane %v11668_v2, 1  ;;  %v11681_v13 = vrot.slane %v11680_v54, 2  ;;  %v11663_v29 = vadd.f32 %v11662_v3, %v11661_v48  ;;  %v11651_v25 = vrot.slane %v11650_v60, 1  ;;  %v16326_v59 = vld [vmem:[#allocation6 + $0x14] ss:$8 sps:$4 sm:$0xff]  }
 0xa2a   :  { %v11677_v33 = vadd.f32 %v11676_v15, %v11675_v10  ;;  %v15635_v35 = vpack.c.bf16 %v11920_v42, %v11916_v32  ;;  %v15643_v14 = vpack.c.bf16 %v11922_v63, %v11918_v34  ;;  %v15637_v1 = vpack.c.bf16 %v11919_v38, %v11915_v44  ;;  %v16336_v32 = vld [vmem:[#allocation6 + $0x50] ss:$8 sps:$4 sm:$0xff]   ;;  %v16341_v42 = vld [vmem:[#allocation6 + $0x64] ss:$8 sps:$4 sm:$0xff]   ;;  %v16339_v34 = vld [vmem:[#allocation6 + $0x60] ss:$8 sps:$4 sm:$0xff]  }
 0xa2b   :  { %v11670_v55 = vadd.f32 %v11669_v8, %v11668_v2  ;;  %v11682_v23 = vadd.f32 %v11681_v13, %v11680_v54  ;;  %v11685_v53 = vsel %vm8906_vm1, %v11631_v62, %v11663_v29  ;;  %v11652_v36 = vadd.f32 %v11651_v25, %v11650_v60  ;;  %v11901_v13 = vld [vmem:[#allocation18] sm:$0x1]  ;;  %v16342_v63 = vld [vmem:[#allocation6 + $0x70] ss:$8 sps:$4 sm:$0xff]   ;;  %v16347_v44 = vld [vmem:[#allocation6 + $0x84] ss:$8 sps:$4 sm:$0xff]  }
 0xa2c   :  { %v11687_v12 = vsel %vm8906_vm1, %v11645_v26, %v11677_v33  ;;  %15636 = vmatprep.subr.bf16.mxu0 %v15635_v35  ;;  %v15645_v57 = vpack.c.bf16 %v11921_v28, %v11917_v40  ;;  %15644 = vmatprep.subr.bf16.mxu1 %v15643_v14  ;;  %v15639_v0 = vpack.c.bf16 %v11928_v56, %v11924_v37  ;;  %v16321_v62 = vld [vmem:[#allocation6] ss:$8 sps:$4 sm:$0xff]   ;;  %v16335_v26 = vld [vmem:[#allocation6 + $0x44] ss:$8 sps:$4 sm:$0xff]   ;;  %v16344_v35 = vld [vmem:[#allocation6 + $0x74] ss:$8 sps:$4 sm:$0xff]  }
 0xa2d   :  { %v11686_v51 = vsel %vm8906_vm1, %v11638_v19, %v11670_v55  ;;  %v11683_v21 = vrot.slane %v11682_v23, 1  ;;  %v15647_v61 = vpack.c.bf16 %v11930_v9, %v11926_v41  ;;  %v15641_v11 = vpack.c.bf16 %v11927_v45, %v11923_v50  ;;  %v11908_v55 = vld [vmem:[#allocation18 + $0x1] sm:$0x1]  ;;  %v16350_v14 = vld [vmem:[#allocation6 + $0x94] ss:$8 sps:$4 sm:$0xff]  }
 0xa2e   :  { %11817 = vmatprep.mubr.f32.mxu0 %v11686_v51  ;;  %v15649_v6 = vpack.c.bf16 %v11929_v46, %v11925_v43  ;;  %v16327_v33 = vld [vmem:[#allocation6 + $0x20] ss:$8 sps:$4 sm:$0xff]   ;;  %v16353_v40 = vld [vmem:[#allocation6 + $0xa4] ss:$8 sps:$4 sm:$0xff]   ;;  %v16354_v37 = vld [vmem:[#allocation6 + $0xb0] ss:$8 sps:$4 sm:$0xff]  }
 0xa2f   :  { %11818 = vmatmul.mubr.f32.vlgmr.msra.gmra.mrb[14].mxu0 %v11685_v53  ;;  %v11684_v30 = vadd.f32 %v11683_v21, %v11682_v23  ;;  %v16324_v21 = vld [vmem:[#allocation6 + $0x10] ss:$8 sps:$4 sm:$0xff]   ;;  %v16329_v53 = vld [vmem:[#allocation6 + $0x24] ss:$8 sps:$4 sm:$0xff]   ;;  %v16345_v38 = vld [vmem:[#allocation6 + $0x80] ss:$8 sps:$4 sm:$0xff]  }
 0xa30   :  { %11999 = vmatprep.mubr.f32.mxu0 %v16851_v27  ;;  %15638 = vmatpush1.bf16.msra.mxu0 %v15637_v1  ;;  %v16348_v1 = vld [vmem:[#allocation6 + $0x90] ss:$8 sps:$4 sm:$0xff]   ;;  %v16351_v28 = vld [vmem:[#allocation6 + $0xa0] ss:$8 sps:$4 sm:$0xff]   ;;  %v16359_v56 = vld [vmem:[#allocation6 + $0xc4] ss:$8 sps:$4 sm:$0xff]  }
 0xa31   :  { %v11688_v31 = vsel %vm8906_vm1, %v11652_v36, %v11684_v30  ;;  %15640 = vmatprep.subr.bf16.mxu0 %v15639_v0  ;;  %v16332_v36 = vld [vmem:[#allocation6 + $0x34] ss:$8 sps:$4 sm:$0xff]   ;;  %v16330_v30 = vld [vmem:[#allocation6 + $0x30] ss:$8 sps:$4 sm:$0xff]   ;;  %v16357_v41 = vld [vmem:[#allocation6 + $0xc0] ss:$8 sps:$4 sm:$0xff]  }
 0xa32   :  { %11887 = vmatprep.mubr.f32.mxu1 %v11688_v31  ;;  %v16333_v31 = vld [vmem:[#allocation6 + $0x40] ss:$8 sps:$4 sm:$0xff]   ;;  %v16362_v0 = vld [vmem:[#allocation6 + $0xd4] ss:$8 sps:$4 sm:$0xff]   ;;  %v16360_v9 = vld [vmem:[#allocation6 + $0xd0] ss:$8 sps:$4 sm:$0xff]  }
 0xa33   :  { %11888 = vmatmul.mubr.f32.vlgmr.msra.gmra.mrb[18].mxu1 %v11687_v12  ;;  %v16338_v12 = vld [vmem:[#allocation6 + $0x54] ss:$8 sps:$4 sm:$0xff]   ;;  %v16365_v50 = vld [vmem:[#allocation6 + $0xe4] ss:$8 sps:$4 sm:$0xff]   ;;  %v16363_v45 = vld [vmem:[#allocation6 + $0xe0] ss:$8 sps:$4 sm:$0xff]  }
 0xa34   :  { %12070 = vmatprep.mubr.f32.mxu1 %v16851_v27  ;;  %15646 = vmatpush1.bf16.msra.mxu1 %v15645_v57  ;;  %v16356_v57 = vld [vmem:[#allocation6 + $0xb4] ss:$8 sps:$4 sm:$0xff]   ;;  %v16371_v43 = vld [vmem:[#allocation6 + $0x104] ss:$8 sps:$4 sm:$0xff]  }
 0xa35   :  { %15648 = vmatprep.subr.bf16.mxu1 %v15647_v61  ;;  %15642 = vmatpush1.bf16.msra.mxu0 %v15641_v11  ;;  %v16368_v61 = vld [vmem:[#allocation6 + $0xf4] ss:$8 sps:$4 sm:$0xff]   ;;  %v16366_v11 = vld [vmem:[#allocation6 + $0xf0] ss:$8 sps:$4 sm:$0xff]   ;;  %v12647_v46 = vld [vmem:[%s18369_s7 + $0x80] sm:$0xff] }
 0xa36   :  { %12517 = vmatprep.subr.bf16.mxu0 %v16323_v47  ;;  %v12631_v47 = vld [vmem:[%s18369_s7] sm:$0xff] }
 0xa38   :  { %15650 = vmatpush1.bf16.msra.mxu1 %v15649_v6  ;;  %v12648_v6 = vld [vmem:[%s18369_s7 + $0x88] sm:$0xff] }
 0xb02   :  { %v15188_v48 = vpop.f32.mrb[14].mxu0 }
 0xb03   :  { %v15189_v49 = vpop.f32.mrb[15].mxu0 }
 0xb04   :  { %v15190_v16 = vadd.f32 %v15189_v49, %v15188_v48  ;;  %v15651_v48 = vpack.c.bf16 %v12648_v6, %v12647_v46  ;;  %v12632_v49 = vld [vmem:[%s18369_s7 + $0x8] sm:$0xff] }
 0xb05   :  { %v16389_v46 = vld [vmem:[#allocation6 + $0x164] ss:$8 sps:$4 sm:$0xff]   ;;  %v16387_v6 = vld [vmem:[#allocation6 + $0x160] ss:$8 sps:$4 sm:$0xff]  }
 0xb06   :  { %v15223_v22 = vpop.f32.mrb[18].mxu1  ;;  %15652 = vmatprep.subr.bf16.mxu1 %v15651_v48  ;;  %v16390_v48 = vld [vmem:[#allocation6 + $0x170] ss:$8 sps:$4 sm:$0xff]  }
 0xb07   :  { %v15224_v52 = vpop.f32.mrb[19].mxu1 }
 0xb08   :  { %v15225_v10 = vadd.f32 %v15224_v52, %v15223_v22  ;;  %v12650_v22 = vld [vmem:[%s18369_s7 + $0x98] sm:$0xff]  ;;  %v15653_v52 = vpack.c.bf16 %v12632_v49, %v12631_v47  ;;  %v16395_v49 = vld [vmem:[#allocation6 + $0x184] ss:$8 sps:$4 sm:$0xff]  }
 0xb09   :  { %v16392_v47 = vld [vmem:[#allocation6 + $0x174] ss:$8 sps:$4 sm:$0xff]  }
 0xb0a   :  { %v11890_v58 = vadd.f32 %v15225_v10, %v15190_v16  ;;  %v12649_v16 = vld [vmem:[%s18369_s7 + $0x90] sm:$0xff] }
 0xb0b   :  { %v15655_v10 = vpack.c.bf16 %v12650_v22, %v12649_v16  ;;  %v16393_v16 = vld [vmem:[#allocation6 + $0x180] ss:$8 sps:$4 sm:$0xff]   ;;  %v16398_v22 = vld [vmem:[#allocation6 + $0x194] ss:$8 sps:$4 sm:$0xff]  }
 0xb0c   :  { %v11894_v2 = vmul.f32 0.03125, %v11890_v58  ;;  %v12633_v58 = vld [vmem:[%s18369_s7 + $0x10] sm:$0xff] }
 0xb0e   :  { %v11895_v3 = vmul.f32 %v11894_v2, %v11894_v2 }
 0xb10   :  { %v11897_v5 = vrot.slane %v11895_v3, 7  ;;  %v12651_v3 = vld [vmem:[%s18369_s7 + $0xa0] sm:$0xff] }
 0xb12   :  { %v11899_v60 = vsub.f32 %v11894_v2, %v11897_v5  ;;  %v12652_v5 = vld [vmem:[%s18369_s7 + $0xa8] sm:$0xff] }
 0xb14   :  { %v11900_v54 = vmax.f32 %v11899_v60, 0.0 }
 0xb16   :  { %v11902_v7 = vadd.f32 1e-05, %v11900_v54  ;;  %v15659_v54 = vpack.c.bf16 %v12652_v5, %v12651_v3  ;;  %v16402_v3 = vld [vmem:[#allocation6 + $0x1b0] ss:$8 sps:$4 sm:$0xff]   ;;  %v16407_v5 = vld [vmem:[#allocation6 + $0x1c4] ss:$8 sps:$4 sm:$0xff]  }
 0xb18   :  { %16445 = vrsqrt.f32 %v11902_v7  ;;  %v12635_v7 = vld [vmem:[%s18369_s7 + $0x20] sm:$0xff] }
 0xb22   :  { %v16446_v8 = vpop.eup %16445 }
 0xb23   :  { %v11905_v29 = vrot.slane %v16446_v8, 1  ;;  %v12636_v8 = vld [vmem:[%s18369_s7 + $0x28] sm:$0xff] }
 0xb25   :  { %v11907_v19 = vmul.f32 %v11905_v29, %v11901_v13  ;;  %v12653_v13 = vld [vmem:[%s18369_s7 + $0xb0] sm:$0xff]  ;;  %v12654_v29 = vld [vmem:[%s18369_s7 + $0xb8] sm:$0xff] }
 0xb27   :  { %v11909_v15 = vmul.f32 %v11907_v19, %v11894_v2  ;;  %v12634_v2 = vld [vmem:[%s18369_s7 + $0x18] sm:$0xff] }
 0xb28   :  { %v15657_v60 = vpack.c.bf16 %v12634_v2, %v12633_v58  ;;  %v16399_v58 = vld [vmem:[#allocation6 + $0x1a0] ss:$8 sps:$4 sm:$0xff]   ;;  %v16404_v2 = vld [vmem:[#allocation6 + $0x1b4] ss:$8 sps:$4 sm:$0xff]  }
 0xb29   :  { %v11910_v25 = vsub.f32 %v11908_v55, %v11909_v15  ;;  %v15663_v55 = vpack.c.bf16 %v12654_v29, %v12653_v13  ;;  %v16411_v13 = vld [vmem:[#allocation6 + $0x1e0] ss:$8 sps:$4 sm:$0xff]   ;;  %v16416_v29 = vld [vmem:[#allocation6 + $0x1f4] ss:$8 sps:$4 sm:$0xff]  }
 0xb2b   :  { %v11912_v23 = vrot.slane %v11910_v25, 7 }
 0xb2d   :  { %v11914_v51 = vsel %vm8906_vm1, %v11907_v19, %v11912_v23  ;;  %v15661_v19 = vpack.c.bf16 %v12636_v8, %v12635_v7  ;;  %v16408_v7 = vld [vmem:[#allocation6 + $0x1d0] ss:$8 sps:$4 sm:$0xff]   ;;  %v16413_v8 = vld [vmem:[#allocation6 + $0x1e4] ss:$8 sps:$4 sm:$0xff]  }
 0xb2e   :  { %14921 = vmatmul.mubr.msk.f32.vlgmr.msra.gmra.mrb[20].mxu0 %vm11931_vm11, %v11914_v51  ;;  %14922 = vmatmul.mubr.msk.f32.vlgmr.msra.gmra.mrb[24].mxu1 %vm11931_vm11, %v11914_v51 }
 0xb2f   :  { %12518 = vmatpush1.bf16.msra.mxu0 %v16321_v62  ;;  %15654 = vmatpush3.bf16.msra.mxu1 %v15653_v52  ;;  %v16396_v52 = vld [vmem:[#allocation6 + $0x190] ss:$8 sps:$4 sm:$0xff]  }
 0xb30   :  { %12519 = vmatprep.subr.bf16.mxu0 %v16326_v59  ;;  %15656 = vmatprep.subr.bf16.mxu1 %v15655_v10  ;;  %v16401_v10 = vld [vmem:[#allocation6 + $0x1a4] ss:$8 sps:$4 sm:$0xff]  }
 0xb33   :  { %12520 = vmatpush1.bf16.msra.mxu0 %v16324_v21  ;;  %15658 = vmatpush3.bf16.msra.mxu1 %v15657_v60  ;;  %v16405_v60 = vld [vmem:[#allocation6 + $0x1c0] ss:$8 sps:$4 sm:$0xff]  }
 0xb34   :  { %12521 = vmatprep.subr.bf16.mxu0 %v16329_v53  ;;  %15660 = vmatprep.subr.bf16.mxu1 %v15659_v54  ;;  %v16410_v54 = vld [vmem:[#allocation6 + $0x1d4] ss:$8 sps:$4 sm:$0xff]  }
 0xb37   :  { %12522 = vmatpush1.bf16.msra.mxu0 %v16327_v33  ;;  %15662 = vmatpush3.bf16.msra.mxu1 %v15661_v19 }
 0xb38   :  { %12523 = vmatprep.subr.bf16.mxu0 %v16332_v36  ;;  %15664 = vmatprep.subr.bf16.mxu1 %v15663_v55  ;;  %v16414_v55 = vld [vmem:[#allocation6 + $0x1f0] ss:$8 sps:$4 sm:$0xff]  }
 0xb3b   :  { %12524 = vmatpush1.bf16.msra.mxu0 %v16330_v30 }
 0xb3c   :  { %12525 = vmatprep.subr.bf16.mxu0 %v16335_v26 }
 0xb3f   :  { %12526 = vmatpush1.bf16.msra.mxu0 %v16333_v31 }
 0xb40   :  { %12527 = vmatprep.subr.bf16.mxu0 %v16338_v12 }
 0xb43   :  { %12528 = vmatpush1.bf16.msra.mxu0 %v16336_v32 }
 0xb44   :  { %12529 = vmatprep.subr.bf16.mxu0 %v16341_v42 }
 0xb47   :  { %12530 = vmatpush1.bf16.msra.mxu0 %v16339_v34 }
 0xb48   :  { %12531 = vmatprep.subr.bf16.mxu0 %v16344_v35 }
 0xb4b   :  { %12532 = vmatpush1.bf16.msra.mxu0 %v16342_v63 }
 0xb4c   :  { %12533 = vmatprep.subr.bf16.mxu0 %v16347_v44 }
 0xb4f   :  { %12534 = vmatpush1.bf16.msra.mxu0 %v16345_v38 }
 0xb50   :  { %12535 = vmatprep.subr.bf16.mxu0 %v16350_v14 }
 0xb53   :  { %12536 = vmatpush1.bf16.msra.mxu0 %v16348_v1 }
 0xb54   :  { %12537 = vmatprep.subr.bf16.mxu0 %v16353_v40 }
 0xb57   :  { %12538 = vmatpush1.bf16.msra.mxu0 %v16351_v28  ;;  %v16369_v28 = vld [vmem:[#allocation6 + $0x100] ss:$8 sps:$4 sm:$0xff]  }
 0xb58   :  { %12539 = vmatprep.subr.bf16.mxu0 %v16356_v57 }
 0xb5b   :  { %12540 = vmatpush1.bf16.msra.mxu0 %v16354_v37 }
 0xb5c   :  { %12541 = vmatprep.subr.bf16.mxu0 %v16359_v56  ;;  %v16372_v56 = vld [vmem:[#allocation6 + $0x110] ss:$8 sps:$4 sm:$0xff]  }
 0xb5f   :  { %12542 = vmatpush1.bf16.msra.mxu0 %v16357_v41  ;;  %v16377_v41 = vld [vmem:[#allocation6 + $0x124] ss:$8 sps:$4 sm:$0xff]  }
 0xb60   :  { %12543 = vmatprep.subr.bf16.mxu0 %v16362_v0  ;;  %v16375_v0 = vld [vmem:[#allocation6 + $0x120] ss:$8 sps:$4 sm:$0xff]  }
 0xb63   :  { %12544 = vmatpush1.bf16.msra.mxu0 %v16360_v9  ;;  %v16380_v9 = vld [vmem:[#allocation6 + $0x134] ss:$8 sps:$4 sm:$0xff]  }
 0xb64   :  { %12545 = vmatprep.subr.bf16.mxu0 %v16365_v50  ;;  %v16378_v50 = vld [vmem:[#allocation6 + $0x130] ss:$8 sps:$4 sm:$0xff]  }
 0xb67   :  { %12546 = vmatpush1.bf16.msra.mxu0 %v16363_v45  ;;  %v16383_v45 = vld [vmem:[#allocation6 + $0x144] ss:$8 sps:$4 sm:$0xff]  }
 0xb68   :  { %12547 = vmatprep.subr.bf16.mxu0 %v16368_v61  ;;  %v16381_v61 = vld [vmem:[#allocation6 + $0x140] ss:$8 sps:$4 sm:$0xff]  }
 0xb6b   :  { %12548 = vmatpush1.bf16.msra.mxu0 %v16366_v11  ;;  %v16386_v11 = vld [vmem:[#allocation6 + $0x154] ss:$8 sps:$4 sm:$0xff]  }
 0xb6c   :  { %12558 = vmatprep.subr.bf16.mxu0 %v16371_v43  ;;  %v16384_v43 = vld [vmem:[#allocation6 + $0x150] ss:$8 sps:$4 sm:$0xff]  }
 0xc01   :  { %v12001_v15 = vpop.f32.mrb[20].mxu0  ;;  %v12072_v25 = vpop.f32.mrb[24].mxu1 }
 0xc02   :  { %v12080_v23 = vrot.slane %v12001_v15, %v17858_v39  ;;  %v12088_v62 = vrot.slane %v12072_v25, %v17858_v39  ;;  %v12003_v59 = vpop.f32.mrb[21].mxu0  ;;  %v12074_v51 = vpop.f32.mrb[25].mxu1  ;;  %v12100_v36 = vrot.slane %v12001_v15, %v17861_v24  ;;  %v12108_v26 = vrot.slane %v12072_v25, %v17861_v24 }
 0xc03   :  { %v12084_v21 = vrot.slane %v12003_v59, %v17858_v39  ;;  %v12092_v53 = vrot.slane %v12074_v51, %v17858_v39  ;;  %v12104_v12 = vrot.slane %v12003_v59, %v17861_v24  ;;  %v12112_v42 = vrot.slane %v12074_v51, %v17861_v24  ;;  %v12655_v51 = vld [vmem:[%s18369_s7 + $0xc0] sm:$0xff] }
 0xc04   :  { %v12093_v33 = vmul.f32 %v12080_v23, %v18104_v17  ;;  %v12095_v30 = vmul.f32 %v12088_v62, %v18110_v18  ;;  %v12637_v23 = vld [vmem:[%s18369_s7 + $0x30] sm:$0xff]  ;;  %v12638_v62 = vld [vmem:[%s18369_s7 + $0x38] sm:$0xff] }
 0xc05   :  { %v12094_v31 = vmul.f32 %v12084_v21, %v18112_v20  ;;  %v12096_v32 = vmul.f32 %v12092_v53, %v18120_v4  ;;  %v16374_v4 = vld [vmem:[#allocation6 + $0x114] ss:$8 sps:$4 sm:$0xff]   ;;  %v15665_v59 = vpack.c.bf16 %v12638_v62, %v12637_v23  ;;  %v12656_v21 = vld [vmem:[%s18369_s7 + $0xc8] sm:$0xff] }
 0xc06   :  { %v12113_v34 = vadd.f32 %v12100_v36, %v12093_v33  ;;  %v18195_v35 = vadd.f32 %v12108_v26, %v12095_v30  ;;  %v15667_v53 = vpack.c.bf16 %v12656_v21, %v12655_v51  ;;  %v12639_v33 = vld [vmem:[%s18369_s7 + $0x40] sm:$0xff]  ;;  %v12640_v36 = vld [vmem:[%s18369_s7 + $0x48] sm:$0xff]  ;;  %v12657_v26 = vld [vmem:[%s18369_s7 + $0xd0] sm:$0xff] }
 0xc07   :  { %v12114_v63 = vadd.f32 %v12104_v12, %v12094_v31  ;;  %v12116_v44 = vadd.f32 %v12112_v42, %v12096_v32  ;;  %15666 = vmatpush3.bf16.msra.mxu1 %v15665_v59  ;;  %v15669_v30 = vpack.c.bf16 %v12640_v36, %v12639_v33  ;;  %v12658_v31 = vld [vmem:[%s18369_s7 + $0xd8] sm:$0xff]  ;;  %v12641_v32 = vld [vmem:[%s18369_s7 + $0x50] sm:$0xff]  ;;  %v12756_v59 = vld [vmem:[#allocation13 + $0x8] sm:$0xff] }
 0xc08   :  { %vm12117_vm12 = vcmp.ge.f32.partialorder %v12113_v34, 0.0  ;;  %v12121_v17 = vmul.f32 0.03, %v12113_v34  ;;  %v12123_v19 = vmul.f32 0.03, %v18195_v35  ;;  %vm12119_vm15 = vcmp.ge.f32.partialorder %v18195_v35, 0.0  ;;  %15668 = vmatprep.subr.bf16.mxu1 %v15667_v53 }
 0xc09   :  { %v12122_v38 = vmul.f32 0.03, %v12114_v63  ;;  %v12124_v14 = vmul.f32 0.03, %v12116_v44  ;;  %vm12118_vm13 = vcmp.ge.f32.partialorder %v12114_v63, 0.0  ;;  %vm12120_vm14 = vcmp.ge.f32.partialorder %v12116_v44, 0.0 }
 0xc0a   :  { %v12125_v18 = vsel %vm12117_vm12, %v12113_v34, %v12121_v17  ;;  %v12127_v15 = vsel %vm12119_vm15, %v18195_v35, %v12123_v19  ;;  %v15671_v12 = vpack.c.bf16 %v12658_v31, %v12657_v26  ;;  %v12642_v42 = vld [vmem:[%s18369_s7 + $0x58] sm:$0xff]  ;;  %v12659_v35 = vld [vmem:[%s18369_s7 + $0xe0] sm:$0xff]  ;;  %v12757_v33 = vld [vmem:[#allocation13 + $0x10] sm:$0xff] }
 0xc0b   :  { %v12126_v1 = vsel %vm12118_vm13, %v12114_v63, %v12122_v38  ;;  %v12128_v20 = vsel %vm12120_vm14, %v12116_v44, %v12124_v14  ;;  %v12129_v57 = vpack.c.bf16 %v12125_v18, %v12125_v18  ;;  %v12131_v25 = vpack.c.bf16 %v12127_v15, %v12127_v15  ;;  %15670 = vmatpush3.bf16.msra.mxu1 %v15669_v30  ;;  %v12660_v63 = vld [vmem:[%s18369_s7 + $0xe8] sm:$0xff]  ;;  %v12643_v17 = vld [vmem:[%s18369_s7 + $0x60] sm:$0xff]  ;;  %v12661_v18 = vld [vmem:[%s18369_s7 + $0xf0] sm:$0xff] }
 0xc0c   :  { %v12130_v40 = vpack.c.bf16 %v12126_v1, %v12126_v1  ;;  %v12132_v37 = vpack.c.bf16 %v12128_v20, %v12128_v20  ;;  %v15673_v34 = vpack.c.bf16 %v12642_v42, %v12641_v32  ;;  %15672 = vmatprep.subr.bf16.mxu1 %v15671_v12  ;;  %v15675_v44 = vpack.c.bf16 %v12660_v63, %v12659_v35  ;;  %v12644_v38 = vld [vmem:[%s18369_s7 + $0x68] sm:$0xff]  ;;  %v12662_v1 = vld [vmem:[%s18369_s7 + $0xf8] sm:$0xff]  ;;  %v12645_v20 = vld [vmem:[%s18369_s7 + $0x70] sm:$0xff] }
 0xc0d   :  { %v15677_v14 = vpack.c.bf16 %v12644_v38, %v12643_v17  ;;  %v12758_v51 = vld [vmem:[#allocation13 + $0x18] sm:$0xff]  ;;  %v12755_v53 = vld [vmem:[#allocation13] sm:$0xff]  ;;  %v12760_v30 = vld [vmem:[#allocation13 + $0x28] sm:$0xff] }
 0xc0e   :  { %12549 = vmatprep.mubr.bf16.mxu0 %v12130_v40  ;;  %v15679_v40 = vpack.c.bf16 %v12662_v1, %v12661_v18  ;;  %v15683_v21 = vpack.c.bf16 %v12758_v51, %v12756_v59  ;;  %v15685_v36 = vpack.c.bf16 %v12757_v33, %v12755_v53  ;;  %v12762_v26 = vld [vmem:[#allocation13 + $0x38] sm:$0xff]  ;;  %v12759_v12 = vld [vmem:[#allocation13 + $0x20] sm:$0xff]  ;;  %v12761_v32 = vld [vmem:[#allocation13 + $0x30] sm:$0xff] }
 0xc0f   :  { %12550 = vmatmul.mubr.bf16.vlgmr.msra.gmra.mrb[24].mxu0 %v12129_v57  ;;  %15674 = vmatpush3.bf16.msra.mxu1 %v15673_v34  ;;  %v15687_v31 = vpack.c.bf16 %v12762_v26, %v12760_v30  ;;  %v15689_v42 = vpack.c.bf16 %v12761_v32, %v12759_v12  ;;  %v12764_v34 = vld [vmem:[#allocation13 + $0x48] sm:$0xff]  ;;  %v12766_v35 = vld [vmem:[#allocation13 + $0x58] sm:$0xff]  ;;  %v12765_v17 = vld [vmem:[#allocation13 + $0x50] sm:$0xff] }
 0xc10   :  { %12559 = vmatpush1.bf16.msra.mxu0 %v16369_v28  ;;  %12590 = vmatprep.mubr.bf16.mxu0 %v12132_v37  ;;  %v12646_v28 = vld [vmem:[%s18369_s7 + $0x78] sm:$0xff]  ;;  %v15691_v63 = vpack.c.bf16 %v12766_v35, %v12764_v34  ;;  %v13058_v34 = vld [vmem:[#allocation9] sm:$0xff]  ;;  %v13059_v35 = vld [vmem:[#allocation9 + $0x8] sm:$0xff] }
 0xc11   :  { %12560 = vmatprep.subr.bf16.mxu0 %v16374_v4  ;;  %15676 = vmatprep.subr.bf16.mxu1 %v15675_v44  ;;  %v15681_v57 = vpack.c.bf16 %v12646_v28, %v12645_v20  ;;  %v12763_v44 = vld [vmem:[#allocation13 + $0x40] sm:$0xff]  ;;  %v12770_v18 = vld [vmem:[#allocation13 + $0x78] sm:$0xff] }
 0xc12   :  { %v15693_v38 = vpack.c.bf16 %v12765_v17, %v12763_v44  ;;  %v12767_v20 = vld [vmem:[#allocation13 + $0x60] sm:$0xff] }
 0xc13   :  { %15678 = vmatpush3.bf16.msra.mxu1 %v15677_v14  ;;  %v12768_v14 = vld [vmem:[#allocation13 + $0x68] sm:$0xff] }
 0xc14   :  { %12561 = vmatpush1.bf16.msra.mxu0 %v16372_v56  ;;  %15680 = vmatprep.subr.bf16.mxu1 %v15679_v40  ;;  %v15695_v1 = vpack.c.bf16 %v12770_v18, %v12768_v14  ;;  %v12769_v40 = vld [vmem:[#allocation13 + $0x70] sm:$0xff]  ;;  %v13061_v18 = vld [vmem:[#allocation9 + $0x18] sm:$0xff] }
 0xc15   :  { %12562 = vmatprep.subr.bf16.mxu0 %v16377_v41  ;;  %v15697_v28 = vpack.c.bf16 %v12769_v40, %v12767_v20  ;;  %v13063_v20 = vld [vmem:[#allocation9 + $0x28] sm:$0xff] }
 0xc17   :  { %15682 = vmatpush3.bf16.msra.mxu1 %v15681_v57  ;;  %v16417_v57 = vld [vmem:[#allocation7 + $0x40] sm:$0xff]  }
 0xc18   :  { %12563 = vmatpush1.bf16.msra.mxu0 %v16375_v0  ;;  %15684 = vmatprep.subr.bf16.mxu1 %v15683_v21 }
 0xc19   :  { %12564 = vmatprep.subr.bf16.mxu0 %v16380_v9 }
 0xc1c   :  { %12565 = vmatpush1.bf16.msra.mxu0 %v16378_v50 }
 0xc1d   :  { %12566 = vmatprep.subr.bf16.mxu0 %v16383_v45 }
 0xc20   :  { %12567 = vmatpush1.bf16.msra.mxu0 %v16381_v61 }
 0xc21   :  { %12568 = vmatprep.subr.bf16.mxu0 %v16386_v11 }
 0xc24   :  { %12569 = vmatpush1.bf16.msra.mxu0 %v16384_v43 }
 0xc25   :  { %12570 = vmatprep.subr.bf16.mxu0 %v16389_v46 }
 0xc28   :  { %12571 = vmatpush1.bf16.msra.mxu0 %v16387_v6 }
 0xc29   :  { %12572 = vmatprep.subr.bf16.mxu0 %v16392_v47 }
 0xc2c   :  { %12573 = vmatpush1.bf16.msra.mxu0 %v16390_v48 }
 0xc2d   :  { %12574 = vmatprep.subr.bf16.mxu0 %v16395_v49 }
 0xc30   :  { %12575 = vmatpush1.bf16.msra.mxu0 %v16393_v16 }
 0xc31   :  { %12576 = vmatprep.subr.bf16.mxu0 %v16398_v22 }
 0xc34   :  { %12577 = vmatpush1.bf16.msra.mxu0 %v16396_v52 }
 0xc35   :  { %12578 = vmatprep.subr.bf16.mxu0 %v16401_v10 }
 0xc38   :  { %12579 = vmatpush1.bf16.msra.mxu0 %v16399_v58 }
 0xc39   :  { %12580 = vmatprep.subr.bf16.mxu0 %v16404_v2 }
 0xc3c   :  { %12581 = vmatpush1.bf16.msra.mxu0 %v16402_v3 }
 0xc3d   :  { %12582 = vmatprep.subr.bf16.mxu0 %v16407_v5 }
 0xc40   :  { %12583 = vmatpush1.bf16.msra.mxu0 %v16405_v60 }
 0xc41   :  { %12584 = vmatprep.subr.bf16.mxu0 %v16410_v54 }
 0xc44   :  { %12585 = vmatpush1.bf16.msra.mxu0 %v16408_v7 }
 0xc45   :  { %12586 = vmatprep.subr.bf16.mxu0 %v16413_v8 }
 0xc48   :  { %12587 = vmatpush1.bf16.msra.mxu0 %v16411_v13 }
 0xc49   :  { %12588 = vmatprep.subr.bf16.mxu0 %v16416_v29 }
 0xc4c   :  { %12589 = vmatpush1.bf16.msra.mxu0 %v16414_v55 }
 0xc4d   :  { %15399 = vmatprep.subr.bf16.mxu0 %v16851_v27 }
 0xc4f   :  { %12591 = vmatmul.mubr.bf16.vlgmr.msra.gmra.mrb[24].mxu0 %v12131_v25 }
 0xc50   :  { %15415 = vmatprep.mubr.msk.bf16.mxu0 %vm16853_vm6, %v16851_v27 }
 0xd22   :  { %v18255_v4 = vpop.f32.mrb[24].mxu0 }
 0xd23   :  { %v12599_v37 = vsel %vm8785_vm0, %v18255_v4, 0.0  ;;  %v12613_v56 = vmul.f32 %v18255_v4, %v18255_v4  ;;  %v18261_v41 = vpop.f32.mrb[25].mxu0 }
 0xd24   :  { %v12600_v0 = vrot.slane %v12599_v37, 4  ;;  %v12606_v9 = vsel %vm8785_vm0, %v18261_v41, 0.0  ;;  %v12614_v50 = vmul.f32 %v18261_v41, %v18261_v41  ;;  %v12596_v45 = vpop.f32.mrb[26].mxu0 }
 0xd25   :  { %v12615_v61 = vsel %vm8785_vm0, %v12613_v56, 0.0  ;;  %v12607_v11 = vrot.slane %v12606_v9, 4  ;;  %v12597_v43 = vpop.f32.mrb[27].mxu0 }
 0xd26   :  { %v12601_v46 = vadd.f32 %v12600_v0, %v12599_v37  ;;  %v12616_v6 = vrot.slane %v12615_v61, 4  ;;  %v12622_v47 = vsel %vm8785_vm0, %v12614_v50, 0.0 }
 0xd27   :  { %v12608_v48 = vadd.f32 %v12607_v11, %v12606_v9  ;;  %v12623_v49 = vrot.slane %v12622_v47, 4 }
 0xd28   :  { %v12602_v16 = vrot.slane %v12601_v46, 2  ;;  %v12617_v22 = vadd.f32 %v12616_v6, %v12615_v61  ;;  %v12741_v6 = vld [vmem:[#allocation19] sm:$0x1] }
 0xd29   :  { %v12609_v52 = vrot.slane %v12608_v48, 2  ;;  %v12624_v10 = vadd.f32 %v12623_v49, %v12622_v47  ;;  %v12748_v49 = vld [vmem:[#allocation19 + $0x1] sm:$0x1] }
 0xd2a   :  { %v12603_v58 = vadd.f32 %v12602_v16, %v12601_v46  ;;  %v12618_v2 = vrot.slane %v12617_v22, 2 }
 0xd2b   :  { %v12610_v3 = vadd.f32 %v12609_v52, %v12608_v48  ;;  %v12625_v5 = vrot.slane %v12624_v10, 2 }
 0xd2c   :  { %v12619_v60 = vadd.f32 %v12618_v2, %v12617_v22  ;;  %v12604_v8 = vrot.slane %v12603_v58, 1 }
 0xd2d   :  { %v12611_v54 = vrot.slane %v12610_v3, 1  ;;  %v12626_v7 = vadd.f32 %v12625_v5, %v12624_v10  ;;  %v16418_v10 = vld [vmem:[#allocation7] sm:$0xff]   ;;  %v16421_v5 = vld [vmem:[#allocation7 + $0x50] sm:$0xff]  }
 0xd2e   :  { %v12620_v13 = vrot.slane %v12619_v60, 1  ;;  %v12605_v25 = vadd.f32 %v12604_v8, %v12603_v58  ;;  %v16419_v58 = vld [vmem:[#allocation7 + $0x48] sm:$0xff]   ;;  %v16425_v8 = vld [vmem:[#allocation7 + $0x60] sm:$0xff]  }
 0xd2f   :  { %v12627_v29 = vrot.slane %v12626_v7, 1  ;;  %v12612_v55 = vadd.f32 %v12611_v54, %v12610_v3  ;;  %v16420_v3 = vld [vmem:[#allocation7 + $0x8] sm:$0xff]   ;;  %v16423_v54 = vld [vmem:[#allocation7 + $0x58] sm:$0xff]  }
 0xd30   :  { %v12621_v19 = vadd.f32 %v12620_v13, %v12619_v60  ;;  %v16422_v60 = vld [vmem:[#allocation7 + $0x10] sm:$0xff]   ;;  %v16426_v13 = vld [vmem:[#allocation7 + $0x20] sm:$0xff]  }
 0xd31   :  { %v12628_v15 = vadd.f32 %v12627_v29, %v12626_v7  ;;  %v16424_v7 = vld [vmem:[#allocation7 + $0x18] sm:$0xff]   ;;  %v16427_v29 = vld [vmem:[#allocation7 + $0x68] sm:$0xff]  }
 0xd32   :  { %v12629_v62 = vsel %vm8906_vm1, %v12605_v25, %v12621_v19  ;;  %v16428_v19 = vld [vmem:[#allocation7 + $0x28] sm:$0xff]   ;;  %v16431_v25 = vld [vmem:[#allocation7 + $0x78] sm:$0xff]  }
 0xd33   :  { %v12630_v23 = vsel %vm8906_vm1, %v12612_v55, %v12628_v15  ;;  %v16429_v55 = vld [vmem:[#allocation7 + $0x70] sm:$0xff]  }
 0xd34   :  { %12727 = vmatprep.mubr.f32.mxu1 %v12630_v23  ;;  %v16430_v15 = vld [vmem:[#allocation7 + $0x30] sm:$0xff]   ;;  %v16432_v23 = vld [vmem:[#allocation7 + $0x38] sm:$0xff]  }
 0xd35   :  { %12728 = vmatmul.mubr.f32.vlgmr.msra.gmra.mrb[26].mxu1 %v12629_v62  ;;  %v16852_v62 = vmov 0.0|0.0  }
 0xd36   :  { %12839 = vmatprep.mubr.f32.mxu1 %v16851_v27  ;;  %15686 = vmatpush1.bf16.msra.mxu1 %v15685_v36 }
 0xd37   :  { %15688 = vmatprep.subr.bf16.mxu1 %v15687_v31 }
 0xd3a   :  { %15690 = vmatpush1.bf16.msra.mxu1 %v15689_v42 }
 0xd3b   :  { %15692 = vmatprep.subr.bf16.mxu1 %v15691_v63 }
 0xd3e   :  { %15694 = vmatpush1.bf16.msra.mxu1 %v15693_v38  ;;  %v15700_v38 = vpack.c.bf16 %v13059_v35, %v13058_v34  ;;  %v13174_v35 = vld [vmem:[#allocation15 + $0x40] sm:$0xff] }
 0xd3f   :  { %15696 = vmatprep.subr.bf16.mxu1 %v15695_v1  ;;  %v13062_v1 = vld [vmem:[#allocation9 + $0x20] sm:$0xff] }
 0xd40   :  { %v15706_v40 = vpack.c.bf16 %v13063_v20, %v13062_v1  ;;  %v13180_v1 = vld [vmem:[#allocation15 + $0x70] sm:$0xff]  ;;  %v13181_v20 = vld [vmem:[#allocation15 + $0x78] sm:$0xff] }
 0xd42   :  { %15698 = vmatpush1.bf16.msra.mxu1 %v15697_v28  ;;  %v13064_v28 = vld [vmem:[#allocation9 + $0x30] sm:$0xff] }
 0xd43   :  { %15261 = vmatprep.subr.bf16.mxu1 %v16417_v57  ;;  %v13065_v57 = vld [vmem:[#allocation9 + $0x38] sm:$0xff] }
 0xe08   :  { %v15258_v37 = vpop.f32.mrb[26].mxu1 }
 0xe09   :  { %v15259_v56 = vpop.f32.mrb[27].mxu1 }
 0xe0a   :  { %v15260_v0 = vadd.f32 %v15259_v56, %v15258_v37  ;;  %v15709_v37 = vpack.c.bf16 %v13065_v57, %v13064_v28  ;;  %v13066_v56 = vld [vmem:[#allocation9 + $0x40] sm:$0xff]  ;;  %v16434_v57 = vld [vmem:[%s18379_s17 + $0x8] sm:$0xff]  }
 0xe0b   :  { %v16433_v28 = vld [vmem:[%s18379_s17] sm:$0xff]  }
 0xe0c   :  { %v12734_v9 = vmul.f32 0.125, %v15260_v0  ;;  %v13067_v0 = vld [vmem:[#allocation9 + $0x48] sm:$0xff]  ;;  %15400 = vmatpush3.bf16.msra.mxu0 %v16433_v28 }
 0xe0d   :  { %15401 = vmatprep.subr.bf16.mxu0 %v16851_v27 }
 0xe0e   :  { %v12735_v50 = vmul.f32 %v12734_v9, %v12734_v9 }
 0xe10   :  { %v12737_v45 = vrot.slane %v12735_v50, 7  ;;  %v13068_v50 = vld [vmem:[#allocation9 + $0x50] sm:$0xff]  ;;  %15402 = vmatpush3.bf16.msra.mxu0 %v16434_v57  ;;  %v13395_v57 = vld [vmem:[#allocation22 + $0x1] sm:$0x1] }
 0xe11   :  { %15403 = vmatprep.subr.bf16.mxu0 %v16851_v27 }
 0xe12   :  { %v12739_v61 = vsub.f32 %v12734_v9, %v12737_v45  ;;  %v13069_v45 = vld [vmem:[#allocation9 + $0x58] sm:$0xff] }
 0xe14   :  { %v12740_v11 = vmax.f32 %v12739_v61, 0.0  ;;  %v15715_v61 = vpack.c.bf16 %v13069_v45, %v13068_v50 }
 0xe16   :  { %v12742_v43 = vadd.f32 1e-05, %v12740_v11  ;;  %v13070_v11 = vld [vmem:[#allocation9 + $0x60] sm:$0xff] }
 0xe18   :  { %16447 = vrsqrt.f32 %v12742_v43  ;;  %v13071_v43 = vld [vmem:[#allocation9 + $0x68] sm:$0xff] }
 0xe22   :  { %v16448_v46 = vpop.eup %16447 }
 0xe23   :  { %v12745_v47 = vrot.slane %v16448_v46, 1  ;;  %v15718_v46 = vpack.c.bf16 %v13071_v43, %v13070_v11 }
 0xe25   :  { %v12747_v48 = vmul.f32 %v12745_v47, %v12741_v6  ;;  %v13072_v6 = vld [vmem:[#allocation9 + $0x70] sm:$0xff]  ;;  %v13073_v47 = vld [vmem:[#allocation9 + $0x78] sm:$0xff] }
 0xe27   :  { %v12749_v16 = vmul.f32 %v12747_v48, %v12734_v9  ;;  %v15712_v9 = vpack.c.bf16 %v13067_v0, %v13066_v56  ;;  %v16437_v56 = vld [vmem:[%s18379_s17 + $0x20] sm:$0xff]  }
 0xe29   :  { %v12750_v22 = vsub.f32 %v12748_v49, %v12749_v16 }
 0xe2b   :  { %v12752_v52 = vrot.slane %v12750_v22, 7 }
 0xe2d   :  { %v12754_v2 = vsel %vm8906_vm1, %v12747_v48, %v12752_v52  ;;  %v15721_v48 = vpack.c.bf16 %v13073_v47, %v13072_v6  ;;  %v13152_v47 = vld [vmem:[#allocation21] sm:$0x1] }
 0xe2e   :  { %14987 = vmatmul.mubr.msk.f32.vlgmr.msra.gmra.mrb[28].mxu1 %vm12771_vm3, %v12754_v2 }
 0xe2f   :  { %15262 = vmatpush3.bf16.msra.mxu1 %v16418_v10 }
 0xe30   :  { %15263 = vmatprep.subr.bf16.mxu1 %v16419_v58 }
 0xe33   :  { %15264 = vmatpush3.bf16.msra.mxu1 %v16420_v3 }
 0xe34   :  { %15265 = vmatprep.subr.bf16.mxu1 %v16421_v5 }
 0xe37   :  { %15266 = vmatpush3.bf16.msra.mxu1 %v16422_v60 }
 0xe38   :  { %15267 = vmatprep.subr.bf16.mxu1 %v16423_v54 }
 0xe3b   :  { %15268 = vmatpush3.bf16.msra.mxu1 %v16424_v7 }
 0xe3c   :  { %15269 = vmatprep.subr.bf16.mxu1 %v16425_v8 }
 0xe3f   :  { %15270 = vmatpush3.bf16.msra.mxu1 %v16426_v13 }
 0xe40   :  { %15271 = vmatprep.subr.bf16.mxu1 %v16427_v29 }
 0xe43   :  { %15272 = vmatpush3.bf16.msra.mxu1 %v16428_v19 }
 0xe44   :  { %15273 = vmatprep.subr.bf16.mxu1 %v16429_v55 }
 0xe47   :  { %15274 = vmatpush3.bf16.msra.mxu1 %v16430_v15 }
 0xe48   :  { %15275 = vmatprep.subr.bf16.mxu1 %v16431_v25 }
 0xe4b   :  { %15276 = vmatpush3.bf16.msra.mxu1 %v16432_v23 }
 0xe4c   :  { %15699 = vmatprep.subr.bf16.mxu1 %v16852_v62 }
 0xf01   :  { %v12841_v59 = vpop.f32.mrb[28].mxu1 }
 0xf02   :  { %v12849_v51 = vrot.slane %v12841_v59, %v17858_v39  ;;  %v12843_v21 = vpop.f32.mrb[29].mxu1  ;;  %v12859_v36 = vrot.slane %v12841_v59, %v17861_v24 }
 0xf03   :  { %v12853_v53 = vrot.slane %v12843_v21, %v17858_v39  ;;  %v12863_v26 = vrot.slane %v12843_v21, %v17861_v24  ;;  %v13167_v21 = vld [vmem:[#allocation15 + $0x8] sm:$0xff] }
 0xf04   :  { %v12854_v33 = vmul.f32 %v12849_v51, %v18255_v4  ;;  %v13060_v4 = vld [vmem:[#allocation9 + $0x10] sm:$0xff]  ;;  %v13166_v51 = vld [vmem:[#allocation15] sm:$0xff] }
 0xf05   :  { %v12855_v30 = vmul.f32 %v12853_v53, %v18261_v41  ;;  %v15703_v41 = vpack.c.bf16 %v13061_v18, %v13060_v4  ;;  %v15724_v53 = vpack.c.bf16 %v13167_v21, %v13166_v51  ;;  %v13178_v4 = vld [vmem:[#allocation15 + $0x60] sm:$0xff]  ;;  %v13179_v18 = vld [vmem:[#allocation15 + $0x68] sm:$0xff] }
 0xf06   :  { %v12864_v31 = vadd.f32 %v12859_v36, %v12854_v33  ;;  %v13168_v33 = vld [vmem:[#allocation15 + $0x10] sm:$0xff]  ;;  %v13169_v36 = vld [vmem:[#allocation15 + $0x18] sm:$0xff] }
 0xf07   :  { %v12865_v12 = vadd.f32 %v12863_v26, %v12855_v30  ;;  %v15727_v30 = vpack.c.bf16 %v13169_v36, %v13168_v33  ;;  %v13170_v26 = vld [vmem:[#allocation15 + $0x20] sm:$0xff] }
 0xf08   :  { %vm12866_vm4 = vcmp.ge.f32.partialorder %v12864_v31, 0.0  ;;  %v12868_v32 = vmul.f32 0.03, %v12864_v31 }
 0xf09   :  { %v12869_v42 = vmul.f32 0.03, %v12865_v12  ;;  %vm12867_vm5 = vcmp.ge.f32.partialorder %v12865_v12, 0.0 }
 0xf0a   :  { %v12870_v63 = vsel %vm12866_vm4, %v12864_v31, %v12868_v32  ;;  %v13171_v31 = vld [vmem:[#allocation15 + $0x28] sm:$0xff]  ;;  %v13172_v32 = vld [vmem:[#allocation15 + $0x30] sm:$0xff] }
 0xf0b   :  { %v12871_v44 = vsel %vm12867_vm5, %v12865_v12, %v12869_v42  ;;  %v12872_v14 = vpack.c.bf16 %v12870_v63, %v12870_v63  ;;  %v15730_v12 = vpack.c.bf16 %v13171_v31, %v13170_v26  ;;  %v13173_v42 = vld [vmem:[#allocation15 + $0x38] sm:$0xff]  ;;  %v13175_v63 = vld [vmem:[#allocation15 + $0x48] sm:$0xff] }
 0xf0c   :  { %v12873_v17 = vpack.c.bf16 %v12871_v44, %v12871_v44  ;;  %v15733_v34 = vpack.c.bf16 %v13173_v42, %v13172_v32  ;;  %v15736_v44 = vpack.c.bf16 %v13175_v63, %v13174_v35 }
 0xf0e   :  { %13034 = vmatprep.mubr.bf16.mxu1 %v12873_v17  ;;  %v13176_v17 = vld [vmem:[#allocation15 + $0x50] sm:$0xff] }
 0xf0f   :  { %13035 = vmatmul.mubr.bf16.vlgmr.msra.gmra.mrb[32].mxu1 %v12872_v14 }
 0xf10   :  { %15701 = vmatpush3.bf16.msra.mxu1 %v15700_v38  ;;  %15361 = vmatprep.mubr.msk.f32.mxu1 %vm16853_vm6, %v16851_v27  ;;  %v13177_v38 = vld [vmem:[#allocation15 + $0x58] sm:$0xff] }
 0xf11   :  { %15702 = vmatprep.subr.bf16.mxu1 %v16852_v62  ;;  %v15739_v14 = vpack.c.bf16 %v13177_v38, %v13176_v17 }
 0xf14   :  { %15704 = vmatpush3.bf16.msra.mxu1 %v15703_v41  ;;  %v15742_v41 = vpack.c.bf16 %v13179_v18, %v13178_v4 }
 0xf15   :  { %15705 = vmatprep.subr.bf16.mxu1 %v16852_v62 }
 0xf18   :  { %15707 = vmatpush3.bf16.msra.mxu1 %v15706_v40  ;;  %v15745_v40 = vpack.c.bf16 %v13181_v20, %v13180_v1  ;;  %v13391_v20 = vld [vmem:[#allocation22] sm:$0x1] }
 0xf19   :  { %15708 = vmatprep.subr.bf16.mxu1 %v16852_v62 }
 0xf1c   :  { %15710 = vmatpush3.bf16.msra.mxu1 %v15709_v37  ;;  %v16436_v37 = vld [vmem:[%s18379_s17 + $0x18] sm:$0xff]  }
 0xf1d   :  { %15711 = vmatprep.subr.bf16.mxu1 %v16852_v62 }
 0xf20   :  { %15713 = vmatpush3.bf16.msra.mxu1 %v15712_v9 }
 0xf21   :  { %15714 = vmatprep.subr.bf16.mxu1 %v16852_v62 }
 0xf24   :  { %15716 = vmatpush3.bf16.msra.mxu1 %v15715_v61 }
 0xf25   :  { %15717 = vmatprep.subr.bf16.mxu1 %v16852_v62 }
 0xf28   :  { %15719 = vmatpush3.bf16.msra.mxu1 %v15718_v46 }
 0xf29   :  { %15720 = vmatprep.subr.bf16.mxu1 %v16852_v62 }
 0xf2c   :  { %15722 = vmatpush3.bf16.msra.mxu1 %v15721_v48 }
 0xf2d   :  { %15723 = vmatprep.subr.bf16.mxu1 %v16852_v62 }
 0xfe2   :  { %v15277_v49 = vpop.f32.mrb[32].mxu1 }
 0xfe3   :  { %v15278_v16 = vpop.f32.mrb[33].mxu1 }
 0xfe4   :  { %v18292_v22 = vadd.f32 %v15278_v16, %v15277_v49  ;;  %v15280_v52 = vpop.f32.mrb[34].mxu1  ;;  %v13159_v16 = vld [vmem:[#allocation21 + $0x1] sm:$0x1] }
 0xfe5   :  { %v15281_v10 = vpop.f32.mrb[35].mxu1 }
 0xfe6   :  { %v13042_v58 = vsel %vm8785_vm0, %v18292_v22, 0.0  ;;  %v13049_v2 = vmul.f32 %v18292_v22, %v18292_v22 }
 0xfe7   :  { %v13043_v3 = vrot.slane %v13042_v58, 4 }
 0xfe8   :  { %v13050_v5 = vsel %vm8785_vm0, %v13049_v2, 0.0 }
 0xfe9   :  { %v13044_v60 = vadd.f32 %v13043_v3, %v13042_v58  ;;  %v13051_v54 = vrot.slane %v13050_v5, 4  ;;  %v16438_v3 = vld [vmem:[%s18379_s17 + $0x28] sm:$0xff]  }
 0xfeb   :  { %v13045_v7 = vrot.slane %v13044_v60, 2  ;;  %v13052_v8 = vadd.f32 %v13051_v54, %v13050_v5  ;;  %v16439_v5 = vld [vmem:[%s18379_s17 + $0x30] sm:$0xff]  }
 0xfed   :  { %v13046_v13 = vadd.f32 %v13045_v7, %v13044_v60  ;;  %v13053_v29 = vrot.slane %v13052_v8, 2  ;;  %v16440_v60 = vld [vmem:[%s18379_s17 + $0x38] sm:$0xff]  }
 0xfef   :  { %v13047_v19 = vrot.slane %v13046_v13, 1  ;;  %v13054_v55 = vadd.f32 %v13053_v29, %v13052_v8 }
 0xff1   :  { %v13055_v15 = vrot.slane %v13054_v55, 1  ;;  %v13048_v25 = vadd.f32 %v13047_v19, %v13046_v13 }
 0xff3   :  { %v13056_v23 = vadd.f32 %v13055_v15, %v13054_v55 }
 0xff5   :  { %v13057_v59 = vsel %vm8906_vm1, %v13048_v25, %v13056_v23  ;;  %v16441_v23 = vld [vmem:[%s18414_s12] sm:$0xff]  }
 0xff6   :  { %15362 = vmatmul.mubr.f32.vlgmr.msra.gmra.mrb[30].mxu1 %v13057_v59  ;;  %v16442_v59 = vld [vmem:[%s18414_s12 + $0x8] sm:$0xff]  }
 0xff7   :  { %15396 = vmatprep.mubr.msk.f32.mxu1 %vm16853_vm6, %v16851_v27  ;;  %15725 = vmatpush3.bf16.msra.mxu1 %v15724_v53 }
 0xff8   :  { %15726 = vmatprep.subr.bf16.mxu1 %v16852_v62 }
 0xffb   :  { %15728 = vmatpush3.bf16.msra.mxu1 %v15727_v30 }
 0xffc   :  { %15729 = vmatprep.subr.bf16.mxu1 %v16852_v62 }
 0xfff   :  { %15731 = vmatpush3.bf16.msra.mxu1 %v15730_v12 }
0x1000   :  { %15732 = vmatprep.subr.bf16.mxu1 %v16852_v62 }
0x1003   :  { %15734 = vmatpush3.bf16.msra.mxu1 %v15733_v34 }
0x1004   :  { %15735 = vmatprep.subr.bf16.mxu1 %v16852_v62 }
0x1007   :  { %15737 = vmatpush3.bf16.msra.mxu1 %v15736_v44 }
0x1008   :  { %15738 = vmatprep.subr.bf16.mxu1 %v16852_v62 }
0x100b   :  { %15740 = vmatpush3.bf16.msra.mxu1 %v15739_v14 }
0x100c   :  { %15741 = vmatprep.subr.bf16.mxu1 %v16852_v62 }
0x100f   :  { %15743 = vmatpush3.bf16.msra.mxu1 %v15742_v41 }
0x1010   :  { %15744 = vmatprep.subr.bf16.mxu1 %v16852_v62  ;;  %v16435_v62 = vld [vmem:[%s18379_s17 + $0x10] sm:$0xff]  }
0x1011   :  { %15404 = vmatpush3.bf16.msra.mxu0 %v16435_v62 }
0x1012   :  { %15405 = vmatprep.subr.bf16.mxu0 %v16851_v27 }
0x1013   :  { %15746 = vmatpush3.bf16.msra.mxu1 %v15745_v40 }
0x1014   :  { %15419 = vmatprep.subr.bf16.mxu1 %v16851_v27 }
0x1015   :  { %15406 = vmatpush3.bf16.msra.mxu0 %v16436_v37 }
0x1016   :  { %15407 = vmatprep.subr.bf16.mxu0 %v16851_v27 }
0x1019   :  { %15408 = vmatpush3.bf16.msra.mxu0 %v16437_v56 }
0x101a   :  { %15409 = vmatprep.subr.bf16.mxu0 %v16851_v27 }
0x101d   :  { %15410 = vmatpush3.bf16.msra.mxu0 %v16438_v3 }
0x101e   :  { %15411 = vmatprep.subr.bf16.mxu0 %v16851_v27 }
0x1021   :  { %15412 = vmatpush3.bf16.msra.mxu0 %v16439_v5 }
0x1022   :  { %15413 = vmatprep.subr.bf16.mxu0 %v16851_v27 }
0x1025   :  { %15414 = vmatpush3.bf16.msra.mxu0 %v16440_v60 }
0x10c9   :  { %v13140_v0 = vpop.f32.mrb[30].mxu1 }
0x10ca   :  { %v13145_v9 = vmul.f32 0.5, %v13140_v0  ;;  %v15363_v50 = vpop.f32.mrb[31].mxu1 }
0x10cc   :  { %v13146_v45 = vmul.f32 %v13145_v9, %v13145_v9 }
0x10ce   :  { %v13148_v61 = vrot.slane %v13146_v45, 7 }
0x10d0   :  { %v13150_v11 = vsub.f32 %v13145_v9, %v13148_v61 }
0x10d2   :  { %v13151_v43 = vmax.f32 %v13150_v11, 0.0 }
0x10d4   :  { %v13153_v46 = vadd.f32 1e-05, %v13151_v43  ;;  %v15012_v43 = vld [vmem:[#allocation24] ss:$0 sm:$0xff] }
0x10d6   :  { %16449 = vrsqrt.f32 %v13153_v46 }
0x10e0   :  { %v16450_v6 = vpop.eup %16449 }
0x10e1   :  { %v13156_v48 = vrot.slane %v16450_v6, 1 }
0x10e3   :  { %v13158_v49 = vmul.f32 %v13156_v48, %v13152_v47 }
0x10e5   :  { %v13160_v52 = vmul.f32 %v13158_v49, %v13145_v9 }
0x10e7   :  { %v13161_v10 = vsub.f32 %v13159_v16, %v13160_v52 }
0x10e9   :  { %v13163_v58 = vrot.slane %v13161_v10, 7 }
0x10eb   :  { %v13165_v2 = vsel %vm8906_vm1, %v13158_v49, %v13163_v58  ;;  %vm13370_vm1 = vcmask 254976  }
0x10ec   :  { %15397 = vmatmul.mubr.f32.vlgmr.msra.gmra.mrb[36].mxu1 %v13165_v2 }
0x10ed   :  { %15423 = vmatprep.mubr.msk.bf16.mxu1 %vm16853_vm6, %v16851_v27  ;;  %15420 = vmatpush3.bf16.msra.mxu1 %v16441_v23 }
0x10ee   :  { %15421 = vmatprep.subr.bf16.mxu1 %v16851_v27 }
0x10f1   :  { %15422 = vmatpush3.bf16.msra.mxu1 %v16442_v59 }
0x11bf   :  { %v13248_v54 = vpop.f32.mrb[36].mxu1 }
0x11c0   :  { %v13255_v7 = vrot.slane %v13248_v54, %v17858_v39  ;;  %v15398_v8 = vpop.f32.mrb[37].mxu1  ;;  %v13260_v29 = vrot.slane %v13248_v54, %v17861_v24 }
0x11c2   :  { %v13256_v13 = vmul.f32 %v18292_v22, %v13255_v7 }
0x11c4   :  { %v13261_v19 = vadd.f32 %v13260_v29, %v13256_v13 }
0x11c6   :  { %vm13262_vm0 = vcmp.ge.f32.partialorder %v13261_v19, 0.0  ;;  %v13263_v55 = vmul.f32 0.03, %v13261_v19 }
0x11c8   :  { %v13264_v15 = vsel %vm13262_vm0, %v13261_v19, %v13263_v55 }
0x11c9   :  { %v13265_v25 = vpack.c.bf16 %v13264_v15, %v13264_v15 }
0x11cb   :  { %15416 = vmatmul.mubr.bf16.vlgmr.msra.gmra.mrb[28].mxu0 %v13265_v25 }
0x129e   :  { %v13364_v24 = vpop.f32.mrb[28].mxu0 }
0x129f   :  { %v13371_v22 = vsel %vm13370_vm1, %v13364_v24, 0.0  ;;  %v13379_v51 = vmul.f32 %v13364_v24, %v13364_v24  ;;  %v15417_v21 = vpop.f32.mrb[29].mxu0 }
0x12a0   :  { %v13372_v53 = vrot.slane %v13371_v22, 4  ;;  %v13367_v33 = vpop.f32.mrb[30].mxu0 }
0x12a1   :  { %v13380_v36 = vsel %vm13370_vm1, %v13379_v51, 0.0  ;;  %v15418_v30 = vpop.f32.mrb[31].mxu0 }
0x12a2   :  { %v13373_v26 = vadd.f32 %v13372_v53, %v13371_v22  ;;  %v13381_v31 = vrot.slane %v13380_v36, 4 }
0x12a4   :  { %v13374_v12 = vrot.slane %v13373_v26, 2  ;;  %v13382_v32 = vadd.f32 %v13381_v31, %v13380_v36 }
0x12a6   :  { %v13375_v42 = vadd.f32 %v13374_v12, %v13373_v26  ;;  %v13383_v27 = vrot.slane %v13382_v32, 2 }
0x12a8   :  { %v13376_v34 = vrot.slane %v13375_v42, 1  ;;  %v13384_v35 = vadd.f32 %v13383_v27, %v13382_v32 }
0x12aa   :  { %v13377_v63 = vadd.f32 %v13376_v34, %v13375_v42  ;;  %v13385_v44 = vrot.slane %v13384_v35, 1 }
0x12ac   :  { %v13378_v17 = vmul.f32 0.5, %v13377_v63  ;;  %v13386_v38 = vadd.f32 %v13385_v44, %v13384_v35 }
0x12ae   :  { %v13387_v14 = vmul.f32 0.5, %v13386_v38  ;;  %v13388_v4 = vmul.f32 %v13378_v17, %v13378_v17 }
0x12b0   :  { %v13389_v18 = vsub.f32 %v13387_v14, %v13388_v4 }
0x12b2   :  { %v13390_v41 = vmax.f32 %v13389_v18, 0.0 }
0x12b4   :  { %v13392_v1 = vadd.f32 1e-05, %v13390_v41 }
0x12b6   :  { %16451 = vrsqrt.f32 %v13392_v1 }
0x12c0   :  { %v16452_v40 = vpop.eup %16451 }
0x12c1   :  { %v13394_v28 = vmul.f32 %v16452_v40, %v13391_v20 }
0x12c3   :  { %v13396_v62 = vmul.f32 %v13394_v28, %v13378_v17  ;;  %v13401_v37 = vrot.slane %v13394_v28, %v17858_v39 }
0x12c5   :  { %v13397_v56 = vsub.f32 %v13395_v57, %v13396_v62  ;;  %v13402_v0 = vmul.f32 %v13401_v37, %v13364_v24 }
0x12c7   :  { %v13406_v9 = vrot.slane %v13397_v56, %v17858_v39  ;;  %v13478_v39 = vld [vmem:[#allocation25] sm:$0x3] }
0x12c9   :  { %v13407_v50 = vadd.f32 %v13406_v9, %v13402_v0 }
0x12cb   :  { %vm13408_vm7 = vcmp.ge.f32.partialorder %v13407_v50, 0.0  ;;  %v13409_v45 = vmul.f32 0.03, %v13407_v50 }
0x12cd   :  { %v13410_v61 = vsel %vm13408_vm7, %v13407_v50, %v13409_v45 }
0x12ce   :  { %v13411_v11 = vpack.c.bf16 %v13410_v61, %v13410_v61 }
0x12d0   :  { %15424 = vmatmul.mubr.msk.bf16.vlgmr.msra.gmra.mrb[40].mxu1 %vm11931_vm11, %v13411_v11 }
0x13a3   :  { %v13472_v46 = vpop.f32.mrb[40].mxu1 }
0x13a4   :  { %v13473_v6 = vadd.f32 %v15012_v43, %v13472_v46  ;;  %v15425_v47 = vpop.f32.mrb[41].mxu1 }
0x13a5   :  { %v13475_v48 = vpop.f32.mrb[42].mxu1 }
0x13a6   :  { %v13479_v49 = vmul.f32 0.5, %v13473_v6  ;;  %v15426_v16 = vpop.f32.mrb[43].mxu1 }
0x13a8   :  { %v13480_v52 = vmul.f32 1.442695, %v13479_v49 }
0x13aa   :  { %16453 = vpow2.f32 %v13480_v52 }
0x13b4   :  { %v16454_v10 = vpop.eup %16453 }
0x13b5   :  { %13483 = vrot.lane.b32.xlu0 %v16454_v10, %s16854_s2 }
0x1427   :  { %v13484_v58 = vpop.permute.xlu0 %13483 }
0x1428   :  { %v13486_v2 = vmul.f32 %v13484_v58, %v13478_v39 }
0x142a   :  { %v13487_v3 = vadd.f32 %v13486_v2, %v13473_v6 }
0x142c   :  { %13489 = vrot.lane.b32.xlu0 %v13487_v3, %s18407_s9 }
0x149e   :  { %v13490_v5 = vpop.permute.xlu0 %13489 }
0x149f   :  { %v13492_v60 = vsel %vm9361_vm2, %v13473_v6, %v13490_v5 }
0x14a0   :  { %13494 = vst.msk [vmem:[%s18415_s19] sm:$0x3] %vm13493_vm8, %v13492_v60 }
0x14a1   :  { %13499 = vsyncpa [#allocation3], 1 }
0x14a2   :  { %13500 = vsyncpa [#allocation5], 1 }
0x14a3   :  { %13501 = vsyncpa [#allocation8], 1 }
0x14a4   :  { %13502 = vsyncpa [#allocation11], 1 }
0x14a5   :  { %13503 = vsyncpa [#allocation14], 1 }
0x14a6   :  { %13504 = vsyncpa [#allocation17], 1 }
0x14a7   :  { %13505 = vsyncpa [#allocation20], 1 }
0x14a8   :  { %13506 = vsyncpa [#allocation23], 1 }
0x14a9   :  { %13507 = vsyncpa [#allocation26], 1 }

</bundles_post_ra>
